<compile_context>
chip_gen: v7x
topology: tpu7x:2x2x1
jax: 0.10.0
libtpu: 0.0.40
codegen_flags: <defaults>
</compile_context>

<pallas_src>
import functools

import jax
import jax.numpy as jnp
from jax import lax
from jax.experimental import pallas as pl
from jax.experimental.pallas import tpu as pltpu

F32 = jnp.float32
BF16 = jnp.bfloat16
LN_EPS = 1e-12
NEG_INF = -1e9


# ----------------------------- kernel helpers ------------------------------

def _mm(a, b):
    """bf16-input, f32-accumulate matmul (MXU-friendly on v5e/v6e/v7x)."""
    return jnp.dot(a.astype(BF16), b.astype(BF16), preferred_element_type=F32)


def _layernorm(x, g, b):
    mu = jnp.mean(x, axis=-1, keepdims=True)
    xc = x - mu
    var = jnp.mean(xc * xc, axis=-1, keepdims=True)
    return xc * lax.rsqrt(var + LN_EPS) * g + b


def _gelu(x):
    # tanh-approx GELU (EUP tanh).  TODO(synk): HF CamemBERT uses exact erf GELU.
    c = jnp.float32(0.7978845608028654)
    return 0.5 * x * (1.0 + jnp.tanh(c * (x + 0.044715 * x * x * x)))


# ------------------------------ Pallas kernels ------------------------------

def _emb_ln_kernel(tok_ref, pos_ref, g_ref, b_ref, o_ref):
    x = tok_ref[...] + pos_ref[...]
    o_ref[...] = _layernorm(x, g_ref[...], b_ref[...]).astype(o_ref.dtype)


def _qkv_kernel(x_ref, w_ref, b_ref, o_ref):
    o_ref[...] = (_mm(x_ref[...], w_ref[...]) + b_ref[...]).astype(o_ref.dtype)


def _attention_kernel(q_ref, k_ref, v_ref, m_ref, o_ref, *, scale):
    q = q_ref[...]                       # [S, Dh]
    k = k_ref[...]                       # [S, Dh]
    v = v_ref[...]                       # [S, Dh]
    # scores = q @ k^T, contraction over Dh, f32 accumulation on the MXU.
    s = lax.dot_general(q.astype(BF16), k.astype(BF16),
                        (((1,), (1,)), ((), ())),
                        preferred_element_type=F32) * scale      # [S, S]
    mask = m_ref[...].reshape(1, -1)                             # [1, S] f32
    s = s + jnp.where(mask > 0.5, 0.0, NEG_INF)                  # f32 bias
    m = jnp.max(s, axis=-1, keepdims=True)
    p = jnp.exp(s - m)
    denom = jnp.sum(p, axis=-1, keepdims=True)
    p = p * pl.reciprocal(denom, approx=True)                    # EUP recip
    o_ref[...] = _mm(p, v).astype(o_ref.dtype)                   # [S, Dh]


def _attn_out_ln_kernel(ctx_ref, res_ref, wo_ref, bo_ref, g_ref, b_ref, o_ref):
    y = _mm(ctx_ref[...], wo_ref[...]) + bo_ref[...]
    o_ref[...] = _layernorm(y + res_ref[...], g_ref[...], b_ref[...]).astype(o_ref.dtype)


def _ffn_ln_kernel(x_ref, w1_ref, b1_ref, w2_ref, b2_ref, g_ref, b_ref, o_ref):
    x = x_ref[...]
    h = _gelu(_mm(x, w1_ref[...]) + b1_ref[...])
    y = _mm(h, w2_ref[...]) + b2_ref[...]
    o_ref[...] = _layernorm(y + x, g_ref[...], b_ref[...]).astype(o_ref.dtype)


def _cls_head_kernel(x_ref, w1_ref, b1_ref, w2_ref, b2_ref, o_ref):
    h = jnp.maximum(_mm(x_ref[...], w1_ref[...]) + b1_ref[...], 0.0)
    o_ref[...] = (_mm(h, w2_ref[...]) + b2_ref[...]).astype(o_ref.dtype)


# ------------------------------ kernel wrappers -----------------------------

_PARALLEL_1D = pltpu.CompilerParams(dimension_semantics=("parallel",))


def embed_layernorm(tok, pos, gamma, beta, *, block_rows):
    M, D = tok.shape
    assert pos.shape == (block_rows, D) and M % block_rows == 0
    return pl.pallas_call(
        _emb_ln_kernel,
        out_shape=jax.ShapeDtypeStruct((M, D), F32),
        grid=(M // block_rows,),
        in_specs=[
            pl.BlockSpec((block_rows, D), lambda i: (i, 0)),
            pl.BlockSpec((block_rows, D), lambda i: (0, 0)),   # positions reused per batch
            pl.BlockSpec((1, D), lambda i: (0, 0)),
            pl.BlockSpec((1, D), lambda i: (0, 0)),
        ],
        out_specs=pl.BlockSpec((block_rows, D), lambda i: (i, 0)),
        compiler_params=_PARALLEL_1D,
    )(tok, pos, gamma.reshape(1, D), beta.reshape(1, D))


def qkv_proj(x, w, b, *, block_rows):
    M, D = x.shape
    N = w.shape[1]
    return pl.pallas_call(
        _qkv_kernel,
        out_shape=jax.ShapeDtypeStruct((M, N), F32),
        grid=(M // block_rows,),
        in_specs=[
            pl.BlockSpec((block_rows, D), lambda i: (i, 0)),
            pl.BlockSpec((D, N), lambda i: (0, 0)),
            pl.BlockSpec((1, N), lambda i: (0, 0)),
        ],
        out_specs=pl.BlockSpec((block_rows, N), lambda i: (i, 0)),
        compiler_params=_PARALLEL_1D,
    )(x, w, b.reshape(1, N))


def attention(qkv, mask_f32, *, B, S, nH, Dh, D):
    """qkv: [B*S, 3*D] packed as [Q | K | V]; head split done via index_maps."""
    scale = 1.0 / float(Dh) ** 0.5
    M = B * S
    return pl.pallas_call(
        functools.partial(_attention_kernel, scale=scale),
        out_shape=jax.ShapeDtypeStruct((M, D), F32),
        grid=(B, nH),
        in_specs=[
            pl.BlockSpec((S, Dh), lambda b, h: (b, h)),              # Q, head h
            pl.BlockSpec((S, Dh), lambda b, h: (b, nH + h)),         # K, head h
            pl.BlockSpec((S, Dh), lambda b, h: (b, 2 * nH + h)),     # V, head h
            pl.BlockSpec((1, 1, S), lambda b, h: (b, 0, 0)),         # mask row, batch b
        ],
        out_specs=pl.BlockSpec((S, Dh), lambda b, h: (b, h)),        # writes into [B*S, D]
        compiler_params=pltpu.CompilerParams(
            dimension_semantics=("parallel", "parallel")),
    )(qkv, qkv, qkv, mask_f32)


def attn_out_layernorm(ctx, res, wo, bo, gamma, beta, *, block_rows):
    M, D = ctx.shape
    return pl.pallas_call(
        _attn_out_ln_kernel,
        out_shape=jax.ShapeDtypeStruct((M, D), F32),
        grid=(M // block_rows,),
        in_specs=[
            pl.BlockSpec((block_rows, D), lambda i: (i, 0)),
            pl.BlockSpec((block_rows, D), lambda i: (i, 0)),
            pl.BlockSpec((D, D), lambda i: (0, 0)),
            pl.BlockSpec((1, D), lambda i: (0, 0)),
            pl.BlockSpec((1, D), lambda i: (0, 0)),
            pl.BlockSpec((1, D), lambda i: (0, 0)),
        ],
        out_specs=pl.BlockSpec((block_rows, D), lambda i: (i, 0)),
        compiler_params=_PARALLEL_1D,
    )(ctx, res, wo, bo.reshape(1, D), gamma.reshape(1, D), beta.reshape(1, D))


def ffn_layernorm(x, w1, b1, w2, b2, gamma, beta, *, block_rows):
    M, D = x.shape
    Fd = w1.shape[1]
    return pl.pallas_call(
        _ffn_ln_kernel,
        out_shape=jax.ShapeDtypeStruct((M, D), F32),
        grid=(M // block_rows,),
        in_specs=[
            pl.BlockSpec((block_rows, D), lambda i: (i, 0)),
            pl.BlockSpec((D, Fd), lambda i: (0, 0)),
            pl.BlockSpec((1, Fd), lambda i: (0, 0)),
            pl.BlockSpec((Fd, D), lambda i: (0, 0)),
            pl.BlockSpec((1, D), lambda i: (0, 0)),
            pl.BlockSpec((1, D), lambda i: (0, 0)),
            pl.BlockSpec((1, D), lambda i: (0, 0)),
        ],
        out_specs=pl.BlockSpec((block_rows, D), lambda i: (i, 0)),
        compiler_params=_PARALLEL_1D,
    )(x, w1, b1.reshape(1, Fd), w2, b2.reshape(1, D),
      gamma.reshape(1, D), beta.reshape(1, D))


def classifier_head(x_cls, w1, b1, w2, b2):
    """Fused CLS head: Linear -> ReLU -> Linear (output lane-padded to 128)."""
    B, D = x_cls.shape
    H = w1.shape[1]
    NO = w2.shape[1]
    return pl.pallas_call(
        _cls_head_kernel,
        out_shape=jax.ShapeDtypeStruct((B, NO), F32),
        grid=(1,),
        in_specs=[
            pl.BlockSpec((B, D), lambda i: (0, 0)),
            pl.BlockSpec((D, H), lambda i: (0, 0)),
            pl.BlockSpec((1, H), lambda i: (0, 0)),
            pl.BlockSpec((H, NO), lambda i: (0, 0)),
            pl.BlockSpec((1, NO), lambda i: (0, 0)),
        ],
        out_specs=pl.BlockSpec((B, NO), lambda i: (0, 0)),
    )(x_cls, w1, b1.reshape(1, H), w2, b2.reshape(1, NO))


# ------------------------------ model setup ---------------------------------

class Config:
    vocab = 512       # (camembert: 32005)
    max_pos = 128     # (camembert: 512)
    d_model = 256     # (camembert: 768)  -> lane-dense
    n_heads = 2       # (camembert: 12)   -> Dh = 128, lane-dense per head
    d_ff = 512        # (camembert: 3072)
    n_layers = 2      # (camembert: 12)
    h_cls = 128       # (classifier H: 50, padded to a lane-dense width)
    n_out = 2         # real number of logits
    n_out_pad = 128   # lane-dense padded head output, sliced outside


def init_params(key, cfg):
    keys = iter(jax.random.split(key, 8 + 8 * cfg.n_layers))
    D, Fd, H = cfg.d_model, cfg.d_ff, cfg.h_cls

    def nrm(shape):
        return 0.02 * jax.random.normal(next(keys), shape, F32)

    params = {
        "tok_emb": nrm((cfg.vocab, D)),
        "pos_emb": nrm((cfg.max_pos, D)),
        "emb_ln_g": jnp.ones((D,), F32),
        "emb_ln_b": jnp.zeros((D,), F32),
        "cls_w1": nrm((D, H)),
        "cls_b1": jnp.zeros((H,), F32),
        # true head is [H, n_out]; zero-pad columns to n_out_pad for lane-dense stores
        "cls_w2": jnp.pad(nrm((H, cfg.n_out)),
                          ((0, 0), (0, cfg.n_out_pad - cfg.n_out))),
        "cls_b2": jnp.zeros((cfg.n_out_pad,), F32),
        "layers": [],
    }
    for _ in range(cfg.n_layers):
        params["layers"].append({
            "wqkv": nrm((D, 3 * D)), "bqkv": jnp.zeros((3 * D,), F32),
            "wo": nrm((D, D)), "bo": jnp.zeros((D,), F32),
            "ln1_g": jnp.ones((D,), F32), "ln1_b": jnp.zeros((D,), F32),
            "w1": nrm((D, Fd)), "b1": jnp.zeros((Fd,), F32),
            "w2": nrm((Fd, D)), "b2": jnp.zeros((D,), F32),
            "ln2_g": jnp.ones((D,), F32), "ln2_b": jnp.zeros((D,), F32),
        })
    return params


def camembert_classifier_forward(params, input_ids, attention_mask, cfg):
    B, S = input_ids.shape
    D, nH = cfg.d_model, cfg.n_heads
    Dh = D // nH

    # embeddings: gather is plain-JAX glue; add + LayerNorm in a Pallas kernel.
    # TODO(synk): RoBERTa offsets position ids by padding_idx+1 from non-pad
    # tokens; simple 0..S-1 positions are used here (synthetic weights).
    tok = jnp.take(params["tok_emb"], input_ids, axis=0).reshape(B * S, D)
    pos = params["pos_emb"][:S]                                   # [S, D]
    x = embed_layernorm(tok, pos, params["emb_ln_g"], params["emb_ln_b"],
                        block_rows=S)                             # [B*S, D]

    mask = attention_mask.astype(F32).reshape(B, 1, S)            # raw mask; bias built in-kernel

    for lyr in params["layers"]:
        qkv = qkv_proj(x, lyr["wqkv"], lyr["bqkv"], block_rows=S)       # [B*S, 3D]
        ctx = attention(qkv, mask, B=B, S=S, nH=nH, Dh=Dh, D=D)         # [B*S, D]
        x = attn_out_layernorm(ctx, x, lyr["wo"], lyr["bo"],
                               lyr["ln1_g"], lyr["ln1_b"], block_rows=S)
        x = ffn_layernorm(x, lyr["w1"], lyr["b1"], lyr["w2"], lyr["b2"],
                          lyr["ln2_g"], lyr["ln2_b"], block_rows=S)

    # CLS pooling + fused Linear -> ReLU -> Linear head (padded, sliced here)
    cls = x.reshape(B, S, D)[:, 0, :]                             # [B, D]
    logits_pad = classifier_head(cls, params["cls_w1"], params["cls_b1"],
                                 params["cls_w2"], params["cls_b2"])
    return logits_pad[:, :cfg.n_out]


# ---------------------------------- main -------------------------------------

if __name__ == "__main__":
    cfg = Config()
    key = jax.random.PRNGKey(0)
    pkey, ikey = jax.random.split(key)

    params = init_params(pkey, cfg)

    B, S = 2, 128
    input_ids = jax.random.randint(ikey, (B, S), 0, cfg.vocab, dtype=jnp.int32)
    attention_mask = (jnp.zeros((B, S), jnp.int32)
                      .at[0, :].set(1)
                      .at[1, : S // 2].set(1))

    fwd = jax.jit(functools.partial(camembert_classifier_forward, cfg=cfg))
    logits = fwd(params, input_ids, attention_mask)
    jax.block_until_ready(logits)

    assert logits.shape == (B, cfg.n_out) and logits.dtype == jnp.float32
    assert bool(jnp.all(jnp.isfinite(logits)))
    print("KERNEL_OK")
</pallas_src>

<mosaic_0001>
module attributes {stable_mosaic.version = 11 : i64} {
  func.func @_emb_ln_kernel(%arg0: i32, %arg1: memref<128x256xf32, #tpu.memory_space<vmem>>, %arg2: memref<128x256xf32, #tpu.memory_space<vmem>>, %arg3: memref<1x256xf32, #tpu.memory_space<vmem>>, %arg4: memref<1x256xf32, #tpu.memory_space<vmem>>, %arg5: memref<128x256xf32, #tpu.memory_space<vmem>>) attributes {dimension_semantics = [#tpu.dimension_semantics<parallel>], iteration_bounds = array<i64: 2>, scalar_prefetch = 0 : i64, scratch_operands = 0 : i64, tpu.core_type = #tpu.core_type<tc>, window_params = [{transform_indices = @transform_0, window_bounds = array<i64: 128, 256>}, {pipeline_mode = #tpu.pipeline_mode<synchronous>, transform_indices = @transform_1, window_bounds = array<i64: 128, 256>}, {pipeline_mode = #tpu.pipeline_mode<synchronous>, transform_indices = @transform_2, window_bounds = array<i64: 1, 256>}, {pipeline_mode = #tpu.pipeline_mode<synchronous>, transform_indices = @transform_3, window_bounds = array<i64: 1, 256>}, {transform_indices = @transform_4, window_bounds = array<i64: 128, 256>}]} {
    %c0 = arith.constant 0 : index
    %c0_0 = arith.constant 0 : index
    %0 = vector.load %arg1[%c0, %c0_0] : memref<128x256xf32, #tpu.memory_space<vmem>>, vector<128x256xf32>
    %c0_1 = arith.constant 0 : index
    %c0_2 = arith.constant 0 : index
    %1 = vector.load %arg2[%c0_1, %c0_2] : memref<128x256xf32, #tpu.memory_space<vmem>>, vector<128x256xf32>
    %2 = arith.addf %0, %1 : vector<128x256xf32>
    %c0_3 = arith.constant 0 : index
    %c0_4 = arith.constant 0 : index
    %3 = vector.load %arg3[%c0_3, %c0_4] : memref<1x256xf32, #tpu.memory_space<vmem>>, vector<1x256xf32>
    %c0_5 = arith.constant 0 : index
    %c0_6 = arith.constant 0 : index
    %4 = vector.load %arg4[%c0_5, %c0_6] : memref<1x256xf32, #tpu.memory_space<vmem>>, vector<1x256xf32>
    %cst = arith.constant dense<0.000000e+00> : vector<128xf32>
    %5 = vector.multi_reduction <add>, %2, %cst [1] : vector<128x256xf32> to vector<128xf32>
    %6 = vector.shape_cast %5 : vector<128xf32> to vector<128x1xf32>
    %cst_7 = arith.constant 2.560000e+02 : f32
    %7 = vector.broadcast %cst_7 : f32 to vector<128x1xf32>
    %8 = arith.divf %6, %7 : vector<128x1xf32>
    %9 = vector.broadcast %8 : vector<128x1xf32> to vector<128x256xf32>
    %10 = arith.subf %2, %9 : vector<128x256xf32>
    %11 = arith.mulf %10, %10 : vector<128x256xf32>
    %cst_8 = arith.constant dense<0.000000e+00> : vector<128xf32>
    %12 = vector.multi_reduction <add>, %11, %cst_8 [1] : vector<128x256xf32> to vector<128xf32>
    %13 = vector.shape_cast %12 : vector<128xf32> to vector<128x1xf32>
    %cst_9 = arith.constant 2.560000e+02 : f32
    %14 = vector.broadcast %cst_9 : f32 to vector<128x1xf32>
    %15 = arith.divf %13, %14 : vector<128x1xf32>
    %cst_10 = arith.constant 9.99999996E-13 : f32
    %16 = vector.broadcast %cst_10 : f32 to vector<128x1xf32>
    %17 = arith.addf %15, %16 : vector<128x1xf32>
    %18 = math.rsqrt %17 : vector<128x1xf32>
    %19 = vector.broadcast %18 : vector<128x1xf32> to vector<128x256xf32>
    %20 = arith.mulf %10, %19 : vector<128x256xf32>
    %21 = vector.broadcast %3 : vector<1x256xf32> to vector<128x256xf32>
    %22 = arith.mulf %20, %21 : vector<128x256xf32>
    %23 = vector.broadcast %4 : vector<1x256xf32> to vector<128x256xf32>
    %24 = arith.addf %22, %23 : vector<128x256xf32>
    %c0_11 = arith.constant 0 : index
    %c0_12 = arith.constant 0 : index
    %25 = vector.load %arg5[%c0_11, %c0_12] : memref<128x256xf32, #tpu.memory_space<vmem>>, vector<128x256xf32>
    tpu.vector_store %arg5[%c0_11, %c0_12], %24 {strides = array<i32>} : memref<128x256xf32, #tpu.memory_space<vmem>>, vector<128x256xf32>,
    return
  }
  func.func @transform_0(%arg0: i32) -> (i32, i32) {
    %c0_i32 = arith.constant 0 : i32
    %c0_i32_0 = arith.constant 0 : i32
    return %arg0, %c0_i32 : i32, i32
  }
  func.func @transform_1(%arg0: i32) -> (i32, i32) {
    %c0_i32 = arith.constant 0 : i32
    %c0_i32_0 = arith.constant 0 : i32
    %c0_i32_1 = arith.constant 0 : i32
    return %c0_i32, %c0_i32_0 : i32, i32
  }
  func.func @transform_2(%arg0: i32) -> (i32, i32) {
    %c0_i32 = arith.constant 0 : i32
    %c0_i32_0 = arith.constant 0 : i32
    %c0_i32_1 = arith.constant 0 : i32
    return %c0_i32, %c0_i32_0 : i32, i32
  }
  func.func @transform_3(%arg0: i32) -> (i32, i32) {
    %c0_i32 = arith.constant 0 : i32
    %c0_i32_0 = arith.constant 0 : i32
    %c0_i32_1 = arith.constant 0 : i32
    return %c0_i32, %c0_i32_0 : i32, i32
  }
  func.func @transform_4(%arg0: i32) -> (i32, i32) {
    %c0_i32 = arith.constant 0 : i32
    %c0_i32_0 = arith.constant 0 : i32
    return %arg0, %c0_i32 : i32, i32
  }
}

module attributes {stable_mosaic.version = 11 : i64} {
  func.func @_qkv_kernel(%arg0: i32, %arg1: memref<128x256xf32, #tpu.memory_space<vmem>>, %arg2: memref<256x768xf32, #tpu.memory_space<vmem>>, %arg3: memref<1x768xf32, #tpu.memory_space<vmem>>, %arg4: memref<128x768xf32, #tpu.memory_space<vmem>>) attributes {dimension_semantics = [#tpu.dimension_semantics<parallel>], iteration_bounds = array<i64: 2>, scalar_prefetch = 0 : i64, scratch_operands = 0 : i64, tpu.core_type = #tpu.core_type<tc>, window_params = [{transform_indices = @transform_0, window_bounds = array<i64: 128, 256>}, {pipeline_mode = #tpu.pipeline_mode<synchronous>, transform_indices = @transform_1, window_bounds = array<i64: 256, 768>}, {pipeline_mode = #tpu.pipeline_mode<synchronous>, transform_indices = @transform_2, window_bounds = array<i64: 1, 768>}, {transform_indices = @transform_3, window_bounds = array<i64: 128, 768>}]} {
    %c0 = arith.constant 0 : index
    %c0_0 = arith.constant 0 : index
    %0 = vector.load %arg1[%c0, %c0_0] : memref<128x256xf32, #tpu.memory_space<vmem>>, vector<128x256xf32>
    %c0_1 = arith.constant 0 : index
    %c0_2 = arith.constant 0 : index
    %1 = vector.load %arg2[%c0_1, %c0_2] : memref<256x768xf32, #tpu.memory_space<vmem>>, vector<256x768xf32>
    %2 = arith.truncf %0 : vector<128x256xf32> to vector<128x256xbf16>
    %3 = arith.truncf %1 : vector<256x768xf32> to vector<256x768xbf16>
    %cst = arith.constant dense<0.000000e+00> : vector<128x768xf32>
    %4 = tpu.matmul %2, %3, %cst {dimension_numbers = #tpu.dot_dimension_numbers<[1], [0], [0], [1], [0, 0, 1, 1], [], []>} : vector<128x256xbf16>, vector<256x768xbf16>, vector<128x768xf32> -> vector<128x768xf32>
    %c0_3 = arith.constant 0 : index
    %c0_4 = arith.constant 0 : index
    %5 = vector.load %arg3[%c0_3, %c0_4] : memref<1x768xf32, #tpu.memory_space<vmem>>, vector<1x768xf32>
    %6 = vector.broadcast %5 : vector<1x768xf32> to vector<128x768xf32>
    %7 = arith.addf %4, %6 : vector<128x768xf32>
    %c0_5 = arith.constant 0 : index
    %c0_6 = arith.constant 0 : index
    %8 = vector.load %arg4[%c0_5, %c0_6] : memref<128x768xf32, #tpu.memory_space<vmem>>, vector<128x768xf32>
    tpu.vector_store %arg4[%c0_5, %c0_6], %7 {strides = array<i32>} : memref<128x768xf32, #tpu.memory_space<vmem>>, vector<128x768xf32>,
    return
  }
  func.func @transform_0(%arg0: i32) -> (i32, i32) {
    %c0_i32 = arith.constant 0 : i32
    %c0_i32_0 = arith.constant 0 : i32
    return %arg0, %c0_i32 : i32, i32
  }
  func.func @transform_1(%arg0: i32) -> (i32, i32) {
    %c0_i32 = arith.constant 0 : i32
    %c0_i32_0 = arith.constant 0 : i32
    %c0_i32_1 = arith.constant 0 : i32
    return %c0_i32, %c0_i32_0 : i32, i32
  }
  func.func @transform_2(%arg0: i32) -> (i32, i32) {
    %c0_i32 = arith.constant 0 : i32
    %c0_i32_0 = arith.constant 0 : i32
    %c0_i32_1 = arith.constant 0 : i32
    return %c0_i32, %c0_i32_0 : i32, i32
  }
  func.func @transform_3(%arg0: i32) -> (i32, i32) {
    %c0_i32 = arith.constant 0 : i32
    %c0_i32_0 = arith.constant 0 : i32
    return %arg0, %c0_i32 : i32, i32
  }
}

module attributes {stable_mosaic.version = 11 : i64} {
  func.func @_attention_kernel(%arg0: i32, %arg1: i32, %arg2: memref<128x128xf32, #tpu.memory_space<vmem>>, %arg3: memref<128x128xf32, #tpu.memory_space<vmem>>, %arg4: memref<128x128xf32, #tpu.memory_space<vmem>>, %arg5: memref<1x1x128xf32, #tpu.memory_space<vmem>>, %arg6: memref<128x128xf32, #tpu.memory_space<vmem>>) attributes {dimension_semantics = [#tpu.dimension_semantics<parallel>, #tpu.dimension_semantics<parallel>], iteration_bounds = array<i64: 2, 2>, scalar_prefetch = 0 : i64, scratch_operands = 0 : i64, tpu.core_type = #tpu.core_type<tc>, window_params = [{transform_indices = @transform_0, window_bounds = array<i64: 128, 128>}, {transform_indices = @transform_1, window_bounds = array<i64: 128, 128>}, {transform_indices = @transform_2, window_bounds = array<i64: 128, 128>}, {transform_indices = @transform_3, window_bounds = array<i64: 1, 1, 128>}, {transform_indices = @transform_4, window_bounds = array<i64: 128, 128>}]} {
    %c0 = arith.constant 0 : index
    %c0_0 = arith.constant 0 : index
    %0 = vector.load %arg2[%c0, %c0_0] : memref<128x128xf32, #tpu.memory_space<vmem>>, vector<128x128xf32>
    %c0_1 = arith.constant 0 : index
    %c0_2 = arith.constant 0 : index
    %1 = vector.load %arg3[%c0_1, %c0_2] : memref<128x128xf32, #tpu.memory_space<vmem>>, vector<128x128xf32>
    %c0_3 = arith.constant 0 : index
    %c0_4 = arith.constant 0 : index
    %2 = vector.load %arg4[%c0_3, %c0_4] : memref<128x128xf32, #tpu.memory_space<vmem>>, vector<128x128xf32>
    %3 = arith.truncf %0 : vector<128x128xf32> to vector<128x128xbf16>
    %4 = arith.truncf %1 : vector<128x128xf32> to vector<128x128xbf16>
    %cst = arith.constant dense<0.000000e+00> : vector<128x128xf32>
    %5 = tpu.matmul %3, %4, %cst {dimension_numbers = #tpu.dot_dimension_numbers<[1], [1], [0], [0], [0, 0, 1, 0], [], []>} : vector<128x128xbf16>, vector<128x128xbf16>, vector<128x128xf32> -> vector<128x128xf32>
    %cst_5 = arith.constant 0.0883883461 : f32
    %6 = vector.broadcast %cst_5 : f32 to vector<128x128xf32>
    %7 = arith.mulf %5, %6 : vector<128x128xf32>
    %c0_6 = arith.constant 0 : index
    %c0_7 = arith.constant 0 : index
    %c0_8 = arith.constant 0 : index
    %8 = vector.load %arg5[%c0_6, %c0_7, %c0_8] : memref<1x1x128xf32, #tpu.memory_space<vmem>>, vector<1x1x128xf32>
    %9 = vector.shape_cast %8 : vector<1x1x128xf32> to vector<1x128xf32>
    %cst_9 = arith.constant 5.000000e-01 : f32
    %10 = vector.broadcast %cst_9 : f32 to vector<1x128xf32>
    %11 = arith.cmpf ogt, %9, %10 : vector<1x128xf32>
    %cst_10 = arith.constant 0.000000e+00 : f32
    %cst_11 = arith.constant -1.000000e+09 : f32
    %12 = vector.broadcast %cst_10 : f32 to vector<1x128xf32>
    %13 = vector.broadcast %cst_11 : f32 to vector<1x128xf32>
    %14 = arith.select %11, %12, %13 : vector<1x128xi1>, vector<1x128xf32>
    %15 = vector.broadcast %14 : vector<1x128xf32> to vector<128x128xf32>
    %16 = arith.addf %7, %15 : vector<128x128xf32>
    %cst_12 = arith.constant dense<0xFF800000> : vector<128xf32>
    %17 = vector.multi_reduction <maximumf>, %16, %cst_12 [1] : vector<128x128xf32> to vector<128xf32>
    %18 = vector.shape_cast %17 : vector<128xf32> to vector<128x1xf32>
    %19 = vector.broadcast %18 : vector<128x1xf32> to vector<128x128xf32>
    %20 = arith.subf %16, %19 : vector<128x128xf32>
    %21 = math.exp %20 : vector<128x128xf32>
    %cst_13 = arith.constant dense<0.000000e+00> : vector<128xf32>
    %22 = vector.multi_reduction <add>, %21, %cst_13 [1] : vector<128x128xf32> to vector<128xf32>
    %23 = vector.shape_cast %22 : vector<128xf32> to vector<128x1xf32>
    %24 = tpu.reciprocal %23 {approx = true} : vector<128x1xf32> -> vector<128x1xf32>
    %25 = vector.broadcast %24 : vector<128x1xf32> to vector<128x128xf32>
    %26 = arith.mulf %21, %25 : vector<128x128xf32>
    %27 = arith.truncf %26 : vector<128x128xf32> to vector<128x128xbf16>
    %28 = arith.truncf %2 : vector<128x128xf32> to vector<128x128xbf16>
    %cst_14 = arith.constant dense<0.000000e+00> : vector<128x128xf32>
    %29 = tpu.matmul %27, %28, %cst_14 {dimension_numbers = #tpu.dot_dimension_numbers<[1], [0], [0], [1], [0, 0, 1, 1], [], []>} : vector<128x128xbf16>, vector<128x128xbf16>, vector<128x128xf32> -> vector<128x128xf32>
    %c0_15 = arith.constant 0 : index
    %c0_16 = arith.constant 0 : index
    %30 = vector.load %arg6[%c0_15, %c0_16] : memref<128x128xf32, #tpu.memory_space<vmem>>, vector<128x128xf32>
    tpu.vector_store %arg6[%c0_15, %c0_16], %29 {strides = array<i32>} : memref<128x128xf32, #tpu.memory_space<vmem>>, vector<128x128xf32>,
    return
  }
  func.func @transform_0(%arg0: i32, %arg1: i32) -> (i32, i32) {
    %c0_i32 = arith.constant 0 : i32
    return %arg0, %arg1 : i32, i32
  }
  func.func @transform_1(%arg0: i32, %arg1: i32) -> (i32, i32) {
    %c2_i32 = arith.constant 2 : i32
    %0 = arith.addi %c2_i32, %arg1 : i32
    %c0_i32 = arith.constant 0 : i32
    return %arg0, %0 : i32, i32
  }
  func.func @transform_2(%arg0: i32, %arg1: i32) -> (i32, i32) {
    %c4_i32 = arith.constant 4 : i32
    %0 = arith.addi %c4_i32, %arg1 : i32
    %c0_i32 = arith.constant 0 : i32
    return %arg0, %0 : i32, i32
  }
  func.func @transform_3(%arg0: i32, %arg1: i32) -> (i32, i32, i32) {
    %c0_i32 = arith.constant 0 : i32
    %c0_i32_0 = arith.constant 0 : i32
    %c0_i32_1 = arith.constant 0 : i32
    return %arg0, %c0_i32, %c0_i32_0 : i32, i32, i32
  }
  func.func @transform_4(%arg0: i32, %arg1: i32) -> (i32, i32) {
    %c0_i32 = arith.constant 0 : i32
    return %arg0, %arg1 : i32, i32
  }
}

module attributes {stable_mosaic.version = 11 : i64} {
  func.func @_attn_out_ln_kernel(%arg0: i32, %arg1: memref<128x256xf32, #tpu.memory_space<vmem>>, %arg2: memref<128x256xf32, #tpu.memory_space<vmem>>, %arg3: memref<256x256xf32, #tpu.memory_space<vmem>>, %arg4: memref<1x256xf32, #tpu.memory_space<vmem>>, %arg5: memref<1x256xf32, #tpu.memory_space<vmem>>, %arg6: memref<1x256xf32, #tpu.memory_space<vmem>>, %arg7: memref<128x256xf32, #tpu.memory_space<vmem>>) attributes {dimension_semantics = [#tpu.dimension_semantics<parallel>], iteration_bounds = array<i64: 2>, scalar_prefetch = 0 : i64, scratch_operands = 0 : i64, tpu.core_type = #tpu.core_type<tc>, window_params = [{transform_indices = @transform_0, window_bounds = array<i64: 128, 256>}, {transform_indices = @transform_1, window_bounds = array<i64: 128, 256>}, {pipeline_mode = #tpu.pipeline_mode<synchronous>, transform_indices = @transform_2, window_bounds = array<i64: 256, 256>}, {pipeline_mode = #tpu.pipeline_mode<synchronous>, transform_indices = @transform_3, window_bounds = array<i64: 1, 256>}, {pipeline_mode = #tpu.pipeline_mode<synchronous>, transform_indices = @transform_4, window_bounds = array<i64: 1, 256>}, {pipeline_mode = #tpu.pipeline_mode<synchronous>, transform_indices = @transform_5, window_bounds = array<i64: 1, 256>}, {transform_indices = @transform_6, window_bounds = array<i64: 128, 256>}]} {
    %c0 = arith.constant 0 : index
    %c0_0 = arith.constant 0 : index
    %0 = vector.load %arg1[%c0, %c0_0] : memref<128x256xf32, #tpu.memory_space<vmem>>, vector<128x256xf32>
    %c0_1 = arith.constant 0 : index
    %c0_2 = arith.constant 0 : index
    %1 = vector.load %arg3[%c0_1, %c0_2] : memref<256x256xf32, #tpu.memory_space<vmem>>, vector<256x256xf32>
    %2 = arith.truncf %0 : vector<128x256xf32> to vector<128x256xbf16>
    %3 = arith.truncf %1 : vector<256x256xf32> to vector<256x256xbf16>
    %cst = arith.constant dense<0.000000e+00> : vector<128x256xf32>
    %4 = tpu.matmul %2, %3, %cst {dimension_numbers = #tpu.dot_dimension_numbers<[1], [0], [0], [1], [0, 0, 1, 1], [], []>} : vector<128x256xbf16>, vector<256x256xbf16>, vector<128x256xf32> -> vector<128x256xf32>
    %c0_3 = arith.constant 0 : index
    %c0_4 = arith.constant 0 : index
    %5 = vector.load %arg4[%c0_3, %c0_4] : memref<1x256xf32, #tpu.memory_space<vmem>>, vector<1x256xf32>
    %6 = vector.broadcast %5 : vector<1x256xf32> to vector<128x256xf32>
    %7 = arith.addf %4, %6 : vector<128x256xf32>
    %c0_5 = arith.constant 0 : index
    %c0_6 = arith.constant 0 : index
    %8 = vector.load %arg2[%c0_5, %c0_6] : memref<128x256xf32, #tpu.memory_space<vmem>>, vector<128x256xf32>
    %9 = arith.addf %7, %8 : vector<128x256xf32>
    %c0_7 = arith.constant 0 : index
    %c0_8 = arith.constant 0 : index
    %10 = vector.load %arg5[%c0_7, %c0_8] : memref<1x256xf32, #tpu.memory_space<vmem>>, vector<1x256xf32>
    %c0_9 = arith.constant 0 : index
    %c0_10 = arith.constant 0 : index
    %11 = vector.load %arg6[%c0_9, %c0_10] : memref<1x256xf32, #tpu.memory_space<vmem>>, vector<1x256xf32>
    %cst_11 = arith.constant dense<0.000000e+00> : vector<128xf32>
    %12 = vector.multi_reduction <add>, %9, %cst_11 [1] : vector<128x256xf32> to vector<128xf32>
    %13 = vector.shape_cast %12 : vector<128xf32> to vector<128x1xf32>
    %cst_12 = arith.constant 2.560000e+02 : f32
    %14 = vector.broadcast %cst_12 : f32 to vector<128x1xf32>
    %15 = arith.divf %13, %14 : vector<128x1xf32>
    %16 = vector.broadcast %15 : vector<128x1xf32> to vector<128x256xf32>
    %17 = arith.subf %9, %16 : vector<128x256xf32>
    %18 = arith.mulf %17, %17 : vector<128x256xf32>
    %cst_13 = arith.constant dense<0.000000e+00> : vector<128xf32>
    %19 = vector.multi_reduction <add>, %18, %cst_13 [1] : vector<128x256xf32> to vector<128xf32>
    %20 = vector.shape_cast %19 : vector<128xf32> to vector<128x1xf32>
    %cst_14 = arith.constant 2.560000e+02 : f32
    %21 = vector.broadcast %cst_14 : f32 to vector<128x1xf32>
    %22 = arith.divf %20, %21 : vector<128x1xf32>
    %cst_15 = arith.constant 9.99999996E-13 : f32
    %23 = vector.broadcast %cst_15 : f32 to vector<128x1xf32>
    %24 = arith.addf %22, %23 : vector<128x1xf32>
    %25 = math.rsqrt %24 : vector<128x1xf32>
    %26 = vector.broadcast %25 : vector<128x1xf32> to vector<128x256xf32>
    %27 = arith.mulf %17, %26 : vector<128x256xf32>
    %28 = vector.broadcast %10 : vector<1x256xf32> to vector<128x256xf32>
    %29 = arith.mulf %27, %28 : vector<128x256xf32>
    %30 = vector.broadcast %11 : vector<1x256xf32> to vector<128x256xf32>
    %31 = arith.addf %29, %30 : vector<128x256xf32>
    %c0_16 = arith.constant 0 : index
    %c0_17 = arith.constant 0 : index
    %32 = vector.load %arg7[%c0_16, %c0_17] : memref<128x256xf32, #tpu.memory_space<vmem>>, vector<128x256xf32>
    tpu.vector_store %arg7[%c0_16, %c0_17], %31 {strides = array<i32>} : memref<128x256xf32, #tpu.memory_space<vmem>>, vector<128x256xf32>,
    return
  }
  func.func @transform_0(%arg0: i32) -> (i32, i32) {
    %c0_i32 = arith.constant 0 : i32
    %c0_i32_0 = arith.constant 0 : i32
    return %arg0, %c0_i32 : i32, i32
  }
  func.func @transform_1(%arg0: i32) -> (i32, i32) {
    %c0_i32 = arith.constant 0 : i32
    %c0_i32_0 = arith.constant 0 : i32
    return %arg0, %c0_i32 : i32, i32
  }
  func.func @transform_2(%arg0: i32) -> (i32, i32) {
    %c0_i32 = arith.constant 0 : i32
    %c0_i32_0 = arith.constant 0 : i32
    %c0_i32_1 = arith.constant 0 : i32
    return %c0_i32, %c0_i32_0 : i32, i32
  }
  func.func @transform_3(%arg0: i32) -> (i32, i32) {
    %c0_i32 = arith.constant 0 : i32
    %c0_i32_0 = arith.constant 0 : i32
    %c0_i32_1 = arith.constant 0 : i32
    return %c0_i32, %c0_i32_0 : i32, i32
  }
  func.func @transform_4(%arg0: i32) -> (i32, i32) {
    %c0_i32 = arith.constant 0 : i32
    %c0_i32_0 = arith.constant 0 : i32
    %c0_i32_1 = arith.constant 0 : i32
    return %c0_i32, %c0_i32_0 : i32, i32
  }
  func.func @transform_5(%arg0: i32) -> (i32, i32) {
    %c0_i32 = arith.constant 0 : i32
    %c0_i32_0 = arith.constant 0 : i32
    %c0_i32_1 = arith.constant 0 : i32
    return %c0_i32, %c0_i32_0 : i32, i32
  }
  func.func @transform_6(%arg0: i32) -> (i32, i32) {
    %c0_i32 = arith.constant 0 : i32
    %c0_i32_0 = arith.constant 0 : i32
    return %arg0, %c0_i32 : i32, i32
  }
}

module attributes {stable_mosaic.version = 11 : i64} {
  func.func @_ffn_ln_kernel(%arg0: i32, %arg1: memref<128x256xf32, #tpu.memory_space<vmem>>, %arg2: memref<256x512xf32, #tpu.memory_space<vmem>>, %arg3: memref<1x512xf32, #tpu.memory_space<vmem>>, %arg4: memref<512x256xf32, #tpu.memory_space<vmem>>, %arg5: memref<1x256xf32, #tpu.memory_space<vmem>>, %arg6: memref<1x256xf32, #tpu.memory_space<vmem>>, %arg7: memref<1x256xf32, #tpu.memory_space<vmem>>, %arg8: memref<128x256xf32, #tpu.memory_space<vmem>>) attributes {dimension_semantics = [#tpu.dimension_semantics<parallel>], iteration_bounds = array<i64: 2>, scalar_prefetch = 0 : i64, scratch_operands = 0 : i64, tpu.core_type = #tpu.core_type<tc>, window_params = [{transform_indices = @transform_0, window_bounds = array<i64: 128, 256>}, {pipeline_mode = #tpu.pipeline_mode<synchronous>, transform_indices = @transform_1, window_bounds = array<i64: 256, 512>}, {pipeline_mode = #tpu.pipeline_mode<synchronous>, transform_indices = @transform_2, window_bounds = array<i64: 1, 512>}, {pipeline_mode = #tpu.pipeline_mode<synchronous>, transform_indices = @transform_3, window_bounds = array<i64: 512, 256>}, {pipeline_mode = #tpu.pipeline_mode<synchronous>, transform_indices = @transform_4, window_bounds = array<i64: 1, 256>}, {pipeline_mode = #tpu.pipeline_mode<synchronous>, transform_indices = @transform_5, window_bounds = array<i64: 1, 256>}, {pipeline_mode = #tpu.pipeline_mode<synchronous>, transform_indices = @transform_6, window_bounds = array<i64: 1, 256>}, {transform_indices = @transform_7, window_bounds = array<i64: 128, 256>}]} {
    %c0 = arith.constant 0 : index
    %c0_0 = arith.constant 0 : index
    %0 = vector.load %arg1[%c0, %c0_0] : memref<128x256xf32, #tpu.memory_space<vmem>>, vector<128x256xf32>
    %c0_1 = arith.constant 0 : index
    %c0_2 = arith.constant 0 : index
    %1 = vector.load %arg2[%c0_1, %c0_2] : memref<256x512xf32, #tpu.memory_space<vmem>>, vector<256x512xf32>
    %2 = arith.truncf %0 : vector<128x256xf32> to vector<128x256xbf16>
    %3 = arith.truncf %1 : vector<256x512xf32> to vector<256x512xbf16>
    %cst = arith.constant dense<0.000000e+00> : vector<128x512xf32>
    %4 = tpu.matmul %2, %3, %cst {dimension_numbers = #tpu.dot_dimension_numbers<[1], [0], [0], [1], [0, 0, 1, 1], [], []>} : vector<128x256xbf16>, vector<256x512xbf16>, vector<128x512xf32> -> vector<128x512xf32>
    %c0_3 = arith.constant 0 : index
    %c0_4 = arith.constant 0 : index
    %5 = vector.load %arg3[%c0_3, %c0_4] : memref<1x512xf32, #tpu.memory_space<vmem>>, vector<1x512xf32>
    %6 = vector.broadcast %5 : vector<1x512xf32> to vector<128x512xf32>
    %7 = arith.addf %4, %6 : vector<128x512xf32>
    %cst_5 = arith.constant 5.000000e-01 : f32
    %8 = vector.broadcast %cst_5 : f32 to vector<128x512xf32>
    %9 = arith.mulf %8, %7 : vector<128x512xf32>
    %cst_6 = arith.constant 4.471500e-02 : f32
    %10 = vector.broadcast %cst_6 : f32 to vector<128x512xf32>
    %11 = arith.mulf %10, %7 : vector<128x512xf32>
    %12 = arith.mulf %11, %7 : vector<128x512xf32>
    %13 = arith.mulf %12, %7 : vector<128x512xf32>
    %14 = arith.addf %7, %13 : vector<128x512xf32>
    %cst_7 = arith.constant 0.797884583 : f32
    %15 = vector.broadcast %cst_7 : f32 to vector<128x512xf32>
    %16 = arith.mulf %15, %14 : vector<128x512xf32>
    %17 = math.tanh %16 : vector<128x512xf32>
    %cst_8 = arith.constant 1.000000e+00 : f32
    %18 = vector.broadcast %cst_8 : f32 to vector<128x512xf32>
    %19 = arith.addf %18, %17 : vector<128x512xf32>
    %20 = arith.mulf %9, %19 : vector<128x512xf32>
    %c0_9 = arith.constant 0 : index
    %c0_10 = arith.constant 0 : index
    %21 = vector.load %arg4[%c0_9, %c0_10] : memref<512x256xf32, #tpu.memory_space<vmem>>, vector<512x256xf32>
    %22 = arith.truncf %20 : vector<128x512xf32> to vector<128x512xbf16>
    %23 = arith.truncf %21 : vector<512x256xf32> to vector<512x256xbf16>
    %cst_11 = arith.constant dense<0.000000e+00> : vector<128x256xf32>
    %24 = tpu.matmul %22, %23, %cst_11 {dimension_numbers = #tpu.dot_dimension_numbers<[1], [0], [0], [1], [0, 0, 1, 1], [], []>} : vector<128x512xbf16>, vector<512x256xbf16>, vector<128x256xf32> -> vector<128x256xf32>
    %c0_12 = arith.constant 0 : index
    %c0_13 = arith.constant 0 : index
    %25 = vector.load %arg5[%c0_12, %c0_13] : memref<1x256xf32, #tpu.memory_space<vmem>>, vector<1x256xf32>
    %26 = vector.broadcast %25 : vector<1x256xf32> to vector<128x256xf32>
    %27 = arith.addf %24, %26 : vector<128x256xf32>
    %28 = arith.addf %27, %0 : vector<128x256xf32>
    %c0_14 = arith.constant 0 : index
    %c0_15 = arith.constant 0 : index
    %29 = vector.load %arg6[%c0_14, %c0_15] : memref<1x256xf32, #tpu.memory_space<vmem>>, vector<1x256xf32>
    %c0_16 = arith.constant 0 : index
    %c0_17 = arith.constant 0 : index
    %30 = vector.load %arg7[%c0_16, %c0_17] : memref<1x256xf32, #tpu.memory_space<vmem>>, vector<1x256xf32>
    %cst_18 = arith.constant dense<0.000000e+00> : vector<128xf32>
    %31 = vector.multi_reduction <add>, %28, %cst_18 [1] : vector<128x256xf32> to vector<128xf32>
    %32 = vector.shape_cast %31 : vector<128xf32> to vector<128x1xf32>
    %cst_19 = arith.constant 2.560000e+02 : f32
    %33 = vector.broadcast %cst_19 : f32 to vector<128x1xf32>
    %34 = arith.divf %32, %33 : vector<128x1xf32>
    %35 = vector.broadcast %34 : vector<128x1xf32> to vector<128x256xf32>
    %36 = arith.subf %28, %35 : vector<128x256xf32>
    %37 = arith.mulf %36, %36 : vector<128x256xf32>
    %cst_20 = arith.constant dense<0.000000e+00> : vector<128xf32>
    %38 = vector.multi_reduction <add>, %37, %cst_20 [1] : vector<128x256xf32> to vector<128xf32>
    %39 = vector.shape_cast %38 : vector<128xf32> to vector<128x1xf32>
    %cst_21 = arith.constant 2.560000e+02 : f32
    %40 = vector.broadcast %cst_21 : f32 to vector<128x1xf32>
    %41 = arith.divf %39, %40 : vector<128x1xf32>
    %cst_22 = arith.constant 9.99999996E-13 : f32
    %42 = vector.broadcast %cst_22 : f32 to vector<128x1xf32>
    %43 = arith.addf %41, %42 : vector<128x1xf32>
    %44 = math.rsqrt %43 : vector<128x1xf32>
    %45 = vector.broadcast %44 : vector<128x1xf32> to vector<128x256xf32>
    %46 = arith.mulf %36, %45 : vector<128x256xf32>
    %47 = vector.broadcast %29 : vector<1x256xf32> to vector<128x256xf32>
    %48 = arith.mulf %46, %47 : vector<128x256xf32>
    %49 = vector.broadcast %30 : vector<1x256xf32> to vector<128x256xf32>
    %50 = arith.addf %48, %49 : vector<128x256xf32>
    %c0_23 = arith.constant 0 : index
    %c0_24 = arith.constant 0 : index
    %51 = vector.load %arg8[%c0_23, %c0_24] : memref<128x256xf32, #tpu.memory_space<vmem>>, vector<128x256xf32>
    tpu.vector_store %arg8[%c0_23, %c0_24], %50 {strides = array<i32>} : memref<128x256xf32, #tpu.memory_space<vmem>>, vector<128x256xf32>,
    return
  }
  func.func @transform_0(%arg0: i32) -> (i32, i32) {
    %c0_i32 = arith.constant 0 : i32
    %c0_i32_0 = arith.constant 0 : i32
    return %arg0, %c0_i32 : i32, i32
  }
  func.func @transform_1(%arg0: i32) -> (i32, i32) {
    %c0_i32 = arith.constant 0 : i32
    %c0_i32_0 = arith.constant 0 : i32
    %c0_i32_1 = arith.constant 0 : i32
    return %c0_i32, %c0_i32_0 : i32, i32
  }
  func.func @transform_2(%arg0: i32) -> (i32, i32) {
    %c0_i32 = arith.constant 0 : i32
    %c0_i32_0 = arith.constant 0 : i32
    %c0_i32_1 = arith.constant 0 : i32
    return %c0_i32, %c0_i32_0 : i32, i32
  }
  func.func @transform_3(%arg0: i32) -> (i32, i32) {
    %c0_i32 = arith.constant 0 : i32
    %c0_i32_0 = arith.constant 0 : i32
    %c0_i32_1 = arith.constant 0 : i32
    return %c0_i32, %c0_i32_0 : i32, i32
  }
  func.func @transform_4(%arg0: i32) -> (i32, i32) {
    %c0_i32 = arith.constant 0 : i32
    %c0_i32_0 = arith.constant 0 : i32
    %c0_i32_1 = arith.constant 0 : i32
    return %c0_i32, %c0_i32_0 : i32, i32
  }
  func.func @transform_5(%arg0: i32) -> (i32, i32) {
    %c0_i32 = arith.constant 0 : i32
    %c0_i32_0 = arith.constant 0 : i32
    %c0_i32_1 = arith.constant 0 : i32
    return %c0_i32, %c0_i32_0 : i32, i32
  }
  func.func @transform_6(%arg0: i32) -> (i32, i32) {
    %c0_i32 = arith.constant 0 : i32
    %c0_i32_0 = arith.constant 0 : i32
    %c0_i32_1 = arith.constant 0 : i32
    return %c0_i32, %c0_i32_0 : i32, i32
  }
  func.func @transform_7(%arg0: i32) -> (i32, i32) {
    %c0_i32 = arith.constant 0 : i32
    %c0_i32_0 = arith.constant 0 : i32
    return %arg0, %c0_i32 : i32, i32
  }
}

module attributes {stable_mosaic.version = 11 : i64} {
  func.func @_cls_head_kernel(%arg0: i32, %arg1: memref<2x256xf32, #tpu.memory_space<vmem>>, %arg2: memref<256x128xf32, #tpu.memory_space<vmem>>, %arg3: memref<1x128xf32, #tpu.memory_space<vmem>>, %arg4: memref<128x128xf32, #tpu.memory_space<vmem>>, %arg5: memref<1x128xf32, #tpu.memory_space<vmem>>, %arg6: memref<2x128xf32, #tpu.memory_space<vmem>>) attributes {dimension_semantics = [#tpu.dimension_semantics<arbitrary>], iteration_bounds = array<i64: 1>, scalar_prefetch = 0 : i64, scratch_operands = 0 : i64, tpu.core_type = #tpu.core_type<tc>, window_params = [{pipeline_mode = #tpu.pipeline_mode<synchronous>, transform_indices = @transform_0, window_bounds = array<i64: 2, 256>}, {pipeline_mode = #tpu.pipeline_mode<synchronous>, transform_indices = @transform_1, window_bounds = array<i64: 256, 128>}, {pipeline_mode = #tpu.pipeline_mode<synchronous>, transform_indices = @transform_2, window_bounds = array<i64: 1, 128>}, {pipeline_mode = #tpu.pipeline_mode<synchronous>, transform_indices = @transform_3, window_bounds = array<i64: 128, 128>}, {pipeline_mode = #tpu.pipeline_mode<synchronous>, transform_indices = @transform_4, window_bounds = array<i64: 1, 128>}, {pipeline_mode = #tpu.pipeline_mode<synchronous>, transform_indices = @transform_5, window_bounds = array<i64: 2, 128>}]} {
    %c0 = arith.constant 0 : index
    %c0_0 = arith.constant 0 : index
    %0 = vector.load %arg1[%c0, %c0_0] : memref<2x256xf32, #tpu.memory_space<vmem>>, vector<2x256xf32>
    %c0_1 = arith.constant 0 : index
    %c0_2 = arith.constant 0 : index
    %1 = vector.load %arg2[%c0_1, %c0_2] : memref<256x128xf32, #tpu.memory_space<vmem>>, vector<256x128xf32>
    %2 = arith.truncf %0 : vector<2x256xf32> to vector<2x256xbf16>
    %3 = arith.truncf %1 : vector<256x128xf32> to vector<256x128xbf16>
    %cst = arith.constant dense<0.000000e+00> : vector<2x128xf32>
    %4 = tpu.matmul %2, %3, %cst {dimension_numbers = #tpu.dot_dimension_numbers<[1], [0], [0], [1], [0, 0, 1, 1], [], []>} : vector<2x256xbf16>, vector<256x128xbf16>, vector<2x128xf32> -> vector<2x128xf32>
    %c0_3 = arith.constant 0 : index
    %c0_4 = arith.constant 0 : index
    %5 = vector.load %arg3[%c0_3, %c0_4] : memref<1x128xf32, #tpu.memory_space<vmem>>, vector<1x128xf32>
    %6 = vector.broadcast %5 : vector<1x128xf32> to vector<2x128xf32>
    %7 = arith.addf %4, %6 : vector<2x128xf32>
    %cst_5 = arith.constant 0.000000e+00 : f32
    %8 = vector.broadcast %cst_5 : f32 to vector<2x128xf32>
    %9 = arith.maximumf %7, %8 : vector<2x128xf32>
    %c0_6 = arith.constant 0 : index
    %c0_7 = arith.constant 0 : index
    %10 = vector.load %arg4[%c0_6, %c0_7] : memref<128x128xf32, #tpu.memory_space<vmem>>, vector<128x128xf32>
    %11 = arith.truncf %9 : vector<2x128xf32> to vector<2x128xbf16>
    %12 = arith.truncf %10 : vector<128x128xf32> to vector<128x128xbf16>
    %cst_8 = arith.constant dense<0.000000e+00> : vector<2x128xf32>
    %13 = tpu.matmul %11, %12, %cst_8 {dimension_numbers = #tpu.dot_dimension_numbers<[1], [0], [0], [1], [0, 0, 1, 1], [], []>} : vector<2x128xbf16>, vector<128x128xbf16>, vector<2x128xf32> -> vector<2x128xf32>
    %c0_9 = arith.constant 0 : index
    %c0_10 = arith.constant 0 : index
    %14 = vector.load %arg5[%c0_9, %c0_10] : memref<1x128xf32, #tpu.memory_space<vmem>>, vector<1x128xf32>
    %15 = vector.broadcast %14 : vector<1x128xf32> to vector<2x128xf32>
    %16 = arith.addf %13, %15 : vector<2x128xf32>
    %c0_11 = arith.constant 0 : index
    %c0_12 = arith.constant 0 : index
    %17 = vector.load %arg6[%c0_11, %c0_12] : memref<2x128xf32, #tpu.memory_space<vmem>>, vector<2x128xf32>
    tpu.vector_store %arg6[%c0_11, %c0_12], %16 {strides = array<i32>} : memref<2x128xf32, #tpu.memory_space<vmem>>, vector<2x128xf32>,
    return
  }
  func.func @transform_0(%arg0: i32) -> (i32, i32) {
    %c0_i32 = arith.constant 0 : i32
    %c0_i32_0 = arith.constant 0 : i32
    %c0_i32_1 = arith.constant 0 : i32
    return %c0_i32, %c0_i32_0 : i32, i32
  }
  func.func @transform_1(%arg0: i32) -> (i32, i32) {
    %c0_i32 = arith.constant 0 : i32
    %c0_i32_0 = arith.constant 0 : i32
    %c0_i32_1 = arith.constant 0 : i32
    return %c0_i32, %c0_i32_0 : i32, i32
  }
  func.func @transform_2(%arg0: i32) -> (i32, i32) {
    %c0_i32 = arith.constant 0 : i32
    %c0_i32_0 = arith.constant 0 : i32
    %c0_i32_1 = arith.constant 0 : i32
    return %c0_i32, %c0_i32_0 : i32, i32
  }
  func.func @transform_3(%arg0: i32) -> (i32, i32) {
    %c0_i32 = arith.constant 0 : i32
    %c0_i32_0 = arith.constant 0 : i32
    %c0_i32_1 = arith.constant 0 : i32
    return %c0_i32, %c0_i32_0 : i32, i32
  }
  func.func @transform_4(%arg0: i32) -> (i32, i32) {
    %c0_i32 = arith.constant 0 : i32
    %c0_i32_0 = arith.constant 0 : i32
    %c0_i32_1 = arith.constant 0 : i32
    return %c0_i32, %c0_i32_0 : i32, i32
  }
  func.func @transform_5(%arg0: i32) -> (i32, i32) {
    %c0_i32 = arith.constant 0 : i32
    %c0_i32_0 = arith.constant 0 : i32
    %c0_i32_1 = arith.constant 0 : i32
    return %c0_i32, %c0_i32_0 : i32, i32
  }
}

</mosaic_0001>

<bundles_post_ra>
// kernel: camembert_classifier_forward.10
= control target key start
LH: loop header
LB: loop body
LE: loop exit
PB: predicated region body
PF: predicated region fallthrough
CT: control target
= control target key end

     0   :  { %s825_s15 = smov 0   ;;  %s1379_s0 = inlined_call_operand.vmem [shape: f32[256,256], index: 0, kind: input, shape index: {}]   ;;  %s1380_s1 = inlined_call_operand.vmem [shape: f32[128,256], index: 1, kind: input, shape index: {}]   ;;  %s1381_s2 = inlined_call_operand.vmem [shape: f32[1,256], index: 2, kind: input, shape index: {}]   ;;  %s1382_s3 = inlined_call_operand.vmem [shape: f32[1,256], index: 3, kind: input, shape index: {}]   ;;  %s1383_s4 = inlined_call_operand.vmem [shape: f32[256,256], index: 4, kind: output, shape index: {}]  }
   0x1 LB: > { %s737_s16 = sadd.s32 4294967295, %s798_s15   ;;  %p741_p0 = scmp.ge.s32.totalorder %s798_s15, 1  ;;  %s798_s15 = sphi %s825_s15, %s14_s15  }
   0x2   : > { %p164_p1 = scmp.lt.s32.totalorder %s798_s15, 3 }
   0x4   : > { %p165_p2 = pnand %p741_p0, %p164_p1 }
   0x5   : > { %s742_s17 = sshll.u32 (!%p165_p2), %s737_s16, 4  ;;  %v238_v0 = vld [vmem:[%s1380_s1] sm:$0xff] (!%p165_p2)  ;;  %v239_v1 = vld [vmem:[%s1380_s1 + $0x8] sm:$0xff] (!%p165_p2)  ;;  %v240_v4 = vld [vmem:[%s1380_s1 + $0x10] sm:$0xff] (!%p165_p2) }
   0x6   : > { %168 = sbr.rel (%p165_p2) target bundleno = 372 (0x174), region = 36  ;;  %p193_p3 = scmp.lt.s32.totalorder (!%p165_p2), %s742_s17, 31  ;;  %v242_v2 = vld [vmem:[%s1380_s1 + $0x20] sm:$0xff] (!%p165_p2)  ;;  %v243_v3 = vld [vmem:[%s1380_s1 + $0x28] sm:$0xff] (!%p165_p2)  ;;  %v241_v5 = vld [vmem:[%s1380_s1 + $0x18] sm:$0xff] (!%p165_p2) }
   0x7   : > { %v244_v6 = vld [vmem:[%s1380_s1 + $0x30] sm:$0xff] (!%p165_p2)  ;;  %v245_v7 = vld [vmem:[%s1380_s1 + $0x38] sm:$0xff] (!%p165_p2)  ;;  %v246_v11 = vld [vmem:[%s1380_s1 + $0x40] sm:$0xff] (!%p165_p2) }
   0x8   : > { %v247_v12 = vld [vmem:[%s1380_s1 + $0x48] sm:$0xff] (!%p165_p2)  ;;  %v248_v19 = vld [vmem:[%s1380_s1 + $0x50] sm:$0xff] (!%p165_p2)  ;;  %v249_v20 = vld [vmem:[%s1380_s1 + $0x58] sm:$0xff] (!%p165_p2) }
   0x9   : > { %v250_v37 = vld [vmem:[%s1380_s1 + $0x60] sm:$0xff] (!%p165_p2)  ;;  %v251_v38 = vld [vmem:[%s1380_s1 + $0x68] sm:$0xff] (!%p165_p2)  ;;  %v252_v44 = vld [vmem:[%s1380_s1 + $0x70] sm:$0xff] (!%p165_p2) }
   0xa   : > { %v253_v47 = vld [vmem:[%s1380_s1 + $0x78] sm:$0xff] (!%p165_p2)  ;;  %v254_v51 = vld [vmem:[%s1380_s1 + $0x80] sm:$0xff] (!%p165_p2)  ;;  %v255_v52 = vld [vmem:[%s1380_s1 + $0x88] sm:$0xff] (!%p165_p2) }
   0xb   : > { %v256_v58 = vld [vmem:[%s1380_s1 + $0x90] sm:$0xff] (!%p165_p2)  ;;  %v257_v61 = vld [vmem:[%s1380_s1 + $0x98] sm:$0xff] (!%p165_p2) }
   0xd   : > { %s1385_s17 = smov (!%p193_p3, %s742_s17), 31 }
   0xe   : > { %s750_s22 = sshll.u32 %s1385_s17, 4 }
   0xf   : > { %s856_s5 = scalar_lea.vmem %s1379_s0, %s750_s22  ;;  %s1250_s24 = scalar_lea.vmem %s1383_s4, %s750_s22 }
  0x10   : > { %v206_v8 = vld [vmem:[%s856_s5] sm:$0xff]  ;;  %v207_v9 = vld [vmem:[%s856_s5 + $0x8] sm:$0xff]  ;;  %v208_v17 = vld [vmem:[%s856_s5 + $0x10] sm:$0xff] }
  0x11   : > { %v210_v10 = vld [vmem:[%s856_s5 + $0x20] sm:$0xff]  ;;  %v876_v13 = vadd.f32 %v238_v0, %v206_v8  ;;  %v878_v14 = vadd.f32 %v239_v1, %v207_v9  ;;  %v211_v15 = vld [vmem:[%s856_s5 + $0x28] sm:$0xff]  ;;  %v209_v18 = vld [vmem:[%s856_s5 + $0x18] sm:$0xff]  ;;  %v893_v22 = vadd.f32 %v240_v4, %v208_v17 }
  0x12   : > { %v881_v16 = vadd.f32 %v242_v2, %v210_v10  ;;  %v891_v21 = vadd.f32 %v243_v3, %v211_v15  ;;  %v895_v23 = vadd.f32 %v241_v5, %v209_v18  ;;  %v212_v24 = vld [vmem:[%s856_s5 + $0x30] sm:$0xff]  ;;  %v213_v25 = vld [vmem:[%s856_s5 + $0x38] sm:$0xff]  ;;  %v214_v26 = vld [vmem:[%s856_s5 + $0x40] sm:$0xff] }
  0x13   : > { %v304_v27 = vadd.f32 %v878_v14, %v876_v13  ;;  %v902_v28 = vadd.f32 %v244_v6, %v212_v24  ;;  %v904_v29 = vadd.f32 %v245_v7, %v213_v25  ;;  %v215_v30 = vld [vmem:[%s856_s5 + $0x48] sm:$0xff]  ;;  %v216_v31 = vld [vmem:[%s856_s5 + $0x50] sm:$0xff]  ;;  %v217_v32 = vld [vmem:[%s856_s5 + $0x58] sm:$0xff]  ;;  %v913_v35 = vadd.f32 %v246_v11, %v214_v26 }
  0x14   : > { %v310_v33 = vadd.f32 %v891_v21, %v881_v16  ;;  %v307_v34 = vadd.f32 %v895_v23, %v893_v22  ;;  %v915_v36 = vadd.f32 %v247_v12, %v215_v30  ;;  %v925_v40 = vadd.f32 %v248_v19, %v216_v31  ;;  %v218_v42 = vld [vmem:[%s856_s5 + $0x60] sm:$0xff]  ;;  %v219_v43 = vld [vmem:[%s856_s5 + $0x68] sm:$0xff]  ;;  %v220_v45 = vld [vmem:[%s856_s5 + $0x70] sm:$0xff] }
  0x15   : > { %305 = vadd.xlane.f32.xlu0 %v304_v27  ;;  %v313_v39 = vadd.f32 %v904_v29, %v902_v28  ;;  %v927_v41 = vadd.f32 %v249_v20, %v217_v32  ;;  %v221_v46 = vld [vmem:[%s856_s5 + $0x78] sm:$0xff]  ;;  %v941_v49 = vadd.f32 %v250_v37, %v218_v42  ;;  %v943_v50 = vadd.f32 %v251_v38, %v219_v43  ;;  %v222_v56 = vld [vmem:[%s856_s5 + $0x80] sm:$0xff]  ;;  %v223_v57 = vld [vmem:[%s856_s5 + $0x88] sm:$0xff] }
  0x16   : > { %311 = vadd.xlane.f32.xlu1 %v310_v33  ;;  %v316_v48 = vadd.f32 %v915_v36, %v913_v35  ;;  %v953_v54 = vadd.f32 %v252_v44, %v220_v45  ;;  %v955_v55 = vadd.f32 %v253_v47, %v221_v46  ;;  %v224_v59 = vld [vmem:[%s856_s5 + $0x90] sm:$0xff]  ;;  %v225_v60 = vld [vmem:[%s856_s5 + $0x98] sm:$0xff]  ;;  %v969_v63 = vadd.f32 %v254_v51, %v222_v56  ;;  %v226_v1 = vld [vmem:[%s856_s5 + $0xa0] sm:$0xff] }
  0x17   : > { %v319_v53 = vadd.f32 %v927_v41, %v925_v40  ;;  %v322_v62 = vadd.f32 %v943_v50, %v941_v49  ;;  %v971_v0 = vadd.f32 %v255_v52, %v223_v57  ;;  %v258_v2 = vld [vmem:[%s1380_s1 + $0xa0] sm:$0xff]  ;;  %v979_v4 = vadd.f32 %v256_v58, %v224_v59  ;;  %v227_v6 = vld [vmem:[%s856_s5 + $0xa8] sm:$0xff]  ;;  %v228_v8 = vld [vmem:[%s856_s5 + $0xb0] sm:$0xff] }
  0x18   : > { %v325_v3 = vadd.f32 %v955_v55, %v953_v54  ;;  %v981_v5 = vadd.f32 %v257_v61, %v225_v60  ;;  %v259_v7 = vld [vmem:[%s1380_s1 + $0xa8] sm:$0xff]  ;;  %v229_v9 = vld [vmem:[%s856_s5 + $0xb8] sm:$0xff]  ;;  %v260_v10 = vld [vmem:[%s1380_s1 + $0xb0] sm:$0xff]  ;;  %v997_v15 = vadd.f32 %v258_v2, %v226_v1 }
  0x19   : > { %308 = vadd.xlane.f32.xlu0 %v307_v34  ;;  %v261_v11 = vld [vmem:[%s1380_s1 + $0xb8] sm:$0xff]  ;;  %v328_v12 = vadd.f32 %v971_v0, %v969_v63  ;;  %v999_v17 = vadd.f32 %v259_v7, %v227_v6  ;;  %v230_v18 = vld [vmem:[%s856_s5 + $0xc0] sm:$0xff]  ;;  %v231_v19 = vld [vmem:[%s856_s5 + $0xc8] sm:$0xff]  ;;  %v1005_v24 = vadd.f32 %v260_v10, %v228_v8 }
  0x1a   : > { %314 = vadd.xlane.f32.xlu1 %v313_v39  ;;  %v331_v20 = vadd.f32 %v981_v5, %v979_v4  ;;  %v1007_v25 = vadd.f32 %v261_v11, %v229_v9  ;;  %v262_v26 = vld [vmem:[%s1380_s1 + $0xc0] sm:$0xff]  ;;  %v263_v27 = vld [vmem:[%s1380_s1 + $0xc8] sm:$0xff]  ;;  %v232_v30 = vld [vmem:[%s856_s5 + $0xd0] sm:$0xff] }
  0x1b   : > { %v233_v31 = vld [vmem:[%s856_s5 + $0xd8] sm:$0xff]  ;;  %v264_v32 = vld [vmem:[%s1380_s1 + $0xd0] sm:$0xff]  ;;  %v334_v34 = vadd.f32 %v999_v17, %v997_v15  ;;  %v1025_v37 = vadd.f32 %v262_v26, %v230_v18  ;;  %v1027_v38 = vadd.f32 %v263_v27, %v231_v19  ;;  %v234_v39 = vld [vmem:[%s856_s5 + $0xe0] sm:$0xff] }
  0x1c   : > { %v265_v33 = vld [vmem:[%s1380_s1 + $0xd8] sm:$0xff]  ;;  %v235_v42 = vld [vmem:[%s856_s5 + $0xe8] sm:$0xff]  ;;  %v337_v43 = vadd.f32 %v1007_v25, %v1005_v24  ;;  %v1033_v44 = vadd.f32 %v264_v32, %v232_v30  ;;  %v266_v46 = vld [vmem:[%s1380_s1 + $0xe0] sm:$0xff] }
  0x1d   : > { %317 = vadd.xlane.f32.xlu0 %v316_v48  ;;  %v1035_v45 = vadd.f32 %v265_v33, %v233_v31  ;;  %v267_v47 = vld [vmem:[%s1380_s1 + $0xe8] sm:$0xff]  ;;  %v236_v48 = vld [vmem:[%s856_s5 + $0xf0] sm:$0xff]  ;;  %v237_v51 = vld [vmem:[%s856_s5 + $0xf8] sm:$0xff]  ;;  %v340_v56 = vadd.f32 %v1027_v38, %v1025_v37  ;;  %v1053_v57 = vadd.f32 %v266_v46, %v234_v39 }
  0x1e   : > { %320 = vadd.xlane.f32.xlu1 %v319_v53  ;;  %v268_v52 = vld [vmem:[%s1380_s1 + $0xf0] sm:$0xff]  ;;  %v269_v53 = vld [vmem:[%s1380_s1 + $0xf8] sm:$0xff]  ;;  %v1055_v58 = vadd.f32 %v267_v47, %v235_v42 }
  0x1f   : > { %v343_v59 = vadd.f32 %v1035_v45, %v1033_v44  ;;  %v1059_v60 = vadd.f32 %v268_v52, %v236_v48  ;;  %v1061_v61 = vadd.f32 %v269_v53, %v237_v51 }
  0x21   : > { %323 = vadd.xlane.f32.xlu0 %v322_v62  ;;  %v346_v62 = vadd.f32 %v1055_v58, %v1053_v57  ;;  %v349_v1 = vadd.f32 %v1061_v61, %v1059_v60 }
  0x22   : > { %326 = vadd.xlane.f32.xlu1 %v325_v3 }
  0x25   : > { %329 = vadd.xlane.f32.xlu0 %v328_v12 }
  0x26   : > { %332 = vadd.xlane.f32.xlu1 %v331_v20 }
  0x29   : > { %335 = vadd.xlane.f32.xlu0 %v334_v34 }
  0x2a   : > { %338 = vadd.xlane.f32.xlu1 %v337_v43 }
  0x2d   : > { %341 = vadd.xlane.f32.xlu0 %v340_v56 }
  0x2e   : > { %344 = vadd.xlane.f32.xlu1 %v343_v59 }
  0x31   : > { %347 = vadd.xlane.f32.xlu0 %v346_v62 }
  0x32   : > { %350 = vadd.xlane.f32.xlu1 %v349_v1 }
  0xa2   : > { %v306_v2 = vpop.xlane.xlu0 %305 }
  0xa3   : > { %v353_v3 = vmul.f32 0.00390625, %v306_v2  ;;  %v312_v6 = vpop.xlane.xlu1 %311 }
  0xa4   : > { %v355_v7 = vmul.f32 0.00390625, %v312_v6 }
  0xa5   : > { %v1068_v8 = vsub.f32 %v876_v13, %v353_v3  ;;  %v1071_v9 = vsub.f32 %v878_v14, %v353_v3 }
  0xa6   : > { %v1074_v10 = vsub.f32 %v881_v16, %v355_v7  ;;  %v1077_v11 = vsub.f32 %v891_v21, %v355_v7  ;;  %v309_v12 = vpop.xlane.xlu0 %308 }
  0xa7   : > { %v354_v18 = vmul.f32 0.00390625, %v309_v12  ;;  %v315_v19 = vpop.xlane.xlu1 %314  ;;  %v401_v20 = vmul.f32 %v1068_v8, %v1068_v8  ;;  %v402_v26 = vmul.f32 %v1071_v9, %v1071_v9 }
  0xa8   : > { %v356_v13 = vmul.f32 0.00390625, %v315_v19  ;;  %v405_v14 = vmul.f32 %v1074_v10, %v1074_v10  ;;  %v406_v16 = vmul.f32 %v1077_v11, %v1077_v11 }
  0xa9   : > { %v1088_v27 = vsub.f32 %v893_v22, %v354_v18  ;;  %v1091_v21 = vsub.f32 %v895_v23, %v354_v18  ;;  %v433_v30 = vadd.f32 %v402_v26, %v401_v20 }
  0xaa   : > { %v1094_v31 = vsub.f32 %v902_v28, %v356_v13  ;;  %v1097_v32 = vsub.f32 %v904_v29, %v356_v13  ;;  %v318_v33 = vpop.xlane.xlu0 %317  ;;  %v439_v42 = vadd.f32 %v406_v16, %v405_v14 }
  0xab   : > { %v357_v34 = vmul.f32 0.00390625, %v318_v33  ;;  %434 = vadd.xlane.f32.xlu0 %v433_v30  ;;  %v321_v39 = vpop.xlane.xlu1 %320  ;;  %v403_v43 = vmul.f32 %v1088_v27, %v1088_v27  ;;  %v404_v22 = vmul.f32 %v1091_v21, %v1091_v21 }
  0xac   : > { %v358_v23 = vmul.f32 0.00390625, %v321_v39  ;;  %v407_v46 = vmul.f32 %v1094_v31, %v1094_v31  ;;  %v408_v28 = vmul.f32 %v1097_v32, %v1097_v32 }
  0xad   : > { %v1108_v29 = vsub.f32 %v913_v35, %v357_v34  ;;  %v1111_v47 = vsub.f32 %v915_v36, %v357_v34  ;;  %v436_v48 = vadd.f32 %v404_v22, %v403_v43 }
  0xae   : > { %v1114_v51 = vsub.f32 %v925_v40, %v358_v23  ;;  %v1117_v52 = vsub.f32 %v927_v41, %v358_v23  ;;  %v324_v53 = vpop.xlane.xlu0 %323  ;;  %v442_v62 = vadd.f32 %v408_v28, %v407_v46 }
  0xaf   : > { %v359_v56 = vmul.f32 0.00390625, %v324_v53  ;;  %440 = vadd.xlane.f32.xlu0 %v439_v42  ;;  %437 = vadd.xlane.f32.xlu1 %v436_v48  ;;  %v327_v59 = vpop.xlane.xlu1 %326  ;;  %v409_v35 = vmul.f32 %v1108_v29, %v1108_v29  ;;  %v410_v36 = vmul.f32 %v1111_v47, %v1111_v47 }
  0xb0   : > { %v360_v1 = vmul.f32 0.00390625, %v327_v59  ;;  %v411_v40 = vmul.f32 %v1114_v51, %v1114_v51  ;;  %v412_v41 = vmul.f32 %v1117_v52, %v1117_v52 }
  0xb1   : > { %v1128_v2 = vsub.f32 %v941_v49, %v359_v56  ;;  %v1131_v3 = vsub.f32 %v943_v50, %v359_v56  ;;  %v445_v6 = vadd.f32 %v410_v36, %v409_v35 }
  0xb2   : > { %v1134_v7 = vsub.f32 %v953_v54, %v360_v1  ;;  %v1137_v12 = vsub.f32 %v955_v55, %v360_v1  ;;  %v330_v18 = vpop.xlane.xlu0 %329  ;;  %v448_v26 = vadd.f32 %v412_v41, %v411_v40 }
  0xb3   : > { %v361_v19 = vmul.f32 0.00390625, %v330_v18  ;;  %443 = vadd.xlane.f32.xlu1 %v442_v62  ;;  %446 = vadd.xlane.f32.xlu0 %v445_v6  ;;  %v333_v20 = vpop.xlane.xlu1 %332  ;;  %v413_v49 = vmul.f32 %v1128_v2, %v1128_v2  ;;  %v414_v50 = vmul.f32 %v1131_v3, %v1131_v3 }
  0xb4   : > { %v362_v13 = vmul.f32 0.00390625, %v333_v20  ;;  %v415_v54 = vmul.f32 %v1134_v7, %v1134_v7  ;;  %v416_v55 = vmul.f32 %v1137_v12, %v1137_v12 }
  0xb5   : > { %v1148_v14 = vsub.f32 %v969_v63, %v361_v19  ;;  %v1151_v16 = vsub.f32 %v971_v0, %v361_v19  ;;  %v451_v30 = vadd.f32 %v414_v50, %v413_v49 }
  0xb6   : > { %v1154_v33 = vsub.f32 %v979_v4, %v362_v13  ;;  %v1157_v34 = vsub.f32 %v981_v5, %v362_v13  ;;  %v336_v39 = vpop.xlane.xlu0 %335  ;;  %v454_v22 = vadd.f32 %v416_v55, %v415_v54 }
  0xb7   : > { %v363_v42 = vmul.f32 0.00390625, %v336_v39  ;;  %449 = vadd.xlane.f32.xlu1 %v448_v26  ;;  %452 = vadd.xlane.f32.xlu0 %v451_v30  ;;  %v339_v43 = vpop.xlane.xlu1 %338  ;;  %v417_v63 = vmul.f32 %v1148_v14, %v1148_v14  ;;  %v418_v0 = vmul.f32 %v1151_v16, %v1151_v16 }
  0xb8   : > { %v364_v23 = vmul.f32 0.00390625, %v339_v43  ;;  %v419_v4 = vmul.f32 %v1154_v33, %v1154_v33  ;;  %v420_v5 = vmul.f32 %v1157_v34, %v1157_v34 }
  0xb9   : > { %v1168_v46 = vsub.f32 %v997_v15, %v363_v42  ;;  %v1171_v28 = vsub.f32 %v999_v17, %v363_v42  ;;  %v457_v48 = vadd.f32 %v418_v0, %v417_v63 }
  0xba   : > { %v1174_v53 = vsub.f32 %v1005_v24, %v364_v23  ;;  %v1177_v56 = vsub.f32 %v1007_v25, %v364_v23  ;;  %v342_v59 = vpop.xlane.xlu0 %341  ;;  %v460_v36 = vadd.f32 %v420_v5, %v419_v4  ;;  %v562_v4 = vlaneseq }
  0xbb   : > { %v365_v62 = vmul.f32 0.00390625, %v342_v59  ;;  %455 = vadd.xlane.f32.xlu1 %v454_v22  ;;  %458 = vadd.xlane.f32.xlu0 %v457_v48  ;;  %v345_v35 = vpop.xlane.xlu1 %344  ;;  %v421_v15 = vmul.f32 %v1168_v46, %v1168_v46  ;;  %v422_v17 = vmul.f32 %v1171_v28, %v1171_v28 }
  0xbc   : > { %v366_v1 = vmul.f32 0.00390625, %v345_v35  ;;  %v423_v24 = vmul.f32 %v1174_v53, %v1174_v53  ;;  %v424_v25 = vmul.f32 %v1177_v56, %v1177_v56 }
  0xbd   : > { %v1188_v40 = vsub.f32 %v1025_v37, %v365_v62  ;;  %v1191_v41 = vsub.f32 %v1027_v38, %v365_v62  ;;  %v463_v6 = vadd.f32 %v422_v17, %v421_v15 }
  0xbe   : > { %v1194_v18 = vsub.f32 %v1033_v44, %v366_v1  ;;  %v1197_v19 = vsub.f32 %v1035_v45, %v366_v1  ;;  %v348_v20 = vpop.xlane.xlu0 %347  ;;  %v466_v50 = vadd.f32 %v424_v25, %v423_v24 }
  0xbf   : > { %v367_v26 = vmul.f32 0.00390625, %v348_v20  ;;  %461 = vadd.xlane.f32.xlu1 %v460_v36  ;;  %464 = vadd.xlane.f32.xlu0 %v463_v6  ;;  %v351_v49 = vpop.xlane.xlu1 %350  ;;  %v425_v37 = vmul.f32 %v1188_v40, %v1188_v40  ;;  %v426_v38 = vmul.f32 %v1191_v41, %v1191_v41  ;;  %v563_v36 = vshrl.u32 %v562_v4, 7 }
  0xc0   : > { %v368_v13 = vmul.f32 0.00390625, %v351_v49  ;;  %v427_v44 = vmul.f32 %v1194_v18, %v1194_v18  ;;  %v428_v45 = vmul.f32 %v1197_v19, %v1197_v19  ;;  %v302_v49 = vld [vmem:[%s1381_s2] sm:$0x3] }
  0xc1   : > { %v1208_v54 = vsub.f32 %v1053_v57, %v367_v26  ;;  %v1211_v55 = vsub.f32 %v1055_v58, %v367_v26  ;;  %v469_v30 = vadd.f32 %v426_v38, %v425_v37  ;;  %v564_v20 = vsub.s32 0, %v563_v36 }
  0xc2   : > { %v1214_v39 = vsub.f32 %v1059_v60, %v368_v13  ;;  %v1217_v42 = vsub.f32 %v1061_v61, %v368_v13  ;;  %v472_v43 = vadd.f32 %v428_v45, %v427_v44  ;;  %v568_v26 = vsub.s32 1, %v563_v36  ;;  %v303_v44 = vld [vmem:[%s1382_s3] sm:$0x3] }
  0xc3   : > { %467 = vadd.xlane.f32.xlu1 %v466_v50  ;;  %470 = vadd.xlane.f32.xlu0 %v469_v30  ;;  %v429_v22 = vmul.f32 %v1208_v54, %v1208_v54  ;;  %v430_v57 = vmul.f32 %v1211_v55, %v1211_v55 }
  0xc4   : > { %v431_v58 = vmul.f32 %v1214_v39, %v1214_v39  ;;  %v432_v63 = vmul.f32 %v1217_v42, %v1217_v42 }
  0xc5   : > { %v475_v60 = vadd.f32 %v430_v57, %v429_v22  ;;  %v1235_v22 = vrot.slane %v302_v49, %v568_v26 }
  0xc6   : > { %v478_v61 = vadd.f32 %v432_v63, %v431_v58 }
  0xc7   : > { %473 = vadd.xlane.f32.xlu1 %v472_v43  ;;  %476 = vadd.xlane.f32.xlu0 %v475_v60  ;;  %v1233_v43 = vrot.slane %v302_v49, %v564_v20  ;;  %v1237_v60 = vrot.slane %v303_v44, %v564_v20 }
  0xcb   : > { %479 = vadd.xlane.f32.xlu1 %v478_v61  ;;  %v1239_v61 = vrot.slane %v303_v44, %v568_v26 }
 0x138   : > { %v435_v0 = vpop.xlane.xlu0 %434 }
 0x139   : > { %v481_v23 = vmul.f32 0.00390625, %v435_v0 }
 0x13b   : > { %v497_v5 = vadd.f32 1e-12, %v481_v23 }
 0x13c   : > { %v438_v48 = vpop.xlane.xlu1 %437  ;;  %v441_v59 = vpop.xlane.xlu0 %440 }
 0x13d   : > { %760 = vrsqrt.f32 %v497_v5  ;;  %v482_v62 = vmul.f32 0.00390625, %v438_v48  ;;  %v483_v35 = vmul.f32 0.00390625, %v441_v59 }
 0x13f   : > { %v498_v15 = vadd.f32 1e-12, %v482_v62  ;;  %v499_v17 = vadd.f32 1e-12, %v483_v35 }
 0x140   : > { %v444_v1 = vpop.xlane.xlu1 %443  ;;  %v447_v24 = vpop.xlane.xlu0 %446 }
 0x141   : > { %762 = vrsqrt.f32 %v498_v15  ;;  %v484_v25 = vmul.f32 0.00390625, %v444_v1  ;;  %v485_v6 = vmul.f32 0.00390625, %v447_v24 }
 0x142   : > { %764 = vrsqrt.f32 %v499_v17 }
 0x143   : > { %v500_v50 = vadd.f32 1e-12, %v484_v25  ;;  %v501_v37 = vadd.f32 1e-12, %v485_v6 }
 0x144   : > { %v450_v38 = vpop.xlane.xlu1 %449  ;;  %v453_v13 = vpop.xlane.xlu0 %452 }
 0x145   : > { %766 = vrsqrt.f32 %v500_v50  ;;  %v486_v45 = vmul.f32 0.00390625, %v450_v38  ;;  %v487_v30 = vmul.f32 0.00390625, %v453_v13 }
 0x146   : > { %768 = vrsqrt.f32 %v501_v37 }
 0x147   : > { %v761_v57 = vpop.eup %760  ;;  %v502_v58 = vadd.f32 1e-12, %v486_v45  ;;  %v503_v63 = vadd.f32 1e-12, %v487_v30 }
 0x148   : > { %v529_v0 = vmul.f32 %v761_v57, %v1068_v8  ;;  %v530_v23 = vmul.f32 %v761_v57, %v1071_v9  ;;  %v456_v4 = vpop.xlane.xlu1 %455  ;;  %v459_v5 = vpop.xlane.xlu0 %458 }
 0x149   : > { %770 = vrsqrt.f32 %v502_v58  ;;  %v488_v48 = vmul.f32 0.00390625, %v456_v4  ;;  %v489_v59 = vmul.f32 0.00390625, %v459_v5 }
 0x14a   : > { %v572_v62 = vmul.f32 %v1233_v43, %v529_v0  ;;  %v573_v35 = vmul.f32 %v1235_v22, %v530_v23  ;;  %772 = vrsqrt.f32 %v503_v63 }
 0x14b   : > { %v763_v36 = vpop.eup %762  ;;  %v504_v8 = vadd.f32 1e-12, %v488_v48  ;;  %v505_v9 = vadd.f32 1e-12, %v489_v59 }
 0x14c   : > { %v765_v15 = vpop.eup %764  ;;  %v615_v17 = vadd.f32 %v1237_v60, %v572_v62  ;;  %v616_v1 = vadd.f32 %v1239_v61, %v573_v35  ;;  %v531_v24 = vmul.f32 %v763_v36, %v1088_v27  ;;  %v532_v25 = vmul.f32 %v763_v36, %v1091_v21  ;;  %v462_v6 = vpop.xlane.xlu1 %461 }
 0x14d   : > { %v465_v20 = vpop.xlane.xlu0 %464  ;;  %v533_v26 = vmul.f32 %v765_v15, %v1074_v10  ;;  %v534_v49 = vmul.f32 %v765_v15, %v1077_v11  ;;  %774 = vrsqrt.f32 %v504_v8  ;;  %v490_v50 = vmul.f32 0.00390625, %v462_v6 }
 0x14e   : > { %647 = vst [vmem:[%s1250_s24] sm:$0xff] %v615_v17  ;;  %648 = vst [vmem:[%s1250_s24 + $0x8] sm:$0xff] %v616_v1  ;;  %v574_v37 = vmul.f32 %v1233_v43, %v531_v24  ;;  %v575_v38 = vmul.f32 %v1235_v22, %v532_v25  ;;  %776 = vrsqrt.f32 %v505_v9  ;;  %v491_v13 = vmul.f32 0.00390625, %v465_v20 }
 0x14f   : > { %v767_v27 = vpop.eup %766  ;;  %v576_v21 = vmul.f32 %v1233_v43, %v533_v26  ;;  %v577_v44 = vmul.f32 %v1235_v22, %v534_v49  ;;  %v506_v10 = vadd.f32 1e-12, %v490_v50 }
 0x150   : > { %v769_v45 = vpop.eup %768  ;;  %v617_v11 = vadd.f32 %v1237_v60, %v574_v37  ;;  %v618_v30 = vadd.f32 %v1239_v61, %v575_v38  ;;  %v535_v57 = vmul.f32 %v767_v27, %v1094_v31  ;;  %v536_v58 = vmul.f32 %v767_v27, %v1097_v32  ;;  %v468_v63 = vpop.xlane.xlu1 %467 }
 0x151   : > { %v471_v0 = vpop.xlane.xlu0 %470  ;;  %v619_v23 = vadd.f32 %v1237_v60, %v576_v21  ;;  %v620_v4 = vadd.f32 %v1239_v61, %v577_v44  ;;  %v537_v5 = vmul.f32 %v769_v45, %v1108_v29  ;;  %v538_v48 = vmul.f32 %v769_v45, %v1111_v47 }
 0x152   : > { %649 = vst [vmem:[%s1250_s24 + $0x10] sm:$0xff] %v617_v11  ;;  %650 = vst [vmem:[%s1250_s24 + $0x18] sm:$0xff] %v618_v30  ;;  %v578_v59 = vmul.f32 %v1233_v43, %v535_v57  ;;  %v579_v62 = vmul.f32 %v1235_v22, %v536_v58  ;;  %778 = vrsqrt.f32 %v506_v10  ;;  %v507_v31 = vadd.f32 1e-12, %v491_v13 }
 0x153   : > { %v771_v35 = vpop.eup %770  ;;  %651 = vst [vmem:[%s1250_s24 + $0x20] sm:$0xff] %v619_v23  ;;  %652 = vst [vmem:[%s1250_s24 + $0x28] sm:$0xff] %v620_v4  ;;  %v580_v32 = vmul.f32 %v1233_v43, %v537_v5  ;;  %v581_v36 = vmul.f32 %v1235_v22, %v538_v48  ;;  %v492_v29 = vmul.f32 0.00390625, %v468_v63  ;;  %v493_v8 = vmul.f32 0.00390625, %v471_v0 }
 0x154   : > { %v773_v47 = vpop.eup %772  ;;  %v621_v9 = vadd.f32 %v1237_v60, %v578_v59  ;;  %v622_v15 = vadd.f32 %v1239_v61, %v579_v62  ;;  %v539_v17 = vmul.f32 %v771_v35, %v1114_v51  ;;  %v540_v1 = vmul.f32 %v771_v35, %v1117_v52  ;;  %v474_v24 = vpop.xlane.xlu1 %473 }
 0x155   : > { %v623_v25 = vadd.f32 %v1237_v60, %v580_v32  ;;  %v624_v6 = vadd.f32 %v1239_v61, %v581_v36  ;;  %v541_v20 = vmul.f32 %v773_v47, %v1128_v2  ;;  %v542_v26 = vmul.f32 %v773_v47, %v1131_v3  ;;  %v477_v45 = vpop.xlane.xlu0 %476 }
 0x156   : > { %653 = vst [vmem:[%s1250_s24 + $0x30] sm:$0xff] %v621_v9  ;;  %654 = vst [vmem:[%s1250_s24 + $0x38] sm:$0xff] %v622_v15  ;;  %v582_v49 = vmul.f32 %v1233_v43, %v539_v17  ;;  %v583_v50 = vmul.f32 %v1235_v22, %v540_v1  ;;  %780 = vrsqrt.f32 %v507_v31  ;;  %v508_v37 = vadd.f32 1e-12, %v492_v29 }
 0x157   : > { %v775_v51 = vpop.eup %774  ;;  %655 = vst [vmem:[%s1250_s24 + $0x40] sm:$0xff] %v623_v25  ;;  %656 = vst [vmem:[%s1250_s24 + $0x48] sm:$0xff] %v624_v6  ;;  %v584_v52 = vmul.f32 %v1233_v43, %v541_v20  ;;  %v585_v38 = vmul.f32 %v1235_v22, %v542_v26  ;;  %v509_v2 = vadd.f32 1e-12, %v493_v8  ;;  %v494_v13 = vmul.f32 0.00390625, %v474_v24 }
 0x158   : > { %v777_v3 = vpop.eup %776  ;;  %v625_v27 = vadd.f32 %v1237_v60, %v582_v49  ;;  %v626_v21 = vadd.f32 %v1239_v61, %v583_v50  ;;  %v543_v44 = vmul.f32 %v775_v51, %v1134_v7  ;;  %v544_v10 = vmul.f32 %v775_v51, %v1137_v12  ;;  %v480_v63 = vpop.xlane.xlu1 %479 }
 0x159   : > { %v627_v11 = vadd.f32 %v1237_v60, %v584_v52  ;;  %v628_v30 = vadd.f32 %v1239_v61, %v585_v38  ;;  %v545_v57 = vmul.f32 %v777_v3, %v1148_v14  ;;  %v546_v58 = vmul.f32 %v777_v3, %v1151_v16 }
 0x15a   : > { %657 = vst [vmem:[%s1250_s24 + $0x50] sm:$0xff] %v625_v27  ;;  %658 = vst [vmem:[%s1250_s24 + $0x58] sm:$0xff] %v626_v21  ;;  %v586_v0 = vmul.f32 %v1233_v43, %v543_v44  ;;  %v587_v23 = vmul.f32 %v1235_v22, %v544_v10  ;;  %782 = vrsqrt.f32 %v508_v37  ;;  %v510_v7 = vadd.f32 1e-12, %v494_v13 }
 0x15b   : > { %659 = vst [vmem:[%s1250_s24 + $0x60] sm:$0xff] %v627_v11  ;;  %660 = vst [vmem:[%s1250_s24 + $0x68] sm:$0xff] %v628_v30  ;;  %v588_v12 = vmul.f32 %v1233_v43, %v545_v57  ;;  %v589_v4 = vmul.f32 %v1235_v22, %v546_v58  ;;  %784 = vrsqrt.f32 %v509_v2  ;;  %v495_v14 = vmul.f32 0.00390625, %v477_v45 }
 0x15c   : > { %v779_v16 = vpop.eup %778  ;;  %v629_v5 = vadd.f32 %v1237_v60, %v586_v0  ;;  %v630_v48 = vadd.f32 %v1239_v61, %v587_v23  ;;  %786 = vrsqrt.f32 %v510_v7  ;;  %v496_v59 = vmul.f32 0.00390625, %v480_v63 }
 0x15d   : > { %v631_v62 = vadd.f32 %v1237_v60, %v588_v12  ;;  %v632_v31 = vadd.f32 %v1239_v61, %v589_v4  ;;  %v547_v35 = vmul.f32 %v779_v16, %v1154_v33  ;;  %v548_v32 = vmul.f32 %v779_v16, %v1157_v34 }
 0x15e   : > { %661 = vst [vmem:[%s1250_s24 + $0x70] sm:$0xff] %v629_v5  ;;  %662 = vst [vmem:[%s1250_s24 + $0x78] sm:$0xff] %v630_v48  ;;  %v511_v36 = vadd.f32 1e-12, %v495_v14  ;;  %v512_v29 = vadd.f32 1e-12, %v496_v59 }
 0x15f   : > { %663 = vst [vmem:[%s1250_s24 + $0x80] sm:$0xff] %v631_v62  ;;  %664 = vst [vmem:[%s1250_s24 + $0x88] sm:$0xff] %v632_v31  ;;  %v590_v8 = vmul.f32 %v1233_v43, %v547_v35  ;;  %v591_v47 = vmul.f32 %v1235_v22, %v548_v32 }
 0x160   : > { %v781_v9 = vpop.eup %780  ;;  %788 = vrsqrt.f32 %v511_v36 }
 0x161   : > { %v633_v15 = vadd.f32 %v1237_v60, %v590_v8  ;;  %v634_v33 = vadd.f32 %v1239_v61, %v591_v47  ;;  %v549_v34 = vmul.f32 %v781_v9, %v1168_v46  ;;  %v550_v17 = vmul.f32 %v781_v9, %v1171_v28 }
 0x162   : > { %790 = vrsqrt.f32 %v512_v29 }
 0x163   : > { %665 = vst [vmem:[%s1250_s24 + $0x90] sm:$0xff] %v633_v15  ;;  %666 = vst [vmem:[%s1250_s24 + $0x98] sm:$0xff] %v634_v33  ;;  %v592_v1 = vmul.f32 %v1233_v43, %v549_v34  ;;  %v593_v24 = vmul.f32 %v1235_v22, %v550_v17 }
 0x164   : > { %v783_v25 = vpop.eup %782 }
 0x165   : > { %v785_v6 = vpop.eup %784  ;;  %v635_v20 = vadd.f32 %v1237_v60, %v592_v1  ;;  %v636_v26 = vadd.f32 %v1239_v61, %v593_v24  ;;  %v551_v49 = vmul.f32 %v783_v25, %v1174_v53  ;;  %v552_v46 = vmul.f32 %v783_v25, %v1177_v56 }
 0x166   : > { %v787_v50 = vpop.eup %786  ;;  %v553_v28 = vmul.f32 %v785_v6, %v1188_v40  ;;  %v554_v37 = vmul.f32 %v785_v6, %v1191_v41 }
 0x167   : > { %667 = vst [vmem:[%s1250_s24 + $0xa0] sm:$0xff] %v635_v20  ;;  %668 = vst [vmem:[%s1250_s24 + $0xa8] sm:$0xff] %v636_v26  ;;  %v594_v51 = vmul.f32 %v1233_v43, %v551_v49  ;;  %v595_v52 = vmul.f32 %v1235_v22, %v552_v46  ;;  %v555_v38 = vmul.f32 %v787_v50, %v1194_v18 }
 0x168   : > { %v556_v2 = vmul.f32 %v787_v50, %v1197_v19  ;;  %v596_v53 = vmul.f32 %v1233_v43, %v553_v28  ;;  %v597_v56 = vmul.f32 %v1235_v22, %v554_v37 }
 0x169   : > { %v637_v40 = vadd.f32 %v1237_v60, %v594_v51  ;;  %v638_v41 = vadd.f32 %v1239_v61, %v595_v52  ;;  %v598_v13 = vmul.f32 %v1233_v43, %v555_v38 }
 0x16a   : > { %v599_v3 = vmul.f32 %v1235_v22, %v556_v2  ;;  %v789_v27 = vpop.eup %788  ;;  %v639_v18 = vadd.f32 %v1237_v60, %v596_v53  ;;  %v640_v19 = vadd.f32 %v1239_v61, %v597_v56 }
 0x16b   : > { %669 = vst [vmem:[%s1250_s24 + $0xb0] sm:$0xff] %v637_v40  ;;  %670 = vst [vmem:[%s1250_s24 + $0xb8] sm:$0xff] %v638_v41  ;;  %v641_v21 = vadd.f32 %v1237_v60, %v598_v13  ;;  %v557_v10 = vmul.f32 %v789_v27, %v1208_v54  ;;  %v558_v45 = vmul.f32 %v789_v27, %v1211_v55 }
 0x16c   : > { %v642_v44 = vadd.f32 %v1239_v61, %v599_v3  ;;  %v791_v11 = vpop.eup %790  ;;  %671 = vst [vmem:[%s1250_s24 + $0xc0] sm:$0xff] %v639_v18  ;;  %672 = vst [vmem:[%s1250_s24 + $0xc8] sm:$0xff] %v640_v19 }
 0x16d   : > { %673 = vst [vmem:[%s1250_s24 + $0xd0] sm:$0xff] %v641_v21  ;;  %v600_v30 = vmul.f32 %v1233_v43, %v557_v10  ;;  %v601_v57 = vmul.f32 %v1235_v22, %v558_v45  ;;  %v559_v58 = vmul.f32 %v791_v11, %v1214_v39  ;;  %v560_v63 = vmul.f32 %v791_v11, %v1217_v42 }
 0x16e   : > { %674 = vst [vmem:[%s1250_s24 + $0xd8] sm:$0xff] %v642_v44 }
 0x16f   : > { %v643_v54 = vadd.f32 %v1237_v60, %v600_v30  ;;  %v644_v0 = vadd.f32 %v1239_v61, %v601_v57  ;;  %v602_v55 = vmul.f32 %v1233_v43, %v559_v58  ;;  %v603_v23 = vmul.f32 %v1235_v22, %v560_v63 }
 0x171   : > { %675 = vst [vmem:[%s1250_s24 + $0xe0] sm:$0xff] %v643_v54  ;;  %676 = vst [vmem:[%s1250_s24 + $0xe8] sm:$0xff] %v644_v0  ;;  %v645_v7 = vadd.f32 %v1237_v60, %v602_v55  ;;  %v646_v12 = vadd.f32 %v1239_v61, %v603_v23 }
 0x173   : > { %677 = vst [vmem:[%s1250_s24 + $0xf0] sm:$0xff] %v645_v7  ;;  %678 = vst [vmem:[%s1250_s24 + $0xf8] sm:$0xff] %v646_v12 }
 0x174 PF: > { %s14_s15 = sadd.s32 1, %s798_s15  }
 0x175   : > { %p11_p4 = scmp.ge.s32.totalorder %s14_s15, 4  }
 0x177   :  { %13 = sbr.rel (!%p11_p4) target bundleno = 1 (0x1), region = 66 }

// kernel: camembert_classifier_forward.11
= control target key start
LH: loop header
LB: loop body
LE: loop exit
PB: predicated region body
PF: predicated region fallthrough
CT: control target
= control target key end

     0   :  { %s1122_s12 = smov 0   ;;  %s2046_s0 = inlined_call_operand.vmem [shape: f32[256,256], index: 0, kind: input, shape index: {}]   ;;  %s2047_s1 = inlined_call_operand.vmem [shape: f32[256,768], index: 1, kind: input, shape index: {}]   ;;  %s2048_s2 = inlined_call_operand.vmem [shape: f32[1,768], index: 2, kind: input, shape index: {}]   ;;  %s2049_s3 = inlined_call_operand.vmem [shape: f32[256,768], index: 3, kind: output, shape index: {}]  }
   0x1 LB: > { %s1040_s13 = sadd.s32 4294967295, %s1100_s12   ;;  %p1044_p0 = scmp.ge.s32.totalorder %s1100_s12, 1  ;;  %s1100_s12 = sphi %s1122_s12, %s13_s12  }
   0x2   : > { %p139_p1 = scmp.lt.s32.totalorder %s1100_s12, 3 }
   0x4   : > { %p140_p2 = pnand %p1044_p0, %p139_p1 }
   0x5   : > { %v212_v0 = vld [vmem:[%s2047_s1 + $0x8] sm:$0xff] (!%p140_p2)  ;;  %v218_v1 = vld [vmem:[%s2047_s1 + $0x38] sm:$0xff] (!%p140_p2)  ;;  %v211_v5 = vld [vmem:[%s2047_s1] sm:$0xff] (!%p140_p2)  ;;  %s1045_s15 = sshll.u32 (!%p140_p2), %s1040_s13, 4 }
   0x6   : > { %143 = sbr.rel (%p140_p2) target bundleno = 379 (0x17b), region = 32  ;;  %v214_v2 = vld [vmem:[%s2047_s1 + $0x18] sm:$0xff] (!%p140_p2)  ;;  %v420_v3 = vpack.c.bf16 (!%p140_p2), %v218_v1, %v212_v0  ;;  %v220_v4 = vld [vmem:[%s2047_s1 + $0x48] sm:$0xff] (!%p140_p2)  ;;  %v217_v6 = vld [vmem:[%s2047_s1 + $0x30] sm:$0xff] (!%p140_p2)  ;;  %p166_p3 = scmp.lt.s32.totalorder (!%p140_p2), %s1045_s15, 31 }
   0x7   : > { %v422_v7 = vpack.c.bf16 (!%p140_p2), %v220_v4, %v214_v2  ;;  %v419_v8 = vpack.c.bf16 (!%p140_p2), %v217_v6, %v211_v5  ;;  %v213_v9 = vld [vmem:[%s2047_s1 + $0x10] sm:$0xff] (!%p140_p2)  ;;  %v219_v10 = vld [vmem:[%s2047_s1 + $0x40] sm:$0xff] (!%p140_p2)  ;;  %v224_v11 = vld [vmem:[%s2047_s1 + $0x68] sm:$0xff] (!%p140_p2) }
   0x8   : > { %547 = vmatprep.subr.bf16.mxu0 (!%p140_p2), %v420_v3  ;;  %v421_v12 = vpack.c.bf16 (!%p140_p2), %v219_v10, %v213_v9  ;;  %v230_v13 = vld [vmem:[%s2047_s1 + $0x98] sm:$0xff] (!%p140_p2)  ;;  %v232_v15 = vld [vmem:[%s2047_s1 + $0xa8] sm:$0xff] (!%p140_p2)  ;;  %v223_v18 = vld [vmem:[%s2047_s1 + $0x60] sm:$0xff] (!%p140_p2) }
   0x9   : > { %v226_v14 = vld [vmem:[%s2047_s1 + $0x78] sm:$0xff] (!%p140_p2)  ;;  %660 = vmatprep.subr.bf16.mxu1 (!%p140_p2), %v422_v7  ;;  %548 = vmatpush1.bf16.msra.mxu0 (!%p140_p2), %v419_v8  ;;  %v426_v16 = vpack.c.bf16 (!%p140_p2), %v230_v13, %v224_v11  ;;  %v229_v19 = vld [vmem:[%s2047_s1 + $0x90] sm:$0xff] (!%p140_p2)  ;;  %v231_v22 = vld [vmem:[%s2047_s1 + $0xa0] sm:$0xff] (!%p140_p2) }
   0xa   : > { %v428_v17 = vpack.c.bf16 (!%p140_p2), %v232_v15, %v226_v14  ;;  %v225_v20 = vld [vmem:[%s2047_s1 + $0x70] sm:$0xff] (!%p140_p2)  ;;  %661 = vmatpush1.bf16.msra.mxu1 (!%p140_p2), %v421_v12  ;;  %v425_v21 = vpack.c.bf16 (!%p140_p2), %v229_v19, %v223_v18  ;;  %v236_v23 = vld [vmem:[%s2047_s1 + $0xc8] sm:$0xff] (!%p140_p2)  ;;  %v242_v24 = vld [vmem:[%s2047_s1 + $0xf8] sm:$0xff] (!%p140_p2) }
   0xb   : > { %549 = vmatprep.subr.bf16.mxu0 (!%p140_p2), %v426_v16  ;;  %v427_v25 = vpack.c.bf16 (!%p140_p2), %v231_v22, %v225_v20  ;;  %v432_v26 = vpack.c.bf16 (!%p140_p2), %v242_v24, %v236_v23  ;;  %v238_v27 = vld [vmem:[%s2047_s1 + $0xd8] sm:$0xff] (!%p140_p2)  ;;  %v244_v28 = vld [vmem:[%s2047_s1 + $0x108] sm:$0xff] (!%p140_p2)  ;;  %v235_v29 = vld [vmem:[%s2047_s1 + $0xc0] sm:$0xff] (!%p140_p2) }
   0xc   : > { %662 = vmatprep.subr.bf16.mxu1 (!%p140_p2), %v428_v17  ;;  %v434_v30 = vpack.c.bf16 (!%p140_p2), %v244_v28, %v238_v27  ;;  %v241_v31 = vld [vmem:[%s2047_s1 + $0xf0] sm:$0xff] (!%p140_p2)  ;;  %v243_v33 = vld [vmem:[%s2047_s1 + $0x100] sm:$0xff] (!%p140_p2)  ;;  %v248_v35 = vld [vmem:[%s2047_s1 + $0x128] sm:$0xff] (!%p140_p2) }
   0xd   : > { %v237_v32 = vld [vmem:[%s2047_s1 + $0xd0] sm:$0xff]  ;;  %550 = vmatpush1.bf16.msra.mxu0 %v425_v21  ;;  %v431_v34 = vpack.c.bf16 %v241_v31, %v235_v29  ;;  %v254_v36 = vld [vmem:[%s2047_s1 + $0x158] sm:$0xff]  ;;  %v256_v40 = vld [vmem:[%s2047_s1 + $0x168] sm:$0xff]  ;;  %s2051_s15 = smov (!%p166_p3, %s1045_s15), 31 }
   0xe   : > { %v250_v37 = vld [vmem:[%s2047_s1 + $0x138] sm:$0xff]  ;;  %663 = vmatpush1.bf16.msra.mxu1 %v427_v25  ;;  %551 = vmatprep.subr.bf16.mxu0 %v432_v26  ;;  %v433_v38 = vpack.c.bf16 %v243_v33, %v237_v32  ;;  %v438_v39 = vpack.c.bf16 %v254_v36, %v248_v35  ;;  %v247_v41 = vld [vmem:[%s2047_s1 + $0x120] sm:$0xff]  ;;  %v253_v42 = vld [vmem:[%s2047_s1 + $0x150] sm:$0xff]  ;;  %s1052_s5 = sshll.u32 %s2051_s15, 4  ;;  %s1085_s9 = smul.u32 48, %s2051_s15 }
   0xf   : > { %664 = vmatprep.subr.bf16.mxu1 %v434_v30  ;;  %v440_v43 = vpack.c.bf16 %v256_v40, %v250_v37  ;;  %v249_v44 = vld [vmem:[%s2047_s1 + $0x130] sm:$0xff]  ;;  %v255_v45 = vld [vmem:[%s2047_s1 + $0x160] sm:$0xff]  ;;  %v260_v46 = vld [vmem:[%s2047_s1 + $0x188] sm:$0xff]  ;;  %v437_v50 = vpack.c.bf16 %v253_v42, %v247_v41  ;;  %s1415_s26 = scalar_lea.vmem %s2046_s0, %s1052_s5 }
  0x10   : > { %v266_v47 = vld [vmem:[%s2047_s1 + $0x1b8] sm:$0xff]  ;;  %v268_v49 = vld [vmem:[%s2047_s1 + $0x1c8] sm:$0xff]  ;;  %v439_v51 = vpack.c.bf16 %v255_v45, %v249_v44  ;;  %v259_v53 = vld [vmem:[%s2047_s1 + $0x180] sm:$0xff]  ;;  %s1841_s14 = scalar_lea.vmem %s2049_s3, %s1085_s9 }
  0x11   : > { %v262_v48 = vld [vmem:[%s2047_s1 + $0x198] sm:$0xff]  ;;  %552 = vmatpush1.bf16.msra.mxu0 %v431_v34  ;;  %v444_v52 = vpack.c.bf16 %v266_v47, %v260_v46  ;;  %v265_v54 = vld [vmem:[%s2047_s1 + $0x1b0] sm:$0xff]  ;;  %v267_v57 = vld [vmem:[%s2047_s1 + $0x1c0] sm:$0xff] }
  0x12   : > { %665 = vmatpush1.bf16.msra.mxu1 %v433_v38  ;;  %553 = vmatprep.subr.bf16.mxu0 %v438_v39  ;;  %v261_v55 = vld [vmem:[%s2047_s1 + $0x190] sm:$0xff]  ;;  %v446_v56 = vpack.c.bf16 %v268_v49, %v262_v48  ;;  %v272_v58 = vld [vmem:[%s2047_s1 + $0x1e8] sm:$0xff]  ;;  %v278_v59 = vld [vmem:[%s2047_s1 + $0x218] sm:$0xff]  ;;  %v443_v62 = vpack.c.bf16 %v265_v54, %v259_v53 }
  0x13   : > { %666 = vmatprep.subr.bf16.mxu1 %v440_v43  ;;  %v274_v60 = vld [vmem:[%s2047_s1 + $0x1f8] sm:$0xff]  ;;  %v280_v61 = vld [vmem:[%s2047_s1 + $0x228] sm:$0xff]  ;;  %v445_v63 = vpack.c.bf16 %v267_v57, %v261_v55  ;;  %v450_v0 = vpack.c.bf16 %v278_v59, %v272_v58  ;;  %v271_v1 = vld [vmem:[%s2047_s1 + $0x1e0] sm:$0xff] }
  0x14   : > { %v277_v2 = vld [vmem:[%s2047_s1 + $0x210] sm:$0xff]  ;;  %v452_v4 = vpack.c.bf16 %v280_v61, %v274_v60  ;;  %v279_v5 = vld [vmem:[%s2047_s1 + $0x220] sm:$0xff]  ;;  %v284_v6 = vld [vmem:[%s2047_s1 + $0x248] sm:$0xff] }
  0x15   : > { %554 = vmatpush1.bf16.msra.mxu0 %v437_v50  ;;  %v273_v3 = vld [vmem:[%s2047_s1 + $0x1f0] sm:$0xff]  ;;  %v290_v7 = vld [vmem:[%s2047_s1 + $0x278] sm:$0xff]  ;;  %v292_v9 = vld [vmem:[%s2047_s1 + $0x288] sm:$0xff]  ;;  %v449_v10 = vpack.c.bf16 %v277_v2, %v271_v1 }
  0x16   : > { %667 = vmatpush1.bf16.msra.mxu1 %v439_v51  ;;  %555 = vmatprep.subr.bf16.mxu0 %v444_v52  ;;  %v286_v8 = vld [vmem:[%s2047_s1 + $0x258] sm:$0xff]  ;;  %v451_v11 = vpack.c.bf16 %v279_v5, %v273_v3  ;;  %v456_v12 = vpack.c.bf16 %v290_v7, %v284_v6  ;;  %v283_v13 = vld [vmem:[%s2047_s1 + $0x240] sm:$0xff]  ;;  %v289_v14 = vld [vmem:[%s2047_s1 + $0x270] sm:$0xff] }
  0x17   : > { %668 = vmatprep.subr.bf16.mxu1 %v446_v56  ;;  %v285_v15 = vld [vmem:[%s2047_s1 + $0x250] sm:$0xff]  ;;  %v458_v16 = vpack.c.bf16 %v292_v9, %v286_v8  ;;  %v291_v17 = vld [vmem:[%s2047_s1 + $0x280] sm:$0xff]  ;;  %v296_v18 = vld [vmem:[%s2047_s1 + $0x2a8] sm:$0xff]  ;;  %v455_v22 = vpack.c.bf16 %v289_v14, %v283_v13 }
  0x18   : > { %v302_v19 = vld [vmem:[%s2047_s1 + $0x2d8] sm:$0xff]  ;;  %v304_v21 = vld [vmem:[%s2047_s1 + $0x2e8] sm:$0xff]  ;;  %v457_v23 = vpack.c.bf16 %v291_v17, %v285_v15  ;;  %v295_v25 = vld [vmem:[%s2047_s1 + $0x2a0] sm:$0xff] }
  0x19   : > { %556 = vmatpush1.bf16.msra.mxu0 %v443_v62  ;;  %v298_v20 = vld [vmem:[%s2047_s1 + $0x2b8] sm:$0xff]  ;;  %v462_v24 = vpack.c.bf16 %v302_v19, %v296_v18  ;;  %v301_v26 = vld [vmem:[%s2047_s1 + $0x2d0] sm:$0xff]  ;;  %v303_v29 = vld [vmem:[%s2047_s1 + $0x2e0] sm:$0xff] }
  0x1a   : > { %669 = vmatpush1.bf16.msra.mxu1 %v445_v63  ;;  %557 = vmatprep.subr.bf16.mxu0 %v450_v0  ;;  %v297_v27 = vld [vmem:[%s2047_s1 + $0x2b0] sm:$0xff]  ;;  %v464_v28 = vpack.c.bf16 %v304_v21, %v298_v20  ;;  %v308_v30 = vld [vmem:[%s2047_s1 + $0x308] sm:$0xff]  ;;  %v314_v31 = vld [vmem:[%s2047_s1 + $0x338] sm:$0xff]  ;;  %v461_v34 = vpack.c.bf16 %v301_v26, %v295_v25 }
  0x1b   : > { %670 = vmatprep.subr.bf16.mxu1 %v452_v4  ;;  %v310_v32 = vld [vmem:[%s2047_s1 + $0x318] sm:$0xff]  ;;  %v316_v33 = vld [vmem:[%s2047_s1 + $0x348] sm:$0xff]  ;;  %v463_v35 = vpack.c.bf16 %v303_v29, %v297_v27  ;;  %v468_v36 = vpack.c.bf16 %v314_v31, %v308_v30  ;;  %v307_v37 = vld [vmem:[%s2047_s1 + $0x300] sm:$0xff] }
  0x1c   : > { %v313_v38 = vld [vmem:[%s2047_s1 + $0x330] sm:$0xff]  ;;  %v470_v40 = vpack.c.bf16 %v316_v33, %v310_v32  ;;  %v315_v41 = vld [vmem:[%s2047_s1 + $0x340] sm:$0xff]  ;;  %v320_v42 = vld [vmem:[%s2047_s1 + $0x368] sm:$0xff] }
  0x1d   : > { %558 = vmatpush1.bf16.msra.mxu0 %v449_v10  ;;  %v309_v39 = vld [vmem:[%s2047_s1 + $0x310] sm:$0xff]  ;;  %v326_v43 = vld [vmem:[%s2047_s1 + $0x398] sm:$0xff]  ;;  %v328_v45 = vld [vmem:[%s2047_s1 + $0x3a8] sm:$0xff]  ;;  %v467_v46 = vpack.c.bf16 %v313_v38, %v307_v37 }
  0x1e   : > { %671 = vmatpush1.bf16.msra.mxu1 %v451_v11  ;;  %559 = vmatprep.subr.bf16.mxu0 %v456_v12  ;;  %v322_v44 = vld [vmem:[%s2047_s1 + $0x378] sm:$0xff]  ;;  %v469_v47 = vpack.c.bf16 %v315_v41, %v309_v39  ;;  %v474_v48 = vpack.c.bf16 %v326_v43, %v320_v42  ;;  %v319_v49 = vld [vmem:[%s2047_s1 + $0x360] sm:$0xff]  ;;  %v325_v50 = vld [vmem:[%s2047_s1 + $0x390] sm:$0xff] }
  0x1f   : > { %672 = vmatprep.subr.bf16.mxu1 %v458_v16  ;;  %v321_v51 = vld [vmem:[%s2047_s1 + $0x370] sm:$0xff]  ;;  %v476_v52 = vpack.c.bf16 %v328_v45, %v322_v44  ;;  %v327_v53 = vld [vmem:[%s2047_s1 + $0x3a0] sm:$0xff]  ;;  %v332_v54 = vld [vmem:[%s2047_s1 + $0x3c8] sm:$0xff]  ;;  %v473_v58 = vpack.c.bf16 %v325_v50, %v319_v49 }
  0x20   : > { %v338_v55 = vld [vmem:[%s2047_s1 + $0x3f8] sm:$0xff]  ;;  %v340_v57 = vld [vmem:[%s2047_s1 + $0x408] sm:$0xff]  ;;  %v475_v59 = vpack.c.bf16 %v327_v53, %v321_v51  ;;  %v331_v61 = vld [vmem:[%s2047_s1 + $0x3c0] sm:$0xff] }
  0x21   : > { %560 = vmatpush1.bf16.msra.mxu0 %v455_v22  ;;  %v334_v56 = vld [vmem:[%s2047_s1 + $0x3d8] sm:$0xff]  ;;  %v480_v60 = vpack.c.bf16 %v338_v55, %v332_v54  ;;  %v337_v62 = vld [vmem:[%s2047_s1 + $0x3f0] sm:$0xff]  ;;  %v339_v1 = vld [vmem:[%s2047_s1 + $0x400] sm:$0xff] }
  0x22   : > { %673 = vmatpush1.bf16.msra.mxu1 %v457_v23  ;;  %561 = vmatprep.subr.bf16.mxu0 %v462_v24  ;;  %v333_v63 = vld [vmem:[%s2047_s1 + $0x3d0] sm:$0xff]  ;;  %v482_v0 = vpack.c.bf16 %v340_v57, %v334_v56  ;;  %v344_v2 = vld [vmem:[%s2047_s1 + $0x428] sm:$0xff]  ;;  %v350_v3 = vld [vmem:[%s2047_s1 + $0x458] sm:$0xff]  ;;  %v479_v6 = vpack.c.bf16 %v337_v62, %v331_v61 }
  0x23   : > { %674 = vmatprep.subr.bf16.mxu1 %v464_v28  ;;  %v346_v4 = vld [vmem:[%s2047_s1 + $0x438] sm:$0xff]  ;;  %v352_v5 = vld [vmem:[%s2047_s1 + $0x468] sm:$0xff]  ;;  %v343_v7 = vld [vmem:[%s2047_s1 + $0x420] sm:$0xff]  ;;  %v481_v8 = vpack.c.bf16 %v339_v1, %v333_v63  ;;  %v486_v9 = vpack.c.bf16 %v350_v3, %v344_v2 }
  0x24   : > { %v349_v10 = vld [vmem:[%s2047_s1 + $0x450] sm:$0xff]  ;;  %v351_v12 = vld [vmem:[%s2047_s1 + $0x460] sm:$0xff]  ;;  %v488_v13 = vpack.c.bf16 %v352_v5, %v346_v4  ;;  %v356_v14 = vld [vmem:[%s2047_s1 + $0x488] sm:$0xff] }
  0x25   : > { %562 = vmatpush1.bf16.msra.mxu0 %v461_v34  ;;  %v345_v11 = vld [vmem:[%s2047_s1 + $0x430] sm:$0xff]  ;;  %v362_v15 = vld [vmem:[%s2047_s1 + $0x4b8] sm:$0xff]  ;;  %v180_v16 = vld [vmem:[%s1415_s26 + $0x8] sm:$0xff]  ;;  %v485_v20 = vpack.c.bf16 %v349_v10, %v343_v7 }
  0x26   : > { %675 = vmatpush1.bf16.msra.mxu1 %v463_v35  ;;  %563 = vmatprep.subr.bf16.mxu0 %v468_v36  ;;  %v358_v17 = vld [vmem:[%s2047_s1 + $0x498] sm:$0xff]  ;;  %v364_v18 = vld [vmem:[%s2047_s1 + $0x4c8] sm:$0xff]  ;;  %v487_v22 = vpack.c.bf16 %v351_v12, %v345_v11  ;;  %v492_v23 = vpack.c.bf16 %v362_v15, %v356_v14  ;;  %v355_v24 = vld [vmem:[%s2047_s1 + $0x480] sm:$0xff] }
  0x27   : > { %676 = vmatprep.subr.bf16.mxu1 %v470_v40  ;;  %v182_v19 = vld [vmem:[%s1415_s26 + $0x18] sm:$0xff]  ;;  %v361_v25 = vld [vmem:[%s2047_s1 + $0x4b0] sm:$0xff]  ;;  %v494_v27 = vpack.c.bf16 %v364_v18, %v358_v17  ;;  %v363_v28 = vld [vmem:[%s2047_s1 + $0x4c0] sm:$0xff] }
  0x28   : > { %v1443_v21 = vpack.c.bf16 %v182_v19, %v180_v16  ;;  %v357_v26 = vld [vmem:[%s2047_s1 + $0x490] sm:$0xff]  ;;  %v368_v29 = vld [vmem:[%s2047_s1 + $0x4e8] sm:$0xff]  ;;  %v374_v30 = vld [vmem:[%s2047_s1 + $0x518] sm:$0xff]  ;;  %v491_v33 = vpack.c.bf16 %v361_v25, %v355_v24 }
  0x29   : > { %564 = vmatpush1.bf16.msra.mxu0 %v467_v46  ;;  %v370_v31 = vld [vmem:[%s2047_s1 + $0x4f8] sm:$0xff]  ;;  %v376_v32 = vld [vmem:[%s2047_s1 + $0x528] sm:$0xff]  ;;  %v493_v34 = vpack.c.bf16 %v363_v28, %v357_v26  ;;  %v498_v35 = vpack.c.bf16 %v374_v30, %v368_v29  ;;  %v367_v36 = vld [vmem:[%s2047_s1 + $0x4e0] sm:$0xff] }
  0x2a   : > { %677 = vmatpush1.bf16.msra.mxu1 %v469_v47  ;;  %565 = vmatprep.subr.bf16.mxu0 %v474_v48  ;;  %v373_v37 = vld [vmem:[%s2047_s1 + $0x510] sm:$0xff]  ;;  %v500_v39 = vpack.c.bf16 %v376_v32, %v370_v31  ;;  %v375_v40 = vld [vmem:[%s2047_s1 + $0x520] sm:$0xff]  ;;  %v380_v41 = vld [vmem:[%s2047_s1 + $0x548] sm:$0xff] }
  0x2b   : > { %678 = vmatprep.subr.bf16.mxu1 %v476_v52  ;;  %579 = vmatprep.mubr.bf16.mxu0 %v1443_v21  ;;  %v369_v38 = vld [vmem:[%s2047_s1 + $0x4f0] sm:$0xff]  ;;  %v386_v42 = vld [vmem:[%s2047_s1 + $0x578] sm:$0xff]  ;;  %v388_v44 = vld [vmem:[%s2047_s1 + $0x588] sm:$0xff]  ;;  %v497_v45 = vpack.c.bf16 %v373_v37, %v367_v36 }
  0x2c   : > { %692 = vmatprep.mubr.bf16.mxu1 %v1443_v21  ;;  %v382_v43 = vld [vmem:[%s2047_s1 + $0x558] sm:$0xff]  ;;  %v499_v46 = vpack.c.bf16 %v375_v40, %v369_v38  ;;  %v504_v47 = vpack.c.bf16 %v386_v42, %v380_v41  ;;  %v379_v48 = vld [vmem:[%s2047_s1 + $0x540] sm:$0xff]  ;;  %v385_v49 = vld [vmem:[%s2047_s1 + $0x570] sm:$0xff] }
  0x2d   : > { %566 = vmatpush1.bf16.msra.mxu0 %v473_v58  ;;  %v381_v50 = vld [vmem:[%s2047_s1 + $0x550] sm:$0xff]  ;;  %v506_v51 = vpack.c.bf16 %v388_v44, %v382_v43  ;;  %v387_v52 = vld [vmem:[%s2047_s1 + $0x580] sm:$0xff]  ;;  %v392_v53 = vld [vmem:[%s2047_s1 + $0x5a8] sm:$0xff]  ;;  %v503_v57 = vpack.c.bf16 %v385_v49, %v379_v48 }
  0x2e   : > { %679 = vmatpush1.bf16.msra.mxu1 %v475_v59  ;;  %567 = vmatprep.subr.bf16.mxu0 %v480_v60  ;;  %v398_v54 = vld [vmem:[%s2047_s1 + $0x5d8] sm:$0xff]  ;;  %v400_v56 = vld [vmem:[%s2047_s1 + $0x5e8] sm:$0xff]  ;;  %v505_v58 = vpack.c.bf16 %v387_v52, %v381_v50  ;;  %v391_v60 = vld [vmem:[%s2047_s1 + $0x5a0] sm:$0xff] }
  0x2f   : > { %680 = vmatprep.subr.bf16.mxu1 %v482_v0  ;;  %v394_v55 = vld [vmem:[%s2047_s1 + $0x5b8] sm:$0xff]  ;;  %v510_v59 = vpack.c.bf16 %v398_v54, %v392_v53  ;;  %v397_v61 = vld [vmem:[%s2047_s1 + $0x5d0] sm:$0xff]  ;;  %v399_v0 = vld [vmem:[%s2047_s1 + $0x5e0] sm:$0xff] }
  0x30   : > { %v393_v62 = vld [vmem:[%s2047_s1 + $0x5b0] sm:$0xff]  ;;  %v512_v63 = vpack.c.bf16 %v400_v56, %v394_v55  ;;  %v216_v1 = vld [vmem:[%s2047_s1 + $0x28] sm:$0xff]  ;;  %v222_v2 = vld [vmem:[%s2047_s1 + $0x58] sm:$0xff]  ;;  %v509_v3 = vpack.c.bf16 %v397_v61, %v391_v60 }
  0x31   : > { %568 = vmatpush1.bf16.msra.mxu0 %v479_v6  ;;  %v179_v4 = vld [vmem:[%s1415_s26] sm:$0xff]  ;;  %v181_v5 = vld [vmem:[%s1415_s26 + $0x10] sm:$0xff]  ;;  %v511_v6 = vpack.c.bf16 %v399_v0, %v393_v62  ;;  %v424_v7 = vpack.c.bf16 %v222_v2, %v216_v1  ;;  %v228_v10 = vld [vmem:[%s2047_s1 + $0x88] sm:$0xff] }
  0x32   : > { %681 = vmatpush1.bf16.msra.mxu1 %v481_v8  ;;  %569 = vmatprep.subr.bf16.mxu0 %v486_v9  ;;  %v215_v8 = vld [vmem:[%s2047_s1 + $0x20] sm:$0xff]  ;;  %v221_v9 = vld [vmem:[%s2047_s1 + $0x50] sm:$0xff]  ;;  %v234_v11 = vld [vmem:[%s2047_s1 + $0xb8] sm:$0xff]  ;;  %v1551_v12 = vpack.c.bf16 %v181_v5, %v179_v4 }
  0x33   : > { %682 = vmatprep.subr.bf16.mxu1 %v488_v13  ;;  %v184_v13 = vld [vmem:[%s1415_s26 + $0x28] sm:$0xff]  ;;  %v186_v14 = vld [vmem:[%s1415_s26 + $0x38] sm:$0xff]  ;;  %v423_v15 = vpack.c.bf16 %v221_v9, %v215_v8  ;;  %v430_v16 = vpack.c.bf16 %v234_v11, %v228_v10  ;;  %v227_v17 = vld [vmem:[%s2047_s1 + $0x80] sm:$0xff] }
  0x34   : > { %v233_v18 = vld [vmem:[%s2047_s1 + $0xb0] sm:$0xff]  ;;  %v1561_v19 = vpack.c.bf16 %v186_v14, %v184_v13  ;;  %v183_v24 = vld [vmem:[%s1415_s26 + $0x20] sm:$0xff]  ;;  %v252_v29 = vld [vmem:[%s2047_s1 + $0x148] sm:$0xff] }
  0x35   : > { %570 = vmatpush1.bf16.msra.mxu0 %v485_v20  ;;  %v240_v20 = vld [vmem:[%s2047_s1 + $0xe8] sm:$0xff]  ;;  %v185_v25 = vld [vmem:[%s1415_s26 + $0x30] sm:$0xff]  ;;  %v258_v30 = vld [vmem:[%s2047_s1 + $0x178] sm:$0xff] }
  0x36   : > { %683 = vmatpush1.bf16.msra.mxu1 %v487_v22  ;;  %571 = vmatprep.subr.bf16.mxu0 %v492_v23  ;;  %v246_v22 = vld [vmem:[%s2047_s1 + $0x118] sm:$0xff]  ;;  %v429_v23 = vpack.c.bf16 %v233_v18, %v227_v17  ;;  %v245_v28 = vld [vmem:[%s2047_s1 + $0x110] sm:$0xff]  ;;  %v1587_v31 = vpack.c.bf16 %v185_v25, %v183_v24  ;;  %v188_v32 = vld [vmem:[%s1415_s26 + $0x48] sm:$0xff] }
  0x37   : > { %684 = vmatprep.subr.bf16.mxu1 %v494_v27  ;;  %v436_v26 = vpack.c.bf16 %v246_v22, %v240_v20  ;;  %v239_v27 = vld [vmem:[%s2047_s1 + $0xe0] sm:$0xff]  ;;  %v257_v37 = vld [vmem:[%s2047_s1 + $0x170] sm:$0xff]  ;;  %v270_v40 = vld [vmem:[%s2047_s1 + $0x1d8] sm:$0xff] }
  0x38   : > { %v251_v36 = vld [vmem:[%s2047_s1 + $0x140] sm:$0xff]  ;;  %v189_v43 = vld [vmem:[%s1415_s26 + $0x50] sm:$0xff]  ;;  %v282_v48 = vld [vmem:[%s2047_s1 + $0x238] sm:$0xff] }
  0x39   : > { %572 = vmatpush1.bf16.msra.mxu0 %v491_v33  ;;  %v190_v33 = vld [vmem:[%s1415_s26 + $0x58] sm:$0xff]  ;;  %v441_v41 = vpack.c.bf16 %v257_v37, %v251_v36  ;;  %v187_v42 = vld [vmem:[%s1415_s26 + $0x40] sm:$0xff]  ;;  %v192_v50 = vld [vmem:[%s1415_s26 + $0x68] sm:$0xff] }
  0x3a   : > { %685 = vmatpush1.bf16.msra.mxu1 %v493_v34  ;;  %573 = vmatprep.subr.bf16.mxu0 %v498_v35  ;;  %v435_v34 = vpack.c.bf16 %v245_v28, %v239_v27  ;;  %v442_v35 = vpack.c.bf16 %v258_v30, %v252_v29  ;;  %v1597_v38 = vpack.c.bf16 %v190_v33, %v188_v32  ;;  %v275_v54 = vld [vmem:[%s2047_s1 + $0x200] sm:$0xff]  ;;  %v281_v55 = vld [vmem:[%s2047_s1 + $0x230] sm:$0xff]  ;;  %v300_v1 = vld [vmem:[%s2047_s1 + $0x2c8] sm:$0xff] }
  0x3b   : > { %686 = vmatprep.subr.bf16.mxu1 %v500_v39  ;;  %v264_v39 = vld [vmem:[%s2047_s1 + $0x1a8] sm:$0xff]  ;;  %v1623_v49 = vpack.c.bf16 %v189_v43, %v187_v42  ;;  %v191_v60 = vld [vmem:[%s1415_s26 + $0x60] sm:$0xff]  ;;  %v193_v61 = vld [vmem:[%s1415_s26 + $0x70] sm:$0xff] }
  0x3c   : > { %v448_v44 = vpack.c.bf16 %v270_v40, %v264_v39  ;;  %v293_v0 = vld [vmem:[%s2047_s1 + $0x290] sm:$0xff]  ;;  %v306_v2 = vld [vmem:[%s2047_s1 + $0x2f8] sm:$0xff]  ;;  %v196_v4 = vld [vmem:[%s1415_s26 + $0x88] sm:$0xff] }
  0x3d   : > { %574 = vmatpush1.bf16.msra.mxu0 %v497_v45  ;;  %v263_v45 = vld [vmem:[%s2047_s1 + $0x1a0] sm:$0xff]  ;;  %v198_v5 = vld [vmem:[%s1415_s26 + $0x98] sm:$0xff]  ;;  %v305_v9 = vld [vmem:[%s2047_s1 + $0x2f0] sm:$0xff] }
  0x3e   : > { %687 = vmatpush1.bf16.msra.mxu1 %v499_v46  ;;  %575 = vmatprep.subr.bf16.mxu0 %v504_v47  ;;  %v269_v46 = vld [vmem:[%s2047_s1 + $0x1d0] sm:$0xff]  ;;  %v276_v47 = vld [vmem:[%s2047_s1 + $0x208] sm:$0xff]  ;;  %v299_v8 = vld [vmem:[%s2047_s1 + $0x2c0] sm:$0xff]  ;;  %v1669_v10 = vpack.c.bf16 %v198_v5, %v196_v4 }
  0x3f   : > { %688 = vmatprep.subr.bf16.mxu1 %v506_v51  ;;  %v194_v51 = vld [vmem:[%s1415_s26 + $0x78] sm:$0xff]  ;;  %v447_v52 = vpack.c.bf16 %v269_v46, %v263_v45  ;;  %v454_v53 = vpack.c.bf16 %v282_v48, %v276_v47  ;;  %v312_v11 = vld [vmem:[%s2047_s1 + $0x328] sm:$0xff]  ;;  %v465_v14 = vpack.c.bf16 %v305_v9, %v299_v8  ;;  %v311_v18 = vld [vmem:[%s2047_s1 + $0x320] sm:$0xff] }
  0x40   : > { %v1633_v56 = vpack.c.bf16 %v194_v51, %v192_v50  ;;  %v318_v13 = vld [vmem:[%s2047_s1 + $0x358] sm:$0xff]  ;;  %v317_v20 = vld [vmem:[%s2047_s1 + $0x350] sm:$0xff]  ;;  %v324_v22 = vld [vmem:[%s2047_s1 + $0x388] sm:$0xff] }
  0x41   : > { %576 = vmatpush1.bf16.msra.mxu0 %v503_v57  ;;  %v288_v57 = vld [vmem:[%s2047_s1 + $0x268] sm:$0xff]  ;;  %v472_v17 = vpack.c.bf16 %v318_v13, %v312_v11  ;;  %v471_v27 = vpack.c.bf16 %v317_v20, %v311_v18  ;;  %v323_v29 = vld [vmem:[%s2047_s1 + $0x380] sm:$0xff]  ;;  %v329_v30 = vld [vmem:[%s2047_s1 + $0x3b0] sm:$0xff] }
  0x42   : > { %689 = vmatpush1.bf16.msra.mxu1 %v505_v58  ;;  %577 = vmatprep.subr.bf16.mxu0 %v510_v59  ;;  %v294_v58 = vld [vmem:[%s2047_s1 + $0x298] sm:$0xff]  ;;  %v453_v59 = vpack.c.bf16 %v281_v55, %v275_v54  ;;  %v200_v25 = vld [vmem:[%s1415_s26 + $0xa8] sm:$0xff]  ;;  %v199_v36 = vld [vmem:[%s1415_s26 + $0xa0] sm:$0xff] }
  0x43   : > { %690 = vmatprep.subr.bf16.mxu1 %v512_v63  ;;  %v460_v62 = vpack.c.bf16 %v294_v58, %v288_v57  ;;  %v287_v63 = vld [vmem:[%s2047_s1 + $0x260] sm:$0xff]  ;;  %v336_v33 = vld [vmem:[%s2047_s1 + $0x3e8] sm:$0xff]  ;;  %v201_v37 = vld [vmem:[%s1415_s26 + $0xb0] sm:$0xff] }
  0x44   : > { %v335_v40 = vld [vmem:[%s2047_s1 + $0x3e0] sm:$0xff]  ;;  %v348_v42 = vld [vmem:[%s2047_s1 + $0x448] sm:$0xff]  ;;  %v354_v43 = vld [vmem:[%s2047_s1 + $0x478] sm:$0xff] }
  0x45   : > { %578 = vmatpush1.bf16.msra.mxu0 %v509_v3  ;;  %v1659_v3 = vpack.c.bf16 %v193_v61, %v191_v60  ;;  %v204_v45 = vld [vmem:[%s1415_s26 + $0xc8] sm:$0xff]  ;;  %v206_v46 = vld [vmem:[%s1415_s26 + $0xd8] sm:$0xff]  ;;  %v490_v48 = vpack.c.bf16 %v354_v43, %v348_v42  ;;  %v347_v50 = vld [vmem:[%s2047_s1 + $0x440] sm:$0xff] }
  0x46   : > { %691 = vmatpush1.bf16.msra.mxu1 %v511_v6  ;;  %773 = vmatprep.subr.bf16.mxu0 %v424_v7  ;;  %v459_v6 = vpack.c.bf16 %v293_v0, %v287_v63  ;;  %v353_v51 = vld [vmem:[%s2047_s1 + $0x470] sm:$0xff]  ;;  %v366_v54 = vld [vmem:[%s2047_s1 + $0x4d8] sm:$0xff]  ;;  %v203_v57 = vld [vmem:[%s1415_s26 + $0xc0] sm:$0xff] }
  0x47   : > { %1053 = vmatprep.subr.bf16.mxu1 %v424_v7  ;;  %v466_v7 = vpack.c.bf16 %v306_v2, %v300_v1  ;;  %v489_v55 = vpack.c.bf16 %v353_v51, %v347_v50  ;;  %v205_v58 = vld [vmem:[%s1415_s26 + $0xd0] sm:$0xff]  ;;  %v359_v60 = vld [vmem:[%s2047_s1 + $0x4a0] sm:$0xff]  ;;  %v378_v63 = vld [vmem:[%s2047_s1 + $0x538] sm:$0xff] }
  0x48   : > { %580 = vmatmul.mubr.bf16.vlgmr.msra.gmra.mrb[0].mxu0 %v1551_v12  ;;  %v365_v61 = vld [vmem:[%s2047_s1 + $0x4d0] sm:$0xff]  ;;  %v415_v0 = vpack.c.bf16 %v205_v58, %v203_v57  ;;  %v208_v1 = vld [vmem:[%s1415_s26 + $0xe8] sm:$0xff]  ;;  %v210_v2 = vld [vmem:[%s1415_s26 + $0xf8] sm:$0xff] }
  0x49   : > { %693 = vmatmul.mubr.bf16.vlgmr.msra.gmra.mrb[0].mxu1 %v1551_v12  ;;  %774 = vmatpush1.bf16.msra.mxu0 %v423_v15  ;;  %v495_v4 = vpack.c.bf16 %v365_v61, %v359_v60  ;;  %v418_v8 = vpack.c.bf16 %v210_v2, %v208_v1  ;;  %v384_v9 = vld [vmem:[%s2047_s1 + $0x568] sm:$0xff]  ;;  %v390_v11 = vld [vmem:[%s2047_s1 + $0x598] sm:$0xff]  ;;  %v389_v18 = vld [vmem:[%s2047_s1 + $0x590] sm:$0xff] }
  0x4a   : > { %1069 = vmatpush1.bf16.msra.mxu1 %v423_v15  ;;  %775 = vmatprep.subr.bf16.mxu0 %v430_v16  ;;  %v195_v15 = vld [vmem:[%s1415_s26 + $0x80] sm:$0xff]  ;;  %v396_v20 = vld [vmem:[%s2047_s1 + $0x5c8] sm:$0xff] }
  0x4b   : > { %1054 = vmatprep.subr.bf16.mxu1 %v430_v16  ;;  %589 = vmatprep.mubr.bf16.mxu0 %v1561_v19  ;;  %v197_v16 = vld [vmem:[%s1415_s26 + $0x90] sm:$0xff] }
  0x4c   : > { %702 = vmatprep.mubr.bf16.mxu1 %v1561_v19  ;;  %v1695_v24 = vpack.c.bf16 %v197_v16, %v195_v15  ;;  %v209_v15 = vld [vmem:[%s1415_s26 + $0xf0] sm:$0xff]  ;;  %v508_v16 = vpack.c.bf16 %v390_v11, %v384_v9 }
  0x4d   : > { %776 = vmatpush1.bf16.msra.mxu0 %v429_v23 }
  0x4e   : > { %1070 = vmatpush1.bf16.msra.mxu1 %v429_v23  ;;  %777 = vmatprep.subr.bf16.mxu0 %v436_v26  ;;  %v330_v23 = vld [vmem:[%s2047_s1 + $0x3b8] sm:$0xff] }
  0x4f   : > { %1055 = vmatprep.subr.bf16.mxu1 %v436_v26  ;;  %v202_v26 = vld [vmem:[%s1415_s26 + $0xb8] sm:$0xff]  ;;  %v478_v28 = vpack.c.bf16 %v330_v23, %v324_v22 }
  0x50   : > { %590 = vmatmul.mubr.bf16.gmra.mrb[4].mxu0 %v1587_v31  ;;  %v1705_v32 = vpack.c.bf16 %v202_v26, %v200_v25  ;;  %v402_v22 = vld [vmem:[%s2047_s1 + $0x5f8] sm:$0xff] }
  0x51   : > { %703 = vmatmul.mubr.bf16.gmra.mrb[4].mxu1 %v1587_v31  ;;  %778 = vmatpush1.bf16.msra.mxu0 %v435_v34  ;;  %v514_v26 = vpack.c.bf16 %v402_v22, %v396_v20 }
  0x52   : > { %1071 = vmatpush1.bf16.msra.mxu1 %v435_v34  ;;  %779 = vmatprep.subr.bf16.mxu0 %v442_v35  ;;  %v342_v34 = vld [vmem:[%s2047_s1 + $0x418] sm:$0xff] }
  0x53   : > { %1056 = vmatprep.subr.bf16.mxu1 %v442_v35  ;;  %599 = vmatprep.mubr.bf16.mxu0 %v1597_v38  ;;  %v477_v35 = vpack.c.bf16 %v329_v30, %v323_v29  ;;  %v484_v39 = vpack.c.bf16 %v342_v34, %v336_v33 }
  0x54   : > { %712 = vmatprep.mubr.bf16.mxu1 %v1597_v38 }
  0x55   : > { %780 = vmatpush1.bf16.msra.mxu0 %v441_v41 }
  0x56   : > { %1072 = vmatpush1.bf16.msra.mxu1 %v441_v41  ;;  %781 = vmatprep.subr.bf16.mxu0 %v448_v44  ;;  %v341_v41 = vld [vmem:[%s2047_s1 + $0x410] sm:$0xff] }
  0x57   : > { %1057 = vmatprep.subr.bf16.mxu1 %v448_v44  ;;  %v1731_v44 = vpack.c.bf16 %v201_v37, %v199_v36  ;;  %v483_v47 = vpack.c.bf16 %v341_v41, %v335_v40 }
  0x58   : > { %600 = vmatmul.mubr.bf16.gmra.mrb[8].mxu0 %v1623_v49 }
  0x59   : > { %713 = vmatmul.mubr.bf16.gmra.mrb[8].mxu1 %v1623_v49  ;;  %782 = vmatpush1.bf16.msra.mxu0 %v447_v52 }
  0x5a   : > { %1073 = vmatpush1.bf16.msra.mxu1 %v447_v52  ;;  %783 = vmatprep.subr.bf16.mxu0 %v454_v53  ;;  %v1741_v52 = vpack.c.bf16 %v206_v46, %v204_v45 }
  0x5b   : > { %1058 = vmatprep.subr.bf16.mxu1 %v454_v53  ;;  %609 = vmatprep.mubr.bf16.mxu0 %v1633_v56  ;;  %v360_v53 = vld [vmem:[%s2047_s1 + $0x4a8] sm:$0xff] }
  0x5c   : > { %722 = vmatprep.mubr.bf16.mxu1 %v1633_v56 }
  0x5d   : > { %784 = vmatpush1.bf16.msra.mxu0 %v453_v59 }
  0x5e   : > { %1074 = vmatpush1.bf16.msra.mxu1 %v453_v59  ;;  %785 = vmatprep.subr.bf16.mxu0 %v460_v62  ;;  %v496_v59 = vpack.c.bf16 %v366_v54, %v360_v53 }
  0x5f   : > { %1059 = vmatprep.subr.bf16.mxu1 %v460_v62  ;;  %v372_v62 = vld [vmem:[%s2047_s1 + $0x508] sm:$0xff] }
  0x60   : > { %610 = vmatmul.mubr.bf16.gmra.mrb[12].mxu0 %v1659_v3  ;;  %v502_v5 = vpack.c.bf16 %v378_v63, %v372_v62 }
  0x61   : > { %723 = vmatmul.mubr.bf16.gmra.mrb[12].mxu1 %v1659_v3  ;;  %786 = vmatpush1.bf16.msra.mxu0 %v459_v6 }
  0x62   : > { %1075 = vmatpush1.bf16.msra.mxu1 %v459_v6  ;;  %787 = vmatprep.subr.bf16.mxu0 %v466_v7  ;;  %v371_v6 = vld [vmem:[%s2047_s1 + $0x500] sm:$0xff] }
  0x63   : > { %1060 = vmatprep.subr.bf16.mxu1 %v466_v7  ;;  %619 = vmatprep.mubr.bf16.mxu0 %v1669_v10  ;;  %v377_v7 = vld [vmem:[%s2047_s1 + $0x530] sm:$0xff] }
  0x64   : > { %732 = vmatprep.mubr.bf16.mxu1 %v1669_v10  ;;  %v501_v13 = vpack.c.bf16 %v377_v7, %v371_v6 }
  0x65   : > { %788 = vmatpush1.bf16.msra.mxu0 %v465_v14 }
  0x66   : > { %1076 = vmatpush1.bf16.msra.mxu1 %v465_v14  ;;  %789 = vmatprep.subr.bf16.mxu0 %v472_v17  ;;  %v207_v14 = vld [vmem:[%s1415_s26 + $0xe0] sm:$0xff] }
  0x67   : > { %1061 = vmatprep.subr.bf16.mxu1 %v472_v17  ;;  %v383_v17 = vld [vmem:[%s2047_s1 + $0x560] sm:$0xff]  ;;  %v417_v23 = vpack.c.bf16 %v209_v15, %v207_v14 }
  0x68   : > { %620 = vmatmul.mubr.bf16.gmra.mrb[16].mxu0 %v1695_v24  ;;  %v507_v25 = vpack.c.bf16 %v389_v18, %v383_v17 }
  0x69   : > { %733 = vmatmul.mubr.bf16.gmra.mrb[16].mxu1 %v1695_v24  ;;  %790 = vmatpush1.bf16.msra.mxu0 %v471_v27 }
  0x6a   : > { %1077 = vmatpush1.bf16.msra.mxu1 %v471_v27  ;;  %791 = vmatprep.subr.bf16.mxu0 %v478_v28  ;;  %v395_v27 = vld [vmem:[%s2047_s1 + $0x5c0] sm:$0xff] }
  0x6b   : > { %1062 = vmatprep.subr.bf16.mxu1 %v478_v28  ;;  %629 = vmatprep.mubr.bf16.mxu0 %v1705_v32  ;;  %v401_v28 = vld [vmem:[%s2047_s1 + $0x5f0] sm:$0xff] }
  0x6c   : > { %742 = vmatprep.mubr.bf16.mxu1 %v1705_v32  ;;  %v513_v29 = vpack.c.bf16 %v401_v28, %v395_v27 }
  0x6d   : > { %792 = vmatpush1.bf16.msra.mxu0 %v477_v35 }
  0x6e   : > { %1078 = vmatpush1.bf16.msra.mxu1 %v477_v35  ;;  %793 = vmatprep.subr.bf16.mxu0 %v484_v39 }
  0x6f   : > { %1063 = vmatprep.subr.bf16.mxu1 %v484_v39 }
  0x70   : > { %630 = vmatmul.mubr.bf16.gmra.mrb[20].mxu0 %v1731_v44 }
  0x71   : > { %743 = vmatmul.mubr.bf16.gmra.mrb[20].mxu1 %v1731_v44  ;;  %794 = vmatpush1.bf16.msra.mxu0 %v483_v47 }
  0x72   : > { %1079 = vmatpush1.bf16.msra.mxu1 %v483_v47  ;;  %795 = vmatprep.subr.bf16.mxu0 %v490_v48 }
  0x73   : > { %1064 = vmatprep.subr.bf16.mxu1 %v490_v48  ;;  %639 = vmatprep.mubr.bf16.mxu0 %v1741_v52 }
  0x74   : > { %752 = vmatprep.mubr.bf16.mxu1 %v1741_v52 }
  0x75   : > { %796 = vmatpush1.bf16.msra.mxu0 %v489_v55 }
  0x76   : > { %1080 = vmatpush1.bf16.msra.mxu1 %v489_v55  ;;  %797 = vmatprep.subr.bf16.mxu0 %v496_v59 }
  0x77   : > { %1065 = vmatprep.subr.bf16.mxu1 %v496_v59 }
  0x78   : > { %640 = vmatmul.mubr.bf16.gmra.mrb[24].mxu0 %v415_v0 }
  0x79   : > { %753 = vmatmul.mubr.bf16.gmra.mrb[24].mxu1 %v415_v0  ;;  %798 = vmatpush1.bf16.msra.mxu0 %v495_v4 }
  0x7a   : > { %1081 = vmatpush1.bf16.msra.mxu1 %v495_v4  ;;  %799 = vmatprep.subr.bf16.mxu0 %v502_v5 }
  0x7b   : > { %1066 = vmatprep.subr.bf16.mxu1 %v502_v5  ;;  %649 = vmatprep.mubr.bf16.mxu0 %v418_v8 }
  0x7c   : > { %762 = vmatprep.mubr.bf16.mxu1 %v418_v8 }
  0x7d   : > { %800 = vmatpush1.bf16.msra.mxu0 %v501_v13 }
  0x7e   : > { %1082 = vmatpush1.bf16.msra.mxu1 %v501_v13  ;;  %801 = vmatprep.subr.bf16.mxu0 %v508_v16 }
  0x7f   : > { %1067 = vmatprep.subr.bf16.mxu1 %v508_v16 }
  0x80   : > { %650 = vmatmul.mubr.bf16.gmra.mrb[28].mxu0 %v417_v23 }
  0x81   : > { %763 = vmatmul.mubr.bf16.gmra.mrb[28].mxu1 %v417_v23  ;;  %802 = vmatpush1.bf16.msra.mxu0 %v507_v25 }
  0x82   : > { %1083 = vmatpush1.bf16.msra.mxu1 %v507_v25  ;;  %803 = vmatprep.subr.bf16.mxu0 %v514_v26 }
  0x83   : > { %1068 = vmatprep.subr.bf16.mxu1 %v514_v26  ;;  %805 = vmatprep.mubr.bf16.mxu0 %v1443_v21  ;;  %v517_v21 = vlaneseq }
  0x84   : > { %845 = vmatprep.mubr.bf16.mxu1 %v1669_v10 }
  0x85   : > { %804 = vmatpush1.bf16.msra.mxu0 %v513_v29 }
  0x86   : > { %1084 = vmatpush1.bf16.msra.mxu1 %v513_v29 }
  0x88   : > { %806 = vmatmul.mubr.bf16.vlgmr.msra.gmra.mrb[32].mxu0 %v1551_v12  ;;  %v1814_v12 = vshrl.u32 %v517_v21, 7 }
  0x89   : > { %846 = vmatmul.mubr.bf16.vlgmr.msra.gmra.mrb[32].mxu1 %v1695_v24  ;;  %815 = vmatprep.mubr.bf16.mxu0 %v1561_v19 }
  0x8a   : > { %855 = vmatprep.mubr.bf16.mxu1 %v1705_v32  ;;  %v519_v19 = vsub.s32 0, %v1814_v12 }
  0x90   : > { %816 = vmatmul.mubr.bf16.gmra.mrb[36].mxu0 %v1587_v31  ;;  %v1820_v31 = vld [vmem:[%s2048_s2] sm:$0x3f] }
  0x91   : > { %856 = vmatmul.mubr.bf16.gmra.mrb[36].mxu1 %v1731_v44  ;;  %825 = vmatprep.mubr.bf16.mxu0 %v1597_v38  ;;  %v527_v38 = vsub.s32 2, %v1814_v12 }
  0x92   : > { %865 = vmatprep.mubr.bf16.mxu1 %v1741_v52 }
  0x93   : > { %v1830_v10 = vrot.slane %v1820_v31, %v527_v38 }
  0x98   : > { %826 = vmatmul.mubr.bf16.gmra.mrb[40].mxu0 %v1623_v49  ;;  %v523_v49 = vsub.s32 1, %v1814_v12 }
  0x99   : > { %866 = vmatmul.mubr.bf16.gmra.mrb[40].mxu1 %v415_v0  ;;  %835 = vmatprep.mubr.bf16.mxu0 %v1633_v56  ;;  %v531_v56 = vsub.s32 3, %v1814_v12 }
  0x9a   : > { %875 = vmatprep.mubr.bf16.mxu1 %v418_v8  ;;  %v1833_v24 = vrot.slane %v1820_v31, %v523_v49 }
  0x9b   : > { %v1836_v30 = vrot.slane %v1820_v31, %v531_v56 }
  0xa0   : > { %836 = vmatmul.mubr.bf16.gmra.mrb[44].mxu0 %v1659_v3  ;;  %v1827_v3 = vrot.slane %v1820_v31, %v519_v19 }
  0xa1   : > { %876 = vmatmul.mubr.bf16.gmra.mrb[44].mxu1 %v417_v23 }
 0x11b   : > { %v581_v32 = vpop.f32.mrb[0].mxu0 }
 0x11c   : > { %v582_v33 = vadd.f32 %v581_v32, %v1827_v3  ;;  %v694_v34 = vpop.f32.mrb[0].mxu1  ;;  %v583_v35 = vpop.f32.mrb[1].mxu0 }
 0x11d   : > { %v695_v36 = vadd.f32 %v694_v34, %v1830_v10  ;;  %v584_v37 = vadd.f32 %v583_v35, %v1833_v24  ;;  %v696_v39 = vpop.f32.mrb[1].mxu1  ;;  %v585_v40 = vpop.f32.mrb[2].mxu0 }
 0x11e   : > { %886 = vst [vmem:[%s1841_s14] sm:$0xff] %v582_v33  ;;  %v697_v41 = vadd.f32 %v696_v39, %v1836_v30  ;;  %v586_v42 = vadd.f32 %v585_v40, %v1827_v3  ;;  %v698_v43 = vpop.f32.mrb[2].mxu1  ;;  %v587_v44 = vpop.f32.mrb[3].mxu0 }
 0x11f   : > { %888 = vst [vmem:[%s1841_s14 + $0x10] sm:$0xff] %v695_v36  ;;  %887 = vst [vmem:[%s1841_s14 + $0x8] sm:$0xff] %v584_v37  ;;  %v699_v45 = vadd.f32 %v698_v43, %v1830_v10  ;;  %v588_v46 = vadd.f32 %v587_v44, %v1833_v24  ;;  %v700_v47 = vpop.f32.mrb[3].mxu1 }
 0x120   : > { %889 = vst [vmem:[%s1841_s14 + $0x18] sm:$0xff] %v697_v41  ;;  %892 = vst [vmem:[%s1841_s14 + $0x30] sm:$0xff] %v586_v42  ;;  %v701_v48 = vadd.f32 %v700_v47, %v1836_v30 }
 0x121   : > { %894 = vst [vmem:[%s1841_s14 + $0x40] sm:$0xff] %v699_v45  ;;  %893 = vst [vmem:[%s1841_s14 + $0x38] sm:$0xff] %v588_v46 }
 0x122   : > { %895 = vst [vmem:[%s1841_s14 + $0x48] sm:$0xff] %v701_v48 }
 0x123   : > { %v591_v50 = vpop.f32.mrb[4].mxu0 }
 0x124   : > { %v592_v51 = vadd.f32 %v591_v50, %v1827_v3  ;;  %v704_v52 = vpop.f32.mrb[4].mxu1  ;;  %v593_v53 = vpop.f32.mrb[5].mxu0 }
 0x125   : > { %v705_v54 = vadd.f32 %v704_v52, %v1830_v10  ;;  %v594_v55 = vadd.f32 %v593_v53, %v1833_v24  ;;  %v706_v57 = vpop.f32.mrb[5].mxu1  ;;  %v595_v58 = vpop.f32.mrb[6].mxu0 }
 0x126   : > { %898 = vst [vmem:[%s1841_s14 + $0x60] sm:$0xff] %v592_v51  ;;  %v707_v59 = vadd.f32 %v706_v57, %v1836_v30  ;;  %v596_v60 = vadd.f32 %v595_v58, %v1827_v3  ;;  %v708_v61 = vpop.f32.mrb[6].mxu1  ;;  %v597_v62 = vpop.f32.mrb[7].mxu0 }
 0x127   : > { %900 = vst [vmem:[%s1841_s14 + $0x70] sm:$0xff] %v705_v54  ;;  %899 = vst [vmem:[%s1841_s14 + $0x68] sm:$0xff] %v594_v55  ;;  %v709_v63 = vadd.f32 %v708_v61, %v1830_v10  ;;  %v598_v0 = vadd.f32 %v597_v62, %v1833_v24  ;;  %v710_v1 = vpop.f32.mrb[7].mxu1 }
 0x128   : > { %901 = vst [vmem:[%s1841_s14 + $0x78] sm:$0xff] %v707_v59  ;;  %904 = vst [vmem:[%s1841_s14 + $0x90] sm:$0xff] %v596_v60  ;;  %v711_v2 = vadd.f32 %v710_v1, %v1836_v30 }
 0x129   : > { %906 = vst [vmem:[%s1841_s14 + $0xa0] sm:$0xff] %v709_v63  ;;  %905 = vst [vmem:[%s1841_s14 + $0x98] sm:$0xff] %v598_v0 }
 0x12a   : > { %907 = vst [vmem:[%s1841_s14 + $0xa8] sm:$0xff] %v711_v2 }
 0x12b   : > { %v601_v4 = vpop.f32.mrb[8].mxu0 }
 0x12c   : > { %v602_v5 = vadd.f32 %v601_v4, %v1827_v3  ;;  %v714_v6 = vpop.f32.mrb[8].mxu1  ;;  %v603_v7 = vpop.f32.mrb[9].mxu0 }
 0x12d   : > { %v715_v8 = vadd.f32 %v714_v6, %v1830_v10  ;;  %v604_v9 = vadd.f32 %v603_v7, %v1833_v24  ;;  %v716_v11 = vpop.f32.mrb[9].mxu1  ;;  %v605_v13 = vpop.f32.mrb[10].mxu0 }
 0x12e   : > { %910 = vst [vmem:[%s1841_s14 + $0xc0] sm:$0xff] %v602_v5  ;;  %v717_v14 = vadd.f32 %v716_v11, %v1836_v30  ;;  %v606_v15 = vadd.f32 %v605_v13, %v1827_v3  ;;  %v718_v16 = vpop.f32.mrb[10].mxu1  ;;  %v607_v17 = vpop.f32.mrb[11].mxu0 }
 0x12f   : > { %912 = vst [vmem:[%s1841_s14 + $0xd0] sm:$0xff] %v715_v8  ;;  %911 = vst [vmem:[%s1841_s14 + $0xc8] sm:$0xff] %v604_v9  ;;  %v719_v18 = vadd.f32 %v718_v16, %v1830_v10  ;;  %v608_v20 = vadd.f32 %v607_v17, %v1833_v24  ;;  %v720_v22 = vpop.f32.mrb[11].mxu1 }
 0x130   : > { %913 = vst [vmem:[%s1841_s14 + $0xd8] sm:$0xff] %v717_v14  ;;  %916 = vst [vmem:[%s1841_s14 + $0xf0] sm:$0xff] %v606_v15  ;;  %v721_v23 = vadd.f32 %v720_v22, %v1836_v30 }
 0x131   : > { %918 = vst [vmem:[%s1841_s14 + $0x100] sm:$0xff] %v719_v18  ;;  %917 = vst [vmem:[%s1841_s14 + $0xf8] sm:$0xff] %v608_v20 }
 0x132   : > { %919 = vst [vmem:[%s1841_s14 + $0x108] sm:$0xff] %v721_v23 }
 0x133   : > { %v611_v25 = vpop.f32.mrb[12].mxu0 }
 0x134   : > { %v612_v26 = vadd.f32 %v611_v25, %v1827_v3  ;;  %v724_v27 = vpop.f32.mrb[12].mxu1  ;;  %v613_v28 = vpop.f32.mrb[13].mxu0 }
 0x135   : > { %v725_v29 = vadd.f32 %v724_v27, %v1830_v10  ;;  %v614_v21 = vadd.f32 %v613_v28, %v1833_v24  ;;  %v726_v19 = vpop.f32.mrb[13].mxu1  ;;  %v615_v38 = vpop.f32.mrb[14].mxu0 }
 0x136   : > { %922 = vst [vmem:[%s1841_s14 + $0x120] sm:$0xff] %v612_v26  ;;  %v727_v49 = vadd.f32 %v726_v19, %v1836_v30  ;;  %v616_v56 = vadd.f32 %v615_v38, %v1827_v3  ;;  %v728_v32 = vpop.f32.mrb[14].mxu1  ;;  %v617_v33 = vpop.f32.mrb[15].mxu0 }
 0x137   : > { %924 = vst [vmem:[%s1841_s14 + $0x130] sm:$0xff] %v725_v29  ;;  %923 = vst [vmem:[%s1841_s14 + $0x128] sm:$0xff] %v614_v21  ;;  %v729_v34 = vadd.f32 %v728_v32, %v1830_v10  ;;  %v618_v35 = vadd.f32 %v617_v33, %v1833_v24  ;;  %v730_v36 = vpop.f32.mrb[15].mxu1  ;;  %v535_v32 = vsub.s32 4, %v1814_v12 }
 0x138   : > { %925 = vst [vmem:[%s1841_s14 + $0x138] sm:$0xff] %v727_v49  ;;  %928 = vst [vmem:[%s1841_s14 + $0x150] sm:$0xff] %v616_v56  ;;  %v731_v37 = vadd.f32 %v730_v36, %v1836_v30 }
 0x139   : > { %930 = vst [vmem:[%s1841_s14 + $0x160] sm:$0xff] %v729_v34  ;;  %929 = vst [vmem:[%s1841_s14 + $0x158] sm:$0xff] %v618_v35 }
 0x13a   : > { %931 = vst [vmem:[%s1841_s14 + $0x168] sm:$0xff] %v731_v37  ;;  %v539_v37 = vsub.s32 5, %v1814_v12 }
 0x13b   : > { %v621_v39 = vpop.f32.mrb[16].mxu0 }
 0x13c   : > { %v622_v40 = vadd.f32 %v621_v39, %v1827_v3  ;;  %v734_v41 = vpop.f32.mrb[16].mxu1  ;;  %v623_v42 = vpop.f32.mrb[17].mxu0 }
 0x13d   : > { %v735_v43 = vadd.f32 %v734_v41, %v1830_v10  ;;  %v624_v44 = vadd.f32 %v623_v42, %v1833_v24  ;;  %v736_v45 = vpop.f32.mrb[17].mxu1  ;;  %v625_v46 = vpop.f32.mrb[18].mxu0 }
 0x13e   : > { %934 = vst [vmem:[%s1841_s14 + $0x180] sm:$0xff] %v622_v40  ;;  %v737_v47 = vadd.f32 %v736_v45, %v1836_v30  ;;  %v626_v48 = vadd.f32 %v625_v46, %v1827_v3  ;;  %v738_v50 = vpop.f32.mrb[18].mxu1  ;;  %v627_v51 = vpop.f32.mrb[19].mxu0  ;;  %v1971_v46 = vrot.slane %v1820_v31, %v535_v32 }
 0x13f   : > { %936 = vst [vmem:[%s1841_s14 + $0x190] sm:$0xff] %v735_v43  ;;  %935 = vst [vmem:[%s1841_s14 + $0x188] sm:$0xff] %v624_v44  ;;  %v739_v52 = vadd.f32 %v738_v50, %v1830_v10  ;;  %v628_v53 = vadd.f32 %v627_v51, %v1833_v24  ;;  %v740_v54 = vpop.f32.mrb[19].mxu1 }
 0x140   : > { %937 = vst [vmem:[%s1841_s14 + $0x198] sm:$0xff] %v737_v47  ;;  %940 = vst [vmem:[%s1841_s14 + $0x1b0] sm:$0xff] %v626_v48  ;;  %v741_v55 = vadd.f32 %v740_v54, %v1836_v30 }
 0x141   : > { %942 = vst [vmem:[%s1841_s14 + $0x1c0] sm:$0xff] %v739_v52  ;;  %941 = vst [vmem:[%s1841_s14 + $0x1b8] sm:$0xff] %v628_v53 }
 0x142   : > { %943 = vst [vmem:[%s1841_s14 + $0x1c8] sm:$0xff] %v741_v55 }
 0x143   : > { %v631_v57 = vpop.f32.mrb[20].mxu0 }
 0x144   : > { %v632_v58 = vadd.f32 %v631_v57, %v1827_v3  ;;  %v744_v59 = vpop.f32.mrb[20].mxu1  ;;  %v633_v60 = vpop.f32.mrb[21].mxu0 }
 0x145   : > { %v745_v61 = vadd.f32 %v744_v59, %v1830_v10  ;;  %v634_v62 = vadd.f32 %v633_v60, %v1833_v24  ;;  %v746_v63 = vpop.f32.mrb[21].mxu1  ;;  %v635_v0 = vpop.f32.mrb[22].mxu0 }
 0x146   : > { %946 = vst [vmem:[%s1841_s14 + $0x1e0] sm:$0xff] %v632_v58  ;;  %v747_v1 = vadd.f32 %v746_v63, %v1836_v30  ;;  %v636_v2 = vadd.f32 %v635_v0, %v1827_v3  ;;  %v748_v4 = vpop.f32.mrb[22].mxu1  ;;  %v637_v5 = vpop.f32.mrb[23].mxu0 }
 0x147   : > { %948 = vst [vmem:[%s1841_s14 + $0x1f0] sm:$0xff] %v745_v61  ;;  %947 = vst [vmem:[%s1841_s14 + $0x1e8] sm:$0xff] %v634_v62  ;;  %v749_v6 = vadd.f32 %v748_v4, %v1830_v10  ;;  %v638_v7 = vadd.f32 %v637_v5, %v1833_v24  ;;  %v750_v8 = vpop.f32.mrb[23].mxu1 }
 0x148   : > { %949 = vst [vmem:[%s1841_s14 + $0x1f8] sm:$0xff] %v747_v1  ;;  %952 = vst [vmem:[%s1841_s14 + $0x210] sm:$0xff] %v636_v2  ;;  %v751_v9 = vadd.f32 %v750_v8, %v1836_v30 }
 0x149   : > { %954 = vst [vmem:[%s1841_s14 + $0x220] sm:$0xff] %v749_v6  ;;  %953 = vst [vmem:[%s1841_s14 + $0x218] sm:$0xff] %v638_v7 }
 0x14a   : > { %955 = vst [vmem:[%s1841_s14 + $0x228] sm:$0xff] %v751_v9 }
 0x14b   : > { %v641_v11 = vpop.f32.mrb[24].mxu0 }
 0x14c   : > { %v642_v13 = vadd.f32 %v641_v11, %v1827_v3  ;;  %v754_v14 = vpop.f32.mrb[24].mxu1  ;;  %v643_v15 = vpop.f32.mrb[25].mxu0 }
 0x14d   : > { %v755_v16 = vadd.f32 %v754_v14, %v1830_v10  ;;  %v644_v17 = vadd.f32 %v643_v15, %v1833_v24  ;;  %v756_v18 = vpop.f32.mrb[25].mxu1  ;;  %v645_v20 = vpop.f32.mrb[26].mxu0 }
 0x14e   : > { %958 = vst [vmem:[%s1841_s14 + $0x240] sm:$0xff] %v642_v13  ;;  %v757_v22 = vadd.f32 %v756_v18, %v1836_v30  ;;  %v646_v23 = vadd.f32 %v645_v20, %v1827_v3  ;;  %v758_v25 = vpop.f32.mrb[26].mxu1  ;;  %v647_v26 = vpop.f32.mrb[27].mxu0 }
 0x14f   : > { %960 = vst [vmem:[%s1841_s14 + $0x250] sm:$0xff] %v755_v16  ;;  %959 = vst [vmem:[%s1841_s14 + $0x248] sm:$0xff] %v644_v17  ;;  %v759_v27 = vadd.f32 %v758_v25, %v1830_v10  ;;  %v648_v28 = vadd.f32 %v647_v26, %v1833_v24  ;;  %v760_v29 = vpop.f32.mrb[27].mxu1 }
 0x150   : > { %961 = vst [vmem:[%s1841_s14 + $0x258] sm:$0xff] %v757_v22  ;;  %964 = vst [vmem:[%s1841_s14 + $0x270] sm:$0xff] %v646_v23  ;;  %v761_v21 = vadd.f32 %v760_v29, %v1836_v30 }
 0x151   : > { %966 = vst [vmem:[%s1841_s14 + $0x280] sm:$0xff] %v759_v27  ;;  %965 = vst [vmem:[%s1841_s14 + $0x278] sm:$0xff] %v648_v28 }
 0x152   : > { %967 = vst [vmem:[%s1841_s14 + $0x288] sm:$0xff] %v761_v21 }
 0x153   : > { %v651_v19 = vpop.f32.mrb[28].mxu0 }
 0x154   : > { %v652_v38 = vadd.f32 %v651_v19, %v1827_v3  ;;  %v764_v49 = vpop.f32.mrb[28].mxu1  ;;  %v653_v56 = vpop.f32.mrb[29].mxu0 }
 0x155   : > { %v765_v33 = vadd.f32 %v764_v49, %v1830_v10  ;;  %v654_v34 = vadd.f32 %v653_v56, %v1833_v24  ;;  %v766_v35 = vpop.f32.mrb[29].mxu1  ;;  %v655_v36 = vpop.f32.mrb[30].mxu0 }
 0x156   : > { %970 = vst [vmem:[%s1841_s14 + $0x2a0] sm:$0xff] %v652_v38  ;;  %v767_v39 = vadd.f32 %v766_v35, %v1836_v30  ;;  %v656_v40 = vadd.f32 %v655_v36, %v1827_v3  ;;  %v768_v41 = vpop.f32.mrb[30].mxu1  ;;  %v657_v42 = vpop.f32.mrb[31].mxu0  ;;  %v1976_v3 = vrot.slane %v1820_v31, %v539_v37 }
 0x157   : > { %972 = vst [vmem:[%s1841_s14 + $0x2b0] sm:$0xff] %v765_v33  ;;  %971 = vst [vmem:[%s1841_s14 + $0x2a8] sm:$0xff] %v654_v34  ;;  %v769_v43 = vadd.f32 %v768_v41, %v1830_v10  ;;  %v658_v44 = vadd.f32 %v657_v42, %v1833_v24  ;;  %v770_v45 = vpop.f32.mrb[31].mxu1 }
 0x158   : > { %973 = vst [vmem:[%s1841_s14 + $0x2b8] sm:$0xff] %v767_v39  ;;  %976 = vst [vmem:[%s1841_s14 + $0x2d0] sm:$0xff] %v656_v40  ;;  %v771_v12 = vadd.f32 %v770_v45, %v1836_v30 }
 0x159   : > { %978 = vst [vmem:[%s1841_s14 + $0x2e0] sm:$0xff] %v769_v43  ;;  %977 = vst [vmem:[%s1841_s14 + $0x2d8] sm:$0xff] %v658_v44 }
 0x15a   : > { %979 = vst [vmem:[%s1841_s14 + $0x2e8] sm:$0xff] %v771_v12 }
 0x15b   : > { %v807_v10 = vpop.f32.mrb[32].mxu0 }
 0x15c   : > { %v808_v24 = vadd.f32 %v807_v10, %v1971_v46  ;;  %v847_v47 = vpop.f32.mrb[32].mxu1  ;;  %v809_v48 = vpop.f32.mrb[33].mxu0 }
 0x15d   : > { %v848_v30 = vadd.f32 %v847_v47, %v1971_v46  ;;  %v810_v50 = vadd.f32 %v809_v48, %v1976_v3  ;;  %v849_v51 = vpop.f32.mrb[33].mxu1  ;;  %v811_v52 = vpop.f32.mrb[34].mxu0 }
 0x15e   : > { %890 = vst [vmem:[%s1841_s14 + $0x20] sm:$0xff] %v808_v24  ;;  %v850_v31 = vadd.f32 %v849_v51, %v1976_v3  ;;  %v812_v53 = vadd.f32 %v811_v52, %v1971_v46  ;;  %v851_v54 = vpop.f32.mrb[34].mxu1  ;;  %v813_v55 = vpop.f32.mrb[35].mxu0 }
 0x15f   : > { %938 = vst [vmem:[%s1841_s14 + $0x1a0] sm:$0xff] %v848_v30  ;;  %891 = vst [vmem:[%s1841_s14 + $0x28] sm:$0xff] %v810_v50  ;;  %v852_v57 = vadd.f32 %v851_v54, %v1971_v46  ;;  %v814_v58 = vadd.f32 %v813_v55, %v1976_v3  ;;  %v853_v59 = vpop.f32.mrb[35].mxu1 }
 0x160   : > { %939 = vst [vmem:[%s1841_s14 + $0x1a8] sm:$0xff] %v850_v31  ;;  %896 = vst [vmem:[%s1841_s14 + $0x50] sm:$0xff] %v812_v53  ;;  %v854_v60 = vadd.f32 %v853_v59, %v1976_v3 }
 0x161   : > { %944 = vst [vmem:[%s1841_s14 + $0x1d0] sm:$0xff] %v852_v57  ;;  %897 = vst [vmem:[%s1841_s14 + $0x58] sm:$0xff] %v814_v58 }
 0x162   : > { %945 = vst [vmem:[%s1841_s14 + $0x1d8] sm:$0xff] %v854_v60 }
 0x163   : > { %v817_v61 = vpop.f32.mrb[36].mxu0 }
 0x164   : > { %v818_v62 = vadd.f32 %v817_v61, %v1971_v46  ;;  %v857_v63 = vpop.f32.mrb[36].mxu1  ;;  %v819_v0 = vpop.f32.mrb[37].mxu0 }
 0x165   : > { %v858_v1 = vadd.f32 %v857_v63, %v1971_v46  ;;  %v820_v2 = vadd.f32 %v819_v0, %v1976_v3  ;;  %v859_v4 = vpop.f32.mrb[37].mxu1  ;;  %v821_v5 = vpop.f32.mrb[38].mxu0 }
 0x166   : > { %902 = vst [vmem:[%s1841_s14 + $0x80] sm:$0xff] %v818_v62  ;;  %v860_v6 = vadd.f32 %v859_v4, %v1976_v3  ;;  %v822_v7 = vadd.f32 %v821_v5, %v1971_v46  ;;  %v861_v8 = vpop.f32.mrb[38].mxu1  ;;  %v823_v9 = vpop.f32.mrb[39].mxu0 }
 0x167   : > { %950 = vst [vmem:[%s1841_s14 + $0x200] sm:$0xff] %v858_v1  ;;  %903 = vst [vmem:[%s1841_s14 + $0x88] sm:$0xff] %v820_v2  ;;  %v862_v11 = vadd.f32 %v861_v8, %v1971_v46  ;;  %v824_v13 = vadd.f32 %v823_v9, %v1976_v3  ;;  %v863_v14 = vpop.f32.mrb[39].mxu1 }
 0x168   : > { %951 = vst [vmem:[%s1841_s14 + $0x208] sm:$0xff] %v860_v6  ;;  %908 = vst [vmem:[%s1841_s14 + $0xb0] sm:$0xff] %v822_v7  ;;  %v864_v15 = vadd.f32 %v863_v14, %v1976_v3 }
 0x169   : > { %956 = vst [vmem:[%s1841_s14 + $0x230] sm:$0xff] %v862_v11  ;;  %909 = vst [vmem:[%s1841_s14 + $0xb8] sm:$0xff] %v824_v13 }
 0x16a   : > { %957 = vst [vmem:[%s1841_s14 + $0x238] sm:$0xff] %v864_v15 }
 0x16b   : > { %v827_v16 = vpop.f32.mrb[40].mxu0 }
 0x16c   : > { %v828_v17 = vadd.f32 %v827_v16, %v1971_v46  ;;  %v867_v18 = vpop.f32.mrb[40].mxu1  ;;  %v829_v20 = vpop.f32.mrb[41].mxu0 }
 0x16d   : > { %v868_v22 = vadd.f32 %v867_v18, %v1971_v46  ;;  %v830_v23 = vadd.f32 %v829_v20, %v1976_v3  ;;  %v869_v25 = vpop.f32.mrb[41].mxu1  ;;  %v831_v26 = vpop.f32.mrb[42].mxu0 }
 0x16e   : > { %914 = vst [vmem:[%s1841_s14 + $0xe0] sm:$0xff] %v828_v17  ;;  %v870_v27 = vadd.f32 %v869_v25, %v1976_v3  ;;  %v832_v28 = vadd.f32 %v831_v26, %v1971_v46  ;;  %v871_v29 = vpop.f32.mrb[42].mxu1  ;;  %v833_v21 = vpop.f32.mrb[43].mxu0 }
 0x16f   : > { %962 = vst [vmem:[%s1841_s14 + $0x260] sm:$0xff] %v868_v22  ;;  %915 = vst [vmem:[%s1841_s14 + $0xe8] sm:$0xff] %v830_v23  ;;  %v872_v19 = vadd.f32 %v871_v29, %v1971_v46  ;;  %v834_v38 = vadd.f32 %v833_v21, %v1976_v3  ;;  %v873_v49 = vpop.f32.mrb[43].mxu1 }
 0x170   : > { %963 = vst [vmem:[%s1841_s14 + $0x268] sm:$0xff] %v870_v27  ;;  %920 = vst [vmem:[%s1841_s14 + $0x110] sm:$0xff] %v832_v28  ;;  %v874_v56 = vadd.f32 %v873_v49, %v1976_v3 }
 0x171   : > { %968 = vst [vmem:[%s1841_s14 + $0x290] sm:$0xff] %v872_v19  ;;  %921 = vst [vmem:[%s1841_s14 + $0x118] sm:$0xff] %v834_v38 }
 0x172   : > { %969 = vst [vmem:[%s1841_s14 + $0x298] sm:$0xff] %v874_v56 }
 0x173   : > { %v837_v32 = vpop.f32.mrb[44].mxu0 }
 0x174   : > { %v838_v33 = vadd.f32 %v837_v32, %v1971_v46  ;;  %v877_v34 = vpop.f32.mrb[44].mxu1  ;;  %v839_v35 = vpop.f32.mrb[45].mxu0 }
 0x175   : > { %v878_v36 = vadd.f32 %v877_v34, %v1971_v46  ;;  %v840_v37 = vadd.f32 %v839_v35, %v1976_v3  ;;  %v879_v39 = vpop.f32.mrb[45].mxu1  ;;  %v841_v40 = vpop.f32.mrb[46].mxu0 }
 0x176   : > { %926 = vst [vmem:[%s1841_s14 + $0x140] sm:$0xff] %v838_v33  ;;  %v880_v41 = vadd.f32 %v879_v39, %v1976_v3  ;;  %v842_v42 = vadd.f32 %v841_v40, %v1971_v46  ;;  %v881_v43 = vpop.f32.mrb[46].mxu1  ;;  %v843_v44 = vpop.f32.mrb[47].mxu0 }
 0x177   : > { %974 = vst [vmem:[%s1841_s14 + $0x2c0] sm:$0xff] %v878_v36  ;;  %927 = vst [vmem:[%s1841_s14 + $0x148] sm:$0xff] %v840_v37  ;;  %v882_v45 = vadd.f32 %v881_v43, %v1971_v46  ;;  %v844_v12 = vadd.f32 %v843_v44, %v1976_v3  ;;  %v883_v10 = vpop.f32.mrb[47].mxu1 }
 0x178   : > { %975 = vst [vmem:[%s1841_s14 + $0x2c8] sm:$0xff] %v880_v41  ;;  %932 = vst [vmem:[%s1841_s14 + $0x170] sm:$0xff] %v842_v42  ;;  %v884_v24 = vadd.f32 %v883_v10, %v1976_v3 }
 0x179   : > { %980 = vst [vmem:[%s1841_s14 + $0x2f0] sm:$0xff] %v882_v45  ;;  %933 = vst [vmem:[%s1841_s14 + $0x178] sm:$0xff] %v844_v12 }
 0x17a   : > { %981 = vst [vmem:[%s1841_s14 + $0x2f8] sm:$0xff] %v884_v24 }
 0x17b PF: > { %s13_s12 = sadd.s32 1, %s1100_s12  }
 0x17c   : > { %p10_p4 = scmp.ge.s32.totalorder %s13_s12, 4  }
 0x17e   :  { %12 = sbr.rel (!%p10_p4) target bundleno = 1 (0x1), region = 62 }

// kernel: camembert_classifier_forward.12
= control target key start
LH: loop header
LB: loop body
LE: loop exit
PB: predicated region body
PF: predicated region fallthrough
CT: control target
= control target key end

     0   :  { %s2179_s0 = inlined_call_operand.vmem [shape: f32[256,768], index: 0, kind: input, shape index: {}, may-alias: {0,1,2}]   ;;  %s2180_s1 = inlined_call_operand.vmem [shape: f32[256,768], index: 1, kind: input, shape index: {}, may-alias: {0,1,2}]   ;;  %s2181_s2 = inlined_call_operand.vmem [shape: f32[256,768], index: 2, kind: input, shape index: {}, may-alias: {0,1,2}]   ;;  %s2182_s3 = inlined_call_operand.vmem [shape: f32[2,1,128], index: 3, kind: input, shape index: {}]   ;;  %s2183_s4 = inlined_call_operand.vmem [shape: f32[256,256], index: 4, kind: output, shape index: {}]  }
   0x1   :  { %2185 = sst [smem:[#allocation8_spill]] %s2183_s4 }
   0x2   :  { %s1692_s15 = smov 0   ;;  %s1694_s16 = smov 0  }
   0x3   :  { %s1696_s17 = smov 0   ;;  %s1698_s18 = smov 0  }
   0x4   :  { %s1700_s19 = smov 0   ;;  %s1702_s20 = smov 0  }
   0x5   :  { %s1704_s21 = smov 0   ;;  %s1706_s22 = smov 0  }
   0x6   :  { %s1708_s23 = smov 0   ;;  %s1710_s24 = smov 0  }
   0x7   :  { %s1712_s25 = smov 0  }
   0x8 LB: > { %2186 = sst [smem:[#allocation6_spill]] %s1648_s21  ;;  %s23_s27 = sadd.s32 1, %s1656_s23  ;;  %s1664_s25 = sphi %s1712_s25, %s14_s25   ;;  %s1660_s24 = sphi %s1710_s24, %s2205_s24   ;;  %s1656_s23 = sphi %s1708_s23, %s2204_s23   ;;  %s1652_s22 = sphi %s1706_s22, %s2203_s22   ;;  %s1648_s21 = sphi %s1704_s21, %s2202_s21   ;;  %s1644_s20 = sphi %s1702_s20, %s2201_s20   ;;  %s1640_s19 = sphi %s1700_s19, %s2200_s19   ;;  %s1636_s18 = sphi %s1698_s18, %s2199_s18   ;;  %s1632_s17 = sphi %s1696_s17, %s2198_s17   ;;  %s1628_s16 = sphi %s1694_s16, %s2197_s16   ;;  %s1624_s15 = sphi %s1692_s15, %s2196_s15  }
   0x9   : > { %p24_p0 = scmp.ge.s32.totalorder %s23_s27, 2  ;;  %s26_s28 = sadd.s32 1, %s1660_s24 }
   0xa   : > { %s35_s29 = sadd.s32 1, %s1644_s20  ;;  %p42_p1 = scmp.ne.s32.totalorder %s1644_s20, %s1640_s19 }
   0xb   : > { %s2207_s27 = smov (%p24_p0, %s23_s27), 0  ;;  %s2209_s28 = smov (!%p24_p0, %s26_s28), %s1660_s24 }
   0xc   : > { %s31_s30 = ssub.s32 %s1656_s23, %s2207_s27  ;;  %p43_p2 = scmp.eq.s32.totalorder %s1664_s25, 0 }
   0xd   : > { %p28_p3 = scmp.ge.s32.totalorder %s2209_s28, 2  ;;  %s58_s5 = sadd.s32 2, %s1656_s23 }
   0xe   : > { %p1765_p4 = por %p43_p2, %p42_p1  ;;  %s59_s7 = sadd.s32 2, %s2207_s27 }
   0xf   : > { %s2211_s28 = smov (%p28_p3, %s2209_s28), 0  ;;  %s61_s8 = ssub.s32 %s58_s5, %s59_s7 }
  0x10   : > { %2188 = sst [smem:[#allocation7_spill]] %s2211_s28  ;;  %s65_s9 = sadd.s32 1, %s1636_s18 }
  0x11   : > { %s30_s10 = ssub.s32 %s1660_s24, %s2211_s28  ;;  %p72_p5 = scmp.ne.s32.totalorder %s1636_s18, %s1632_s17 }
  0x12   : > { %s32_s11 = sor.u32 %s31_s30, %s30_s10  ;;  %s62_s12 = sor.u32 %s61_s8, %s30_s10 }
  0x13   : > { %p33_p6 = scmp.eq.s32.totalorder %s32_s11, 0  ;;  %p63_p7 = scmp.eq.s32.totalorder %s62_s12, 0 }
  0x14   : > { %p1779_p8 = por %p72_p5, %p43_p2  ;;  %s88_s14 = sadd.s32 4, %s1656_s23 }
  0x15   : > { %s1785_s26 = scalar_select %p33_p6, %s1644_s20, %s35_s29  }
  0x16   : > { %s1788_s5 = scalar_select %p63_p7, %s1636_s18, %s65_s9  }
  0x17   : > { %s89_s7 = sadd.s32 4, %s2207_s27  ;;  %s95_s28 = sadd.s32 1, %s1628_s16 }
  0x18   : > { %s91_s4 = ssub.s32 %s88_s14, %s89_s7  ;;  %p102_p9 = scmp.ne.s32.totalorder %s1628_s16, %s1624_s15 }
  0x19   : > { %s92_s30 = sor.u32 %s91_s4, %s30_s10  ;;  %s2190_s21 = sadd.s32 4294967295, %s1664_s25  }
  0x1a   : > { %p160_p10 = scmp.eq.s32.totalorder %s2190_s21, 3  ;;  %p93_p11 = scmp.eq.s32.totalorder %s92_s30, 0 }
  0x1b   : > { %p1798_p12 = por %p102_p9, %p43_p2  ;;  %p1275_p0 = scmp.ge.s32.totalorder %s1664_s25, 4 }
  0x1c   : > { %p1805_p13 = por %p160_p10, %p42_p1 }
  0x1d   : > { %s1810_s29 = scalar_select %p93_p11, %s1628_s16, %s95_s28  }
  0x1e   : > { %182 = sbr.rel (%p1275_p0) target bundleno = 82 (0x52), region = 16 }
  0x25   : > { %185 = sbr.rel (!%p1765_p4) target bundleno = 52 (0x34), region = 20  ;;  %s187_s4 = sand.u32 (%p1765_p4), 1, %s1644_s20  }
  0x26   : > { %s1424_s21 = smul.u32 (%p1765_p4), 96, %s1660_s24  ;;  %s1276_s9 = sshll.u32 (%p1765_p4), %s187_s4, 7 }
  0x27   : > { %s189_s28 = scalar_lea.vmem (%p1765_p4), [#allocation2], %s1276_s9 }
  0x28   : > { %s192_s10 = sadd.s32 (%p1765_p4), %s1656_s23, %s1424_s21 }
  0x29   : > { %s1279_s12 = sshll.u32 (%p1765_p4), %s192_s10, 3 }
  0x2a   : > { %s1821_s30 = scalar_lea.vmem (%p1765_p4), %s2179_s0, %s1279_s12 }
  0x2b   : > { %v252_v0 = vld [vmem:[%s1821_s30] sm:$0xff] (%p1765_p4)  ;;  %v254_v1 = vld [vmem:[%s1821_s30 + $0x30] sm:$0xff] (%p1765_p4) }
  0x2c   : > { %v256_v2 = vld [vmem:[%s1821_s30 + $0x60] sm:$0xff]  ;;  %253 = vst [vmem:[%s189_s28] sm:$0xff] %v252_v0  ;;  %255 = vst [vmem:[%s189_s28 + $0x8] sm:$0xff] %v254_v1  ;;  %v258_v3 = vld [vmem:[%s1821_s30 + $0x90] sm:$0xff] }
  0x2d   : > { %257 = vst [vmem:[%s189_s28 + $0x10] sm:$0xff] %v256_v2  ;;  %v260_v4 = vld [vmem:[%s1821_s30 + $0xc0] sm:$0xff]  ;;  %v262_v5 = vld [vmem:[%s1821_s30 + $0xf0] sm:$0xff]  ;;  %259 = vst [vmem:[%s189_s28 + $0x18] sm:$0xff] %v258_v3 }
  0x2e   : > { %261 = vst [vmem:[%s189_s28 + $0x20] sm:$0xff] %v260_v4  ;;  %263 = vst [vmem:[%s189_s28 + $0x28] sm:$0xff] %v262_v5  ;;  %v264_v6 = vld [vmem:[%s1821_s30 + $0x120] sm:$0xff]  ;;  %v266_v7 = vld [vmem:[%s1821_s30 + $0x150] sm:$0xff] }
  0x2f   : > { %v268_v8 = vld [vmem:[%s1821_s30 + $0x180] sm:$0xff]  ;;  %265 = vst [vmem:[%s189_s28 + $0x30] sm:$0xff] %v264_v6  ;;  %267 = vst [vmem:[%s189_s28 + $0x38] sm:$0xff] %v266_v7  ;;  %v270_v9 = vld [vmem:[%s1821_s30 + $0x1b0] sm:$0xff] }
  0x30   : > { %269 = vst [vmem:[%s189_s28 + $0x40] sm:$0xff] %v268_v8  ;;  %v272_v10 = vld [vmem:[%s1821_s30 + $0x1e0] sm:$0xff]  ;;  %v274_v11 = vld [vmem:[%s1821_s30 + $0x210] sm:$0xff]  ;;  %271 = vst [vmem:[%s189_s28 + $0x48] sm:$0xff] %v270_v9 }
  0x31   : > { %273 = vst [vmem:[%s189_s28 + $0x50] sm:$0xff] %v272_v10  ;;  %275 = vst [vmem:[%s189_s28 + $0x58] sm:$0xff] %v274_v11  ;;  %v276_v12 = vld [vmem:[%s1821_s30 + $0x240] sm:$0xff]  ;;  %v278_v13 = vld [vmem:[%s1821_s30 + $0x270] sm:$0xff] }
  0x32   : > { %v280_v14 = vld [vmem:[%s1821_s30 + $0x2a0] sm:$0xff]  ;;  %277 = vst [vmem:[%s189_s28 + $0x60] sm:$0xff] %v276_v12  ;;  %279 = vst [vmem:[%s189_s28 + $0x68] sm:$0xff] %v278_v13  ;;  %v282_v15 = vld [vmem:[%s1821_s30 + $0x2d0] sm:$0xff] }
  0x33   : > { %281 = vst [vmem:[%s189_s28 + $0x70] sm:$0xff] %v280_v14  ;;  %283 = vst [vmem:[%s189_s28 + $0x78] sm:$0xff] %v282_v15 }
  0x34 PF: > { %289 = sbr.rel (!%p1779_p8) target bundleno = 67 (0x43), region = 58  ;;  %s291_s6 = sand.u32 (%p1779_p8), 1, %s1636_s18  }
  0x35   : > { %s1169_s4 = smul.u32 (%p1779_p8), 96, %s1660_s24  ;;  %s1280_s21 = sshll.u32 (%p1779_p8), %s291_s6, 7 }
  0x36   : > { %s293_s13 = scalar_lea.vmem (%p1779_p8), [#allocation3], %s1280_s21 }
  0x37   : > { %s1170_s9 = sadd.s32 (%p1779_p8), %s1656_s23, %s1169_s4 }
  0x38   : > { %s1281_s10 = sshll.u32 (%p1779_p8), %s1170_s9, 3 }
  0x39   : > { %s1847_s7 = scalar_lea.vmem (%p1779_p8), %s2180_s1, %s1281_s10 }
  0x3a   : > { %v1282_v16 = vld [vmem:[%s1847_s7 + $0x10] sm:$0xff] (%p1779_p8)  ;;  %v1283_v17 = vld [vmem:[%s1847_s7 + $0x40] sm:$0xff] (%p1779_p8) }
  0x3b   : > { %v1284_v18 = vld [vmem:[%s1847_s7 + $0x70] sm:$0xff]  ;;  %358 = vst [vmem:[%s293_s13] sm:$0xff] %v1282_v16  ;;  %360 = vst [vmem:[%s293_s13 + $0x8] sm:$0xff] %v1283_v17  ;;  %v1285_v19 = vld [vmem:[%s1847_s7 + $0xa0] sm:$0xff] }
  0x3c   : > { %362 = vst [vmem:[%s293_s13 + $0x10] sm:$0xff] %v1284_v18  ;;  %v1286_v20 = vld [vmem:[%s1847_s7 + $0xd0] sm:$0xff]  ;;  %v1287_v21 = vld [vmem:[%s1847_s7 + $0x100] sm:$0xff]  ;;  %364 = vst [vmem:[%s293_s13 + $0x18] sm:$0xff] %v1285_v19 }
  0x3d   : > { %366 = vst [vmem:[%s293_s13 + $0x20] sm:$0xff] %v1286_v20  ;;  %368 = vst [vmem:[%s293_s13 + $0x28] sm:$0xff] %v1287_v21  ;;  %v1288_v22 = vld [vmem:[%s1847_s7 + $0x130] sm:$0xff]  ;;  %v1289_v23 = vld [vmem:[%s1847_s7 + $0x160] sm:$0xff] }
  0x3e   : > { %v1290_v24 = vld [vmem:[%s1847_s7 + $0x190] sm:$0xff]  ;;  %370 = vst [vmem:[%s293_s13 + $0x30] sm:$0xff] %v1288_v22  ;;  %372 = vst [vmem:[%s293_s13 + $0x38] sm:$0xff] %v1289_v23  ;;  %v1291_v25 = vld [vmem:[%s1847_s7 + $0x1c0] sm:$0xff] }
  0x3f   : > { %374 = vst [vmem:[%s293_s13 + $0x40] sm:$0xff] %v1290_v24  ;;  %v1292_v26 = vld [vmem:[%s1847_s7 + $0x1f0] sm:$0xff]  ;;  %v1293_v27 = vld [vmem:[%s1847_s7 + $0x220] sm:$0xff]  ;;  %376 = vst [vmem:[%s293_s13 + $0x48] sm:$0xff] %v1291_v25 }
  0x40   : > { %378 = vst [vmem:[%s293_s13 + $0x50] sm:$0xff] %v1292_v26  ;;  %380 = vst [vmem:[%s293_s13 + $0x58] sm:$0xff] %v1293_v27  ;;  %v1294_v28 = vld [vmem:[%s1847_s7 + $0x250] sm:$0xff]  ;;  %v1295_v29 = vld [vmem:[%s1847_s7 + $0x280] sm:$0xff] }
  0x41   : > { %v1296_v30 = vld [vmem:[%s1847_s7 + $0x2b0] sm:$0xff]  ;;  %382 = vst [vmem:[%s293_s13 + $0x60] sm:$0xff] %v1294_v28  ;;  %384 = vst [vmem:[%s293_s13 + $0x68] sm:$0xff] %v1295_v29  ;;  %v1297_v31 = vld [vmem:[%s1847_s7 + $0x2e0] sm:$0xff] }
  0x42   : > { %386 = vst [vmem:[%s293_s13 + $0x70] sm:$0xff] %v1296_v30  ;;  %388 = vst [vmem:[%s293_s13 + $0x78] sm:$0xff] %v1297_v31 }
  0x43 PF: > { %394 = sbr.rel (!%p1798_p12) target bundleno = 82 (0x52), region = 96  ;;  %s396_s30 = sand.u32 (%p1798_p12), 1, %s1628_s16  }
  0x44   : > { %s1176_s28 = smul.u32 (%p1798_p12), 96, %s1660_s24  ;;  %s1298_s6 = sshll.u32 (%p1798_p12), %s396_s30, 7 }
  0x45   : > { %s398_s8 = scalar_lea.vmem (%p1798_p12), [#allocation4], %s1298_s6 }
  0x46   : > { %s1177_s4 = sadd.s32 (%p1798_p12), %s1656_s23, %s1176_s28 }
  0x47   : > { %s1299_s21 = sshll.u32 (%p1798_p12), %s1177_s4, 3 }
  0x48   : > { %s1873_s12 = scalar_lea.vmem (%p1798_p12), %s2181_s2, %s1299_s21 }
  0x49   : > { %v1300_v32 = vld [vmem:[%s1873_s12 + $0x20] sm:$0xff] (%p1798_p12)  ;;  %v1301_v33 = vld [vmem:[%s1873_s12 + $0x50] sm:$0xff] (%p1798_p12) }
  0x4a   : > { %v1302_v34 = vld [vmem:[%s1873_s12 + $0x80] sm:$0xff]  ;;  %463 = vst [vmem:[%s398_s8] sm:$0xff] %v1300_v32  ;;  %465 = vst [vmem:[%s398_s8 + $0x8] sm:$0xff] %v1301_v33  ;;  %v1303_v35 = vld [vmem:[%s1873_s12 + $0xb0] sm:$0xff] }
  0x4b   : > { %467 = vst [vmem:[%s398_s8 + $0x10] sm:$0xff] %v1302_v34  ;;  %v1304_v36 = vld [vmem:[%s1873_s12 + $0xe0] sm:$0xff]  ;;  %v1305_v37 = vld [vmem:[%s1873_s12 + $0x110] sm:$0xff]  ;;  %469 = vst [vmem:[%s398_s8 + $0x18] sm:$0xff] %v1303_v35 }
  0x4c   : > { %471 = vst [vmem:[%s398_s8 + $0x20] sm:$0xff] %v1304_v36  ;;  %473 = vst [vmem:[%s398_s8 + $0x28] sm:$0xff] %v1305_v37  ;;  %v1306_v38 = vld [vmem:[%s1873_s12 + $0x140] sm:$0xff]  ;;  %v1307_v39 = vld [vmem:[%s1873_s12 + $0x170] sm:$0xff] }
  0x4d   : > { %v1308_v40 = vld [vmem:[%s1873_s12 + $0x1a0] sm:$0xff]  ;;  %475 = vst [vmem:[%s398_s8 + $0x30] sm:$0xff] %v1306_v38  ;;  %477 = vst [vmem:[%s398_s8 + $0x38] sm:$0xff] %v1307_v39  ;;  %v1309_v41 = vld [vmem:[%s1873_s12 + $0x1d0] sm:$0xff] }
  0x4e   : > { %479 = vst [vmem:[%s398_s8 + $0x40] sm:$0xff] %v1308_v40  ;;  %v1310_v42 = vld [vmem:[%s1873_s12 + $0x200] sm:$0xff]  ;;  %v1311_v43 = vld [vmem:[%s1873_s12 + $0x230] sm:$0xff]  ;;  %481 = vst [vmem:[%s398_s8 + $0x48] sm:$0xff] %v1309_v41 }
  0x4f   : > { %483 = vst [vmem:[%s398_s8 + $0x50] sm:$0xff] %v1310_v42  ;;  %485 = vst [vmem:[%s398_s8 + $0x58] sm:$0xff] %v1311_v43  ;;  %v1312_v44 = vld [vmem:[%s1873_s12 + $0x260] sm:$0xff]  ;;  %v1313_v45 = vld [vmem:[%s1873_s12 + $0x290] sm:$0xff] }
  0x50   : > { %v1314_v46 = vld [vmem:[%s1873_s12 + $0x2c0] sm:$0xff]  ;;  %487 = vst [vmem:[%s398_s8 + $0x60] sm:$0xff] %v1312_v44  ;;  %489 = vst [vmem:[%s398_s8 + $0x68] sm:$0xff] %v1313_v45  ;;  %v1315_v47 = vld [vmem:[%s1873_s12 + $0x2f0] sm:$0xff] }
  0x51   : > { %491 = vst [vmem:[%s398_s8 + $0x70] sm:$0xff] %v1314_v46  ;;  %493 = vst [vmem:[%s398_s8 + $0x78] sm:$0xff] %v1315_v47 }
  0x52 PF: > { %p1316_p1 = scmp.ge.s32.totalorder %s1664_s25, 1  ;;  %p504_p2 = scmp.lt.s32.totalorder %s1664_s25, 5 }
  0x54   : > { %p505_p3 = pnand %p1316_p1, %p504_p2 }
  0x55   : > { %s518_s14 = sand.u32 (!%p505_p3), 1, %s1632_s17   ;;  %s511_s7 = sand.u32 (!%p505_p3), 1, %s1640_s19   ;;  %v751_v32 = vlaneseq (!%p505_p3)  ;;  %v1666_v36 = vmov (!%p505_p3), -1e+09  }
  0x56   : > { %508 = sbr.rel (%p505_p3) target bundleno = 942 (0x3ae), region = 138  ;;  %s1318_s13 = sshll.u32 (!%p505_p3), %s518_s14, 7 }
  0x57   : > { %s1895_s30 = sshll.u32 (!%p505_p3), %s511_s7, 7  ;;  %s1897_s28 = scalar_lea.vmem (!%p505_p3), [#allocation3], %s1318_s13  ;;  %v752_v34 = vshrl.u32 (!%p505_p3), %v751_v32, 7 }
  0x58   : > { %v586_v48 = vld [vmem:[%s1897_s28] sm:$0xff] (!%p505_p3)  ;;  %v587_v49 = vld [vmem:[%s1897_s28 + $0x8] sm:$0xff] (!%p505_p3)  ;;  %v588_v50 = vld [vmem:[%s1897_s28 + $0x10] sm:$0xff] (!%p505_p3)  ;;  %s1904_s17 = scalar_lea.vmem (!%p505_p3), [#allocation2], %s1895_s30  ;;  %p565_p4 = scmp.lt.s32.totalorder (!%p505_p3), %s1652_s22, 1 }
  0x59   : > { %v626_v51 = vpack.c.bf16 (!%p505_p3), %v587_v49, %v586_v48  ;;  %v589_v52 = vld [vmem:[%s1897_s28 + $0x18] sm:$0xff] (!%p505_p3)  ;;  %v570_v54 = vld [vmem:[%s1904_s17] sm:$0xff] (!%p505_p3)  ;;  %v571_v55 = vld [vmem:[%s1904_s17 + $0x8] sm:$0xff] (!%p505_p3)  ;;  %v753_v35 = vsub.s32 (!%p505_p3), 0, %v752_v34  ;;  %s525_s9 = sand.u32 (!%p505_p3), 1, %s1624_s15   ;;  %s2105_s15 = scalar_lea.vmem (!%p505_p3), [#allocation5], %s1895_s30 }
  0x5a   : > { %v627_v53 = vpack.c.bf16 (!%p505_p3), %v589_v52, %v588_v50  ;;  %v590_v56 = vld [vmem:[%s1897_s28 + $0x20] sm:$0xff] (!%p505_p3)  ;;  %v591_v57 = vld [vmem:[%s1897_s28 + $0x28] sm:$0xff] (!%p505_p3)  ;;  %v618_v58 = vpack.c.bf16 (!%p505_p3), %v571_v55, %v570_v54  ;;  %v592_v60 = vld [vmem:[%s1897_s28 + $0x30] sm:$0xff] (!%p505_p3)  ;;  %s1319_s10 = sshll.u32 (!%p505_p3), %s525_s9, 7 }
  0x5b   : > { %1360 = vmatprep.subr.bf16.mxu0 (!%p505_p3), %v626_v51  ;;  %v628_v59 = vpack.c.bf16 (!%p505_p3), %v591_v57, %v590_v56  ;;  %v593_v61 = vld [vmem:[%s1897_s28 + $0x38] sm:$0xff] (!%p505_p3)  ;;  %v594_v63 = vld [vmem:[%s1897_s28 + $0x40] sm:$0xff] (!%p505_p3)  ;;  %v595_v0 = vld [vmem:[%s1897_s28 + $0x48] sm:$0xff] (!%p505_p3)  ;;  %s2006_s12 = scalar_lea.vmem (!%p505_p3), [#allocation4], %s1319_s10 }
  0x5c   : > { %1361 = vmatpush3.bf16.xpose.msra.mxu0 (!%p505_p3), %v626_v51  ;;  %1376 = vmatprep.mubr.bf16.mxu0 (!%p505_p3), %v618_v58  ;;  %v629_v62 = vpack.c.bf16 (!%p505_p3), %v593_v61, %v592_v60  ;;  %v630_v1 = vpack.c.bf16 (!%p505_p3), %v595_v0, %v594_v63  ;;  %v596_v2 = vld [vmem:[%s1897_s28 + $0x50] sm:$0xff] (!%p505_p3)  ;;  %v597_v3 = vld [vmem:[%s1897_s28 + $0x58] sm:$0xff] (!%p505_p3)  ;;  %v598_v5 = vld [vmem:[%s1897_s28 + $0x60] sm:$0xff] (!%p505_p3) }
  0x5d   : > { %1362 = vmatprep.subr.bf16.mxu0 %v627_v53  ;;  %v631_v4 = vpack.c.bf16 %v597_v3, %v596_v2  ;;  %v599_v6 = vld [vmem:[%s1897_s28 + $0x68] sm:$0xff]  ;;  %v600_v8 = vld [vmem:[%s1897_s28 + $0x70] sm:$0xff]  ;;  %v601_v9 = vld [vmem:[%s1897_s28 + $0x78] sm:$0xff]  ;;  %s566_s19 = scalar_select %p565_p4, %s1652_s22, 1 }
  0x5e   : > { %v632_v7 = vpack.c.bf16 %v599_v6, %v598_v5  ;;  %v633_v10 = vpack.c.bf16 %v601_v9, %v600_v8  ;;  %v572_v11 = vld [vmem:[%s1904_s17 + $0x10] sm:$0xff]  ;;  %v573_v12 = vld [vmem:[%s1904_s17 + $0x18] sm:$0xff]  ;;  %v574_v13 = vld [vmem:[%s1904_s17 + $0x20] sm:$0xff]  ;;  %s2193_s8 = sld [smem:[#allocation6_spill]] (%p1805_p13)  ;;  %s1327_s14 = sshll.u32 (%p1805_p13), %s1652_s22, 5 }
  0x5f   : > { %v575_v14 = vld [vmem:[%s1904_s17 + $0x28] sm:$0xff]  ;;  %v619_v15 = vpack.c.bf16 %v573_v12, %v572_v11  ;;  %v576_v17 = vld [vmem:[%s1904_s17 + $0x30] sm:$0xff]  ;;  %v577_v18 = vld [vmem:[%s1904_s17 + $0x38] sm:$0xff]  ;;  %s567_s21 = scalar_lea.vmem %s2182_s3, %s566_s19  ;;  %s2194_s28 = sld [smem:[#allocation8_spill]] (%p1805_p13) }
  0x60   : > { %v620_v16 = vpack.c.bf16 %v575_v14, %v574_v13  ;;  %v578_v19 = vld [vmem:[%s1904_s17 + $0x40] sm:$0xff]  ;;  %v579_v20 = vld [vmem:[%s1904_s17 + $0x48] sm:$0xff]  ;;  %v621_v21 = vpack.c.bf16 %v577_v18, %v576_v17  ;;  %v580_v23 = vld [vmem:[%s1904_s17 + $0x50] sm:$0xff] }
  0x61   : > { %v622_v22 = vpack.c.bf16 %v579_v20, %v578_v19  ;;  %v581_v24 = vld [vmem:[%s1904_s17 + $0x58] sm:$0xff]  ;;  %v582_v25 = vld [vmem:[%s1904_s17 + $0x60] sm:$0xff]  ;;  %v583_v26 = vld [vmem:[%s1904_s17 + $0x68] sm:$0xff] }
  0x62   : > { %v623_v27 = vpack.c.bf16 %v581_v24, %v580_v23  ;;  %v624_v28 = vpack.c.bf16 %v583_v26, %v582_v25  ;;  %v584_v29 = vld [vmem:[%s1904_s17 + $0x70] sm:$0xff]  ;;  %v585_v30 = vld [vmem:[%s1904_s17 + $0x78] sm:$0xff]  ;;  %v747_v33 = vld [vmem:[%s567_s21] sm:$0x1] }
  0x63   : > { %v625_v31 = vpack.c.bf16 %v585_v30, %v584_v29  ;;  %vm748_vm0 = vcmp.gt.f32.partialorder %v747_v33, 0.5  ;;  %v602_v23 = vld [vmem:[%s2006_s12] sm:$0xff]  ;;  %v603_v24 = vld [vmem:[%s2006_s12 + $0x8] sm:$0xff]  ;;  %v604_v25 = vld [vmem:[%s2006_s12 + $0x10] sm:$0xff] }
  0x64   : > { %1363 = vmatpush3.bf16.xpose.msra.mxu0 %v627_v53  ;;  %v749_v37 = vsel %vm748_vm0, 0.0, %v1666_v36  ;;  %v924_v26 = vpack.c.bf16 %v603_v24, %v602_v23  ;;  %v606_v29 = vld [vmem:[%s2006_s12 + $0x20] sm:$0xff]  ;;  %v607_v30 = vld [vmem:[%s2006_s12 + $0x28] sm:$0xff]  ;;  %v608_v24 = vld [vmem:[%s2006_s12 + $0x30] sm:$0xff]  ;;  %s1054_s11 = sadd.s32 (%p1805_p13), %s2193_s8, %s1327_s14 }
  0x65   : > { %1364 = vmatprep.subr.bf16.mxu0 %v628_v59  ;;  %v1939_v38 = vrot.slane %v749_v37, %v753_v35  ;;  %s1324_s7 = sshll.u32 (%p1805_p13), %s1054_s11, 3 }
  0x66   : > { %1392 = vmatprep.subr.bf16.mxu1 %v924_v26  ;;  %s1056_s17 = scalar_lea.vmem (%p1805_p13), %s2194_s28, %s1324_s7 }
  0x67   : > { %1393 = vmatpush3.bf16.msra.mxu1 %v924_v26 }
  0x6c   : > { %1365 = vmatpush3.bf16.xpose.msra.mxu0 %v628_v59 }
  0x6d   : > { %1366 = vmatprep.subr.bf16.mxu0 %v629_v62 }
  0x74   : > { %1367 = vmatpush3.bf16.xpose.msra.mxu0 %v629_v62 }
  0x75   : > { %1368 = vmatprep.subr.bf16.mxu0 %v630_v1 }
  0x7c   : > { %1369 = vmatpush3.bf16.xpose.msra.mxu0 %v630_v1 }
  0x7d   : > { %1370 = vmatprep.subr.bf16.mxu0 %v631_v4 }
  0x84   : > { %1371 = vmatpush3.bf16.xpose.msra.mxu0 %v631_v4 }
  0x85   : > { %1372 = vmatprep.subr.bf16.mxu0 %v632_v7 }
  0x8c   : > { %1373 = vmatpush3.bf16.xpose.msra.mxu0 %v632_v7 }
  0x8d   : > { %1374 = vmatprep.subr.bf16.mxu0 %v633_v10 }
  0x94   : > { %1375 = vmatpush3.bf16.xpose.msra.mxu0 %v633_v10 }
  0x9b   : > { %1377 = vmatmul.mubr.bf16.vlgmr.msra.gmra.mrb[0].mxu0 %v619_v15 }
  0x9c   : > { %1380 = vmatprep.mubr.bf16.mxu0 %v620_v16 }
  0xa3   : > { %1381 = vmatmul.mubr.bf16.gmra.mrb[4].mxu0 %v621_v21 }
  0xa4   : > { %1384 = vmatprep.mubr.bf16.mxu0 %v622_v22 }
  0xab   : > { %1385 = vmatmul.mubr.bf16.gmra.mrb[8].mxu0 %v623_v27  ;;  %v605_v27 = vld [vmem:[%s2006_s12 + $0x18] sm:$0xff] }
  0xac   : > { %1388 = vmatprep.mubr.bf16.mxu0 %v624_v28  ;;  %v925_v28 = vpack.c.bf16 %v605_v27, %v604_v25  ;;  %v609_v25 = vld [vmem:[%s2006_s12 + $0x38] sm:$0xff] }
  0xae   : > { %1394 = vmatprep.subr.bf16.mxu1 %v925_v28 }
  0xaf   : > { %1395 = vmatpush3.bf16.msra.mxu1 %v925_v28  ;;  %v927_v28 = vpack.c.bf16 %v609_v25, %v608_v24 }
  0xb3   : > { %1389 = vmatmul.mubr.bf16.gmra.mrb[12].mxu0 %v625_v31  ;;  %v926_v31 = vpack.c.bf16 %v607_v30, %v606_v29 }
  0xb5   : > { %1396 = vmatprep.subr.bf16.mxu1 %v926_v31 }
  0xb6   : > { %1397 = vmatpush3.bf16.msra.mxu1 %v926_v31  ;;  %v610_v31 = vld [vmem:[%s2006_s12 + $0x40] sm:$0xff] }
  0xb7   : > { %1398 = vmatprep.subr.bf16.mxu1 %v927_v28 }
  0xba   : > { %1399 = vmatpush3.bf16.msra.mxu1 %v927_v28 }
 0x16e   : > { %v1378_v39 = vpop.f32.mrb[0].mxu0 }
 0x16f   : > { %v733_v40 = vmul.f32 0.088388346, %v1378_v39  ;;  %v668_v41 = vpop.f32.mrb[1].mxu0 }
 0x170   : > { %v731_v42 = vmul.f32 0.088388346, %v668_v41  ;;  %v1379_v43 = vpop.f32.mrb[2].mxu0 }
 0x171   : > { %v734_v44 = vmul.f32 0.088388346, %v1379_v43  ;;  %v671_v45 = vpop.f32.mrb[3].mxu0  ;;  %v1942_v46 = vadd.f32 %v1939_v38, %v733_v40 }
 0x172   : > { %v732_v47 = vmul.f32 0.088388346, %v671_v45  ;;  %v1945_v48 = vadd.f32 %v1939_v38, %v731_v42 }
 0x173   : > { %776 = vmax.xlane.f32.xlu1 %v1942_v46  ;;  %v1950_v49 = vadd.f32 %v1939_v38, %v734_v44 }
 0x174   : > { %772 = vmax.xlane.f32.xlu0 %v1945_v48  ;;  %v1953_v51 = vadd.f32 %v1939_v38, %v732_v47 }
 0x176   : > { %v1382_v50 = vpop.f32.mrb[4].mxu0 }
 0x177   : > { %778 = vmax.xlane.f32.xlu1 %v1950_v49  ;;  %v684_v52 = vpop.f32.mrb[5].mxu0  ;;  %v737_v56 = vmul.f32 0.088388346, %v1382_v50 }
 0x178   : > { %v735_v53 = vmul.f32 0.088388346, %v684_v52  ;;  %774 = vmax.xlane.f32.xlu0 %v1953_v51  ;;  %v1383_v54 = vpop.f32.mrb[6].mxu0 }
 0x179   : > { %v687_v55 = vpop.f32.mrb[7].mxu0  ;;  %v738_v59 = vmul.f32 0.088388346, %v1383_v54  ;;  %v1966_v62 = vadd.f32 %v1939_v38, %v737_v56 }
 0x17a   : > { %v736_v57 = vmul.f32 0.088388346, %v687_v55  ;;  %v1958_v58 = vadd.f32 %v1939_v38, %v735_v53 }
 0x17b   : > { %v1970_v2 = vadd.f32 %v1939_v38, %v738_v59 }
 0x17c   : > { %780 = vmax.xlane.f32.xlu0 %v1958_v58  ;;  %v1962_v60 = vadd.f32 %v1939_v38, %v736_v57 }
 0x17e   : > { %782 = vmax.xlane.f32.xlu1 %v1962_v60  ;;  %v1386_v61 = vpop.f32.mrb[8].mxu0 }
 0x17f   : > { %v700_v63 = vpop.f32.mrb[9].mxu0  ;;  %v741_v4 = vmul.f32 0.088388346, %v1386_v61 }
 0x180   : > { %v739_v0 = vmul.f32 0.088388346, %v700_v63  ;;  %784 = vmax.xlane.f32.xlu0 %v1966_v62  ;;  %v1387_v1 = vpop.f32.mrb[10].mxu0 }
 0x181   : > { %v703_v3 = vpop.f32.mrb[11].mxu0  ;;  %v742_v7 = vmul.f32 0.088388346, %v1387_v1  ;;  %v1982_v10 = vadd.f32 %v1939_v38, %v741_v4 }
 0x182   : > { %v740_v5 = vmul.f32 0.088388346, %v703_v3  ;;  %786 = vmax.xlane.f32.xlu1 %v1970_v2  ;;  %v1974_v6 = vadd.f32 %v1939_v38, %v739_v0 }
 0x183   : > { %v1986_v14 = vadd.f32 %v1939_v38, %v742_v7 }
 0x184   : > { %788 = vmax.xlane.f32.xlu0 %v1974_v6  ;;  %v1978_v8 = vadd.f32 %v1939_v38, %v740_v5 }
 0x186   : > { %790 = vmax.xlane.f32.xlu1 %v1978_v8  ;;  %v1390_v9 = vpop.f32.mrb[12].mxu0 }
 0x187   : > { %v716_v11 = vpop.f32.mrb[13].mxu0  ;;  %v745_v16 = vmul.f32 0.088388346, %v1390_v9 }
 0x188   : > { %v743_v12 = vmul.f32 0.088388346, %v716_v11  ;;  %792 = vmax.xlane.f32.xlu0 %v1982_v10  ;;  %v1391_v13 = vpop.f32.mrb[14].mxu0 }
 0x189   : > { %v719_v15 = vpop.f32.mrb[15].mxu0  ;;  %v746_v19 = vmul.f32 0.088388346, %v1391_v13  ;;  %v1998_v21 = vadd.f32 %v1939_v38, %v745_v16 }
 0x18a   : > { %v744_v17 = vmul.f32 0.088388346, %v719_v15  ;;  %794 = vmax.xlane.f32.xlu1 %v1986_v14  ;;  %v1990_v18 = vadd.f32 %v1939_v38, %v743_v12 }
 0x18b   : > { %v2002_v22 = vadd.f32 %v1939_v38, %v746_v19 }
 0x18c   : > { %796 = vmax.xlane.f32.xlu0 %v1990_v18  ;;  %v1994_v20 = vadd.f32 %v1939_v38, %v744_v17 }
 0x18e   : > { %798 = vmax.xlane.f32.xlu1 %v1994_v20 }
 0x190   : > { %800 = vmax.xlane.f32.xlu0 %v1998_v21 }
 0x192   : > { %802 = vmax.xlane.f32.xlu1 %v2002_v22 }
 0x200   : > { %v777_v32 = vpop.xlane.xlu1 %776 }
 0x201   : > { %v806_v33 = vsub.f32 %v1942_v46, %v777_v32  ;;  %v773_v34 = vpop.xlane.xlu0 %772  ;;  %v611_v32 = vld [vmem:[%s2006_s12 + $0x48] sm:$0xff] }
 0x202   : > { %v804_v35 = vsub.f32 %v1945_v48, %v773_v34 }
 0x203   : > { %v824_v38 = vmul.f32 1.442695, %v806_v33 }
 0x204   : > { %v820_v36 = vmul.f32 1.442695, %v804_v35  ;;  %v779_v37 = vpop.xlane.xlu1 %778  ;;  %v612_v35 = vld [vmem:[%s2006_s12 + $0x50] sm:$0xff] }
 0x205   : > { %v807_v39 = vsub.f32 %v1950_v49, %v779_v37  ;;  %v775_v40 = vpop.xlane.xlu0 %774 }
 0x206   : > { %1514 = vpow2.f32 %v820_v36  ;;  %v805_v41 = vsub.f32 %v1953_v51, %v775_v40  ;;  %v613_v36 = vld [vmem:[%s2006_s12 + $0x58] sm:$0xff]  ;;  %v614_v40 = vld [vmem:[%s2006_s12 + $0x60] sm:$0xff] }
 0x207   : > { %1516 = vpow2.f32 %v824_v38  ;;  %v826_v43 = vmul.f32 1.442695, %v807_v39  ;;  %v929_v37 = vpack.c.bf16 %v613_v36, %v612_v35 }
 0x208   : > { %v822_v42 = vmul.f32 1.442695, %v805_v41  ;;  %v615_v41 = vld [vmem:[%s2006_s12 + $0x68] sm:$0xff] }
 0x209   : > { %v781_v44 = vpop.xlane.xlu0 %780 }
 0x20a   : > { %1518 = vpow2.f32 %v822_v42  ;;  %v808_v45 = vsub.f32 %v1958_v58, %v781_v44  ;;  %v930_v42 = vpack.c.bf16 %v615_v41, %v614_v40  ;;  %v616_v44 = vld [vmem:[%s2006_s12 + $0x70] sm:$0xff] }
 0x20b   : > { %v783_v46 = vpop.xlane.xlu1 %782  ;;  %1520 = vpow2.f32 %v826_v43 }
 0x20c   : > { %v828_v47 = vmul.f32 1.442695, %v808_v45  ;;  %v809_v48 = vsub.f32 %v1962_v60, %v783_v46  ;;  %v617_v45 = vld [vmem:[%s2006_s12 + $0x78] sm:$0xff] }
 0x20d   : > { %v785_v50 = vpop.xlane.xlu0 %784  ;;  %v931_v46 = vpack.c.bf16 %v617_v45, %v616_v44 }
 0x20e   : > { %1522 = vpow2.f32 %v828_v47  ;;  %v830_v52 = vmul.f32 1.442695, %v809_v48  ;;  %v810_v49 = vsub.f32 %v1966_v62, %v785_v50 }
 0x20f   : > { %v787_v53 = vpop.xlane.xlu1 %786 }
 0x210   : > { %v2021_v54 = vpop.eup %1514  ;;  %v832_v51 = vmul.f32 1.442695, %v810_v49  ;;  %v811_v55 = vsub.f32 %v1970_v2, %v787_v53  ;;  %1524 = vpow2.f32 %v830_v52 }
 0x211   : > { %v789_v56 = vpop.xlane.xlu0 %788  ;;  %852 = vadd.xlane.f32.xlu0 %v2021_v54  ;;  %v2026_v59 = vpop.eup %1516 }
 0x212   : > { %1526 = vpow2.f32 %v832_v51  ;;  %v834_v57 = vmul.f32 1.442695, %v811_v55  ;;  %v812_v58 = vsub.f32 %v1974_v6, %v789_v56 }
 0x213   : > { %v791_v60 = vpop.xlane.xlu1 %790 }
 0x214   : > { %v2028_v61 = vpop.eup %1518  ;;  %v836_v62 = vmul.f32 1.442695, %v812_v58  ;;  %v813_v63 = vsub.f32 %v1978_v8, %v791_v60  ;;  %1528 = vpow2.f32 %v834_v57 }
 0x215   : > { %v793_v0 = vpop.xlane.xlu0 %792  ;;  %856 = vadd.xlane.f32.xlu0 %v2026_v59  ;;  %854 = vadd.xlane.f32.xlu1 %v2028_v61  ;;  %v2034_v3 = vpop.eup %1520 }
 0x216   : > { %1530 = vpow2.f32 %v836_v62  ;;  %v838_v1 = vmul.f32 1.442695, %v813_v63  ;;  %v814_v2 = vsub.f32 %v1982_v10, %v793_v0 }
 0x217   : > { %v795_v4 = vpop.xlane.xlu1 %794 }
 0x218   : > { %v2036_v5 = vpop.eup %1522  ;;  %v840_v6 = vmul.f32 1.442695, %v814_v2  ;;  %v815_v7 = vsub.f32 %v1986_v14, %v795_v4  ;;  %1532 = vpow2.f32 %v838_v1 }
 0x219   : > { %860 = vadd.xlane.f32.xlu0 %v2036_v5  ;;  %v797_v8 = vpop.xlane.xlu0 %796  ;;  %858 = vadd.xlane.f32.xlu1 %v2034_v3 }
 0x21a   : > { %1534 = vpow2.f32 %v840_v6  ;;  %v842_v9 = vmul.f32 1.442695, %v815_v7  ;;  %v816_v11 = vsub.f32 %v1990_v18, %v797_v8  ;;  %v2042_v10 = vpop.eup %1524 }
 0x21b   : > { %v799_v12 = vpop.xlane.xlu1 %798 }
 0x21c   : > { %v2044_v13 = vpop.eup %1526  ;;  %v844_v15 = vmul.f32 1.442695, %v816_v11  ;;  %v817_v14 = vsub.f32 %v1994_v20, %v799_v12  ;;  %1536 = vpow2.f32 %v842_v9 }
 0x21d   : > { %864 = vadd.xlane.f32.xlu0 %v2044_v13  ;;  %v801_v16 = vpop.xlane.xlu0 %800  ;;  %862 = vadd.xlane.f32.xlu1 %v2042_v10 }
 0x21e   : > { %1538 = vpow2.f32 %v844_v15  ;;  %v846_v17 = vmul.f32 1.442695, %v817_v14  ;;  %v818_v19 = vsub.f32 %v1998_v21, %v801_v16  ;;  %v2050_v18 = vpop.eup %1528 }
 0x21f   : > { %v803_v23 = vpop.xlane.xlu1 %802 }
 0x220   : > { %v2054_v26 = vpop.eup %1530  ;;  %v848_v20 = vmul.f32 1.442695, %v818_v19  ;;  %v819_v27 = vsub.f32 %v2002_v22, %v803_v23  ;;  %1540 = vpow2.f32 %v846_v17  ;;  %v928_v22 = vpack.c.bf16 %v611_v32, %v610_v31 }
 0x221   : > { %868 = vadd.xlane.f32.xlu0 %v2054_v26  ;;  %866 = vadd.xlane.f32.xlu1 %v2050_v18 }
 0x222   : > { %1542 = vpow2.f32 %v848_v20  ;;  %v850_v21 = vmul.f32 1.442695, %v819_v27  ;;  %v2059_v29 = vpop.eup %1532  ;;  %1400 = vmatprep.subr.bf16.mxu1 %v928_v22 }
 0x223   : > { %1401 = vmatpush3.bf16.msra.mxu1 %v928_v22 }
 0x224   : > { %v2061_v30 = vpop.eup %1534  ;;  %1544 = vpow2.f32 %v850_v21  ;;  %1402 = vmatprep.subr.bf16.mxu1 %v929_v37 }
 0x225   : > { %872 = vadd.xlane.f32.xlu0 %v2061_v30  ;;  %870 = vadd.xlane.f32.xlu1 %v2059_v29 }
 0x226   : > { %v2067_v33 = vpop.eup %1536 }
 0x227   : > { %1403 = vmatpush3.bf16.msra.mxu1 %v929_v37 }
 0x228   : > { %v2069_v34 = vpop.eup %1538  ;;  %1404 = vmatprep.subr.bf16.mxu1 %v930_v42 }
 0x229   : > { %876 = vadd.xlane.f32.xlu0 %v2069_v34  ;;  %874 = vadd.xlane.f32.xlu1 %v2067_v33 }
 0x22a   : > { %v2075_v38 = vpop.eup %1540 }
 0x22b   : > { %1405 = vmatpush3.bf16.msra.mxu1 %v930_v42 }
 0x22c   : > { %v2077_v39 = vpop.eup %1542  ;;  %1406 = vmatprep.subr.bf16.mxu1 %v931_v46 }
 0x22d   : > { %880 = vadd.xlane.f32.xlu0 %v2077_v39  ;;  %878 = vadd.xlane.f32.xlu1 %v2075_v38 }
 0x22e   : > { %v2083_v43 = vpop.eup %1544 }
 0x22f   : > { %1407 = vmatpush3.bf16.msra.mxu1 %v931_v46 }
 0x231   : > { %882 = vadd.xlane.f32.xlu1 %v2083_v43 }
 0x29e   : > { %v853_v47 = vpop.xlane.xlu0 %852 }
 0x29f   : > { %1546 = vrcp.f32 %v853_v47 }
 0x2a2   : > { %v857_v48 = vpop.xlane.xlu0 %856  ;;  %v855_v50 = vpop.xlane.xlu1 %854 }
 0x2a3   : > { %1548 = vrcp.f32 %v855_v50 }
 0x2a4   : > { %1550 = vrcp.f32 %v857_v48 }
 0x2a6   : > { %v861_v52 = vpop.xlane.xlu0 %860  ;;  %v859_v49 = vpop.xlane.xlu1 %858 }
 0x2a7   : > { %1552 = vrcp.f32 %v859_v49 }
 0x2a8   : > { %1554 = vrcp.f32 %v861_v52 }
 0x2a9   : > { %v1547_v55 = vpop.eup %1546 }
 0x2aa   : > { %v865_v53 = vpop.xlane.xlu0 %864  ;;  %v863_v51 = vpop.xlane.xlu1 %862  ;;  %v900_v60 = vmul.f32 %v1547_v55, %v2021_v54 }
 0x2ab   : > { %1556 = vrcp.f32 %v863_v51 }
 0x2ac   : > { %1558 = vrcp.f32 %v865_v53 }
 0x2ad   : > { %v1549_v56 = vpop.eup %1548 }
 0x2ae   : > { %v869_v57 = vpop.xlane.xlu0 %868  ;;  %v867_v58 = vpop.xlane.xlu1 %866  ;;  %v901_v62 = vmul.f32 %v1549_v56, %v2028_v61 }
 0x2af   : > { %v1551_v63 = vpop.eup %1550  ;;  %1560 = vrcp.f32 %v867_v58 }
 0x2b0   : > { %v916_v0 = vpack.c.bf16 %v901_v62, %v900_v60  ;;  %1562 = vrcp.f32 %v869_v57  ;;  %v902_v6 = vmul.f32 %v1551_v63, %v2026_v59 }
 0x2b1   : > { %v1553_v1 = vpop.eup %1552 }
 0x2b2   : > { %v873_v2 = vpop.xlane.xlu0 %872  ;;  %v871_v4 = vpop.xlane.xlu1 %870  ;;  %1408 = vmatprep.mubr.bf16.mxu1 %v916_v0  ;;  %v903_v7 = vmul.f32 %v1553_v1, %v2034_v3 }
 0x2b3   : > { %v1555_v8 = vpop.eup %1554  ;;  %1564 = vrcp.f32 %v871_v4 }
 0x2b4   : > { %v917_v9 = vpack.c.bf16 %v903_v7, %v902_v6  ;;  %1566 = vrcp.f32 %v873_v2  ;;  %v904_v61 = vmul.f32 %v1555_v8, %v2036_v5 }
 0x2b5   : > { %v1557_v11 = vpop.eup %1556 }
 0x2b6   : > { %v877_v54 = vpop.xlane.xlu0 %876  ;;  %v875_v12 = vpop.xlane.xlu1 %874  ;;  %1409 = vmatmul.mubr.bf16.vlgmr.msra.gmra.mrb[0].mxu1 %v917_v9  ;;  %v905_v15 = vmul.f32 %v1557_v11, %v2042_v10 }
 0x2b7   : > { %v1559_v14 = vpop.eup %1558  ;;  %1568 = vrcp.f32 %v875_v12 }
 0x2b8   : > { %v918_v16 = vpack.c.bf16 %v905_v15, %v904_v61  ;;  %1570 = vrcp.f32 %v877_v54  ;;  %v906_v3 = vmul.f32 %v1559_v14, %v2044_v13 }
 0x2b9   : > { %v1561_v17 = vpop.eup %1560 }
 0x2ba   : > { %v881_v59 = vpop.xlane.xlu0 %880  ;;  %v879_v19 = vpop.xlane.xlu1 %878  ;;  %1412 = vmatprep.mubr.bf16.mxu1 %v918_v16  ;;  %v907_v23 = vmul.f32 %v1561_v17, %v2050_v18 }
 0x2bb   : > { %v1563_v24 = vpop.eup %1562  ;;  %1572 = vrcp.f32 %v879_v19 }
 0x2bc   : > { %1574 = vrcp.f32 %v881_v59  ;;  %v919_v25 = vpack.c.bf16 %v907_v23, %v906_v3  ;;  %v908_v10 = vmul.f32 %v1563_v24, %v2054_v26 }
 0x2bd   : > { %v1565_v20 = vpop.eup %1564 }
 0x2be   : > { %v883_v5 = vpop.xlane.xlu1 %882  ;;  %1413 = vmatmul.mubr.bf16.gmra.mrb[4].mxu1 %v919_v25  ;;  %v909_v27 = vmul.f32 %v1565_v20, %v2059_v29  ;;  %v1567_v28 = vpop.eup %1566 }
 0x2bf   : > { %1576 = vrcp.f32 %v883_v5  ;;  %v910_v13 = vmul.f32 %v1567_v28, %v2061_v30 }
 0x2c0   : > { %v920_v21 = vpack.c.bf16 %v909_v27, %v908_v10 }
 0x2c1   : > { %v1569_v31 = vpop.eup %1568 }
 0x2c2   : > { %1416 = vmatprep.mubr.bf16.mxu1 %v920_v21  ;;  %v911_v18 = vmul.f32 %v1569_v31, %v2067_v33  ;;  %v1571_v32 = vpop.eup %1570 }
 0x2c3   : > { %v912_v37 = vmul.f32 %v1571_v32, %v2069_v34 }
 0x2c4   : > { %v921_v22 = vpack.c.bf16 %v911_v18, %v910_v13 }
 0x2c5   : > { %v1573_v35 = vpop.eup %1572 }
 0x2c6   : > { %v1575_v36 = vpop.eup %1574  ;;  %1417 = vmatmul.mubr.bf16.gmra.mrb[8].mxu1 %v921_v22  ;;  %v913_v26 = vmul.f32 %v1573_v35, %v2075_v38 }
 0x2c7   : > { %v914_v41 = vmul.f32 %v1575_v36, %v2077_v39 }
 0x2c8   : > { %v922_v29 = vpack.c.bf16 %v913_v26, %v912_v37 }
 0x2c9   : > { %v1577_v40 = vpop.eup %1576 }
 0x2ca   : > { %v915_v42 = vmul.f32 %v1577_v40, %v2083_v43  ;;  %1420 = vmatprep.mubr.bf16.mxu1 %v922_v29 }
 0x2cc   : > { %v923_v30 = vpack.c.bf16 %v915_v42, %v914_v41 }
 0x2ce   : > { %1421 = vmatmul.mubr.bf16.gmra.mrb[12].mxu1 %v923_v30 }
 0x389   : > { %v1410_v33 = vpop.f32.mrb[0].mxu1 }
 0x38a   : > { %1031 = vst [vmem:[%s2105_s15 + $0x10] sm:$0xff] %v1410_v33  ;;  %v966_v34 = vpop.f32.mrb[1].mxu1 }
 0x38b   : > { %1029 = vst [vmem:[%s2105_s15] sm:$0xff] %v966_v34  ;;  %v1411_v38 = vpop.f32.mrb[2].mxu1 }
 0x38c   : > { %1032 = vst [vmem:[%s2105_s15 + $0x18] sm:$0xff] %v1411_v38  ;;  %v969_v39 = vpop.f32.mrb[3].mxu1 }
 0x38d   : > { %1030 = vst [vmem:[%s2105_s15 + $0x8] sm:$0xff] %v969_v39 }
 0x391   : > { %v1414_v43 = vpop.f32.mrb[4].mxu1  ;;  %v1118_v58 = vld [vmem:[%s2105_s15 + $0x10] sm:$0xff] (%p1805_p13) }
 0x392   : > { %1035 = vst [vmem:[%s2105_s15 + $0x30] sm:$0xff] %v1414_v43  ;;  %v982_v44 = vpop.f32.mrb[5].mxu1  ;;  %v1114_v56 = vld [vmem:[%s2105_s15] sm:$0xff] (%p1805_p13)  ;;  %1119 = vst [vmem:[%s1056_s17 + $0x20] sm:$0xff] (%p1805_p13), %v1118_v58 }
 0x393   : > { %1033 = vst [vmem:[%s2105_s15 + $0x20] sm:$0xff] %v982_v44  ;;  %v1415_v45 = vpop.f32.mrb[6].mxu1  ;;  %v1120_v60 = vld [vmem:[%s2105_s15 + $0x18] sm:$0xff] (%p1805_p13)  ;;  %1115 = vst [vmem:[%s1056_s17] sm:$0xff] (%p1805_p13), %v1114_v56 }
 0x394   : > { %1036 = vst [vmem:[%s2105_s15 + $0x38] sm:$0xff] %v1415_v45  ;;  %v985_v46 = vpop.f32.mrb[7].mxu1  ;;  %v1116_v57 = vld [vmem:[%s2105_s15 + $0x8] sm:$0xff] (%p1805_p13)  ;;  %1121 = vst [vmem:[%s1056_s17 + $0x30] sm:$0xff] (%p1805_p13), %v1120_v60 }
 0x395   : > { %1034 = vst [vmem:[%s2105_s15 + $0x28] sm:$0xff] %v985_v46  ;;  %1117 = vst [vmem:[%s1056_s17 + $0x10] sm:$0xff] (%p1805_p13), %v1116_v57 }
 0x399   : > { %v1418_v47 = vpop.f32.mrb[8].mxu1  ;;  %v1126_v0 = vld [vmem:[%s2105_s15 + $0x30] sm:$0xff] (%p1805_p13) }
 0x39a   : > { %1039 = vst [vmem:[%s2105_s15 + $0x50] sm:$0xff] %v1418_v47  ;;  %v998_v48 = vpop.f32.mrb[9].mxu1  ;;  %v1122_v62 = vld [vmem:[%s2105_s15 + $0x20] sm:$0xff] (%p1805_p13)  ;;  %1127 = vst [vmem:[%s1056_s17 + $0x60] sm:$0xff] (%p1805_p13), %v1126_v0 }
 0x39b   : > { %1037 = vst [vmem:[%s2105_s15 + $0x40] sm:$0xff] %v998_v48  ;;  %v1419_v50 = vpop.f32.mrb[10].mxu1  ;;  %v1128_v1 = vld [vmem:[%s2105_s15 + $0x38] sm:$0xff] (%p1805_p13)  ;;  %1123 = vst [vmem:[%s1056_s17 + $0x40] sm:$0xff] (%p1805_p13), %v1122_v62 }
 0x39c   : > { %1040 = vst [vmem:[%s2105_s15 + $0x58] sm:$0xff] %v1419_v50  ;;  %v1001_v52 = vpop.f32.mrb[11].mxu1  ;;  %v1124_v63 = vld [vmem:[%s2105_s15 + $0x28] sm:$0xff] (%p1805_p13)  ;;  %1129 = vst [vmem:[%s1056_s17 + $0x70] sm:$0xff] (%p1805_p13), %v1128_v1 }
 0x39d   : > { %1038 = vst [vmem:[%s2105_s15 + $0x48] sm:$0xff] %v1001_v52  ;;  %1125 = vst [vmem:[%s1056_s17 + $0x50] sm:$0xff] (%p1805_p13), %v1124_v63 }
 0x39f   : > { %1051 = sbr.rel (!%p1805_p13) target bundleno = 942 (0x3ae), region = 154 }
 0x3a1   : > { %v1422_v49 = vpop.f32.mrb[12].mxu1  ;;  %v1134_v6 = vld [vmem:[%s2105_s15 + $0x50] sm:$0xff] (%p1805_p13) }
 0x3a2   : > { %1043 = vst [vmem:[%s2105_s15 + $0x70] sm:$0xff] %v1422_v49  ;;  %v1014_v53 = vpop.f32.mrb[13].mxu1  ;;  %v1130_v2 = vld [vmem:[%s2105_s15 + $0x40] sm:$0xff] (%p1805_p13)  ;;  %1135 = vst [vmem:[%s1056_s17 + $0xa0] sm:$0xff] (%p1805_p13), %v1134_v6 }
 0x3a3   : > { %1041 = vst [vmem:[%s2105_s15 + $0x60] sm:$0xff] %v1014_v53  ;;  %v1423_v51 = vpop.f32.mrb[14].mxu1  ;;  %v1136_v7 = vld [vmem:[%s2105_s15 + $0x58] sm:$0xff] (%p1805_p13)  ;;  %1131 = vst [vmem:[%s1056_s17 + $0x80] sm:$0xff] (%p1805_p13), %v1130_v2 }
 0x3a4   : > { %1044 = vst [vmem:[%s2105_s15 + $0x78] sm:$0xff] %v1423_v51  ;;  %v1017_v55 = vpop.f32.mrb[15].mxu1  ;;  %v1132_v4 = vld [vmem:[%s2105_s15 + $0x48] sm:$0xff] (%p1805_p13)  ;;  %1137 = vst [vmem:[%s1056_s17 + $0xb0] sm:$0xff] (%p1805_p13), %v1136_v7 }
 0x3a5   : > { %1042 = vst [vmem:[%s2105_s15 + $0x68] sm:$0xff] %v1017_v55  ;;  %1133 = vst [vmem:[%s1056_s17 + $0x90] sm:$0xff] (%p1805_p13), %v1132_v4 }
 0x3a9   : > { %v1142_v11 = vld [vmem:[%s2105_s15 + $0x70] sm:$0xff] }
 0x3aa   : > { %v1138_v8 = vld [vmem:[%s2105_s15 + $0x60] sm:$0xff]  ;;  %1143 = vst [vmem:[%s1056_s17 + $0xe0] sm:$0xff] %v1142_v11 }
 0x3ab   : > { %1139 = vst [vmem:[%s1056_s17 + $0xc0] sm:$0xff] %v1138_v8  ;;  %v1144_v54 = vld [vmem:[%s2105_s15 + $0x78] sm:$0xff] }
 0x3ac   : > { %v1140_v9 = vld [vmem:[%s2105_s15 + $0x68] sm:$0xff]  ;;  %1145 = vst [vmem:[%s1056_s17 + $0xf0] sm:$0xff] %v1144_v54 }
 0x3ad   : > { %1141 = vst [vmem:[%s1056_s17 + $0xd0] sm:$0xff] %v1140_v9 }
 0x3ae PF: > { %s14_s25 = sadd.s32 1, %s1664_s25   ;;  %s2195_s6 = sld [smem:[#allocation7_spill]] }
 0x3af   : > { %p11_p5 = scmp.ge.s32.totalorder %s14_s25, 6   ;;  %s2196_s15 = smov %s1628_s16 }
 0x3b0   : > { %s2197_s16 = smov %s1810_s29  ;;  %s2198_s17 = smov %s1636_s18 }
 0x3b1   : > { %s2199_s18 = smov %s1788_s5  ;;  %s2200_s19 = smov %s1644_s20 }
 0x3b2   : > { %s2201_s20 = smov %s1785_s26  ;;  %s2202_s21 = smov %s1656_s23 }
 0x3b3   : > { %s2203_s22 = smov %s1660_s24  ;;  %s2204_s23 = smov %s2207_s27 }
 0x3b4   : > { %s2205_s24 = smov %s2195_s6  ;;  %13 = sbr.rel (!%p11_p5) target bundleno = 8 (0x8), region = 242 }

// kernel: camembert_classifier_forward.13
= control target key start
LH: loop header
LB: loop body
LE: loop exit
PB: predicated region body
PF: predicated region fallthrough
CT: control target
= control target key end

     0   :  { %s1199_s21 = smov 0   ;;  %s1933_s0 = inlined_call_operand.vmem [shape: f32[256,256], index: 0, kind: input, shape index: {}]   ;;  %s1934_s1 = inlined_call_operand.vmem [shape: f32[256,256], index: 1, kind: input, shape index: {}]   ;;  %s1935_s2 = inlined_call_operand.vmem [shape: f32[256,256], index: 2, kind: input, shape index: {}]   ;;  %s1936_s3 = inlined_call_operand.vmem [shape: f32[1,256], index: 3, kind: input, shape index: {}]   ;;  %s1937_s4 = inlined_call_operand.vmem [shape: f32[1,256], index: 4, kind: input, shape index: {}]   ;;  %s1938_s5 = inlined_call_operand.vmem [shape: f32[1,256], index: 5, kind: input, shape index: {}]   ;;  %s1939_s6 = inlined_call_operand.vmem [shape: f32[256,256], index: 6, kind: output, shape index: {}]  }
   0x1 LB: > { %s1065_s22 = sadd.s32 4294967295, %s1162_s21   ;;  %p1069_p0 = scmp.ge.s32.totalorder %s1162_s21, 1  ;;  %s1162_s21 = sphi %s1199_s21, %s16_s21  }
   0x2   : > { %p226_p1 = scmp.lt.s32.totalorder %s1162_s21, 3 }
   0x4   : > { %p227_p2 = pnand %p1069_p0, %p226_p1 }
   0x5   : > { %v318_v0 = vld [vmem:[%s1935_s2 + $0x8] sm:$0xff] (!%p227_p2)  ;;  %v320_v1 = vld [vmem:[%s1935_s2 + $0x18] sm:$0xff] (!%p227_p2)  ;;  %v317_v2 = vld [vmem:[%s1935_s2] sm:$0xff] (!%p227_p2)  ;;  %s1070_s19 = sshll.u32 (!%p227_p2), %s1065_s22, 4 }
   0x6   : > { %230 = sbr.rel (%p227_p2) target bundleno = 645 (0x285), region = 44  ;;  %v398_v3 = vpack.c.bf16 (!%p227_p2), %v320_v1, %v318_v0  ;;  %v319_v4 = vld [vmem:[%s1935_s2 + $0x10] sm:$0xff] (!%p227_p2)  ;;  %v322_v5 = vld [vmem:[%s1935_s2 + $0x28] sm:$0xff] (!%p227_p2)  ;;  %v324_v6 = vld [vmem:[%s1935_s2 + $0x38] sm:$0xff] (!%p227_p2)  ;;  %p265_p3 = scmp.lt.s32.totalorder (!%p227_p2), %s1070_s19, 31 }
   0x7   : > { %v397_v7 = vpack.c.bf16 (!%p227_p2), %v319_v4, %v317_v2  ;;  %v400_v8 = vpack.c.bf16 (!%p227_p2), %v324_v6, %v322_v5  ;;  %v321_v9 = vld [vmem:[%s1935_s2 + $0x20] sm:$0xff] (!%p227_p2)  ;;  %v323_v10 = vld [vmem:[%s1935_s2 + $0x30] sm:$0xff] (!%p227_p2)  ;;  %v326_v11 = vld [vmem:[%s1935_s2 + $0x48] sm:$0xff] (!%p227_p2) }
   0x8   : > { %441 = vmatprep.subr.bf16.mxu0 (!%p227_p2), %v398_v3  ;;  %1084 = vmatprep.subr.bf16.mxu1 (!%p227_p2), %v398_v3  ;;  %v328_v12 = vld [vmem:[%s1935_s2 + $0x58] sm:$0xff] (!%p227_p2)  ;;  %v399_v13 = vpack.c.bf16 (!%p227_p2), %v323_v10, %v321_v9  ;;  %v325_v15 = vld [vmem:[%s1935_s2 + $0x40] sm:$0xff] (!%p227_p2)  ;;  %v327_v16 = vld [vmem:[%s1935_s2 + $0x50] sm:$0xff] (!%p227_p2) }
   0x9   : > { %442 = vmatpush1.bf16.msra.mxu0 (!%p227_p2), %v397_v7  ;;  %1100 = vmatpush1.bf16.msra.mxu1 (!%p227_p2), %v397_v7  ;;  %v402_v14 = vpack.c.bf16 (!%p227_p2), %v328_v12, %v326_v11  ;;  %v330_v17 = vld [vmem:[%s1935_s2 + $0x68] sm:$0xff] (!%p227_p2)  ;;  %v332_v18 = vld [vmem:[%s1935_s2 + $0x78] sm:$0xff] (!%p227_p2)  ;;  %v401_v19 = vpack.c.bf16 (!%p227_p2), %v327_v16, %v325_v15  ;;  %v329_v21 = vld [vmem:[%s1935_s2 + $0x60] sm:$0xff] (!%p227_p2) }
   0xa   : > { %443 = vmatprep.subr.bf16.mxu0 (!%p227_p2), %v400_v8  ;;  %1085 = vmatprep.subr.bf16.mxu1 (!%p227_p2), %v400_v8  ;;  %v404_v20 = vpack.c.bf16 (!%p227_p2), %v332_v18, %v330_v17  ;;  %v331_v22 = vld [vmem:[%s1935_s2 + $0x70] sm:$0xff] (!%p227_p2)  ;;  %v334_v23 = vld [vmem:[%s1935_s2 + $0x88] sm:$0xff] (!%p227_p2)  ;;  %v336_v24 = vld [vmem:[%s1935_s2 + $0x98] sm:$0xff] (!%p227_p2) }
   0xb   : > { %v403_v25 = vpack.c.bf16 (!%p227_p2), %v331_v22, %v329_v21  ;;  %v406_v26 = vpack.c.bf16 (!%p227_p2), %v336_v24, %v334_v23  ;;  %v333_v27 = vld [vmem:[%s1935_s2 + $0x80] sm:$0xff] (!%p227_p2)  ;;  %v335_v28 = vld [vmem:[%s1935_s2 + $0x90] sm:$0xff] (!%p227_p2)  ;;  %v338_v29 = vld [vmem:[%s1935_s2 + $0xa8] sm:$0xff] (!%p227_p2) }
   0xc   : > { %v340_v30 = vld [vmem:[%s1935_s2 + $0xb8] sm:$0xff] (!%p227_p2)  ;;  %v405_v31 = vpack.c.bf16 (!%p227_p2), %v335_v28, %v333_v27  ;;  %v337_v33 = vld [vmem:[%s1935_s2 + $0xa0] sm:$0xff] (!%p227_p2)  ;;  %v339_v34 = vld [vmem:[%s1935_s2 + $0xb0] sm:$0xff] (!%p227_p2) }
   0xd   : > { %444 = vmatpush1.bf16.msra.mxu0 %v399_v13  ;;  %1101 = vmatpush1.bf16.msra.mxu1 %v399_v13  ;;  %s1941_s19 = smov (!%p265_p3, %s1070_s19), 31  ;;  %v408_v32 = vpack.c.bf16 %v340_v30, %v338_v29  ;;  %v342_v35 = vld [vmem:[%s1935_s2 + $0xc8] sm:$0xff]  ;;  %v344_v36 = vld [vmem:[%s1935_s2 + $0xd8] sm:$0xff]  ;;  %v407_v37 = vpack.c.bf16 %v339_v34, %v337_v33  ;;  %v341_v38 = vld [vmem:[%s1935_s2 + $0xc0] sm:$0xff] }
   0xe   : > { %445 = vmatprep.subr.bf16.mxu0 %v402_v14  ;;  %1086 = vmatprep.subr.bf16.mxu1 %v402_v14  ;;  %s1273_s24 = sshll.u32 %s1941_s19, 4  ;;  %v343_v39 = vld [vmem:[%s1935_s2 + $0xd0] sm:$0xff]  ;;  %v410_v40 = vpack.c.bf16 %v344_v36, %v342_v35  ;;  %v346_v41 = vld [vmem:[%s1935_s2 + $0xe8] sm:$0xff]  ;;  %v348_v44 = vld [vmem:[%s1935_s2 + $0xf8] sm:$0xff] }
   0xf   : > { %s1291_s9 = scalar_lea.vmem %s1933_s0, %s1273_s24  ;;  %v409_v49 = vpack.c.bf16 %v343_v39, %v341_v38  ;;  %v412_v50 = vpack.c.bf16 %v348_v44, %v346_v41  ;;  %v345_v51 = vld [vmem:[%s1935_s2 + $0xe0] sm:$0xff]  ;;  %v347_v52 = vld [vmem:[%s1935_s2 + $0xf0] sm:$0xff]  ;;  %v350_v53 = vld [vmem:[%s1935_s2 + $0x108] sm:$0xff]  ;;  %s1804_s12 = scalar_lea.vmem %s1939_s6, %s1273_s24 }
  0x10   : > { %v286_v42 = vld [vmem:[%s1291_s9 + $0x8] sm:$0xff]  ;;  %v288_v43 = vld [vmem:[%s1291_s9 + $0x18] sm:$0xff]  ;;  %v411_v55 = vpack.c.bf16 %v347_v52, %v345_v51  ;;  %v349_v57 = vld [vmem:[%s1935_s2 + $0x100] sm:$0xff] }
  0x11   : > { %446 = vmatpush1.bf16.msra.mxu0 %v401_v19  ;;  %1102 = vmatpush1.bf16.msra.mxu1 %v401_v19  ;;  %v382_v45 = vpack.c.bf16 %v288_v43, %v286_v42  ;;  %v302_v46 = vld [vmem:[%s1291_s9 + $0x88] sm:$0xff]  ;;  %v304_v47 = vld [vmem:[%s1291_s9 + $0x98] sm:$0xff]  ;;  %v351_v58 = vld [vmem:[%s1935_s2 + $0x110] sm:$0xff] }
  0x12   : > { %447 = vmatprep.subr.bf16.mxu0 %v404_v20  ;;  %1087 = vmatprep.subr.bf16.mxu1 %v404_v20  ;;  %v390_v48 = vpack.c.bf16 %v304_v47, %v302_v46  ;;  %v352_v54 = vld [vmem:[%s1935_s2 + $0x118] sm:$0xff]  ;;  %v354_v59 = vld [vmem:[%s1935_s2 + $0x128] sm:$0xff]  ;;  %v413_v61 = vpack.c.bf16 %v351_v58, %v349_v57  ;;  %v353_v63 = vld [vmem:[%s1935_s2 + $0x120] sm:$0xff] }
  0x13   : > { %473 = vmatprep.mubr.bf16.mxu0 %v382_v45  ;;  %v414_v56 = vpack.c.bf16 %v352_v54, %v350_v53  ;;  %v356_v60 = vld [vmem:[%s1935_s2 + $0x138] sm:$0xff]  ;;  %v355_v0 = vld [vmem:[%s1935_s2 + $0x130] sm:$0xff]  ;;  %v358_v1 = vld [vmem:[%s1935_s2 + $0x148] sm:$0xff] }
  0x14   : > { %513 = vmatprep.mubr.bf16.mxu1 %v390_v48  ;;  %v416_v62 = vpack.c.bf16 %v356_v60, %v354_v59  ;;  %v360_v2 = vld [vmem:[%s1935_s2 + $0x158] sm:$0xff]  ;;  %v415_v3 = vpack.c.bf16 %v355_v0, %v353_v63  ;;  %v357_v5 = vld [vmem:[%s1935_s2 + $0x140] sm:$0xff]  ;;  %v359_v6 = vld [vmem:[%s1935_s2 + $0x150] sm:$0xff] }
  0x15   : > { %448 = vmatpush1.bf16.msra.mxu0 %v403_v25  ;;  %1103 = vmatpush1.bf16.msra.mxu1 %v403_v25  ;;  %v418_v4 = vpack.c.bf16 %v360_v2, %v358_v1  ;;  %v362_v7 = vld [vmem:[%s1935_s2 + $0x168] sm:$0xff]  ;;  %v364_v8 = vld [vmem:[%s1935_s2 + $0x178] sm:$0xff]  ;;  %v417_v9 = vpack.c.bf16 %v359_v6, %v357_v5  ;;  %v361_v11 = vld [vmem:[%s1935_s2 + $0x160] sm:$0xff] }
  0x16   : > { %449 = vmatprep.subr.bf16.mxu0 %v406_v26  ;;  %1088 = vmatprep.subr.bf16.mxu1 %v406_v26  ;;  %v420_v10 = vpack.c.bf16 %v364_v8, %v362_v7  ;;  %v363_v12 = vld [vmem:[%s1935_s2 + $0x170] sm:$0xff]  ;;  %v366_v13 = vld [vmem:[%s1935_s2 + $0x188] sm:$0xff]  ;;  %v368_v14 = vld [vmem:[%s1935_s2 + $0x198] sm:$0xff] }
  0x17   : > { %v419_v15 = vpack.c.bf16 %v363_v12, %v361_v11  ;;  %v422_v16 = vpack.c.bf16 %v368_v14, %v366_v13  ;;  %v365_v17 = vld [vmem:[%s1935_s2 + $0x180] sm:$0xff]  ;;  %v367_v18 = vld [vmem:[%s1935_s2 + $0x190] sm:$0xff]  ;;  %v370_v19 = vld [vmem:[%s1935_s2 + $0x1a8] sm:$0xff] }
  0x18   : > { %v372_v20 = vld [vmem:[%s1935_s2 + $0x1b8] sm:$0xff]  ;;  %v421_v21 = vpack.c.bf16 %v367_v18, %v365_v17  ;;  %v369_v23 = vld [vmem:[%s1935_s2 + $0x1a0] sm:$0xff]  ;;  %v371_v24 = vld [vmem:[%s1935_s2 + $0x1b0] sm:$0xff] }
  0x19   : > { %450 = vmatpush1.bf16.msra.mxu0 %v405_v31  ;;  %1104 = vmatpush1.bf16.msra.mxu1 %v405_v31  ;;  %v424_v22 = vpack.c.bf16 %v372_v20, %v370_v19  ;;  %v374_v25 = vld [vmem:[%s1935_s2 + $0x1c8] sm:$0xff]  ;;  %v376_v26 = vld [vmem:[%s1935_s2 + $0x1d8] sm:$0xff]  ;;  %v423_v27 = vpack.c.bf16 %v371_v24, %v369_v23  ;;  %v373_v29 = vld [vmem:[%s1935_s2 + $0x1c0] sm:$0xff] }
  0x1a   : > { %451 = vmatprep.subr.bf16.mxu0 %v408_v32  ;;  %1089 = vmatprep.subr.bf16.mxu1 %v408_v32  ;;  %v426_v28 = vpack.c.bf16 %v376_v26, %v374_v25  ;;  %v375_v30 = vld [vmem:[%s1935_s2 + $0x1d0] sm:$0xff]  ;;  %v378_v31 = vld [vmem:[%s1935_s2 + $0x1e8] sm:$0xff]  ;;  %v380_v32 = vld [vmem:[%s1935_s2 + $0x1f8] sm:$0xff] }
  0x1b   : > { %v425_v33 = vpack.c.bf16 %v375_v30, %v373_v29  ;;  %v428_v34 = vpack.c.bf16 %v380_v32, %v378_v31  ;;  %v377_v35 = vld [vmem:[%s1935_s2 + $0x1e0] sm:$0xff]  ;;  %v379_v36 = vld [vmem:[%s1935_s2 + $0x1f0] sm:$0xff]  ;;  %v290_v42 = vld [vmem:[%s1291_s9 + $0x28] sm:$0xff] }
  0x1c   : > { %v287_v38 = vld [vmem:[%s1291_s9 + $0x10] sm:$0xff]  ;;  %v427_v39 = vpack.c.bf16 %v379_v36, %v377_v35  ;;  %v292_v43 = vld [vmem:[%s1291_s9 + $0x38] sm:$0xff]  ;;  %v306_v44 = vld [vmem:[%s1291_s9 + $0xa8] sm:$0xff] }
  0x1d   : > { %452 = vmatpush1.bf16.msra.mxu0 %v407_v37  ;;  %1105 = vmatpush1.bf16.msra.mxu1 %v407_v37  ;;  %v285_v37 = vld [vmem:[%s1291_s9] sm:$0xff]  ;;  %v303_v41 = vld [vmem:[%s1291_s9 + $0x90] sm:$0xff]  ;;  %v308_v45 = vld [vmem:[%s1291_s9 + $0xb8] sm:$0xff]  ;;  %v384_v48 = vpack.c.bf16 %v292_v43, %v290_v42 }
  0x1e   : > { %453 = vmatprep.subr.bf16.mxu0 %v410_v40  ;;  %1090 = vmatprep.subr.bf16.mxu1 %v410_v40  ;;  %v301_v40 = vld [vmem:[%s1291_s9 + $0x80] sm:$0xff]  ;;  %v381_v46 = vpack.c.bf16 %v287_v38, %v285_v37  ;;  %v291_v51 = vld [vmem:[%s1291_s9 + $0x30] sm:$0xff]  ;;  %v294_v54 = vld [vmem:[%s1291_s9 + $0x48] sm:$0xff] }
  0x1f   : > { %v389_v47 = vpack.c.bf16 %v303_v41, %v301_v40  ;;  %v305_v52 = vld [vmem:[%s1291_s9 + $0xa0] sm:$0xff]  ;;  %v307_v53 = vld [vmem:[%s1291_s9 + $0xb0] sm:$0xff]  ;;  %v312_v57 = vld [vmem:[%s1291_s9 + $0xd8] sm:$0xff] }
  0x20   : > { %v391_v59 = vpack.c.bf16 %v307_v53, %v305_v52  ;;  %v295_v63 = vld [vmem:[%s1291_s9 + $0x50] sm:$0xff]  ;;  %v309_v0 = vld [vmem:[%s1291_s9 + $0xc0] sm:$0xff]  ;;  %v298_v2 = vld [vmem:[%s1291_s9 + $0x68] sm:$0xff] }
  0x21   : > { %454 = vmatpush1.bf16.msra.mxu0 %v409_v49  ;;  %1106 = vmatpush1.bf16.msra.mxu1 %v409_v49  ;;  %v392_v49 = vpack.c.bf16 %v308_v45, %v306_v44  ;;  %v311_v1 = vld [vmem:[%s1291_s9 + $0xd0] sm:$0xff]  ;;  %v316_v5 = vld [vmem:[%s1291_s9 + $0xf8] sm:$0xff]  ;;  %v313_v12 = vld [vmem:[%s1291_s9 + $0xe0] sm:$0xff] }
  0x22   : > { %455 = vmatprep.subr.bf16.mxu0 %v412_v50  ;;  %1091 = vmatprep.subr.bf16.mxu1 %v412_v50  ;;  %v289_v50 = vld [vmem:[%s1291_s9 + $0x20] sm:$0xff]  ;;  %v393_v7 = vpack.c.bf16 %v311_v1, %v309_v0  ;;  %v299_v11 = vld [vmem:[%s1291_s9 + $0x70] sm:$0xff] }
  0x23   : > { %v383_v58 = vpack.c.bf16 %v291_v51, %v289_v50  ;;  %v315_v13 = vld [vmem:[%s1291_s9 + $0xf0] sm:$0xff]  ;;  %v429_v19 = vld [vmem:[%s1936_s3] sm:$0x3] }
  0x25   : > { %456 = vmatpush1.bf16.msra.mxu0 %v411_v55  ;;  %1107 = vmatpush1.bf16.msra.mxu1 %v411_v55  ;;  %v296_v55 = vld [vmem:[%s1291_s9 + $0x58] sm:$0xff] }
  0x26   : > { %457 = vmatprep.subr.bf16.mxu0 %v414_v56  ;;  %1092 = vmatprep.subr.bf16.mxu1 %v414_v56  ;;  %v310_v56 = vld [vmem:[%s1291_s9 + $0xc8] sm:$0xff]  ;;  %v386_v60 = vpack.c.bf16 %v296_v55, %v294_v54 }
  0x29   : > { %458 = vmatpush1.bf16.msra.mxu0 %v413_v61  ;;  %1108 = vmatpush1.bf16.msra.mxu1 %v413_v61  ;;  %v394_v61 = vpack.c.bf16 %v312_v57, %v310_v56 }
  0x2a   : > { %459 = vmatprep.subr.bf16.mxu0 %v416_v62  ;;  %1093 = vmatprep.subr.bf16.mxu1 %v416_v62  ;;  %v293_v62 = vld [vmem:[%s1291_s9 + $0x40] sm:$0xff] }
  0x2b   : > { %v385_v6 = vpack.c.bf16 %v295_v63, %v293_v62 }
  0x2d   : > { %460 = vmatpush1.bf16.msra.mxu0 %v415_v3  ;;  %1109 = vmatpush1.bf16.msra.mxu1 %v415_v3  ;;  %v300_v3 = vld [vmem:[%s1291_s9 + $0x78] sm:$0xff] }
  0x2e   : > { %461 = vmatprep.subr.bf16.mxu0 %v418_v4  ;;  %1094 = vmatprep.subr.bf16.mxu1 %v418_v4  ;;  %v314_v4 = vld [vmem:[%s1291_s9 + $0xe8] sm:$0xff]  ;;  %v388_v8 = vpack.c.bf16 %v300_v3, %v298_v2 }
  0x31   : > { %462 = vmatpush1.bf16.msra.mxu0 %v417_v9  ;;  %1110 = vmatpush1.bf16.msra.mxu1 %v417_v9  ;;  %v396_v9 = vpack.c.bf16 %v316_v5, %v314_v4 }
  0x32   : > { %463 = vmatprep.subr.bf16.mxu0 %v420_v10  ;;  %1095 = vmatprep.subr.bf16.mxu1 %v420_v10  ;;  %v297_v10 = vld [vmem:[%s1291_s9 + $0x60] sm:$0xff]  ;;  %s1453_s9 = scalar_lea.vmem %s1934_s1, %s1273_s24 }
  0x33   : > { %v387_v14 = vpack.c.bf16 %v299_v11, %v297_v10  ;;  %v554_v25 = vld [vmem:[%s1453_s9] sm:$0xff]  ;;  %v571_v31 = vld [vmem:[%s1453_s9 + $0x88] sm:$0xff]  ;;  %v572_v37 = vld [vmem:[%s1453_s9 + $0x90] sm:$0xff] }
  0x34   : > { %v555_v32 = vld [vmem:[%s1453_s9 + $0x8] sm:$0xff]  ;;  %v573_v42 = vld [vmem:[%s1453_s9 + $0x98] sm:$0xff]  ;;  %v556_v50 = vld [vmem:[%s1453_s9 + $0x10] sm:$0xff] }
  0x35   : > { %464 = vmatpush1.bf16.msra.mxu0 %v419_v15  ;;  %1111 = vmatpush1.bf16.msra.mxu1 %v419_v15  ;;  %v395_v15 = vpack.c.bf16 %v315_v13, %v313_v12  ;;  %v557_v51 = vld [vmem:[%s1453_s9 + $0x18] sm:$0xff]  ;;  %v558_v55 = vld [vmem:[%s1453_s9 + $0x20] sm:$0xff]  ;;  %v559_v0 = vld [vmem:[%s1453_s9 + $0x28] sm:$0xff] }
  0x36   : > { %465 = vmatprep.subr.bf16.mxu0 %v422_v16  ;;  %1096 = vmatprep.subr.bf16.mxu1 %v422_v16  ;;  %v431_v16 = vlaneseq  ;;  %v575_v3 = vld [vmem:[%s1453_s9 + $0xa8] sm:$0xff]  ;;  %v561_v12 = vld [vmem:[%s1453_s9 + $0x38] sm:$0xff] }
  0x38   : > { %v432_v17 = vshrl.u32 %v431_v16, 7 }
  0x39   : > { %466 = vmatpush1.bf16.msra.mxu0 %v421_v21  ;;  %1112 = vmatpush1.bf16.msra.mxu1 %v421_v21 }
  0x3a   : > { %467 = vmatprep.subr.bf16.mxu0 %v424_v22  ;;  %1097 = vmatprep.subr.bf16.mxu1 %v424_v22  ;;  %v1439_v18 = vsub.s32 0, %v432_v17  ;;  %v1444_v20 = vsub.s32 1, %v432_v17  ;;  %v577_v17 = vld [vmem:[%s1453_s9 + $0xb8] sm:$0xff] }
  0x3c   : > { %v1447_v21 = vrot.slane %v429_v19, %v1439_v18  ;;  %v1456_v22 = vrot.slane %v429_v19, %v1444_v20 }
  0x3d   : > { %468 = vmatpush1.bf16.msra.mxu0 %v423_v27  ;;  %1113 = vmatpush1.bf16.msra.mxu1 %v423_v27 }
  0x3e   : > { %469 = vmatprep.subr.bf16.mxu0 %v426_v28  ;;  %1098 = vmatprep.subr.bf16.mxu1 %v426_v28  ;;  %v570_v28 = vld [vmem:[%s1453_s9 + $0x80] sm:$0xff] }
  0x41   : > { %470 = vmatpush1.bf16.msra.mxu0 %v425_v33  ;;  %1114 = vmatpush1.bf16.msra.mxu1 %v425_v33 }
  0x42   : > { %471 = vmatprep.subr.bf16.mxu0 %v428_v34  ;;  %1099 = vmatprep.subr.bf16.mxu1 %v428_v34 }
  0x45   : > { %472 = vmatpush1.bf16.msra.mxu0 %v427_v39  ;;  %1115 = vmatpush1.bf16.msra.mxu1 %v427_v39 }
  0x48   : > { %474 = vmatmul.mubr.bf16.vlgmr.msra.gmra.mrb[0].mxu0 %v381_v46  ;;  %514 = vmatmul.mubr.bf16.vlgmr.msra.gmra.mrb[0].mxu1 %v389_v47 }
  0x49   : > { %483 = vmatprep.mubr.bf16.mxu0 %v384_v48  ;;  %523 = vmatprep.mubr.bf16.mxu1 %v392_v49 }
  0x50   : > { %484 = vmatmul.mubr.bf16.gmra.mrb[4].mxu0 %v383_v58  ;;  %524 = vmatmul.mubr.bf16.gmra.mrb[4].mxu1 %v391_v59  ;;  %v574_v58 = vld [vmem:[%s1453_s9 + $0xa0] sm:$0xff] }
  0x51   : > { %493 = vmatprep.mubr.bf16.mxu0 %v386_v60  ;;  %533 = vmatprep.mubr.bf16.mxu1 %v394_v61 }
  0x58   : > { %494 = vmatmul.mubr.bf16.gmra.mrb[8].mxu0 %v385_v6  ;;  %534 = vmatmul.mubr.bf16.gmra.mrb[8].mxu1 %v393_v7  ;;  %v560_v6 = vld [vmem:[%s1453_s9 + $0x30] sm:$0xff] }
  0x59   : > { %503 = vmatprep.mubr.bf16.mxu0 %v388_v8  ;;  %543 = vmatprep.mubr.bf16.mxu1 %v396_v9 }
  0x60   : > { %504 = vmatmul.mubr.bf16.gmra.mrb[12].mxu0 %v387_v14  ;;  %544 = vmatmul.mubr.bf16.gmra.mrb[12].mxu1 %v395_v15  ;;  %v576_v15 = vld [vmem:[%s1453_s9 + $0xb0] sm:$0xff] }
 0x11b   : > { %v475_v23 = vpop.f32.mrb[0].mxu0  ;;  %v515_v24 = vpop.f32.mrb[0].mxu1 }
 0x11c   : > { %v476_v26 = vadd.f32 %v475_v23, %v1447_v21  ;;  %v516_v27 = vadd.f32 %v515_v24, %v1447_v21  ;;  %v477_v29 = vpop.f32.mrb[1].mxu0  ;;  %v517_v30 = vpop.f32.mrb[1].mxu1 }
 0x11d   : > { %v478_v33 = vadd.f32 %v477_v29, %v1456_v22  ;;  %v518_v34 = vadd.f32 %v517_v30, %v1456_v22  ;;  %v479_v35 = vpop.f32.mrb[2].mxu0  ;;  %v519_v36 = vpop.f32.mrb[2].mxu1 }
 0x11e   : > { %v520_v38 = vadd.f32 %v519_v36, %v1447_v21  ;;  %v481_v39 = vpop.f32.mrb[3].mxu0  ;;  %v521_v40 = vpop.f32.mrb[3].mxu1  ;;  %v1468_v41 = vadd.f32 %v554_v25, %v476_v26  ;;  %v1471_v43 = vadd.f32 %v570_v28, %v516_v27  ;;  %v480_v47 = vadd.f32 %v479_v35, %v1447_v21  ;;  %v578_v35 = vld [vmem:[%s1453_s9 + $0xc0] sm:$0xff] }
 0x11f   : > { %v1473_v44 = vadd.f32 %v571_v31, %v518_v34  ;;  %v522_v45 = vadd.f32 %v521_v40, %v1456_v22  ;;  %v1476_v46 = vadd.f32 %v555_v32, %v478_v33  ;;  %v482_v48 = vadd.f32 %v481_v39, %v1456_v22  ;;  %v562_v33 = vld [vmem:[%s1453_s9 + $0x40] sm:$0xff]  ;;  %v563_v40 = vld [vmem:[%s1453_s9 + $0x48] sm:$0xff] }
 0x120   : > { %v1480_v49 = vadd.f32 %v572_v37, %v520_v38  ;;  %v1494_v60 = vadd.f32 %v556_v50, %v480_v47  ;;  %v579_v47 = vld [vmem:[%s1453_s9 + $0xc8] sm:$0xff] }
 0x121   : > { %v620_v52 = vadd.f32 %v1476_v46, %v1468_v41  ;;  %v1486_v53 = vadd.f32 %v573_v42, %v522_v45  ;;  %v644_v59 = vadd.f32 %v1473_v44, %v1471_v43  ;;  %v1496_v61 = vadd.f32 %v557_v51, %v482_v48  ;;  %v564_v51 = vld [vmem:[%s1453_s9 + $0x50] sm:$0xff] }
 0x123   : > { %v485_v54 = vpop.f32.mrb[4].mxu0  ;;  %621 = vadd.xlane.f32.xlu0 %v620_v52  ;;  %v647_v56 = vadd.f32 %v1486_v53, %v1480_v49  ;;  %v525_v57 = vpop.f32.mrb[4].mxu1  ;;  %v623_v27 = vadd.f32 %v1496_v61, %v1494_v60 }
 0x124   : > { %v486_v62 = vadd.f32 %v485_v54, %v1447_v21  ;;  %v487_v63 = vpop.f32.mrb[5].mxu0  ;;  %v526_v1 = vadd.f32 %v525_v57, %v1447_v21  ;;  %v527_v2 = vpop.f32.mrb[5].mxu1 }
 0x125   : > { %v488_v4 = vadd.f32 %v487_v63, %v1456_v22  ;;  %648 = vadd.xlane.f32.xlu1 %v647_v56  ;;  %v489_v5 = vpop.f32.mrb[6].mxu0  ;;  %v528_v7 = vadd.f32 %v527_v2, %v1456_v22  ;;  %v529_v8 = vpop.f32.mrb[6].mxu1 }
 0x126   : > { %v1505_v9 = vadd.f32 %v558_v55, %v486_v62  ;;  %v490_v10 = vadd.f32 %v489_v5, %v1447_v21  ;;  %v491_v11 = vpop.f32.mrb[7].mxu0  ;;  %v1509_v13 = vadd.f32 %v574_v58, %v526_v1  ;;  %v530_v14 = vadd.f32 %v529_v8, %v1447_v21  ;;  %v531_v16 = vpop.f32.mrb[7].mxu1  ;;  %v565_v62 = vld [vmem:[%s1453_s9 + $0x58] sm:$0xff] }
 0x127   : > { %v1514_v19 = vadd.f32 %v559_v0, %v488_v4  ;;  %v492_v23 = vadd.f32 %v491_v11, %v1456_v22  ;;  %645 = vadd.xlane.f32.xlu0 %v644_v59  ;;  %v1517_v24 = vadd.f32 %v575_v3, %v528_v7  ;;  %v532_v25 = vadd.f32 %v531_v16, %v1456_v22  ;;  %v580_v0 = vld [vmem:[%s1453_s9 + $0xd0] sm:$0xff]  ;;  %v581_v5 = vld [vmem:[%s1453_s9 + $0xd8] sm:$0xff] }
 0x128   : > { %v1520_v26 = vadd.f32 %v560_v6, %v490_v10  ;;  %v1526_v29 = vadd.f32 %v576_v15, %v530_v14  ;;  %v566_v15 = vld [vmem:[%s1453_s9 + $0x60] sm:$0xff] }
 0x129   : > { %v1524_v28 = vadd.f32 %v561_v12, %v492_v23  ;;  %v626_v30 = vadd.f32 %v1514_v19, %v1505_v9  ;;  %v1530_v31 = vadd.f32 %v577_v17, %v532_v25  ;;  %v650_v37 = vadd.f32 %v1517_v24, %v1509_v13  ;;  %v582_v17 = vld [vmem:[%s1453_s9 + $0xe0] sm:$0xff] }
 0x12b   : > { %v495_v32 = vpop.f32.mrb[8].mxu0  ;;  %627 = vadd.xlane.f32.xlu1 %v626_v30  ;;  %624 = vadd.xlane.f32.xlu0 %v623_v27  ;;  %v535_v34 = vpop.f32.mrb[8].mxu1  ;;  %v629_v36 = vadd.f32 %v1524_v28, %v1520_v26  ;;  %v653_v55 = vadd.f32 %v1530_v31, %v1526_v29 }
 0x12c   : > { %v496_v38 = vadd.f32 %v495_v32, %v1447_v21  ;;  %v497_v39 = vpop.f32.mrb[9].mxu0  ;;  %v536_v42 = vadd.f32 %v535_v34, %v1447_v21  ;;  %v537_v45 = vpop.f32.mrb[9].mxu1  ;;  %v567_v32 = vld [vmem:[%s1453_s9 + $0x68] sm:$0xff] }
 0x12d   : > { %v498_v48 = vadd.f32 %v497_v39, %v1456_v22  ;;  %v499_v50 = vpop.f32.mrb[10].mxu0  ;;  %v538_v52 = vadd.f32 %v537_v45, %v1456_v22  ;;  %v539_v54 = vpop.f32.mrb[10].mxu1 }
 0x12e   : > { %v1547_v56 = vadd.f32 %v562_v33, %v496_v38  ;;  %v500_v57 = vadd.f32 %v499_v50, %v1447_v21  ;;  %v1550_v58 = vadd.f32 %v578_v35, %v536_v42  ;;  %v501_v59 = vpop.f32.mrb[11].mxu0  ;;  %v540_v63 = vadd.f32 %v539_v54, %v1447_v21  ;;  %v541_v1 = vpop.f32.mrb[11].mxu1  ;;  %v583_v35 = vld [vmem:[%s1453_s9 + $0xe8] sm:$0xff]  ;;  %v568_v38 = vld [vmem:[%s1453_s9 + $0x70] sm:$0xff] }
 0x12f   : > { %v1555_v2 = vadd.f32 %v563_v40, %v498_v48  ;;  %630 = vadd.xlane.f32.xlu1 %v629_v36  ;;  %651 = vadd.xlane.f32.xlu0 %v650_v37  ;;  %v502_v3 = vadd.f32 %v501_v59, %v1456_v22  ;;  %v1558_v4 = vadd.f32 %v579_v47, %v538_v52 }
 0x130   : > { %v1561_v6 = vadd.f32 %v564_v51, %v500_v57  ;;  %v542_v7 = vadd.f32 %v541_v1, %v1456_v22  ;;  %v1566_v10 = vadd.f32 %v580_v0, %v540_v63  ;;  %v569_v51 = vld [vmem:[%s1453_s9 + $0x78] sm:$0xff] }
 0x131   : > { %v1564_v8 = vadd.f32 %v565_v62, %v502_v3  ;;  %v632_v11 = vadd.f32 %v1555_v2, %v1547_v56  ;;  %v656_v25 = vadd.f32 %v1558_v4, %v1550_v58  ;;  %v584_v62 = vld [vmem:[%s1453_s9 + $0xf0] sm:$0xff]  ;;  %v585_v1 = vld [vmem:[%s1453_s9 + $0xf8] sm:$0xff] }
 0x132   : > { %v1570_v12 = vadd.f32 %v581_v5, %v542_v7 }
 0x133   : > { %v505_v14 = vpop.f32.mrb[12].mxu0  ;;  %654 = vadd.xlane.f32.xlu1 %v653_v55  ;;  %633 = vadd.xlane.f32.xlu0 %v632_v11  ;;  %v545_v16 = vpop.f32.mrb[12].mxu1  ;;  %v635_v23 = vadd.f32 %v1564_v8, %v1561_v6 }
 0x134   : > { %v506_v27 = vadd.f32 %v505_v14, %v1447_v21  ;;  %v507_v30 = vpop.f32.mrb[13].mxu0  ;;  %v546_v33 = vadd.f32 %v545_v16, %v1447_v21  ;;  %v547_v34 = vpop.f32.mrb[13].mxu1  ;;  %v659_v42 = vadd.f32 %v1570_v12, %v1566_v10 }
 0x135   : > { %v508_v36 = vadd.f32 %v507_v30, %v1456_v22  ;;  %v509_v37 = vpop.f32.mrb[14].mxu0  ;;  %v548_v39 = vadd.f32 %v547_v34, %v1456_v22  ;;  %v549_v40 = vpop.f32.mrb[14].mxu1 }
 0x136   : > { %v1587_v45 = vadd.f32 %v566_v15, %v506_v27  ;;  %v510_v47 = vadd.f32 %v509_v37, %v1447_v21  ;;  %v1590_v48 = vadd.f32 %v582_v17, %v546_v33  ;;  %v511_v50 = vpop.f32.mrb[15].mxu0  ;;  %v550_v52 = vadd.f32 %v549_v40, %v1447_v21  ;;  %v551_v54 = vpop.f32.mrb[15].mxu1 }
 0x137   : > { %v1594_v55 = vadd.f32 %v567_v32, %v508_v36  ;;  %636 = vadd.xlane.f32.xlu1 %v635_v23  ;;  %657 = vadd.xlane.f32.xlu0 %v656_v25  ;;  %v512_v57 = vadd.f32 %v511_v50, %v1456_v22  ;;  %v1597_v59 = vadd.f32 %v583_v35, %v548_v39 }
 0x138   : > { %v1600_v63 = vadd.f32 %v568_v38, %v510_v47  ;;  %v552_v0 = vadd.f32 %v551_v54, %v1456_v22  ;;  %v1608_v5 = vadd.f32 %v584_v62, %v550_v52 }
 0x139   : > { %v1604_v3 = vadd.f32 %v569_v51, %v512_v57  ;;  %v638_v21 = vadd.f32 %v1594_v55, %v1587_v45  ;;  %v662_v14 = vadd.f32 %v1597_v59, %v1590_v48 }
 0x13a   : > { %v1610_v7 = vadd.f32 %v585_v1, %v552_v0 }
 0x13b   : > { %660 = vadd.xlane.f32.xlu1 %v659_v42  ;;  %639 = vadd.xlane.f32.xlu0 %v638_v21  ;;  %v641_v11 = vadd.f32 %v1604_v3, %v1600_v63 }
 0x13c   : > { %v665_v22 = vadd.f32 %v1610_v7, %v1608_v5 }
 0x13f   : > { %642 = vadd.xlane.f32.xlu1 %v641_v11  ;;  %663 = vadd.xlane.f32.xlu0 %v662_v14 }
 0x143   : > { %666 = vadd.xlane.f32.xlu1 %v665_v22 }
 0x1b0   : > { %v622_v15 = vpop.xlane.xlu0 %621 }
 0x1b1   : > { %v669_v16 = vmul.f32 0.00390625, %v622_v15 }
 0x1b2   : > { %v649_v25 = vpop.xlane.xlu1 %648 }
 0x1b3   : > { %v1619_v17 = vsub.f32 %v1468_v41, %v669_v16  ;;  %v1622_v23 = vsub.f32 %v1476_v46, %v669_v16  ;;  %v678_v41 = vmul.f32 0.00390625, %v649_v25 }
 0x1b4   : > { %v646_v27 = vpop.xlane.xlu0 %645 }
 0x1b5   : > { %v677_v30 = vmul.f32 0.00390625, %v646_v27  ;;  %v717_v32 = vmul.f32 %v1619_v17, %v1619_v17  ;;  %v718_v33 = vmul.f32 %v1622_v23, %v1622_v23  ;;  %v1651_v51 = vsub.f32 %v1480_v49, %v678_v41 }
 0x1b6   : > { %v1654_v52 = vsub.f32 %v1486_v53, %v678_v41 }
 0x1b7   : > { %v1629_v34 = vsub.f32 %v1471_v43, %v677_v30  ;;  %v1632_v35 = vsub.f32 %v1473_v44, %v677_v30  ;;  %v749_v46 = vadd.f32 %v718_v33, %v717_v32  ;;  %v735_v25 = vmul.f32 %v1651_v51, %v1651_v51 }
 0x1b8   : > { %v628_v36 = vpop.xlane.xlu1 %627  ;;  %v625_v37 = vpop.xlane.xlu0 %624 }
 0x1b9   : > { %v671_v38 = vmul.f32 0.00390625, %v628_v36  ;;  %v670_v39 = vmul.f32 0.00390625, %v625_v37  ;;  %v733_v40 = vmul.f32 %v1629_v34, %v1629_v34  ;;  %v734_v42 = vmul.f32 %v1632_v35, %v1632_v35  ;;  %750 = vadd.xlane.f32.xlu0 %v749_v46 }
 0x1bb   : > { %v1639_v47 = vsub.f32 %v1505_v9, %v671_v38  ;;  %v1642_v43 = vsub.f32 %v1514_v19, %v671_v38  ;;  %v1645_v44 = vsub.f32 %v1494_v60, %v670_v39  ;;  %v1648_v50 = vsub.f32 %v1496_v61, %v670_v39 }
 0x1bc   : > { %v631_v54 = vpop.xlane.xlu1 %630  ;;  %v652_v57 = vpop.xlane.xlu0 %651  ;;  %v773_v62 = vadd.f32 %v734_v42, %v733_v40 }
 0x1bd   : > { %v672_v9 = vmul.f32 0.00390625, %v631_v54  ;;  %v679_v0 = vmul.f32 0.00390625, %v652_v57  ;;  %v721_v19 = vmul.f32 %v1639_v47, %v1639_v47  ;;  %v722_v60 = vmul.f32 %v1642_v43, %v1642_v43 }
 0x1be   : > { %774 = vadd.xlane.f32.xlu0 %v773_v62  ;;  %v719_v61 = vmul.f32 %v1645_v44, %v1645_v44  ;;  %v720_v49 = vmul.f32 %v1648_v50, %v1648_v50 }
 0x1bf   : > { %v1665_v53 = vsub.f32 %v1520_v26, %v672_v9  ;;  %v1668_v1 = vsub.f32 %v1524_v28, %v672_v9  ;;  %v1671_v21 = vsub.f32 %v1509_v13, %v679_v0  ;;  %v1674_v11 = vsub.f32 %v1517_v24, %v679_v0 }
 0x1c0   : > { %v655_v14 = vpop.xlane.xlu1 %654  ;;  %v634_v22 = vpop.xlane.xlu0 %633  ;;  %v755_v15 = vadd.f32 %v722_v60, %v721_v19  ;;  %v752_v16 = vadd.f32 %v720_v49, %v719_v61  ;;  %v736_v26 = vmul.f32 %v1654_v52, %v1654_v52 }
 0x1c1   : > { %v680_v27 = vmul.f32 0.00390625, %v655_v14  ;;  %v673_v30 = vmul.f32 0.00390625, %v634_v22  ;;  %v737_v28 = vmul.f32 %v1671_v21, %v1671_v21  ;;  %v738_v13 = vmul.f32 %v1674_v11, %v1674_v11 }
 0x1c2   : > { %756 = vadd.xlane.f32.xlu0 %v755_v15  ;;  %753 = vadd.xlane.f32.xlu1 %v752_v16  ;;  %v723_v24 = vmul.f32 %v1665_v53, %v1665_v53  ;;  %v724_v36 = vmul.f32 %v1668_v1, %v1668_v1  ;;  %v776_v39 = vadd.f32 %v736_v26, %v735_v25 }
 0x1c3   : > { %v1687_v32 = vsub.f32 %v1526_v29, %v680_v27  ;;  %v1690_v33 = vsub.f32 %v1547_v56, %v673_v30  ;;  %v1693_v41 = vsub.f32 %v1555_v2, %v673_v30  ;;  %v1698_v37 = vsub.f32 %v1530_v31, %v680_v27 }
 0x1c4   : > { %v637_v46 = vpop.xlane.xlu1 %636  ;;  %v658_v38 = vpop.xlane.xlu0 %657  ;;  %v779_v40 = vadd.f32 %v738_v13, %v737_v28  ;;  %v758_v57 = vadd.f32 %v724_v36, %v723_v24 }
 0x1c5   : > { %v674_v42 = vmul.f32 0.00390625, %v637_v46  ;;  %v681_v54 = vmul.f32 0.00390625, %v658_v38  ;;  %v725_v29 = vmul.f32 %v1690_v33, %v1690_v33  ;;  %v726_v56 = vmul.f32 %v1693_v41, %v1693_v41 }
 0x1c6   : > { %777 = vadd.xlane.f32.xlu1 %v776_v39  ;;  %780 = vadd.xlane.f32.xlu0 %v779_v40  ;;  %v739_v62 = vmul.f32 %v1687_v32, %v1687_v32 }
 0x1c7   : > { %v1705_v2 = vsub.f32 %v1550_v58, %v681_v54  ;;  %v1708_v31 = vsub.f32 %v1558_v4, %v681_v54  ;;  %v1713_v9 = vsub.f32 %v1561_v6, %v674_v42  ;;  %v1716_v0 = vsub.f32 %v1564_v8, %v674_v42 }
 0x1c8   : > { %v661_v19 = vpop.xlane.xlu1 %660  ;;  %v640_v60 = vpop.xlane.xlu0 %639  ;;  %v761_v61 = vadd.f32 %v726_v56, %v725_v29  ;;  %v740_v58 = vmul.f32 %v1698_v37, %v1698_v37 }
 0x1c9   : > { %v682_v49 = vmul.f32 0.00390625, %v661_v19  ;;  %v675_v14 = vmul.f32 0.00390625, %v640_v60  ;;  %v741_v4 = vmul.f32 %v1705_v2, %v1705_v2  ;;  %v742_v22 = vmul.f32 %v1708_v31, %v1708_v31 }
 0x1ca   : > { %759 = vadd.xlane.f32.xlu1 %v758_v57  ;;  %762 = vadd.xlane.f32.xlu0 %v761_v61  ;;  %v782_v27 = vadd.f32 %v740_v58, %v739_v62  ;;  %v727_v28 = vmul.f32 %v1713_v9, %v1713_v9 }
 0x1cb   : > { %v1725_v6 = vsub.f32 %v1566_v10, %v682_v49  ;;  %v1728_v8 = vsub.f32 %v1570_v12, %v682_v49  ;;  %v1731_v15 = vsub.f32 %v1587_v45, %v675_v14  ;;  %v1734_v16 = vsub.f32 %v1594_v55, %v675_v14 }
 0x1cc   : > { %v643_v25 = vpop.xlane.xlu1 %642  ;;  %v664_v26 = vpop.xlane.xlu0 %663  ;;  %v785_v30 = vadd.f32 %v742_v22, %v741_v4  ;;  %v728_v10 = vmul.f32 %v1716_v0, %v1716_v0 }
 0x1cd   : > { %v676_v13 = vmul.f32 0.00390625, %v643_v25  ;;  %v683_v24 = vmul.f32 0.00390625, %v664_v26  ;;  %v729_v12 = vmul.f32 %v1731_v15, %v1731_v15  ;;  %v730_v45 = vmul.f32 %v1734_v16, %v1734_v16 }
 0x1ce   : > { %783 = vadd.xlane.f32.xlu1 %v782_v27  ;;  %786 = vadd.xlane.f32.xlu0 %v785_v30  ;;  %v743_v46 = vmul.f32 %v1725_v6, %v1725_v6  ;;  %v744_v38 = vmul.f32 %v1728_v8, %v1728_v8  ;;  %v764_v54 = vadd.f32 %v728_v10, %v727_v28 }
 0x1cf   : > { %v1745_v55 = vsub.f32 %v1590_v48, %v683_v24  ;;  %v1748_v36 = vsub.f32 %v1597_v59, %v683_v24  ;;  %v1755_v39 = vsub.f32 %v1600_v63, %v676_v13  ;;  %v1758_v40 = vsub.f32 %v1604_v3, %v676_v13  ;;  %v618_v13 = vld [vmem:[%s1937_s4] sm:$0x3] }
 0x1d0   : > { %v667_v42 = vpop.xlane.xlu1 %666  ;;  %v767_v29 = vadd.f32 %v730_v45, %v729_v12  ;;  %v788_v57 = vadd.f32 %v744_v38, %v743_v46  ;;  %v619_v38 = vld [vmem:[%s1938_s5] sm:$0x3] }
 0x1d1   : > { %v684_v48 = vmul.f32 0.00390625, %v667_v42  ;;  %v745_v59 = vmul.f32 %v1745_v55, %v1745_v55  ;;  %v746_v56 = vmul.f32 %v1748_v36, %v1748_v36  ;;  %v731_v19 = vmul.f32 %v1755_v39, %v1755_v39 }
 0x1d2   : > { %765 = vadd.xlane.f32.xlu1 %v764_v54  ;;  %768 = vadd.xlane.f32.xlu0 %v767_v29  ;;  %v732_v60 = vmul.f32 %v1758_v40, %v1758_v40  ;;  %v1785_v29 = vrot.slane %v618_v13, %v1439_v18 }
 0x1d3   : > { %v791_v62 = vadd.f32 %v746_v56, %v745_v59  ;;  %v1765_v63 = vsub.f32 %v1608_v5, %v684_v48  ;;  %v1768_v3 = vsub.f32 %v1610_v7, %v684_v48  ;;  %v1788_v48 = vrot.slane %v618_v13, %v1444_v20 }
 0x1d4   : > { %v770_v61 = vadd.f32 %v732_v60, %v731_v19  ;;  %v1794_v19 = vrot.slane %v619_v38, %v1444_v20 }
 0x1d5   : > { %v747_v58 = vmul.f32 %v1765_v63, %v1765_v63  ;;  %v748_v49 = vmul.f32 %v1768_v3, %v1768_v3 }
 0x1d6   : > { %789 = vadd.xlane.f32.xlu1 %v788_v57  ;;  %792 = vadd.xlane.f32.xlu0 %v791_v62  ;;  %v1791_v62 = vrot.slane %v619_v38, %v1439_v18 }
 0x1d7   : > { %v794_v5 = vadd.f32 %v748_v49, %v747_v58 }
 0x1da   : > { %771 = vadd.xlane.f32.xlu1 %v770_v61 }
 0x1de   : > { %795 = vadd.xlane.f32.xlu1 %v794_v5 }
 0x246   : > { %v751_v7 = vpop.xlane.xlu0 %750 }
 0x247   : > { %v797_v14 = vmul.f32 0.00390625, %v751_v7 }
 0x249   : > { %v813_v4 = vadd.f32 1e-12, %v797_v14 }
 0x24b   : > { %v775_v22 = vpop.xlane.xlu0 %774  ;;  %1124 = vrsqrt.f32 %v813_v4 }
 0x24c   : > { %v805_v25 = vmul.f32 0.00390625, %v775_v22 }
 0x24e   : > { %v821_v26 = vadd.f32 1e-12, %v805_v25 }
 0x24f   : > { %v754_v27 = vpop.xlane.xlu1 %753  ;;  %v757_v30 = vpop.xlane.xlu0 %756 }
 0x250   : > { %1126 = vrsqrt.f32 %v821_v26  ;;  %v798_v28 = vmul.f32 0.00390625, %v754_v27  ;;  %v799_v10 = vmul.f32 0.00390625, %v757_v30 }
 0x252   : > { %v814_v24 = vadd.f32 1e-12, %v798_v28  ;;  %v815_v12 = vadd.f32 1e-12, %v799_v10 }
 0x253   : > { %v778_v45 = vpop.xlane.xlu1 %777  ;;  %v781_v46 = vpop.xlane.xlu0 %780 }
 0x254   : > { %1128 = vrsqrt.f32 %v814_v24  ;;  %v806_v42 = vmul.f32 0.00390625, %v778_v45  ;;  %v807_v54 = vmul.f32 0.00390625, %v781_v46 }
 0x255   : > { %1130 = vrsqrt.f32 %v815_v12  ;;  %v1125_v59 = vpop.eup %1124 }
 0x256   : > { %v822_v56 = vadd.f32 1e-12, %v806_v42  ;;  %v823_v57 = vadd.f32 1e-12, %v807_v54  ;;  %v845_v60 = vmul.f32 %v1125_v59, %v1619_v17  ;;  %v846_v61 = vmul.f32 %v1125_v59, %v1622_v23 }
 0x257   : > { %v760_v58 = vpop.xlane.xlu1 %759  ;;  %v763_v49 = vpop.xlane.xlu0 %762 }
 0x258   : > { %1132 = vrsqrt.f32 %v822_v56  ;;  %v800_v5 = vmul.f32 0.00390625, %v760_v58  ;;  %v801_v7 = vmul.f32 0.00390625, %v763_v49  ;;  %v888_v14 = vmul.f32 %v1785_v29, %v845_v60 }
 0x259   : > { %v889_v4 = vmul.f32 %v1788_v48, %v846_v61  ;;  %1134 = vrsqrt.f32 %v823_v57 }
 0x25a   : > { %v1127_v22 = vpop.eup %1126  ;;  %v816_v18 = vadd.f32 1e-12, %v800_v5  ;;  %v817_v20 = vadd.f32 1e-12, %v801_v7  ;;  %v931_v17 = vadd.f32 %v1791_v62, %v888_v14 }
 0x25b   : > { %v932_v23 = vadd.f32 %v1794_v19, %v889_v4  ;;  %v861_v25 = vmul.f32 %v1127_v22, %v1629_v34  ;;  %v862_v26 = vmul.f32 %v1127_v22, %v1632_v35  ;;  %v784_v27 = vpop.xlane.xlu1 %783  ;;  %v787_v30 = vpop.xlane.xlu0 %786 }
 0x25c   : > { %1136 = vrsqrt.f32 %v816_v18  ;;  %v808_v28 = vmul.f32 0.00390625, %v784_v27  ;;  %v809_v10 = vmul.f32 0.00390625, %v787_v30  ;;  %963 = vst [vmem:[%s1804_s12] sm:$0xff] %v931_v17 }
 0x25d   : > { %964 = vst [vmem:[%s1804_s12 + $0x8] sm:$0xff] %v932_v23  ;;  %v904_v13 = vmul.f32 %v1785_v29, %v861_v25  ;;  %v905_v24 = vmul.f32 %v1788_v48, %v862_v26  ;;  %1138 = vrsqrt.f32 %v817_v20 }
 0x25e   : > { %v1129_v12 = vpop.eup %1128  ;;  %v824_v45 = vadd.f32 1e-12, %v808_v28  ;;  %v825_v46 = vadd.f32 1e-12, %v809_v10 }
 0x25f   : > { %v1131_v34 = vpop.eup %1130  ;;  %v947_v35 = vadd.f32 %v1791_v62, %v904_v13  ;;  %v948_v38 = vadd.f32 %v1794_v19, %v905_v24  ;;  %v847_v42 = vmul.f32 %v1129_v12, %v1645_v44  ;;  %v848_v54 = vmul.f32 %v1129_v12, %v1648_v50  ;;  %v766_v59 = vpop.xlane.xlu1 %765 }
 0x260   : > { %v769_v56 = vpop.xlane.xlu0 %768  ;;  %v849_v57 = vmul.f32 %v1131_v34, %v1639_v47  ;;  %v850_v60 = vmul.f32 %v1131_v34, %v1642_v43  ;;  %1140 = vrsqrt.f32 %v824_v45  ;;  %v802_v61 = vmul.f32 0.00390625, %v766_v59 }
 0x261   : > { %979 = vst [vmem:[%s1804_s12 + $0x80] sm:$0xff] %v947_v35  ;;  %980 = vst [vmem:[%s1804_s12 + $0x88] sm:$0xff] %v948_v38  ;;  %v890_v58 = vmul.f32 %v1785_v29, %v847_v42  ;;  %v891_v49 = vmul.f32 %v1788_v48, %v848_v54  ;;  %1142 = vrsqrt.f32 %v825_v46  ;;  %v803_v5 = vmul.f32 0.00390625, %v769_v56 }
 0x262   : > { %v1133_v44 = vpop.eup %1132  ;;  %v892_v50 = vmul.f32 %v1785_v29, %v849_v57  ;;  %v893_v7 = vmul.f32 %v1788_v48, %v850_v60  ;;  %v818_v47 = vadd.f32 1e-12, %v802_v61 }
 0x263   : > { %v1135_v14 = vpop.eup %1134  ;;  %v933_v43 = vadd.f32 %v1791_v62, %v890_v58  ;;  %v934_v4 = vadd.f32 %v1794_v19, %v891_v49  ;;  %v863_v22 = vmul.f32 %v1133_v44, %v1651_v51  ;;  %v864_v18 = vmul.f32 %v1133_v44, %v1654_v52  ;;  %v790_v20 = vpop.xlane.xlu1 %789 }
 0x264   : > { %v793_v17 = vpop.xlane.xlu0 %792  ;;  %v935_v23 = vadd.f32 %v1791_v62, %v892_v50  ;;  %v936_v25 = vadd.f32 %v1794_v19, %v893_v7  ;;  %v865_v26 = vmul.f32 %v1135_v14, %v1671_v21  ;;  %v866_v27 = vmul.f32 %v1135_v14, %v1674_v11 }
 0x265   : > { %965 = vst [vmem:[%s1804_s12 + $0x10] sm:$0xff] %v933_v43  ;;  %966 = vst [vmem:[%s1804_s12 + $0x18] sm:$0xff] %v934_v4  ;;  %v906_v30 = vmul.f32 %v1785_v29, %v863_v22  ;;  %v907_v28 = vmul.f32 %v1788_v48, %v864_v18  ;;  %1144 = vrsqrt.f32 %v818_v47  ;;  %v819_v51 = vadd.f32 1e-12, %v803_v5 }
 0x266   : > { %v1137_v10 = vpop.eup %1136  ;;  %967 = vst [vmem:[%s1804_s12 + $0x20] sm:$0xff] %v935_v23  ;;  %968 = vst [vmem:[%s1804_s12 + $0x28] sm:$0xff] %v936_v25  ;;  %v908_v52 = vmul.f32 %v1785_v29, %v865_v26  ;;  %v909_v13 = vmul.f32 %v1788_v48, %v866_v27  ;;  %v810_v21 = vmul.f32 0.00390625, %v790_v20  ;;  %v811_v24 = vmul.f32 0.00390625, %v793_v17 }
 0x267   : > { %v1139_v11 = vpop.eup %1138  ;;  %v949_v12 = vadd.f32 %v1791_v62, %v906_v30  ;;  %v950_v45 = vadd.f32 %v1794_v19, %v907_v28  ;;  %v851_v46 = vmul.f32 %v1137_v10, %v1665_v53  ;;  %v852_v34 = vmul.f32 %v1137_v10, %v1668_v1  ;;  %v772_v35 = vpop.xlane.xlu1 %771 }
 0x268   : > { %v951_v38 = vadd.f32 %v1791_v62, %v908_v52  ;;  %v952_v42 = vadd.f32 %v1794_v19, %v909_v13  ;;  %v853_v54 = vmul.f32 %v1139_v11, %v1690_v33  ;;  %v854_v59 = vmul.f32 %v1139_v11, %v1693_v41 }
 0x269   : > { %981 = vst [vmem:[%s1804_s12 + $0x90] sm:$0xff] %v949_v12  ;;  %982 = vst [vmem:[%s1804_s12 + $0x98] sm:$0xff] %v950_v45  ;;  %v894_v56 = vmul.f32 %v1785_v29, %v851_v46  ;;  %v895_v57 = vmul.f32 %v1788_v48, %v852_v34  ;;  %1146 = vrsqrt.f32 %v819_v51  ;;  %v826_v60 = vadd.f32 1e-12, %v810_v21 }
 0x26a   : > { %v1141_v53 = vpop.eup %1140  ;;  %983 = vst [vmem:[%s1804_s12 + $0xa0] sm:$0xff] %v951_v38  ;;  %984 = vst [vmem:[%s1804_s12 + $0xa8] sm:$0xff] %v952_v42  ;;  %v896_v1 = vmul.f32 %v1785_v29, %v853_v54  ;;  %v897_v61 = vmul.f32 %v1788_v48, %v854_v59  ;;  %v827_v33 = vadd.f32 1e-12, %v811_v24  ;;  %v804_v58 = vmul.f32 0.00390625, %v772_v35 }
 0x26b   : > { %v1143_v41 = vpop.eup %1142  ;;  %v937_v49 = vadd.f32 %v1791_v62, %v894_v56  ;;  %v938_v5 = vadd.f32 %v1794_v19, %v895_v57  ;;  %v867_v44 = vmul.f32 %v1141_v53, %v1687_v32  ;;  %v868_v50 = vmul.f32 %v1141_v53, %v1698_v37  ;;  %v796_v7 = vpop.xlane.xlu1 %795 }
 0x26c   : > { %v939_v47 = vadd.f32 %v1791_v62, %v896_v1  ;;  %v940_v14 = vadd.f32 %v1794_v19, %v897_v61  ;;  %v869_v43 = vmul.f32 %v1143_v41, %v1705_v2  ;;  %v870_v4 = vmul.f32 %v1143_v41, %v1708_v31 }
 0x26d   : > { %969 = vst [vmem:[%s1804_s12 + $0x30] sm:$0xff] %v937_v49  ;;  %970 = vst [vmem:[%s1804_s12 + $0x38] sm:$0xff] %v938_v5  ;;  %v910_v22 = vmul.f32 %v1785_v29, %v867_v44  ;;  %v911_v18 = vmul.f32 %v1788_v48, %v868_v50  ;;  %1148 = vrsqrt.f32 %v826_v60  ;;  %v820_v32 = vadd.f32 1e-12, %v804_v58 }
 0x26e   : > { %971 = vst [vmem:[%s1804_s12 + $0x40] sm:$0xff] %v939_v47  ;;  %972 = vst [vmem:[%s1804_s12 + $0x48] sm:$0xff] %v940_v14  ;;  %v912_v37 = vmul.f32 %v1785_v29, %v869_v43  ;;  %v913_v2 = vmul.f32 %v1788_v48, %v870_v4  ;;  %1150 = vrsqrt.f32 %v827_v33  ;;  %v812_v31 = vmul.f32 0.00390625, %v796_v7 }
 0x26f   : > { %v1145_v20 = vpop.eup %1144  ;;  %v953_v17 = vadd.f32 %v1791_v62, %v910_v22  ;;  %v954_v23 = vadd.f32 %v1794_v19, %v911_v18  ;;  %1152 = vrsqrt.f32 %v820_v32 }
 0x270   : > { %v955_v25 = vadd.f32 %v1791_v62, %v912_v37  ;;  %v956_v26 = vadd.f32 %v1794_v19, %v913_v2  ;;  %v855_v27 = vmul.f32 %v1145_v20, %v1713_v9  ;;  %v856_v30 = vmul.f32 %v1145_v20, %v1716_v0 }
 0x271   : > { %985 = vst [vmem:[%s1804_s12 + $0xb0] sm:$0xff] %v953_v17  ;;  %986 = vst [vmem:[%s1804_s12 + $0xb8] sm:$0xff] %v954_v23  ;;  %v828_v28 = vadd.f32 1e-12, %v812_v31 }
 0x272   : > { %987 = vst [vmem:[%s1804_s12 + $0xc0] sm:$0xff] %v955_v25  ;;  %988 = vst [vmem:[%s1804_s12 + $0xc8] sm:$0xff] %v956_v26  ;;  %v898_v51 = vmul.f32 %v1785_v29, %v855_v27  ;;  %v899_v10 = vmul.f32 %v1788_v48, %v856_v30 }
 0x273   : > { %v1147_v52 = vpop.eup %1146  ;;  %1154 = vrsqrt.f32 %v828_v28 }
 0x274   : > { %v941_v13 = vadd.f32 %v1791_v62, %v898_v51  ;;  %v942_v21 = vadd.f32 %v1794_v19, %v899_v10  ;;  %v857_v9 = vmul.f32 %v1147_v52, %v1731_v15  ;;  %v858_v0 = vmul.f32 %v1147_v52, %v1734_v16 }
 0x276   : > { %973 = vst [vmem:[%s1804_s12 + $0x50] sm:$0xff] %v941_v13  ;;  %974 = vst [vmem:[%s1804_s12 + $0x58] sm:$0xff] %v942_v21  ;;  %v900_v24 = vmul.f32 %v1785_v29, %v857_v9  ;;  %v901_v11 = vmul.f32 %v1788_v48, %v858_v0 }
 0x277   : > { %v1149_v12 = vpop.eup %1148 }
 0x278   : > { %v1151_v45 = vpop.eup %1150  ;;  %v943_v46 = vadd.f32 %v1791_v62, %v900_v24  ;;  %v944_v34 = vadd.f32 %v1794_v19, %v901_v11  ;;  %v871_v35 = vmul.f32 %v1149_v12, %v1725_v6  ;;  %v872_v38 = vmul.f32 %v1149_v12, %v1728_v8 }
 0x279   : > { %v1153_v15 = vpop.eup %1152  ;;  %v873_v42 = vmul.f32 %v1151_v45, %v1745_v55  ;;  %v874_v16 = vmul.f32 %v1151_v45, %v1748_v36 }
 0x27a   : > { %975 = vst [vmem:[%s1804_s12 + $0x60] sm:$0xff] %v943_v46  ;;  %976 = vst [vmem:[%s1804_s12 + $0x68] sm:$0xff] %v944_v34  ;;  %v914_v54 = vmul.f32 %v1785_v29, %v871_v35  ;;  %v915_v59 = vmul.f32 %v1788_v48, %v872_v38  ;;  %v859_v56 = vmul.f32 %v1153_v15, %v1755_v39 }
 0x27b   : > { %v860_v57 = vmul.f32 %v1153_v15, %v1758_v40  ;;  %v916_v6 = vmul.f32 %v1785_v29, %v873_v42  ;;  %v917_v8 = vmul.f32 %v1788_v48, %v874_v16 }
 0x27c   : > { %v957_v55 = vadd.f32 %v1791_v62, %v914_v54  ;;  %v958_v36 = vadd.f32 %v1794_v19, %v915_v59  ;;  %v902_v60 = vmul.f32 %v1785_v29, %v859_v56 }
 0x27d   : > { %v903_v53 = vmul.f32 %v1788_v48, %v860_v57  ;;  %v1155_v1 = vpop.eup %1154  ;;  %v959_v39 = vadd.f32 %v1791_v62, %v916_v6  ;;  %v960_v40 = vadd.f32 %v1794_v19, %v917_v8 }
 0x27e   : > { %989 = vst [vmem:[%s1804_s12 + $0xd0] sm:$0xff] %v957_v55  ;;  %990 = vst [vmem:[%s1804_s12 + $0xd8] sm:$0xff] %v958_v36  ;;  %v945_v61 = vadd.f32 %v1791_v62, %v902_v60  ;;  %v875_v58 = vmul.f32 %v1155_v1, %v1765_v63  ;;  %v876_v41 = vmul.f32 %v1155_v1, %v1768_v3 }
 0x27f   : > { %v946_v33 = vadd.f32 %v1794_v19, %v903_v53  ;;  %991 = vst [vmem:[%s1804_s12 + $0xe0] sm:$0xff] %v959_v39  ;;  %992 = vst [vmem:[%s1804_s12 + $0xe8] sm:$0xff] %v960_v40 }
 0x280   : > { %977 = vst [vmem:[%s1804_s12 + $0x70] sm:$0xff] %v945_v61  ;;  %v918_v49 = vmul.f32 %v1785_v29, %v875_v58  ;;  %v919_v5 = vmul.f32 %v1788_v48, %v876_v41 }
 0x281   : > { %978 = vst [vmem:[%s1804_s12 + $0x78] sm:$0xff] %v946_v33 }
 0x282   : > { %v961_v44 = vadd.f32 %v1791_v62, %v918_v49  ;;  %v962_v50 = vadd.f32 %v1794_v19, %v919_v5 }
 0x284   : > { %993 = vst [vmem:[%s1804_s12 + $0xf0] sm:$0xff] %v961_v44  ;;  %994 = vst [vmem:[%s1804_s12 + $0xf8] sm:$0xff] %v962_v50 }
 0x285 PF: > { %s16_s21 = sadd.s32 1, %s1162_s21  }
 0x286   : > { %p13_p4 = scmp.ge.s32.totalorder %s16_s21, 4  }
 0x288   :  { %15 = sbr.rel (!%p13_p4) target bundleno = 1 (0x1), region = 77 }

// kernel: camembert_classifier_forward.19
= control target key start
LH: loop header
LB: loop body
LE: loop exit
PB: predicated region body
PF: predicated region fallthrough
CT: control target
= control target key end

     0   :  { %v300_v7 = vmov 0.0   ;;  %s513_s0 = inlined_call_operand.vmem [shape: f32[2,256], index: 0, kind: input, shape index: {}]   ;;  %s514_s1 = inlined_call_operand.vmem [shape: f32[256,128], index: 1, kind: input, shape index: {}]   ;;  %s515_s2 = inlined_call_operand.vmem [shape: f32[1,128], index: 2, kind: input, shape index: {}]   ;;  %s516_s3 = inlined_call_operand.vmem [shape: f32[128,128], index: 3, kind: input, shape index: {}]   ;;  %s517_s4 = inlined_call_operand.vmem [shape: f32[1,128], index: 4, kind: input, shape index: {}]   ;;  %s518_s5 = inlined_call_operand.hbm [shape: f32[2,128], index: 5, kind: output, shape index: {}]  }
   0x1   :  { %v39_v0 = vld [vmem:[%s514_s1 + $0x80] sm:$0xff]  ;;  %v40_v1 = vld [vmem:[%s514_s1 + $0x88] sm:$0xff]  ;;  %v41_v5 = vld [vmem:[%s514_s1 + $0x90] sm:$0xff]  ;;  %253 = vmatprep.subr.bf16.mxu1 %v300_v7 }
   0x2   :  { %v23_v2 = vld [vmem:[%s514_s1] sm:$0xff]  ;;  %v76_v3 = vpack.c.bf16 %v40_v1, %v39_v0  ;;  %v24_v4 = vld [vmem:[%s514_s1 + $0x8] sm:$0xff]  ;;  %v42_v6 = vld [vmem:[%s514_s1 + $0x98] sm:$0xff] }
   0x3   :  { %v68_v8 = vpack.c.bf16 %v24_v4, %v23_v2  ;;  %v77_v9 = vpack.c.bf16 %v42_v6, %v41_v5  ;;  %v25_v10 = vld [vmem:[%s514_s1 + $0x10] sm:$0xff]  ;;  %v26_v11 = vld [vmem:[%s514_s1 + $0x18] sm:$0xff]  ;;  %v43_v12 = vld [vmem:[%s514_s1 + $0xa0] sm:$0xff] }
   0x4   :  { %222 = vmatprep.subr.bf16.mxu0 %v76_v3  ;;  %v44_v13 = vld [vmem:[%s514_s1 + $0xa8] sm:$0xff]  ;;  %v69_v14 = vpack.c.bf16 %v26_v11, %v25_v10  ;;  %v27_v16 = vld [vmem:[%s514_s1 + $0x20] sm:$0xff]  ;;  %v45_v18 = vld [vmem:[%s514_s1 + $0xb0] sm:$0xff] }
   0x5   :  { %223 = vmatpush3.bf16.msra.mxu0 %v68_v8  ;;  %v78_v15 = vpack.c.bf16 %v44_v13, %v43_v12  ;;  %v28_v17 = vld [vmem:[%s514_s1 + $0x28] sm:$0xff]  ;;  %v46_v19 = vld [vmem:[%s514_s1 + $0xb8] sm:$0xff]  ;;  %v29_v22 = vld [vmem:[%s514_s1 + $0x30] sm:$0xff] }
   0x6   :  { %224 = vmatprep.subr.bf16.mxu0 %v77_v9  ;;  %v70_v20 = vpack.c.bf16 %v28_v17, %v27_v16  ;;  %v79_v21 = vpack.c.bf16 %v46_v19, %v45_v18  ;;  %v30_v23 = vld [vmem:[%s514_s1 + $0x38] sm:$0xff]  ;;  %v47_v24 = vld [vmem:[%s514_s1 + $0xc0] sm:$0xff]  ;;  %v48_v25 = vld [vmem:[%s514_s1 + $0xc8] sm:$0xff] }
   0x7   :  { %v391_v26 = vld.sshfl [vmem:[%s513_s0] sm:$0x33 pattern:$0x76325410]  ;;  %v133_v29 = vld [vmem:[%s516_s3 + $0x8] sm:$0xff]  ;;  %v134_v30 = vld [vmem:[%s516_s3 + $0x10] sm:$0xff]  ;;  %v71_v31 = vpack.c.bf16 %v30_v23, %v29_v22  ;;  %v80_v34 = vpack.c.bf16 %v48_v25, %v47_v24 }
   0x8   :  { %v63_v27 = vcombine.high %v391_v26, %v391_v26  ;;  %v132_v28 = vld [vmem:[%s516_s3] sm:$0xff]  ;;  %v135_v33 = vld [vmem:[%s516_s3 + $0x18] sm:$0xff]  ;;  %v32_v36 = vld [vmem:[%s514_s1 + $0x48] sm:$0xff] }
   0x9   :  { %225 = vmatpush3.bf16.msra.mxu0 %v69_v14  ;;  %v149_v32 = vpack.c.bf16 %v133_v29, %v132_v28  ;;  %v31_v35 = vld [vmem:[%s514_s1 + $0x40] sm:$0xff]  ;;  %v49_v38 = vld [vmem:[%s514_s1 + $0xd0] sm:$0xff]  ;;  %v50_v39 = vld [vmem:[%s514_s1 + $0xd8] sm:$0xff]  ;;  %v150_v40 = vpack.c.bf16 %v135_v33, %v134_v30 }
   0xa   :  { %226 = vmatprep.subr.bf16.mxu0 %v78_v15  ;;  %v67_v37 = vpack.c.bf16 %v63_v27, %v63_v27  ;;  %v136_v41 = vld [vmem:[%s516_s3 + $0x20] sm:$0xff]  ;;  %v137_v42 = vld [vmem:[%s516_s3 + $0x28] sm:$0xff] }
   0xb   :  { %254 = vmatpush3.bf16.msra.mxu1 %v149_v32 }
   0xc   :  { %123 = vmatprep.mubr.bf16.mxu0 %v67_v37  ;;  %255 = vmatprep.subr.bf16.mxu1 %v300_v7 }
   0xd   :  { %227 = vmatpush3.bf16.msra.mxu0 %v70_v20 }
   0xe   :  { %228 = vmatprep.subr.bf16.mxu0 %v79_v21 }
   0xf   :  { %10 = vsyncpa [#allocation3], 0  ;;  %v72_v43 = vpack.c.bf16 %v32_v36, %v31_v35  ;;  %v81_v44 = vpack.c.bf16 %v50_v39, %v49_v38  ;;  %v33_v45 = vld [vmem:[%s514_s1 + $0x50] sm:$0xff]  ;;  %v34_v46 = vld [vmem:[%s514_s1 + $0x58] sm:$0xff]  ;;  %256 = vmatpush3.bf16.msra.mxu1 %v150_v40  ;;  %v151_v49 = vpack.c.bf16 %v137_v42, %v136_v41  ;;  %v66_v6 = vpack.c.bf16 %v391_v26, %v391_v26  ;;  %s302_s15 = smov [#allocation2]  }
  0x10   :  { %v51_v47 = vld [vmem:[%s514_s1 + $0xe0] sm:$0xff]  ;;  %v52_v48 = vld [vmem:[%s514_s1 + $0xe8] sm:$0xff]  ;;  %257 = vmatprep.subr.bf16.mxu1 %v300_v7  ;;  %v138_v50 = vld [vmem:[%s516_s3 + $0x30] sm:$0xff]  ;;  %v73_v52 = vpack.c.bf16 %v34_v46, %v33_v45  ;;  %vm301_vm0 = vmmov 0   ;;  %s211_s16 = sshll.u32 %s302_s15, 4  ;;  %s212_s16 = int_to_ptr.vmem [resolvable:$true] %s211_s16 }
  0x11   :  { %229 = vmatpush3.bf16.msra.mxu0 %v71_v31  ;;  %v139_v51 = vld [vmem:[%s516_s3 + $0x38] sm:$0xff]  ;;  %v82_v53 = vpack.c.bf16 %v52_v48, %v51_v47  ;;  %v35_v54 = vld [vmem:[%s514_s1 + $0x60] sm:$0xff]  ;;  %v36_v55 = vld [vmem:[%s514_s1 + $0x68] sm:$0xff]  ;;  %269 = vmatprep.mubr.msk.bf16.mxu1 %vm301_vm0, %v300_v7  ;;  %p281_p1 = scmp.lt.s32.totalorder %s212_s16, %s212_s16 }
  0x12   :  { %230 = vmatprep.subr.bf16.mxu0 %v80_v34  ;;  %v53_v56 = vld [vmem:[%s514_s1 + $0xf0] sm:$0xff]  ;;  %v54_v57 = vld [vmem:[%s514_s1 + $0xf8] sm:$0xff]  ;;  %v152_v58 = vpack.c.bf16 %v139_v51, %v138_v50  ;;  %v140_v59 = vld [vmem:[%s516_s3 + $0x40] sm:$0xff]  ;;  %v74_v61 = vpack.c.bf16 %v36_v55, %v35_v54 }
  0x13   :  { %258 = vmatpush3.bf16.msra.mxu1 %v151_v49  ;;  %v141_v60 = vld [vmem:[%s516_s3 + $0x48] sm:$0xff]  ;;  %v83_v62 = vpack.c.bf16 %v54_v57, %v53_v56  ;;  %v37_v63 = vld [vmem:[%s514_s1 + $0x70] sm:$0xff]  ;;  %v38_v0 = vld [vmem:[%s514_s1 + $0x78] sm:$0xff] }
  0x14   :  { %259 = vmatprep.subr.bf16.mxu1 %v300_v7  ;;  %v153_v1 = vpack.c.bf16 %v141_v60, %v140_v59  ;;  %v142_v2 = vld [vmem:[%s516_s3 + $0x50] sm:$0xff]  ;;  %v143_v3 = vld [vmem:[%s516_s3 + $0x58] sm:$0xff]  ;;  %v75_v4 = vpack.c.bf16 %v38_v0, %v37_v63  ;;  %v144_v8 = vld [vmem:[%s516_s3 + $0x60] sm:$0xff] }
  0x15   :  { %231 = vmatpush3.bf16.msra.mxu0 %v72_v43  ;;  %v154_v5 = vpack.c.bf16 %v143_v3, %v142_v2  ;;  %v145_v9 = vld [vmem:[%s516_s3 + $0x68] sm:$0xff]  ;;  %v146_v11 = vld [vmem:[%s516_s3 + $0x70] sm:$0xff]  ;;  %v147_v12 = vld [vmem:[%s516_s3 + $0x78] sm:$0xff] }
  0x16   :  { %232 = vmatprep.subr.bf16.mxu0 %v81_v44  ;;  %v155_v10 = vpack.c.bf16 %v145_v9, %v144_v8  ;;  %v156_v13 = vpack.c.bf16 %v147_v12, %v146_v11  ;;  %v220_v15 = vld [vmem:[%s515_s2] ss:$0 sm:$0xff]  ;;  %s276_s2 = scalar_lea.vmem %s212_s16, 32 }
  0x17   :  { %260 = vmatpush3.bf16.msra.mxu1 %v152_v58  ;;  %v221_v23 = vld [vmem:[%s517_s4] ss:$0 sm:$0xff]  ;;  %p277_p0 = scmp.ne.s32.totalorder %s212_s16, %s276_s2  ;;  %p282_p2 = scmp.lt.s32.totalorder %s276_s2, %s276_s2 }
  0x18   :  { %261 = vmatprep.subr.bf16.mxu1 %v300_v7 }
  0x19   :  { %233 = vmatpush3.bf16.msra.mxu0 %v73_v52  ;;  %p283_p3 = por %p282_p2, %p281_p1 }
  0x1a   :  { %234 = vmatprep.subr.bf16.mxu0 %v82_v53 }
  0x1b   :  { %262 = vmatpush3.bf16.msra.mxu1 %v153_v1  ;;  %p284_p4 = pnand %p283_p3, %p277_p0 }
  0x1c   :  { %263 = vmatprep.subr.bf16.mxu1 %v300_v7 }
  0x1d   :  { %235 = vmatpush3.bf16.msra.mxu0 %v74_v61 }
  0x1e   :  { %236 = vmatprep.subr.bf16.mxu0 %v83_v62 }
  0x1f   :  { %264 = vmatpush3.bf16.msra.mxu1 %v154_v5 }
  0x20   :  { %265 = vmatprep.subr.bf16.mxu1 %v300_v7 }
  0x21   :  { %237 = vmatpush3.bf16.msra.mxu0 %v75_v4 }
  0x23   :  { %266 = vmatpush3.bf16.msra.mxu1 %v155_v10 }
  0x24   :  { %124 = vmatmul.mubr.bf16.vlgmr.msra.gmra.mrb[0].mxu0 %v66_v6  ;;  %267 = vmatprep.subr.bf16.mxu1 %v300_v7 }
  0x27   :  { %268 = vmatpush3.bf16.msra.mxu1 %v156_v13 }
  0xf7   :  { %v238_v14 = vpop.f32.mrb[0].mxu0 }
  0xf8   :  { %v239_v16 = vpop.f32.mrb[1].mxu0 }
  0xf9   :  { %v240_v17 = vadd.f32 %v239_v16, %v238_v14  ;;  %v241_v18 = vpop.f32.mrb[2].mxu0 }
  0xfa   :  { %v242_v19 = vpop.f32.mrb[3].mxu0 }
  0xfb   :  { %v126_v20 = vadd.f32 %v240_v17, %v220_v15 }
  0xfd   :  { %v131_v21 = vmax.f32 %v126_v20, 0.0 }
  0xff   :  { %v148_v22 = vpack.c.bf16 %v131_v21, %v131_v21 }
 0x101   :  { %270 = vmatmul.mubr.bf16.vlgmr.msra.gmra.mrb[0].mxu1 %v148_v22 }
 0x1d4   :  { %v198_v7 = vpop.f32.mrb[0].mxu1 }
 0x1d5   :  { %v199_v24 = vadd.f32 %v221_v23, %v198_v7  ;;  %v271_v25 = vpop.f32.mrb[1].mxu1 }
 0x1d6   :  { %v201_v26 = vpop.f32.mrb[2].mxu1 }
 0x1d7   :  { %204 = vst [vmem:[#allocation2] sm:$0x3] %v199_v24  ;;  %v272_v27 = vpop.f32.mrb[3].mxu1 }
 0x1d8   :  { %287 = shalt.err (!%p284_p4)
}
 0x1d9   :  { %s288_s4 = scalar_lea.hbm %s518_s5, 32 }
 0x1da   :  { %p289_p5 = scmp.ne.s32.totalorder %s518_s5, %s288_s4  ;;  %p292_p6 = scmp.lt.u32.totalorder %s288_s4, %s518_s5 }
 0x1dc   :  { %p294_p7 = pnand %p292_p6, %p289_p5 }
 0x1de   :  { %297 = shalt.err (!%p294_p7)
}
 0x1df   :  { %214 = dma.vmem_to_hbm [thread:$0]  %s212_s16, 32, %s518_s5, [#allocation3]  }
 0x1e0   :  { %298 = dma.done.wait [#allocation3], 32  }
 0x1e1   :  { %299 = vsyncadd [#allocation3], 4294967264 }
 0x1e2   :  { %218 = vsyncpa [#allocation3], 1 }

// kernel: camembert_classifier_forward.14
= control target key start
LH: loop header
LB: loop body
LE: loop exit
PB: predicated region body
PF: predicated region fallthrough
CT: control target
= control target key end

     0   :  { %s2607_s24 = smov 0   ;;  %s4984_s0 = inlined_call_operand.vmem [shape: f32[256,256], index: 0, kind: input, shape index: {}]   ;;  %s4985_s1 = inlined_call_operand.vmem [shape: f32[256,512], index: 1, kind: input, shape index: {}]   ;;  %s4986_s2 = inlined_call_operand.vmem [shape: f32[1,512], index: 2, kind: input, shape index: {}]   ;;  %s4987_s3 = inlined_call_operand.vmem [shape: f32[512,256], index: 3, kind: input, shape index: {}]   ;;  %s4988_s4 = inlined_call_operand.vmem [shape: f32[1,256], index: 4, kind: input, shape index: {}]   ;;  %s4989_s5 = inlined_call_operand.vmem [shape: f32[1,256], index: 5, kind: input, shape index: {}]   ;;  %s4990_s6 = inlined_call_operand.vmem [shape: f32[1,256], index: 6, kind: input, shape index: {}]   ;;  %s4991_s7 = inlined_call_operand.vmem [shape: f32[256,256], index: 7, kind: output, shape index: {}]  }
   0x1 LB: > { %s2280_s25 = sadd.s32 4294967295, %s2565_s24   ;;  %p2284_p0 = scmp.ge.s32.totalorder %s2565_s24, 1  ;;  %s2565_s24 = sphi %s2607_s24, %s17_s24  }
   0x2   : > { %p239_p1 = scmp.lt.s32.totalorder %s2565_s24, 3 }
   0x4   : > { %p240_p2 = pnand %p2284_p0, %p239_p1 }
   0x6   : > { %243 = sbr.rel (%p240_p2) target bundleno = 1026 (0x402), region = 48 }
   0xd   : > { %v320_v0 = vld [vmem:[%s4985_s1 + $0x8] sm:$0xff]  ;;  %v319_v2 = vld [vmem:[%s4985_s1] sm:$0xff]  ;;  %s2285_s23 = sshll.u32 %s2280_s25, 4 }
   0xe   : > { %v324_v1 = vld [vmem:[%s4985_s1 + $0x28] sm:$0xff]  ;;  %v323_v4 = vld [vmem:[%s4985_s1 + $0x20] sm:$0xff]  ;;  %p274_p3 = scmp.lt.s32.totalorder %s2285_s23, 31 }
   0xf   : > { %v464_v3 = vpack.c.bf16 %v324_v1, %v320_v0  ;;  %v328_v5 = vld [vmem:[%s4985_s1 + $0x48] sm:$0xff]  ;;  %v463_v7 = vpack.c.bf16 %v323_v4, %v319_v2  ;;  %v327_v9 = vld [vmem:[%s4985_s1 + $0x40] sm:$0xff] }
  0x10   : > { %v332_v6 = vld [vmem:[%s4985_s1 + $0x68] sm:$0xff]  ;;  %v331_v10 = vld [vmem:[%s4985_s1 + $0x60] sm:$0xff]  ;;  %s5149_s23 = smov (!%p274_p3, %s2285_s23), 31 }
  0x11   : > { %v468_v8 = vpack.c.bf16 %v332_v6, %v328_v5  ;;  %v336_v11 = vld [vmem:[%s4985_s1 + $0x88] sm:$0xff]  ;;  %549 = vmatprep.subr.bf16.mxu1 %v464_v3  ;;  %v467_v13 = vpack.c.bf16 %v331_v10, %v327_v9  ;;  %v335_v15 = vld [vmem:[%s4985_s1 + $0x80] sm:$0xff]  ;;  %s2293_s29 = sshll.u32 %s5149_s23, 4 }
  0x12   : > { %v340_v12 = vld [vmem:[%s4985_s1 + $0xa8] sm:$0xff]  ;;  %550 = vmatpush1.bf16.msra.mxu1 %v463_v7  ;;  %v339_v16 = vld [vmem:[%s4985_s1 + $0xa0] sm:$0xff]  ;;  %s2701_s16 = scalar_lea.vmem %s4984_s0, %s2293_s29  ;;  %s4855_s25 = scalar_lea.vmem %s4991_s7, %s2293_s29 }
  0x13   : > { %551 = vmatprep.subr.bf16.mxu1 %v468_v8  ;;  %v472_v14 = vpack.c.bf16 %v340_v12, %v336_v11  ;;  %v344_v17 = vld [vmem:[%s4985_s1 + $0xc8] sm:$0xff]  ;;  %v471_v19 = vpack.c.bf16 %v339_v16, %v335_v15  ;;  %v343_v21 = vld [vmem:[%s4985_s1 + $0xc0] sm:$0xff]  ;;  %v290_v42 = vld [vmem:[%s2701_s16 + $0x18] sm:$0xff] }
  0x14   : > { %v348_v18 = vld [vmem:[%s4985_s1 + $0xe8] sm:$0xff]  ;;  %v347_v22 = vld [vmem:[%s4985_s1 + $0xe0] sm:$0xff] }
  0x15   : > { %v476_v20 = vpack.c.bf16 %v348_v18, %v344_v17  ;;  %v352_v23 = vld [vmem:[%s4985_s1 + $0x108] sm:$0xff]  ;;  %v475_v25 = vpack.c.bf16 %v347_v22, %v343_v21  ;;  %v351_v27 = vld [vmem:[%s4985_s1 + $0x100] sm:$0xff] }
  0x16   : > { %552 = vmatpush1.bf16.msra.mxu1 %v467_v13  ;;  %v356_v24 = vld [vmem:[%s4985_s1 + $0x128] sm:$0xff]  ;;  %v355_v28 = vld [vmem:[%s4985_s1 + $0x120] sm:$0xff] }
  0x17   : > { %553 = vmatprep.subr.bf16.mxu1 %v472_v14  ;;  %v480_v26 = vpack.c.bf16 %v356_v24, %v352_v23  ;;  %v360_v29 = vld [vmem:[%s4985_s1 + $0x148] sm:$0xff]  ;;  %v479_v31 = vpack.c.bf16 %v355_v28, %v351_v27  ;;  %v359_v33 = vld [vmem:[%s4985_s1 + $0x140] sm:$0xff] }
  0x18   : > { %v364_v30 = vld [vmem:[%s4985_s1 + $0x168] sm:$0xff]  ;;  %v363_v34 = vld [vmem:[%s4985_s1 + $0x160] sm:$0xff] }
  0x19   : > { %v484_v32 = vpack.c.bf16 %v364_v30, %v360_v29  ;;  %v368_v35 = vld [vmem:[%s4985_s1 + $0x188] sm:$0xff]  ;;  %v483_v37 = vpack.c.bf16 %v363_v34, %v359_v33  ;;  %v367_v38 = vld [vmem:[%s4985_s1 + $0x180] sm:$0xff] }
  0x1a   : > { %554 = vmatpush1.bf16.msra.mxu1 %v471_v19  ;;  %v372_v36 = vld [vmem:[%s4985_s1 + $0x1a8] sm:$0xff]  ;;  %v371_v40 = vld [vmem:[%s4985_s1 + $0x1a0] sm:$0xff] }
  0x1b   : > { %555 = vmatprep.subr.bf16.mxu1 %v476_v20  ;;  %v488_v39 = vpack.c.bf16 %v372_v36, %v368_v35  ;;  %v288_v41 = vld [vmem:[%s2701_s16 + $0x8] sm:$0xff]  ;;  %v487_v46 = vpack.c.bf16 %v371_v40, %v367_v38  ;;  %v375_v48 = vld [vmem:[%s4985_s1 + $0x1c0] sm:$0xff]  ;;  %v289_v35 = vld [vmem:[%s2701_s16 + $0x10] sm:$0xff] }
  0x1c   : > { %v376_v43 = vld [vmem:[%s4985_s1 + $0x1c8] sm:$0xff]  ;;  %v2717_v45 = vpack.c.bf16 %v290_v42, %v288_v41  ;;  %v379_v49 = vld [vmem:[%s4985_s1 + $0x1e0] sm:$0xff]  ;;  %v322_v36 = vld [vmem:[%s4985_s1 + $0x18] sm:$0xff] }
  0x1d   : > { %v380_v44 = vld [vmem:[%s4985_s1 + $0x1e8] sm:$0xff]  ;;  %v491_v52 = vpack.c.bf16 %v379_v49, %v375_v48  ;;  %v383_v54 = vld [vmem:[%s4985_s1 + $0x200] sm:$0xff]  ;;  %v321_v38 = vld [vmem:[%s4985_s1 + $0x10] sm:$0xff] }
  0x1e   : > { %556 = vmatpush1.bf16.msra.mxu1 %v475_v25  ;;  %581 = vmatprep.mubr.bf16.mxu1 %v2717_v45  ;;  %v492_v47 = vpack.c.bf16 %v380_v44, %v376_v43  ;;  %v384_v50 = vld [vmem:[%s4985_s1 + $0x208] sm:$0xff]  ;;  %v387_v55 = vld [vmem:[%s4985_s1 + $0x220] sm:$0xff]  ;;  %v1354_v42 = vld [vmem:[%s4987_s3 + $0x18] sm:$0xff] }
  0x1f   : > { %557 = vmatprep.subr.bf16.mxu1 %v480_v26  ;;  %v388_v51 = vld [vmem:[%s4985_s1 + $0x228] sm:$0xff]  ;;  %v495_v58 = vpack.c.bf16 %v387_v55, %v383_v54  ;;  %v391_v60 = vld [vmem:[%s4985_s1 + $0x240] sm:$0xff]  ;;  %v1353_v48 = vld [vmem:[%s4987_s3 + $0x10] sm:$0xff] }
  0x20   : > { %v496_v53 = vpack.c.bf16 %v388_v51, %v384_v50  ;;  %v392_v56 = vld [vmem:[%s4985_s1 + $0x248] sm:$0xff]  ;;  %v395_v61 = vld [vmem:[%s4985_s1 + $0x260] sm:$0xff]  ;;  %v1358_v50 = vld [vmem:[%s4987_s3 + $0x38] sm:$0xff] }
  0x21   : > { %v396_v57 = vld [vmem:[%s4985_s1 + $0x268] sm:$0xff]  ;;  %v499_v0 = vpack.c.bf16 %v395_v61, %v391_v60  ;;  %v399_v2 = vld [vmem:[%s4985_s1 + $0x280] sm:$0xff] }
  0x22   : > { %558 = vmatpush1.bf16.msra.mxu1 %v479_v31  ;;  %v500_v59 = vpack.c.bf16 %v396_v57, %v392_v56  ;;  %v400_v62 = vld [vmem:[%s4985_s1 + $0x288] sm:$0xff]  ;;  %v403_v3 = vld [vmem:[%s4985_s1 + $0x2a0] sm:$0xff]  ;;  %v1357_v56 = vld [vmem:[%s4987_s3 + $0x30] sm:$0xff] }
  0x23   : > { %559 = vmatprep.subr.bf16.mxu1 %v484_v32  ;;  %v404_v63 = vld [vmem:[%s4985_s1 + $0x2a8] sm:$0xff]  ;;  %v503_v6 = vpack.c.bf16 %v403_v3, %v399_v2  ;;  %v407_v8 = vld [vmem:[%s4985_s1 + $0x2c0] sm:$0xff]  ;;  %v334_v57 = vld [vmem:[%s4985_s1 + $0x78] sm:$0xff] }
  0x24   : > { %v504_v1 = vpack.c.bf16 %v404_v63, %v400_v62  ;;  %v408_v4 = vld [vmem:[%s4985_s1 + $0x2c8] sm:$0xff]  ;;  %v411_v9 = vld [vmem:[%s4985_s1 + $0x2e0] sm:$0xff]  ;;  %v329_v63 = vld [vmem:[%s4985_s1 + $0x50] sm:$0xff] }
  0x25   : > { %v412_v5 = vld [vmem:[%s4985_s1 + $0x2e8] sm:$0xff]  ;;  %v507_v12 = vpack.c.bf16 %v411_v9, %v407_v8  ;;  %v415_v14 = vld [vmem:[%s4985_s1 + $0x300] sm:$0xff]  ;;  %v1361_v2 = vld [vmem:[%s4987_s3 + $0x50] sm:$0xff] }
  0x26   : > { %560 = vmatpush1.bf16.msra.mxu1 %v483_v37  ;;  %v508_v7 = vpack.c.bf16 %v412_v5, %v408_v4  ;;  %v416_v10 = vld [vmem:[%s4985_s1 + $0x308] sm:$0xff]  ;;  %v419_v15 = vld [vmem:[%s4985_s1 + $0x320] sm:$0xff]  ;;  %v326_v37 = vld [vmem:[%s4985_s1 + $0x38] sm:$0xff] }
  0x27   : > { %561 = vmatprep.subr.bf16.mxu1 %v488_v39  ;;  %v420_v11 = vld [vmem:[%s4985_s1 + $0x328] sm:$0xff]  ;;  %v511_v18 = vpack.c.bf16 %v419_v15, %v415_v14  ;;  %v423_v20 = vld [vmem:[%s4985_s1 + $0x340] sm:$0xff]  ;;  %v325_v39 = vld [vmem:[%s4985_s1 + $0x30] sm:$0xff]  ;;  %v466_v51 = vpack.c.bf16 %v326_v37, %v322_v36 }
  0x28   : > { %v512_v13 = vpack.c.bf16 %v420_v11, %v416_v10  ;;  %v424_v16 = vld [vmem:[%s4985_s1 + $0x348] sm:$0xff]  ;;  %v427_v21 = vld [vmem:[%s4985_s1 + $0x360] sm:$0xff]  ;;  %v465_v62 = vpack.c.bf16 %v325_v39, %v321_v38  ;;  %v333_v4 = vld [vmem:[%s4985_s1 + $0x70] sm:$0xff] }
  0x29   : > { %v428_v17 = vld [vmem:[%s4985_s1 + $0x368] sm:$0xff]  ;;  %v515_v24 = vpack.c.bf16 %v427_v21, %v423_v20  ;;  %v431_v26 = vld [vmem:[%s4985_s1 + $0x380] sm:$0xff]  ;;  %v338_v8 = vld [vmem:[%s4985_s1 + $0x98] sm:$0xff]  ;;  %v469_v14 = vpack.c.bf16 %v333_v4, %v329_v63 }
  0x2a   : > { %562 = vmatpush1.bf16.msra.mxu1 %v487_v46  ;;  %v516_v19 = vpack.c.bf16 %v428_v17, %v424_v16  ;;  %v432_v22 = vld [vmem:[%s4985_s1 + $0x388] sm:$0xff]  ;;  %v435_v27 = vld [vmem:[%s4985_s1 + $0x3a0] sm:$0xff]  ;;  %v330_v46 = vld [vmem:[%s4985_s1 + $0x58] sm:$0xff] }
  0x2b   : > { %563 = vmatprep.subr.bf16.mxu1 %v492_v47  ;;  %v436_v23 = vld [vmem:[%s4985_s1 + $0x3a8] sm:$0xff]  ;;  %v519_v30 = vpack.c.bf16 %v435_v27, %v431_v26  ;;  %v439_v32 = vld [vmem:[%s4985_s1 + $0x3c0] sm:$0xff]  ;;  %v470_v3 = vpack.c.bf16 %v334_v57, %v330_v46  ;;  %v342_v9 = vld [vmem:[%s4985_s1 + $0xb8] sm:$0xff] }
  0x2c   : > { %v520_v25 = vpack.c.bf16 %v436_v23, %v432_v22  ;;  %v440_v28 = vld [vmem:[%s4985_s1 + $0x3c8] sm:$0xff]  ;;  %v443_v33 = vld [vmem:[%s4985_s1 + $0x3e0] sm:$0xff]  ;;  %v293_v11 = vld [vmem:[%s2701_s16 + $0x30] sm:$0xff] }
  0x2d   : > { %v444_v29 = vld [vmem:[%s4985_s1 + $0x3e8] sm:$0xff]  ;;  %v287_v34 = vld [vmem:[%s2701_s16] sm:$0xff]  ;;  %v523_v44 = vpack.c.bf16 %v443_v33, %v439_v32  ;;  %v341_v15 = vld [vmem:[%s4985_s1 + $0xb0] sm:$0xff] }
  0x2e   : > { %564 = vmatpush1.bf16.msra.mxu1 %v491_v52  ;;  %v524_v31 = vpack.c.bf16 %v444_v29, %v440_v28  ;;  %v292_v40 = vld [vmem:[%s2701_s16 + $0x28] sm:$0xff]  ;;  %v1351_v43 = vld [vmem:[%s4987_s3] sm:$0xff]  ;;  %v294_v52 = vld [vmem:[%s2701_s16 + $0x38] sm:$0xff]  ;;  %v2874_v60 = vpack.c.bf16 %v289_v35, %v287_v34 }
  0x2f   : > { %565 = vmatprep.subr.bf16.mxu1 %v496_v53  ;;  %v1352_v41 = vld [vmem:[%s4987_s3 + $0x8] sm:$0xff]  ;;  %v1511_v53 = vpack.c.bf16 %v1353_v48, %v1351_v43  ;;  %v1355_v55 = vld [vmem:[%s4987_s3 + $0x20] sm:$0xff]  ;;  %v346_v20 = vld [vmem:[%s4985_s1 + $0xd8] sm:$0xff] }
  0x30   : > { %v1512_v47 = vpack.c.bf16 %v1354_v42, %v1352_v41  ;;  %v1356_v49 = vld [vmem:[%s4987_s3 + $0x28] sm:$0xff]  ;;  %v1513_v61 = vpack.c.bf16 %v1357_v56, %v1355_v55  ;;  %v291_v10 = vld [vmem:[%s2701_s16 + $0x20] sm:$0xff]  ;;  %v298_v22 = vld [vmem:[%s2701_s16 + $0x58] sm:$0xff] }
  0x31   : > { %v1514_v54 = vpack.c.bf16 %v1358_v50, %v1356_v49  ;;  %v1363_v17 = vld [vmem:[%s4987_s3 + $0x60] sm:$0xff]  ;;  %v296_v21 = vld [vmem:[%s2701_s16 + $0x48] sm:$0xff]  ;;  %v350_v23 = vld [vmem:[%s4985_s1 + $0xf8] sm:$0xff]  ;;  %v2932_v26 = vpack.c.bf16 %v293_v11, %v291_v10 }
  0x32   : > { %566 = vmatpush1.bf16.msra.mxu1 %v495_v58  ;;  %1587 = vmatprep.subr.bf16.mxu0 %v1512_v47  ;;  %v1360_v58 = vld [vmem:[%s4987_s3 + $0x48] sm:$0xff]  ;;  %v345_v29 = vld [vmem:[%s4985_s1 + $0xd0] sm:$0xff]  ;;  %v478_v33 = vpack.c.bf16 %v350_v23, %v346_v20  ;;  %v1374_v37 = vld [vmem:[%s4987_s3 + $0xb8] sm:$0xff] }
  0x33   : > { %567 = vmatprep.subr.bf16.mxu1 %v500_v59  ;;  %v1362_v59 = vld [vmem:[%s4987_s3 + $0x58] sm:$0xff]  ;;  %1588 = vmatpush1.bf16.msra.mxu0 %v1511_v53  ;;  %v1369_v32 = vld [vmem:[%s4987_s3 + $0x90] sm:$0xff]  ;;  %v1372_v36 = vld [vmem:[%s4987_s3 + $0xa8] sm:$0xff] }
  0x34   : > { %1589 = vmatprep.subr.bf16.mxu0 %v1514_v54  ;;  %v1516_v5 = vpack.c.bf16 %v1362_v59, %v1360_v58  ;;  %v349_v34 = vld [vmem:[%s4985_s1 + $0xf0] sm:$0xff]  ;;  %v354_v38 = vld [vmem:[%s4985_s1 + $0x118] sm:$0xff]  ;;  %v1522_v47 = vpack.c.bf16 %v1374_v37, %v1372_v36  ;;  %v1371_v48 = vld [vmem:[%s4987_s3 + $0xa0] sm:$0xff] }
  0x35   : > { %v358_v39 = vld [vmem:[%s4985_s1 + $0x138] sm:$0xff]  ;;  %v297_v41 = vld [vmem:[%s2701_s16 + $0x50] sm:$0xff]  ;;  %v1376_v55 = vld [vmem:[%s4987_s3 + $0xc8] sm:$0xff] }
  0x36   : > { %568 = vmatpush1.bf16.msra.mxu1 %v499_v0  ;;  %v2879_v0 = vpack.c.bf16 %v294_v52, %v292_v40  ;;  %v295_v40 = vld [vmem:[%s2701_s16 + $0x40] sm:$0xff]  ;;  %v353_v42 = vld [vmem:[%s4985_s1 + $0x110] sm:$0xff]  ;;  %v482_v50 = vpack.c.bf16 %v358_v39, %v354_v38  ;;  %v300_v52 = vld [vmem:[%s2701_s16 + $0x68] sm:$0xff] }
  0x37   : > { %569 = vmatprep.subr.bf16.mxu1 %v504_v1  ;;  %v1359_v1 = vld [vmem:[%s4987_s3 + $0x40] sm:$0xff]  ;;  %1590 = vmatpush1.bf16.msra.mxu0 %v1513_v61  ;;  %v357_v46 = vld [vmem:[%s4985_s1 + $0x130] sm:$0xff]  ;;  %v302_v53 = vld [vmem:[%s2701_s16 + $0x78] sm:$0xff]  ;;  %v2990_v57 = vpack.c.bf16 %v297_v41, %v295_v40 }
  0x38   : > { %1591 = vmatprep.subr.bf16.mxu0 %v1516_v5  ;;  %v1373_v49 = vld [vmem:[%s4987_s3 + $0xb0] sm:$0xff]  ;;  %v366_v54 = vld [vmem:[%s4985_s1 + $0x178] sm:$0xff]  ;;  %v481_v59 = vpack.c.bf16 %v357_v46, %v353_v42  ;;  %v1375_v63 = vld [vmem:[%s4987_s3 + $0xc0] sm:$0xff] }
  0x39   : > { %v1378_v56 = vld [vmem:[%s4987_s3 + $0xd8] sm:$0xff]  ;;  %v1521_v58 = vpack.c.bf16 %v1373_v49, %v1371_v48  ;;  %v361_v61 = vld [vmem:[%s4985_s1 + $0x150] sm:$0xff]  ;;  %v1380_v5 = vld [vmem:[%s4987_s3 + $0xe8] sm:$0xff] }
  0x3a   : > { %570 = vmatpush1.bf16.msra.mxu1 %v503_v6  ;;  %v1364_v6 = vld [vmem:[%s4987_s3 + $0x68] sm:$0xff]  ;;  %v1524_v4 = vpack.c.bf16 %v1378_v56, %v1376_v55  ;;  %v301_v10 = vld [vmem:[%s2701_s16 + $0x70] sm:$0xff]  ;;  %v306_v20 = vld [vmem:[%s2701_s16 + $0x98] sm:$0xff] }
  0x3b   : > { %571 = vmatprep.subr.bf16.mxu1 %v508_v7  ;;  %v1366_v7 = vld [vmem:[%s4987_s3 + $0x78] sm:$0xff]  ;;  %v305_v36 = vld [vmem:[%s2701_s16 + $0x90] sm:$0xff]  ;;  %v308_v40 = vld [vmem:[%s2701_s16 + $0xa8] sm:$0xff] }
  0x3c   : > { %v1518_v16 = vpack.c.bf16 %v1366_v7, %v1364_v6  ;;  %v1382_v6 = vld [vmem:[%s4987_s3 + $0xf8] sm:$0xff]  ;;  %v385_v37 = vld [vmem:[%s4985_s1 + $0x210] sm:$0xff] }
  0x3d   : > { %v370_v7 = vld [vmem:[%s4985_s1 + $0x198] sm:$0xff]  ;;  %v389_v39 = vld [vmem:[%s4985_s1 + $0x230] sm:$0xff] }
  0x3e   : > { %572 = vmatpush1.bf16.msra.mxu1 %v507_v12  ;;  %v337_v12 = vld [vmem:[%s4985_s1 + $0x90] sm:$0xff]  ;;  %v310_v41 = vld [vmem:[%s2701_s16 + $0xb8] sm:$0xff]  ;;  %v497_v46 = vpack.c.bf16 %v389_v39, %v385_v37 }
  0x3f   : > { %573 = vmatprep.subr.bf16.mxu1 %v512_v13  ;;  %v1515_v13 = vpack.c.bf16 %v1361_v2, %v1359_v1  ;;  %v473_v28 = vpack.c.bf16 %v341_v15, %v337_v12  ;;  %v1377_v1 = vld [vmem:[%s4987_s3 + $0xd0] sm:$0xff]  ;;  %v1379_v15 = vld [vmem:[%s4987_s3 + $0xe0] sm:$0xff]  ;;  %v394_v42 = vld [vmem:[%s4985_s1 + $0x258] sm:$0xff] }
  0x40   : > { %v1523_v11 = vpack.c.bf16 %v1377_v1, %v1375_v63  ;;  %v393_v49 = vld [vmem:[%s4985_s1 + $0x250] sm:$0xff]  ;;  %v314_v63 = vld [vmem:[%s2701_s16 + $0xd8] sm:$0xff] }
  0x41   : > { %1592 = vmatpush1.bf16.msra.mxu0 %v1515_v13  ;;  %v369_v13 = vld [vmem:[%s4985_s1 + $0x190] sm:$0xff]  ;;  %v410_v1 = vld [vmem:[%s4985_s1 + $0x2d8] sm:$0xff] }
  0x42   : > { %574 = vmatpush1.bf16.msra.mxu1 %v511_v18  ;;  %v1365_v18 = vld [vmem:[%s4987_s3 + $0x70] sm:$0xff]  ;;  %1593 = vmatprep.subr.bf16.mxu0 %v1518_v16  ;;  %v442_v39 = vld [vmem:[%s4985_s1 + $0x3d8] sm:$0xff] }
  0x43   : > { %575 = vmatprep.subr.bf16.mxu1 %v516_v19  ;;  %v474_v19 = vpack.c.bf16 %v342_v9, %v338_v8  ;;  %v1517_v27 = vpack.c.bf16 %v1365_v18, %v1363_v17  ;;  %v374_v8 = vld [vmem:[%s4985_s1 + $0x1b8] sm:$0xff]  ;;  %v299_v9 = vld [vmem:[%s2701_s16 + $0x60] sm:$0xff]  ;;  %v1381_v16 = vld [vmem:[%s4987_s3 + $0xf0] sm:$0xff] }
  0x44   : > { %v490_v17 = vpack.c.bf16 %v374_v8, %v370_v7  ;;  %v373_v18 = vld [vmem:[%s4985_s1 + $0x1b0] sm:$0xff]  ;;  %v3042_v23 = vpack.c.bf16 %v301_v10, %v299_v9  ;;  %v418_v9 = vld [vmem:[%s4985_s1 + $0x318] sm:$0xff] }
  0x45   : > { %1594 = vmatpush1.bf16.msra.mxu0 %v1517_v27  ;;  %v309_v55 = vld [vmem:[%s2701_s16 + $0xb0] sm:$0xff]  ;;  %v422_v10 = vld [vmem:[%s4985_s1 + $0x338] sm:$0xff] }
  0x46   : > { %576 = vmatpush1.bf16.msra.mxu1 %v515_v24  ;;  %v1368_v24 = vld [vmem:[%s4987_s3 + $0x88] sm:$0xff]  ;;  %v401_v56 = vld [vmem:[%s4985_s1 + $0x290] sm:$0xff] }
  0x47   : > { %577 = vmatprep.subr.bf16.mxu1 %v520_v25  ;;  %v1370_v25 = vld [vmem:[%s4987_s3 + $0x98] sm:$0xff]  ;;  %v409_v7 = vld [vmem:[%s4985_s1 + $0x2d0] sm:$0xff] }
  0x48   : > { %v1520_v35 = vpack.c.bf16 %v1370_v25, %v1368_v24  ;;  %v1525_v24 = vpack.c.bf16 %v1381_v16, %v1379_v15  ;;  %v489_v25 = vpack.c.bf16 %v373_v18, %v369_v13  ;;  %v413_v8 = vld [vmem:[%s4985_s1 + $0x2f0] sm:$0xff]  ;;  %v514_v15 = vpack.c.bf16 %v422_v10, %v418_v9  ;;  %v318_v18 = vld [vmem:[%s2701_s16 + $0xf8] sm:$0xff]  ;;  %v1399_v10 = vld [vmem:[%s4987_s3 + $0x180] sm:$0xff] }
  0x49   : > { %v313_v13 = vld [vmem:[%s2701_s16 + $0xd0] sm:$0xff] }
  0x4a   : > { %578 = vmatpush1.bf16.msra.mxu1 %v519_v30  ;;  %v2937_v30 = vpack.c.bf16 %v298_v22, %v296_v21  ;;  %1595 = vmatprep.subr.bf16.mxu0 %v1520_v35  ;;  %v378_v21 = vld [vmem:[%s4985_s1 + $0x1d8] sm:$0xff]  ;;  %v303_v35 = vld [vmem:[%s2701_s16 + $0x80] sm:$0xff]  ;;  %v421_v16 = vld [vmem:[%s4985_s1 + $0x330] sm:$0xff] }
  0x4b   : > { %579 = vmatprep.subr.bf16.mxu1 %v524_v31  ;;  %v1367_v31 = vld [vmem:[%s4987_s3 + $0x80] sm:$0xff]  ;;  %v382_v22 = vld [vmem:[%s4985_s1 + $0x1f8] sm:$0xff]  ;;  %v433_v37 = vld [vmem:[%s4985_s1 + $0x390] sm:$0xff] }
  0x4c   : > { %v1519_v43 = vpack.c.bf16 %v1369_v32, %v1367_v31  ;;  %v381_v31 = vld [vmem:[%s4985_s1 + $0x1f0] sm:$0xff]  ;;  %v386_v32 = vld [vmem:[%s4985_s1 + $0x218] sm:$0xff] }
  0x4e   : > { %580 = vmatpush1.bf16.msra.mxu1 %v523_v44  ;;  %v477_v44 = vpack.c.bf16 %v349_v34, %v345_v29  ;;  %1596 = vmatpush1.bf16.msra.mxu0 %v1519_v43  ;;  %v377_v29 = vld [vmem:[%s4985_s1 + $0x1d0] sm:$0xff]  ;;  %v398_v43 = vld [vmem:[%s4985_s1 + $0x278] sm:$0xff] }
  0x4f   : > { %662 = vmatprep.subr.bf16.mxu1 %v466_v51  ;;  %v362_v51 = vld [vmem:[%s4985_s1 + $0x158] sm:$0xff]  ;;  %1597 = vmatprep.subr.bf16.mxu0 %v1522_v47  ;;  %v493_v34 = vpack.c.bf16 %v381_v31, %v377_v29  ;;  %v3078_v47 = vpack.c.bf16 %v310_v41, %v308_v40  ;;  %v502_v48 = vpack.c.bf16 %v398_v43, %v394_v42  ;;  %v429_v29 = vld [vmem:[%s4985_s1 + $0x370] sm:$0xff] }
  0x50   : > { %v486_v2 = vpack.c.bf16 %v366_v54, %v362_v51  ;;  %v402_v51 = vld [vmem:[%s4985_s1 + $0x298] sm:$0xff]  ;;  %v307_v54 = vld [vmem:[%s2701_s16 + $0xa0] sm:$0xff] }
  0x51   : > { %582 = vmatmul.mubr.bf16.vlgmr.msra.gmra.mrb[0].mxu1 %v2874_v60  ;;  %v434_v31 = vld [vmem:[%s4985_s1 + $0x398] sm:$0xff] }
  0x52   : > { %663 = vmatpush1.bf16.msra.mxu1 %v465_v62  ;;  %591 = vmatprep.mubr.bf16.mxu1 %v2879_v0  ;;  %v2995_v62 = vpack.c.bf16 %v302_v53, %v300_v52  ;;  %v406_v52 = vld [vmem:[%s4985_s1 + $0x2b8] sm:$0xff] }
  0x53   : > { %664 = vmatprep.subr.bf16.mxu1 %v470_v3  ;;  %v365_v3 = vld [vmem:[%s4985_s1 + $0x170] sm:$0xff]  ;;  %1598 = vmatpush1.bf16.msra.mxu0 %v1521_v58  ;;  %v506_v58 = vpack.c.bf16 %v406_v52, %v402_v51  ;;  %v446_v40 = vld [vmem:[%s4985_s1 + $0x3f8] sm:$0xff]  ;;  %v1387_v52 = vld [vmem:[%s4987_s3 + $0x120] sm:$0xff] }
  0x54   : > { %v485_v12 = vpack.c.bf16 %v365_v3, %v361_v61  ;;  %1599 = vmatprep.subr.bf16.mxu0 %v1524_v4  ;;  %v312_v61 = vld [vmem:[%s2701_s16 + $0xc8] sm:$0xff]  ;;  %v3110_v3 = vpack.c.bf16 %v309_v55, %v307_v54  ;;  %v526_v43 = vpack.c.bf16 %v446_v40, %v442_v39  ;;  %v3321_v39 = vld [vmem:[%s4987_s3 + $0x210] sm:$0xff] }
  0x55   : > { %v1392_v55 = vld [vmem:[%s4987_s3 + $0x148] sm:$0xff] }
  0x56   : > { %665 = vmatpush1.bf16.msra.mxu1 %v469_v14  ;;  %v1526_v14 = vpack.c.bf16 %v1382_v6, %v1380_v5  ;;  %v3112_v5 = vpack.c.bf16 %v314_v63, %v312_v61  ;;  %v1396_v61 = vld [vmem:[%s4987_s3 + $0x168] sm:$0xff]  ;;  %v1398_v63 = vld [vmem:[%s4987_s3 + $0x178] sm:$0xff] }
  0x57   : > { %666 = vmatprep.subr.bf16.mxu1 %v474_v19  ;;  %v304_v19 = vld [vmem:[%s2701_s16 + $0x88] sm:$0xff]  ;;  %1600 = vmatpush1.bf16.msra.mxu0 %v1523_v11  ;;  %v509_v11 = vpack.c.bf16 %v413_v8, %v409_v7  ;;  %v1402_v8 = vld [vmem:[%s4987_s3 + $0x198] sm:$0xff] }
  0x58   : > { %v3044_v27 = vpack.c.bf16 %v306_v20, %v304_v19  ;;  %1601 = vmatprep.subr.bf16.mxu0 %v1526_v14  ;;  %v417_v14 = vld [vmem:[%s4985_s1 + $0x310] sm:$0xff]  ;;  %v426_v19 = vld [vmem:[%s4985_s1 + $0x358] sm:$0xff]  ;;  %v1400_v7 = vld [vmem:[%s4987_s3 + $0x188] sm:$0xff] }
  0x59   : > { %592 = vmatmul.mubr.bf16.gmra.mrb[4].mxu1 %v2932_v26  ;;  %v430_v20 = vld [vmem:[%s4985_s1 + $0x378] sm:$0xff]  ;;  %v1536_v9 = vpack.c.bf16 %v1402_v8, %v1400_v7  ;;  %v3326_v40 = vld [vmem:[%s4987_s3 + $0x228] sm:$0xff] }
  0x5a   : > { %667 = vmatpush1.bf16.msra.mxu1 %v473_v28  ;;  %601 = vmatprep.mubr.bf16.mxu1 %v2937_v30  ;;  %v494_v28 = vpack.c.bf16 %v382_v22, %v378_v21  ;;  %v513_v22 = vpack.c.bf16 %v421_v16, %v417_v14  ;;  %v1403_v14 = vld [vmem:[%s4987_s3 + $0x1a0] sm:$0xff]  ;;  %v3596_v8 = vld [vmem:[%s4987_s3 + $0x378] sm:$0xff] }
  0x5b   : > { %668 = vmatprep.subr.bf16.mxu1 %v478_v33  ;;  %v390_v33 = vld [vmem:[%s4985_s1 + $0x238] sm:$0xff]  ;;  %1602 = vmatpush1.bf16.msra.mxu0 %v1525_v24  ;;  %5057 = vst [vmem:[#allocation24_spill] sm:$0xff] %v3596_v8 }
  0x5c   : > { %v498_v38 = vpack.c.bf16 %v390_v33, %v386_v32  ;;  %v438_v32 = vld [vmem:[%s4985_s1 + $0x3b8] sm:$0xff] }
  0x5e   : > { %669 = vmatpush1.bf16.msra.mxu1 %v477_v44  ;;  %v3076_v44 = vpack.c.bf16 %v305_v36, %v303_v35  ;;  %v317_v35 = vld [vmem:[%s2701_s16 + $0xf0] sm:$0xff]  ;;  %v522_v36 = vpack.c.bf16 %v438_v32, %v434_v31 }
  0x5f   : > { %670 = vmatprep.subr.bf16.mxu1 %v482_v50  ;;  %v397_v50 = vld [vmem:[%s4985_s1 + $0x270] sm:$0xff] }
  0x60   : > { %v501_v53 = vpack.c.bf16 %v397_v50, %v393_v49  ;;  %v1384_v50 = vld [vmem:[%s4987_s3 + $0x108] sm:$0xff]  ;;  %v1413_v31 = vld [vmem:[%s4987_s3 + $0x1f0] sm:$0xff] }
  0x61   : > { %602 = vmatmul.mubr.bf16.gmra.mrb[8].mxu1 %v2990_v57 }
  0x62   : > { %671 = vmatpush1.bf16.msra.mxu1 %v481_v59  ;;  %611 = vmatprep.mubr.bf16.mxu1 %v2995_v62  ;;  %v405_v59 = vld [vmem:[%s4985_s1 + $0x2b0] sm:$0xff] }
  0x63   : > { %672 = vmatprep.subr.bf16.mxu1 %v486_v2  ;;  %v414_v2 = vld [vmem:[%s4985_s1 + $0x2f8] sm:$0xff]  ;;  %v505_v4 = vpack.c.bf16 %v405_v59, %v401_v56  ;;  %v1391_v59 = vld [vmem:[%s4987_s3 + $0x140] sm:$0xff] }
  0x64   : > { %v510_v6 = vpack.c.bf16 %v414_v2, %v410_v1  ;;  %v1394_v56 = vld [vmem:[%s4987_s3 + $0x158] sm:$0xff]  ;;  %v1534_v1 = vpack.c.bf16 %v1398_v63, %v1396_v61  ;;  %v1395_v2 = vld [vmem:[%s4987_s3 + $0x160] sm:$0xff]  ;;  %v3617_v63 = vld [vmem:[%s4987_s3 + $0x388] sm:$0xff] }
  0x65   : > { %5060 = vst [vmem:[#allocation27_spill] sm:$0xff] %v3617_v63 }
  0x66   : > { %673 = vmatpush1.bf16.msra.mxu1 %v485_v12  ;;  %v311_v12 = vld [vmem:[%s2701_s16 + $0xc0] sm:$0xff] }
  0x67   : > { %674 = vmatprep.subr.bf16.mxu1 %v490_v17  ;;  %v316_v17 = vld [vmem:[%s2701_s16 + $0xe8] sm:$0xff]  ;;  %v3144_v21 = vpack.c.bf16 %v313_v13, %v311_v12  ;;  %v1406_v12 = vld [vmem:[%s4987_s3 + $0x1b8] sm:$0xff] }
  0x68   : > { %v3146_v24 = vpack.c.bf16 %v318_v18, %v316_v17  ;;  %v1408_v17 = vld [vmem:[%s4987_s3 + $0x1c8] sm:$0xff]  ;;  %v1410_v18 = vld [vmem:[%s4987_s3 + $0x1d8] sm:$0xff] }
  0x69   : > { %612 = vmatmul.mubr.bf16.gmra.mrb[12].mxu1 %v3042_v23 }
  0x6a   : > { %675 = vmatpush1.bf16.msra.mxu1 %v489_v25  ;;  %621 = vmatprep.mubr.bf16.mxu1 %v3044_v27  ;;  %v518_v25 = vpack.c.bf16 %v430_v20, %v426_v19  ;;  %v1540_v19 = vpack.c.bf16 %v1410_v18, %v1408_v17  ;;  %v1407_v20 = vld [vmem:[%s4987_s3 + $0x1c0] sm:$0xff]  ;;  %v3500_v17 = vld [vmem:[%s4987_s3 + $0x318] sm:$0xff] }
  0x6b   : > { %676 = vmatprep.subr.bf16.mxu1 %v494_v28  ;;  %v425_v28 = vld [vmem:[%s4985_s1 + $0x350] sm:$0xff]  ;;  %5043 = vst [vmem:[#allocation10_spill] sm:$0xff] %v3500_v17  ;;  %v3505_v18 = vld [vmem:[%s4987_s3 + $0x300] sm:$0xff] }
  0x6c   : > { %v517_v33 = vpack.c.bf16 %v429_v29, %v425_v28  ;;  %v1411_v29 = vld [vmem:[%s4987_s3 + $0x1e0] sm:$0xff]  ;;  %5044 = vst [vmem:[#allocation11_spill] sm:$0xff] %v3505_v18 }
  0x6d   : > { %v1541_v32 = vpack.c.bf16 %v1413_v31, %v1411_v29  ;;  %v3529_v29 = vld [vmem:[%s4987_s3 + $0x338] sm:$0xff] }
  0x6e   : > { %677 = vmatpush1.bf16.msra.mxu1 %v493_v34  ;;  %v315_v34 = vld [vmem:[%s2701_s16 + $0xe0] sm:$0xff]  ;;  %5047 = vst [vmem:[#allocation14_spill] sm:$0xff] %v3529_v29 }
  0x6f   : > { %678 = vmatprep.subr.bf16.mxu1 %v498_v38  ;;  %v437_v38 = vld [vmem:[%s4985_s1 + $0x3b0] sm:$0xff]  ;;  %v3176_v41 = vpack.c.bf16 %v317_v35, %v315_v34  ;;  %v1418_v34 = vld [vmem:[%s4987_s3 + $0x218] sm:$0xff] }
  0x70   : > { %v521_v42 = vpack.c.bf16 %v437_v38, %v433_v37  ;;  %v3316_v38 = vld [vmem:[%s4987_s3 + $0x200] sm:$0xff] }
  0x71   : > { %622 = vmatmul.mubr.bf16.gmra.mrb[16].mxu1 %v3076_v44 }
  0x72   : > { %679 = vmatpush1.bf16.msra.mxu1 %v497_v46  ;;  %631 = vmatprep.mubr.bf16.mxu1 %v3078_v47  ;;  %v441_v46 = vld [vmem:[%s4985_s1 + $0x3d0] sm:$0xff] }
  0x73   : > { %680 = vmatprep.subr.bf16.mxu1 %v502_v48  ;;  %v445_v48 = vld [vmem:[%s4985_s1 + $0x3f0] sm:$0xff] }
  0x74   : > { %v525_v49 = vpack.c.bf16 %v445_v48, %v441_v46  ;;  %v3344_v46 = vld [vmem:[%s4987_s3 + $0x230] sm:$0xff]  ;;  %v3349_v48 = vld [vmem:[%s4987_s3 + $0x248] sm:$0xff] }
  0x76   : > { %681 = vmatpush1.bf16.msra.mxu1 %v501_v53  ;;  %v1389_v53 = vld [vmem:[%s4987_s3 + $0x130] sm:$0xff] }
  0x77   : > { %682 = vmatprep.subr.bf16.mxu1 %v506_v58  ;;  %v1529_v54 = vpack.c.bf16 %v1389_v53, %v1387_v52  ;;  %v1532_v58 = vpack.c.bf16 %v1394_v56, %v1392_v55  ;;  %v3404_v52 = vld [vmem:[%s4987_s3 + $0x290] sm:$0xff]  ;;  %v3409_v53 = vld [vmem:[%s4987_s3 + $0x2a8] sm:$0xff]  ;;  %v3419_v55 = vld [vmem:[%s4987_s3 + $0x2a0] sm:$0xff] }
  0x79   : > { %632 = vmatmul.mubr.bf16.gmra.mrb[20].mxu1 %v3110_v3 }
  0x7a   : > { %683 = vmatpush1.bf16.msra.mxu1 %v505_v4  ;;  %641 = vmatprep.mubr.bf16.mxu1 %v3112_v5  ;;  %v1397_v4 = vld [vmem:[%s4987_s3 + $0x170] sm:$0xff] }
  0x7b   : > { %684 = vmatprep.subr.bf16.mxu1 %v510_v6  ;;  %v1533_v6 = vpack.c.bf16 %v1397_v4, %v1395_v2  ;;  %v3456_v2 = vld [vmem:[%s4987_s3 + $0x2d0] sm:$0xff]  ;;  %v3461_v4 = vld [vmem:[%s4987_s3 + $0x2e8] sm:$0xff] }
  0x7c   : > { %5038 = vst [vmem:[#allocation5_spill] sm:$0xff] %v3461_v4 }
  0x7e   : > { %685 = vmatpush1.bf16.msra.mxu1 %v509_v11  ;;  %v1404_v11 = vld [vmem:[%s4987_s3 + $0x1a8] sm:$0xff] }
  0x7f   : > { %686 = vmatprep.subr.bf16.mxu1 %v514_v15  ;;  %v1538_v13 = vpack.c.bf16 %v1406_v12, %v1404_v11  ;;  %v1405_v15 = vld [vmem:[%s4987_s3 + $0x1b0] sm:$0xff]  ;;  %v3591_v12 = vld [vmem:[%s4987_s3 + $0x368] sm:$0xff] }
  0x80   : > { %v1537_v16 = vpack.c.bf16 %v1405_v15, %v1403_v14  ;;  %5056 = vst [vmem:[#allocation23_spill] sm:$0xff] %v3591_v12 }
  0x81   : > { %642 = vmatmul.mubr.bf16.gmra.mrb[24].mxu1 %v3144_v21 }
  0x82   : > { %687 = vmatpush1.bf16.msra.mxu1 %v513_v22  ;;  %651 = vmatprep.mubr.bf16.mxu1 %v3146_v24  ;;  %v1412_v22 = vld [vmem:[%s4987_s3 + $0x1e8] sm:$0xff] }
  0x83   : > { %688 = vmatprep.subr.bf16.mxu1 %v518_v25  ;;  %v1414_v25 = vld [vmem:[%s4987_s3 + $0x1f8] sm:$0xff] }
  0x84   : > { %v1542_v28 = vpack.c.bf16 %v1414_v25, %v1412_v22  ;;  %v3519_v25 = vld [vmem:[%s4987_s3 + $0x310] sm:$0xff] }
  0x85   : > { %5045 = vst [vmem:[#allocation12_spill] sm:$0xff] %v3519_v25 }
  0x86   : > { %689 = vmatpush1.bf16.msra.mxu1 %v517_v33  ;;  %v1416_v33 = vld [vmem:[%s4987_s3 + $0x208] sm:$0xff] }
  0x87   : > { %690 = vmatprep.subr.bf16.mxu1 %v522_v36  ;;  %v1544_v35 = vpack.c.bf16 %v1418_v34, %v1416_v33  ;;  %v529_v36 = vlaneseq }
  0x89   : > { %652 = vmatmul.mubr.bf16.gmra.mrb[28].mxu1 %v3176_v41  ;;  %v3303_v37 = vshrl.u32 %v529_v36, 7  ;;  %v3543_v36 = vld [vmem:[%s4987_s3 + $0x320] sm:$0xff] }
  0x8a   : > { %691 = vmatpush1.bf16.msra.mxu1 %v521_v42  ;;  %694 = vmatprep.mubr.bf16.mxu1 %v2717_v45  ;;  %v1386_v45 = vld [vmem:[%s4987_s3 + $0x118] sm:$0xff]  ;;  %5048 = vst [vmem:[#allocation15_spill] sm:$0xff] %v3543_v36 }
  0x8b   : > { %692 = vmatprep.subr.bf16.mxu1 %v526_v43  ;;  %v1528_v51 = vpack.c.bf16 %v1386_v45, %v1384_v50  ;;  %v3334_v42 = vsub.s32 1, %v3303_v37  ;;  %v3339_v43 = vld [vmem:[%s4987_s3 + $0x220] sm:$0xff]  ;;  %v3364_v45 = vld [vmem:[%s4987_s3 + $0x250] sm:$0xff]  ;;  %v543_v15 = vsub.s32 3, %v3303_v37 }
  0x8c   : > { %v3359_v50 = vld [vmem:[%s4987_s3 + $0x240] sm:$0xff] }
  0x8d   : > { %1603 = vmatprep.subr.bf16.mxu0 %v1528_v51  ;;  %5036 = vst [vmem:[#allocation3_spill] sm:$0xff] %v3334_v42  ;;  %v3369_v51 = vld [vmem:[%s4987_s3 + $0x268] sm:$0xff] }
  0x8e   : > { %693 = vmatpush1.bf16.msra.mxu1 %v525_v49  ;;  %v3354_v49 = vld [vmem:[%s4987_s3 + $0x258] sm:$0xff] }
  0x91   : > { %695 = vmatmul.mubr.bf16.vlgmr.msra.gmra.mrb[32].mxu1 %v2874_v60  ;;  %v1383_v60 = vld [vmem:[%s4987_s3 + $0x100] sm:$0xff] }
  0x92   : > { %704 = vmatprep.mubr.bf16.mxu1 %v2879_v0  ;;  %v1385_v0 = vld [vmem:[%s4987_s3 + $0x110] sm:$0xff] }
  0x99   : > { %705 = vmatmul.mubr.bf16.gmra.mrb[36].mxu1 %v2932_v26  ;;  %v1527_v26 = vpack.c.bf16 %v1385_v0, %v1383_v60  ;;  %v3374_v60 = vld [vmem:[%s4987_s3 + $0x278] sm:$0xff]  ;;  %v3379_v0 = vld [vmem:[%s4987_s3 + $0x260] sm:$0xff] }
  0x9a   : > { %714 = vmatprep.mubr.bf16.mxu1 %v2937_v30  ;;  %v1388_v30 = vld [vmem:[%s4987_s3 + $0x128] sm:$0xff] }
  0x9b   : > { %1604 = vmatpush1.bf16.msra.mxu0 %v1527_v26  ;;  %v3384_v26 = vld [vmem:[%s4987_s3 + $0x270] sm:$0xff] }
  0xa1   : > { %715 = vmatmul.mubr.bf16.gmra.mrb[40].mxu1 %v2990_v57  ;;  %v1390_v57 = vld [vmem:[%s4987_s3 + $0x138] sm:$0xff] }
  0xa2   : > { %724 = vmatprep.mubr.bf16.mxu1 %v2995_v62  ;;  %v1530_v62 = vpack.c.bf16 %v1390_v57, %v1388_v30  ;;  %v3389_v30 = vld [vmem:[%s4987_s3 + $0x288] sm:$0xff]  ;;  %v3394_v57 = vld [vmem:[%s4987_s3 + $0x298] sm:$0xff] }
  0xa4   : > { %1605 = vmatprep.subr.bf16.mxu0 %v1530_v62  ;;  %v3399_v62 = vld [vmem:[%s4987_s3 + $0x280] sm:$0xff] }
  0xa5   : > { %1606 = vmatpush1.bf16.msra.mxu0 %v1529_v54  ;;  %v3414_v54 = vld [vmem:[%s4987_s3 + $0x2b8] sm:$0xff] }
  0xa6   : > { %1607 = vmatprep.subr.bf16.mxu0 %v1532_v58  ;;  %v3428_v58 = vld [vmem:[%s4987_s3 + $0x2b0] sm:$0xff] }
  0xa9   : > { %725 = vmatmul.mubr.bf16.gmra.mrb[44].mxu1 %v3042_v23  ;;  %v1393_v23 = vld [vmem:[%s4987_s3 + $0x150] sm:$0xff] }
  0xaa   : > { %734 = vmatprep.mubr.bf16.mxu1 %v3044_v27  ;;  %v1531_v27 = vpack.c.bf16 %v1393_v23, %v1391_v59  ;;  %v3433_v59 = vld [vmem:[%s4987_s3 + $0x2c8] sm:$0xff]  ;;  %v3438_v23 = vld [vmem:[%s4987_s3 + $0x2d8] sm:$0xff] }
  0xac   : > { %1608 = vmatpush1.bf16.msra.mxu0 %v1531_v27 }
  0xad   : > { %1609 = vmatprep.subr.bf16.mxu0 %v1534_v1  ;;  %v3451_v1 = vld [vmem:[%s4987_s3 + $0x2c0] sm:$0xff] }
  0xae   : > { %5037 = vst [vmem:[#allocation4_spill] sm:$0xff] %v3451_v1 }
  0xb0   : > { %1610 = vmatpush1.bf16.msra.mxu0 %v1533_v6  ;;  %v3612_v6 = vld [vmem:[%s4987_s3 + $0x370] sm:$0xff] }
  0xb1   : > { %735 = vmatmul.mubr.bf16.gmra.mrb[48].mxu1 %v3076_v44  ;;  %v1401_v44 = vld [vmem:[%s4987_s3 + $0x190] sm:$0xff]  ;;  %1611 = vmatprep.subr.bf16.mxu0 %v1536_v9  ;;  %v3472_v9 = vld [vmem:[%s4987_s3 + $0x2f8] sm:$0xff]  ;;  %5059 = vst [vmem:[#allocation26_spill] sm:$0xff] %v3612_v6 }
  0xb2   : > { %744 = vmatprep.mubr.bf16.mxu1 %v3078_v47  ;;  %v1535_v47 = vpack.c.bf16 %v1401_v44, %v1399_v10  ;;  %5039 = vst [vmem:[#allocation6_spill] sm:$0xff] %v3472_v9  ;;  %v3477_v10 = vld [vmem:[%s4987_s3 + $0x2e0] sm:$0xff]  ;;  %v3482_v44 = vld [vmem:[%s4987_s3 + $0x2f0] sm:$0xff] }
  0xb3   : > { %5040 = vst [vmem:[#allocation7_spill] sm:$0xff] %v3477_v10  ;;  %5041 = vst [vmem:[#allocation8_spill] sm:$0xff] %v3482_v44 }
  0xb4   : > { %1612 = vmatpush1.bf16.msra.mxu0 %v1535_v47  ;;  %v539_v47 = vsub.s32 2, %v3303_v37 }
  0xb5   : > { %1613 = vmatprep.subr.bf16.mxu0 %v1538_v13 }
  0xb8   : > { %1614 = vmatpush1.bf16.msra.mxu0 %v1537_v16  ;;  %v3495_v16 = vld [vmem:[%s4987_s3 + $0x308] sm:$0xff] }
  0xb9   : > { %745 = vmatmul.mubr.bf16.gmra.mrb[52].mxu1 %v3110_v3  ;;  %v1409_v3 = vld [vmem:[%s4987_s3 + $0x1d0] sm:$0xff]  ;;  %1615 = vmatprep.subr.bf16.mxu0 %v1540_v19  ;;  %5042 = vst [vmem:[#allocation9_spill] sm:$0xff] %v3495_v16 }
  0xba   : > { %754 = vmatprep.mubr.bf16.mxu1 %v3112_v5  ;;  %v1539_v5 = vpack.c.bf16 %v1409_v3, %v1407_v20  ;;  %v3572_v3 = vld [vmem:[%s4987_s3 + $0x340] sm:$0xff] }
  0xbb   : > { %5053 = vst [vmem:[#allocation20_spill] sm:$0xff] %v3572_v3 }
  0xbc   : > { %1616 = vmatpush1.bf16.msra.mxu0 %v1539_v5  ;;  %v3567_v5 = vld [vmem:[%s4987_s3 + $0x358] sm:$0xff] }
  0xbd   : > { %1617 = vmatprep.subr.bf16.mxu0 %v1542_v28  ;;  %v3524_v28 = vld [vmem:[%s4987_s3 + $0x328] sm:$0xff]  ;;  %5052 = vst [vmem:[#allocation19_spill] sm:$0xff] %v3567_v5  ;;  %v3654_v5 = vld [vmem:[%s4987_s3 + $0x3b8] sm:$0xff] }
  0xbe   : > { %5046 = vst [vmem:[#allocation13_spill] sm:$0xff] %v3524_v28  ;;  %v3638_v28 = vld [vmem:[%s4987_s3 + $0x390] sm:$0xff]  ;;  %5065 = vst [vmem:[#allocation32_spill] sm:$0xff] %v3654_v5 }
  0xbf   : > { %5063 = vst [vmem:[#allocation30_spill] sm:$0xff] %v3638_v28 }
  0xc0   : > { %1618 = vmatpush1.bf16.msra.mxu0 %v1541_v32 }
  0xc1   : > { %755 = vmatmul.mubr.bf16.gmra.mrb[56].mxu1 %v3144_v21  ;;  %1700 = vmatprep.subr.bf16.mxu0 %v1544_v35  ;;  %v3308_v21 = vld [vmem:[%s4986_s2] sm:$0xf] }
  0xc2   : > { %764 = vmatprep.mubr.bf16.mxu1 %v3146_v24  ;;  %v3311_v24 = vsub.s32 0, %v3303_v37  ;;  %v3442_v27 = vrot.slane %v3308_v21, %v3334_v42  ;;  %v3548_v37 = vld [vmem:[%s4987_s3 + $0x330] sm:$0xff]  ;;  %v3562_v22 = vrot.slane %v3308_v21, %v539_v47  ;;  %v3584_v14 = vrot.slane %v3308_v21, %v543_v15 }
  0xc3   : > { %5049 = vst [vmem:[#allocation16_spill] sm:$0xff] %v3548_v37 }
  0xc4   : > { %5035 = vst [vmem:[#allocation2_spill] sm:$0xff] %v3311_v24  ;;  %v3423_v56 = vrot.slane %v3308_v21, %v3311_v24  ;;  %5051 = vst [vmem:[#allocation18_spill] sm:$0xff] %v3562_v22  ;;  %v3633_v24 = vld [vmem:[%s4987_s3 + $0x380] sm:$0xff] }
  0xc5   : > { %5055 = vst [vmem:[#allocation22_spill] sm:$0xff] %v3584_v14  ;;  %5062 = vst [vmem:[#allocation29_spill] sm:$0xff] %v3633_v24 }
  0xc9   : > { %765 = vmatmul.mubr.bf16.gmra.mrb[60].mxu1 %v3176_v41  ;;  %v3331_v41 = vld [vmem:[%s4987_s3 + $0x238] sm:$0xff] }
 0x124   : > { %v583_v11 = vpop.f32.mrb[0].mxu1 }
 0x125   : > { %v3508_v19 = vadd.f32 %v583_v11, %v3423_v56  ;;  %v585_v20 = vpop.f32.mrb[1].mxu1  ;;  %v3553_v11 = vld [vmem:[%s4987_s3 + $0x348] sm:$0xff] }
 0x126   : > { %v3532_v31 = vadd.f32 %v585_v20, %v3442_v27  ;;  %v587_v32 = vpop.f32.mrb[2].mxu1  ;;  %5050 = vst [vmem:[#allocation17_spill] sm:$0xff] %v3553_v11  ;;  %v3649_v11 = vld [vmem:[%s4987_s3 + $0x3a8] sm:$0xff] }
 0x127   : > { %v839_v20 = vmul.f32 0.044715, %v3508_v19  ;;  %v3557_v34 = vadd.f32 %v587_v32, %v3423_v56  ;;  %v589_v35 = vpop.f32.mrb[3].mxu1  ;;  %v3577_v32 = vld [vmem:[%s4987_s3 + $0x350] sm:$0xff]  ;;  %5064 = vst [vmem:[#allocation31_spill] sm:$0xff] %v3649_v11 }
 0x128   : > { %5054 = vst [vmem:[#allocation21_spill] sm:$0xff] %v3577_v32  ;;  %v840_v33 = vmul.f32 0.044715, %v3532_v31  ;;  %v3581_v47 = vadd.f32 %v589_v35, %v3442_v27  ;;  %v3601_v35 = vld [vmem:[%s4987_s3 + $0x360] sm:$0xff] }
 0x129   : > { %5058 = vst [vmem:[#allocation25_spill] sm:$0xff] %v3601_v35  ;;  %v903_v21 = vmul.f32 %v839_v20, %v3508_v19  ;;  %v843_v15 = vmul.f32 0.044715, %v3557_v34  ;;  %v3622_v20 = vld [vmem:[%s4987_s3 + $0x398] sm:$0xff] }
 0x12a   : > { %5061 = vst [vmem:[#allocation28_spill] sm:$0xff] %v3622_v20  ;;  %v844_v13 = vmul.f32 0.044715, %v3581_v47  ;;  %v904_v61 = vmul.f32 %v840_v33, %v3532_v31 }
 0x12b   : > { %v967_v29 = vmul.f32 %v903_v21, %v3508_v19  ;;  %v907_v33 = vmul.f32 %v843_v15, %v3557_v34 }
 0x12c   : > { %v593_v36 = vpop.f32.mrb[4].mxu1  ;;  %v908_v21 = vmul.f32 %v844_v13, %v3581_v47  ;;  %v968_v15 = vmul.f32 %v904_v61, %v3532_v31 }
 0x12d   : > { %v971_v12 = vmul.f32 %v907_v33, %v3557_v34  ;;  %v3664_v8 = vadd.f32 %v593_v36, %v3423_v56  ;;  %v595_v3 = vpop.f32.mrb[5].mxu1  ;;  %v1031_v32 = vadd.f32 %v967_v29, %v3508_v19  ;;  %v3679_v36 = vld [vmem:[%s4987_s3 + $0x3a0] sm:$0xff] }
 0x12e   : > { %v3670_v13 = vadd.f32 %v595_v3, %v3442_v27  ;;  %v597_v61 = vpop.f32.mrb[6].mxu1  ;;  %v972_v7 = vmul.f32 %v908_v21, %v3581_v47  ;;  %v1032_v35 = vadd.f32 %v968_v15, %v3532_v31  ;;  %5066 = vst [vmem:[#allocation33_spill] sm:$0xff] %v3679_v36  ;;  %v3689_v21 = vld [vmem:[%s4987_s3 + $0x3b0] sm:$0xff] }
 0x12f   : > { %v847_v29 = vmul.f32 0.044715, %v3664_v8  ;;  %v3683_v37 = vadd.f32 %v597_v61, %v3423_v56  ;;  %v599_v3 = vpop.f32.mrb[7].mxu1  ;;  %v1035_v42 = vadd.f32 %v971_v12, %v3557_v34  ;;  %v1095_v24 = vmul.f32 0.7978846, %v1031_v32  ;;  %5067 = vst [vmem:[#allocation34_spill] sm:$0xff] %v3689_v21 }
 0x130   : > { %v848_v15 = vmul.f32 0.044715, %v3670_v13  ;;  %v3693_v33 = vadd.f32 %v599_v3, %v3442_v27  ;;  %v1036_v11 = vadd.f32 %v972_v7, %v3581_v47  ;;  %v1096_v5 = vmul.f32 0.7978846, %v1032_v35  ;;  %v3699_v61 = vld [vmem:[%s4987_s3 + $0x3c8] sm:$0xff]  ;;  %v3704_v12 = vld [vmem:[%s4987_s3 + $0x3d8] sm:$0xff] }
 0x131   : > { %5068 = vst [vmem:[#allocation35_spill] sm:$0xff] %v3699_v61  ;;  %5069 = vst [vmem:[#allocation36_spill] sm:$0xff] %v3704_v12  ;;  %v911_v32 = vmul.f32 %v847_v29, %v3664_v8  ;;  %v851_v28 = vmul.f32 0.044715, %v3683_v37  ;;  %v1099_v63 = vmul.f32 0.7978846, %v1035_v42  ;;  %2367 = vtanh.f32 %v1095_v24 }
 0x132   : > { %v3711_v7 = vld [vmem:[%s4987_s3 + $0x3c0] sm:$0xff]  ;;  %v3716_v35 = vld [vmem:[%s4987_s3 + $0x3d0] sm:$0xff]  ;;  %v912_v3 = vmul.f32 %v848_v15, %v3670_v13  ;;  %v852_v20 = vmul.f32 0.044715, %v3693_v33  ;;  %v1100_v6 = vmul.f32 0.7978846, %v1036_v11  ;;  %2369 = vtanh.f32 %v1096_v5 }
 0x133   : > { %5070 = vst [vmem:[#allocation37_spill] sm:$0xff] %v3711_v7  ;;  %5071 = vst [vmem:[#allocation38_spill] sm:$0xff] %v3716_v35  ;;  %v3723_v24 = vld [vmem:[%s4987_s3 + $0x3e8] sm:$0xff]  ;;  %v3728_v42 = vld [vmem:[%s4987_s3 + $0x3f8] sm:$0xff]  ;;  %v975_v29 = vmul.f32 %v911_v32, %v3664_v8  ;;  %v915_v18 = vmul.f32 %v851_v28, %v3683_v37  ;;  %2371 = vtanh.f32 %v1099_v63  ;;  %v776_v28 = vmul.f32 0.5, %v3532_v31 }
 0x134   : > { %5072 = vst [vmem:[#allocation39_spill] sm:$0xff] %v3723_v24  ;;  %5073 = vst [vmem:[#allocation40_spill] sm:$0xff] %v3728_v42  ;;  %v976_v5 = vmul.f32 %v912_v3, %v3670_v13  ;;  %v916_v11 = vmul.f32 %v852_v20, %v3693_v33  ;;  %v603_v25 = vpop.f32.mrb[8].mxu1  ;;  %2373 = vtanh.f32 %v1100_v6  ;;  %v3760_v63 = vld [vmem:[%s4987_s3 + $0x3f0] sm:$0xff]  ;;  %v779_v21 = vmul.f32 0.5, %v3557_v34 }
 0x135   : > { %v979_v16 = vmul.f32 %v915_v18, %v3683_v37  ;;  %v3740_v17 = vadd.f32 %v603_v25, %v3423_v56  ;;  %v605_v32 = vpop.f32.mrb[9].mxu1  ;;  %v1039_v18 = vadd.f32 %v975_v29, %v3664_v8  ;;  %v3755_v25 = vld [vmem:[%s4987_s3 + $0x3e0] sm:$0xff]  ;;  %5075 = vst [vmem:[#allocation42_spill] sm:$0xff] %v3760_v63 }
 0x136   : > { %v980_v3 = vmul.f32 %v916_v11, %v3693_v33  ;;  %v3748_v20 = vadd.f32 %v605_v32, %v3442_v27  ;;  %v607_v6 = vpop.f32.mrb[10].mxu1  ;;  %v1040_v14 = vadd.f32 %v976_v5, %v3670_v13  ;;  %5074 = vst [vmem:[#allocation41_spill] sm:$0xff] %v3755_v25  ;;  %v775_v5 = vmul.f32 0.5, %v3508_v19 }
 0x137   : > { %v3763_v11 = vadd.f32 %v607_v6, %v3423_v56  ;;  %v609_v32 = vpop.f32.mrb[11].mxu1  ;;  %v1043_v29 = vadd.f32 %v979_v16, %v3683_v37  ;;  %v855_v35 = vmul.f32 0.044715, %v3740_v17  ;;  %v1103_v61 = vmul.f32 0.7978846, %v1039_v18 }
 0x138   : > { %v856_v15 = vmul.f32 0.044715, %v3748_v20  ;;  %v3770_v24 = vadd.f32 %v609_v32, %v3442_v27  ;;  %v1044_v42 = vadd.f32 %v980_v3, %v3693_v33  ;;  %v1104_v7 = vmul.f32 0.7978846, %v1040_v14 }
 0x139   : > { %v1107_v6 = vmul.f32 0.7978846, %v1043_v29  ;;  %v780_v32 = vmul.f32 0.5, %v3581_v47  ;;  %v3781_v14 = vmul.f32 0.5, %v3670_v13  ;;  %v859_v18 = vmul.f32 0.044715, %v3763_v11 }
 0x13a   : > { %v920_v31 = vmul.f32 %v856_v15, %v3748_v20  ;;  %v860_v19 = vmul.f32 0.044715, %v3770_v24  ;;  %v1108_v16 = vmul.f32 0.7978846, %v1044_v42  ;;  %2375 = vtanh.f32 %v1104_v7 }
 0x13b   : > { %v2368_v36 = vpop.eup %2367  ;;  %2377 = vtanh.f32 %v1103_v61  ;;  %v3787_v47 = vmul.f32 0.5, %v3693_v33  ;;  %v919_v13 = vmul.f32 %v855_v35, %v3740_v17  ;;  %v787_v33 = vmul.f32 0.5, %v3683_v37 }
 0x13c   : > { %v2370_v3 = vpop.eup %2369  ;;  %v924_v29 = vmul.f32 %v860_v19, %v3770_v24  ;;  %v613_v12 = vpop.f32.mrb[12].mxu1  ;;  %v1223_v15 = vadd.f32 1.0, %v2368_v36  ;;  %2379 = vtanh.f32 %v1108_v16  ;;  %v984_v7 = vmul.f32 %v920_v31, %v3748_v20 }
 0x13d   : > { %v2372_v25 = vpop.eup %2371  ;;  %v615_v42 = vpop.f32.mrb[13].mxu1  ;;  %v1224_v63 = vadd.f32 1.0, %v2370_v3  ;;  %2381 = vtanh.f32 %v1107_v6  ;;  %v3792_v22 = vadd.f32 %v613_v12, %v3423_v56  ;;  %v783_v3 = vmul.f32 0.5, %v3664_v8 }
 0x13e   : > { %v2374_v34 = vpop.eup %2373  ;;  %v988_v61 = vmul.f32 %v924_v29, %v3770_v24  ;;  %v617_v19 = vpop.f32.mrb[14].mxu1  ;;  %v1227_v36 = vadd.f32 1.0, %v2372_v25  ;;  %v3795_v16 = vadd.f32 %v615_v42, %v3442_v27  ;;  %v923_v6 = vmul.f32 %v859_v18, %v3763_v11 }
 0x13f   : > { %v619_v31 = vpop.f32.mrb[15].mxu1  ;;  %v1228_v10 = vadd.f32 1.0, %v2374_v34  ;;  %v1287_v29 = vmul.f32 %v1223_v15, %v775_v5  ;;  %v1288_v12 = vmul.f32 %v1224_v63, %v776_v28  ;;  %v1048_v25 = vadd.f32 %v984_v7, %v3748_v20 }
 0x140   : > { %v3801_v35 = vadd.f32 %v619_v31, %v3442_v27  ;;  %v1291_v44 = vmul.f32 %v1227_v36, %v779_v21  ;;  %v3805_v42 = vmul.f32 0.5, %v3740_v17  ;;  %v983_v34 = vmul.f32 %v919_v13, %v3740_v17 }
 0x141   : > { %v1292_v4 = vmul.f32 %v1228_v10, %v780_v32  ;;  %v863_v8 = vmul.f32 0.044715, %v3792_v22  ;;  %v1052_v37 = vadd.f32 %v988_v61, %v3770_v24  ;;  %v864_v18 = vmul.f32 0.044715, %v3795_v16 }
 0x142   : > { %v1479_v9 = vpack.c.bf16 %v1291_v44, %v1287_v29  ;;  %v868_v31 = vmul.f32 0.044715, %v3801_v35  ;;  %v1112_v21 = vmul.f32 0.7978846, %v1048_v25  ;;  %v987_v10 = vmul.f32 %v923_v6, %v3763_v11 }
 0x143   : > { %v1480_v5 = vpack.c.bf16 %v1292_v4, %v1288_v12  ;;  %v3814_v28 = vadd.f32 %v617_v19, %v3423_v56  ;;  %v3817_v15 = vmul.f32 0.5, %v3748_v20  ;;  %v1116_v7 = vmul.f32 0.7978846, %v1052_v37 }
 0x144   : > { %v2376_v63 = vpop.eup %2375  ;;  %v623_v32 = vpop.f32.mrb[16].mxu1  ;;  %v3823_v4 = vmul.f32 0.5, %v3770_v24  ;;  %2383 = vtanh.f32 %v1112_v21  ;;  %v927_v19 = vmul.f32 %v863_v8, %v3792_v22  ;;  %v928_v37 = vmul.f32 %v864_v18, %v3795_v16 }
 0x145   : > { %v2378_v44 = vpop.eup %2377  ;;  %v3820_v13 = vadd.f32 %v623_v32, %v3423_v56  ;;  %v625_v61 = vpop.f32.mrb[17].mxu1  ;;  %1619 = vmatprep.mubr.bf16.mxu0 %v1480_v5  ;;  %v1232_v36 = vadd.f32 1.0, %v2376_v63  ;;  %2385 = vtanh.f32 %v1116_v7  ;;  %v932_v5 = vmul.f32 %v868_v31, %v3801_v35 }
 0x146   : > { %v2380_v6 = vpop.eup %2379  ;;  %v3827_v29 = vadd.f32 %v625_v61, %v3442_v27  ;;  %v627_v20 = vpop.f32.mrb[18].mxu1  ;;  %1620 = vmatmul.mubr.bf16.vlgmr.msra.gmra.mrb[0].mxu0 %v1479_v9  ;;  %v1231_v12 = vadd.f32 1.0, %v2378_v44  ;;  %v5076_v21 = vpack.c.bf16 %v3321_v39, %v3316_v38  ;;  %v867_v32 = vmul.f32 0.044715, %v3814_v28 }
 0x147   : > { %v2382_v25 = vpop.eup %2381  ;;  %v3832_v63 = vadd.f32 %v627_v20, %v3423_v56  ;;  %v629_v24 = vpop.f32.mrb[19].mxu1  ;;  %v1236_v8 = vadd.f32 1.0, %v2380_v6  ;;  %v871_v9 = vmul.f32 0.044715, %v3820_v13  ;;  %v5077_v18 = vpack.c.bf16 %v3331_v41, %v3326_v40 }
 0x148   : > { %1701 = vmatpush1.bf16.msra.mxu0 %v5076_v21  ;;  %v3840_v7 = vadd.f32 %v629_v24, %v3442_v27  ;;  %v1235_v31 = vadd.f32 1.0, %v2382_v25  ;;  %v872_v44 = vmul.f32 0.044715, %v3827_v29  ;;  %v1296_v61 = vmul.f32 %v1232_v36, %v3781_v14 }
 0x149   : > { %1702 = vmatprep.subr.bf16.mxu0 %v5077_v18  ;;  %v1300_v38 = vmul.f32 %v1236_v8, %v3787_v47  ;;  %v1047_v39 = vadd.f32 %v983_v34, %v3740_v17  ;;  %v875_v6 = vmul.f32 0.044715, %v3832_v63  ;;  %v1295_v20 = vmul.f32 %v1231_v12, %v783_v3 }
 0x14a   : > { %v1299_v21 = vmul.f32 %v1235_v31, %v787_v33  ;;  %v1051_v24 = vadd.f32 %v987_v10, %v3763_v11  ;;  %v992_v1 = vmul.f32 %v928_v37, %v3795_v16  ;;  %v996_v40 = vmul.f32 %v932_v5, %v3801_v35 }
 0x14b   : > { %v5078_v41 = vpack.c.bf16 %v3344_v46, %v3339_v43  ;;  %v1484_v25 = vpack.c.bf16 %v1300_v38, %v1296_v61  ;;  %v1111_v14 = vmul.f32 0.7978846, %v1047_v39  ;;  %v931_v47 = vmul.f32 %v867_v32, %v3814_v28 }
 0x14c   : > { %v876_v17 = vmul.f32 0.044715, %v3840_v7  ;;  %v633_v34 = vpop.f32.mrb[20].mxu1  ;;  %v1483_v36 = vpack.c.bf16 %v1299_v21, %v1295_v20  ;;  %v5079_v3 = vpack.c.bf16 %v3354_v49, %v3349_v48  ;;  %v1115_v33 = vmul.f32 0.7978846, %v1051_v24 }
 0x14d   : > { %1703 = vmatpush1.bf16.msra.mxu0 %v5078_v41  ;;  %v991_v10 = vmul.f32 %v927_v19, %v3792_v22  ;;  %v935_v12 = vmul.f32 %v871_v9, %v3820_v13  ;;  %v3864_v43 = vadd.f32 %v633_v34, %v3423_v56  ;;  %v635_v46 = vpop.f32.mrb[21].mxu1  ;;  %1629 = vmatprep.mubr.bf16.mxu0 %v1484_v25  ;;  %2387 = vtanh.f32 %v1111_v14 }
 0x14e   : > { %1704 = vmatprep.subr.bf16.mxu0 %v5079_v3  ;;  %v936_v37 = vmul.f32 %v872_v44, %v3827_v29  ;;  %v939_v5 = vmul.f32 %v875_v6, %v3832_v63  ;;  %v3869_v8 = vadd.f32 %v635_v46, %v3442_v27  ;;  %v637_v48 = vpop.f32.mrb[22].mxu1  ;;  %1630 = vmatmul.mubr.bf16.gmra.mrb[4].mxu0 %v1483_v36  ;;  %2389 = vtanh.f32 %v1115_v33  ;;  %v2384_v49 = vpop.eup %2383 }
 0x14f   : > { %v3872_v19 = vadd.f32 %v637_v48, %v3423_v56  ;;  %v639_v32 = vpop.f32.mrb[23].mxu1  ;;  %v5080_v9 = vpack.c.bf16 %v3364_v45, %v3359_v50  ;;  %v795_v18 = vmul.f32 0.5, %v3763_v11  ;;  %v1056_v31 = vadd.f32 %v992_v1, %v3795_v16  ;;  %v2386_v61 = vpop.eup %2385 }
 0x150   : > { %v1060_v44 = vadd.f32 %v996_v40, %v3801_v35  ;;  %v995_v38 = vmul.f32 %v931_v47, %v3814_v28  ;;  %v940_v39 = vmul.f32 %v876_v17, %v3840_v7  ;;  %v3883_v6 = vadd.f32 %v639_v32, %v3442_v27 }
 0x151   : > { %1705 = vmatpush1.bf16.msra.mxu0 %v5080_v9  ;;  %v5081_v20 = vpack.c.bf16 %v3374_v60, %v3369_v51  ;;  %v1240_v50 = vadd.f32 1.0, %v2384_v49  ;;  %v3889_v45 = vmul.f32 %v935_v12, %v3820_v13  ;;  %v879_v1 = vmul.f32 0.044715, %v3864_v43 }
 0x152   : > { %v1244_v11 = vadd.f32 1.0, %v2386_v61  ;;  %v1120_v21 = vmul.f32 0.7978846, %v1056_v31  ;;  %v1000_v24 = vmul.f32 %v936_v37, %v3827_v29  ;;  %v3894_v40 = vmul.f32 %v939_v5, %v3832_v63 }
 0x153   : > { %1706 = vmatprep.subr.bf16.mxu0 %v5081_v20  ;;  %v880_v41 = vmul.f32 0.044715, %v3869_v8  ;;  %v1124_v25 = vmul.f32 0.7978846, %v1060_v44  ;;  %v883_v14 = vmul.f32 0.044715, %v3872_v19  ;;  %v5082_v51 = vpack.c.bf16 %v3384_v26, %v3379_v0 }
 0x154   : > { %v1304_v60 = vmul.f32 %v1240_v50, %v3817_v15  ;;  %v1308_v47 = vmul.f32 %v1244_v11, %v3823_v4  ;;  %2391 = vtanh.f32 %v1120_v21  ;;  %v1004_v17 = vmul.f32 %v940_v39, %v3840_v7  ;;  %v643_v36 = vpop.f32.mrb[24].mxu1 }
 0x155   : > { %1707 = vmatpush1.bf16.msra.mxu0 %v5082_v51  ;;  %v884_v34 = vmul.f32 0.044715, %v3883_v6  ;;  %v5083_v3 = vpack.c.bf16 %v3394_v57, %v3389_v30  ;;  %v3909_v33 = vmul.f32 0.5, %v3795_v16  ;;  %2393 = vtanh.f32 %v1124_v25  ;;  %v645_v15 = vpop.f32.mrb[25].mxu1 }
 0x156   : > { %v943_v0 = vmul.f32 %v879_v1, %v3864_v43  ;;  %v3913_v26 = vadd.f32 %v643_v36, %v3423_v56  ;;  %v1488_v4 = vpack.c.bf16 %v1308_v47, %v1304_v60  ;;  %v1055_v12 = vadd.f32 %v991_v10, %v3792_v22  ;;  %v647_v30 = vpop.f32.mrb[26].mxu1 }
 0x157   : > { %1708 = vmatprep.subr.bf16.mxu0 %v5083_v3  ;;  %v944_v46 = vmul.f32 %v880_v41, %v3869_v8  ;;  %v3918_v37 = vadd.f32 %v645_v15, %v3442_v27  ;;  %v804_v57 = vmul.f32 0.5, %v3801_v35  ;;  %v1059_v16 = vadd.f32 %v995_v38, %v3814_v28  ;;  %v2388_v5 = vpop.eup %2387  ;;  %v649_v32 = vpop.f32.mrb[27].mxu1 }
 0x158   : > { %v947_v48 = vmul.f32 %v883_v14, %v3872_v19  ;;  %1639 = vmatprep.mubr.bf16.mxu0 %v1488_v4  ;;  %v3924_v49 = vadd.f32 %v647_v30, %v3423_v56  ;;  %v5084_v10 = vpack.c.bf16 %v3404_v52, %v3399_v62  ;;  %v3930_v9 = vmul.f32 0.5, %v3792_v22  ;;  %v2390_v44 = vpop.eup %2389 }
 0x159   : > { %v1119_v31 = vmul.f32 0.7978846, %v1055_v12  ;;  %v948_v35 = vmul.f32 %v884_v34, %v3883_v6  ;;  %v1239_v61 = vadd.f32 1.0, %v2388_v5  ;;  %v3934_v38 = vadd.f32 %v649_v32, %v3442_v27  ;;  %v5088_v32 = vld [vmem:[#allocation4_spill] sm:$0xff] }
 0x15a   : > { %1709 = vmatpush1.bf16.msra.mxu0 %v5084_v10  ;;  %v5085_v39 = vpack.c.bf16 %v3414_v54, %v3409_v53  ;;  %v1123_v20 = vmul.f32 0.7978846, %v1059_v16  ;;  %v3940_v50 = vmul.f32 %v943_v0, %v3864_v43  ;;  %v887_v62 = vmul.f32 0.044715, %v3913_v26 }
 0x15b   : > { %v1243_v52 = vadd.f32 1.0, %v2390_v44  ;;  %2395 = vtanh.f32 %v1119_v31  ;;  %v3944_v22 = vmul.f32 %v944_v46, %v3869_v8  ;;  %v888_v1 = vmul.f32 0.044715, %v3918_v37 }
 0x15c   : > { %1710 = vmatprep.subr.bf16.mxu0 %v5085_v39  ;;  %v3948_v11 = vmul.f32 0.5, %v3814_v28  ;;  %2397 = vtanh.f32 %v1123_v20  ;;  %v891_v53 = vmul.f32 0.044715, %v3924_v49  ;;  %v1303_v54 = vmul.f32 %v1239_v61, %v3805_v42  ;;  %v653_v60 = vpop.f32.mrb[28].mxu1 }
 0x15d   : > { %v1307_v21 = vmul.f32 %v1243_v52, %v795_v18  ;;  %v5086_v41 = vpack.c.bf16 %v3428_v58, %v3419_v55  ;;  %v1064_v25 = vadd.f32 %v1000_v24, %v3827_v29  ;;  %v3957_v14 = vmul.f32 %v947_v48, %v3872_v19  ;;  %v655_v34 = vpop.f32.mrb[29].mxu1 }
 0x15e   : > { %v3960_v51 = vmul.f32 %v948_v35, %v3883_v6  ;;  %v892_v28 = vmul.f32 0.044715, %v3934_v38  ;;  %v5087_v47 = vpack.c.bf16 %v3438_v23, %v3433_v59  ;;  %v1068_v42 = vadd.f32 %v1004_v17, %v3840_v7  ;;  %v2392_v18 = vpop.eup %2391  ;;  %v657_v59 = vpop.f32.mrb[30].mxu1  ;;  %v5090_v35 = vld [vmem:[#allocation6_spill] sm:$0xff] }
 0x15f   : > { %1711 = vmatpush1.bf16.msra.mxu0 %v5086_v41  ;;  %v951_v55 = vmul.f32 %v887_v62, %v3913_v26  ;;  %v1487_v58 = vpack.c.bf16 %v1307_v21, %v1303_v54  ;;  %v3969_v24 = vadd.f32 %v653_v60, %v3423_v56  ;;  %v1128_v36 = vmul.f32 0.7978846, %v1064_v25  ;;  %v2394_v3 = vpop.eup %2393  ;;  %v659_v30 = vpop.f32.mrb[31].mxu1  ;;  %v5093_v41 = vld [vmem:[#allocation8_spill] sm:$0xff] }
 0x160   : > { %1712 = vmatprep.subr.bf16.mxu0 %v5087_v47  ;;  %v952_v0 = vmul.f32 %v888_v1, %v3918_v37  ;;  %v3973_v15 = vadd.f32 %v655_v34, %v3442_v27  ;;  %v1248_v4 = vadd.f32 1.0, %v2392_v18  ;;  %v1132_v23 = vmul.f32 0.7978846, %v1068_v42  ;;  %v5096_v18 = vld [vmem:[#allocation18_spill] sm:$0xff] }
 0x161   : > { %v955_v17 = vmul.f32 %v891_v53, %v3924_v49  ;;  %1640 = vmatmul.mubr.bf16.gmra.mrb[8].mxu0 %v1487_v58  ;;  %v1252_v12 = vadd.f32 1.0, %v2394_v3  ;;  %v3977_v46 = vadd.f32 %v657_v59, %v3423_v56  ;;  %2399 = vtanh.f32 %v1128_v36  ;;  %v5091_v56 = vld [vmem:[#allocation5_spill] sm:$0xff]  ;;  %v5097_v34 = vld [vmem:[#allocation10_spill] sm:$0xff] }
 0x162   : > { %v956_v16 = vmul.f32 %v892_v28, %v3934_v38  ;;  %v895_v5 = vmul.f32 0.044715, %v3969_v24  ;;  %v3982_v48 = vadd.f32 %v659_v30, %v3442_v27  ;;  %v5089_v10 = vpack.c.bf16 %v3456_v2, %v5088_v32  ;;  %v5098_v36 = vld [vmem:[#allocation9_spill] sm:$0xff] }
 0x163   : > { %2401 = vtanh.f32 %v1132_v23  ;;  %v1312_v31 = vmul.f32 %v1248_v4, %v3909_v33  ;;  %v1316_v44 = vmul.f32 %v1252_v12, %v804_v57  ;;  %v5092_v61 = vpack.c.bf16 %v5090_v35, %v5091_v56  ;;  %v5100_v4 = vld [vmem:[#allocation22_spill] sm:$0xff]  ;;  %v5102_v35 = vld [vmem:[#allocation11_spill] sm:$0xff] }
 0x164   : > { %1713 = vmatpush1.bf16.msra.mxu0 %v5089_v10  ;;  %v3992_v39 = vmul.f32 0.5, %v3827_v29  ;;  %v3995_v20 = vmul.f32 0.5, %v3840_v7  ;;  %v3998_v27 = vmul.f32 %v951_v55, %v3913_v26  ;;  %v896_v2 = vmul.f32 0.044715, %v3973_v15  ;;  %v696_v28 = vpop.f32.mrb[32].mxu1 }
 0x165   : > { %1714 = vmatprep.subr.bf16.mxu0 %v5092_v61  ;;  %v1063_v62 = vadd.f32 %v3889_v45, %v3820_v13  ;;  %v1067_v33 = vadd.f32 %v3894_v40, %v3832_v63  ;;  %v2396_v57 = vpop.eup %2395  ;;  %v4006_v52 = vmul.f32 %v952_v0, %v3918_v37  ;;  %v4009_v29 = vmul.f32 %v955_v17, %v3924_v49  ;;  %v5094_v40 = vld [vmem:[#allocation7_spill] sm:$0xff]  ;;  %v698_v55 = vpop.f32.mrb[33].mxu1 }
 0x166   : > { %v1492_v7 = vpack.c.bf16 %v1316_v44, %v1312_v31  ;;  %v4012_v1 = vmul.f32 0.5, %v3820_v13  ;;  %v2398_v53 = vpop.eup %2397  ;;  %v4015_v54 = vmul.f32 %v956_v16, %v3934_v38  ;;  %v959_v45 = vmul.f32 %v895_v5, %v3969_v24  ;;  %v700_v23 = vpop.f32.mrb[34].mxu1 }
 0x167   : > { %v1247_v21 = vadd.f32 1.0, %v2396_v57  ;;  %v5095_v25 = vpack.c.bf16 %v5093_v41, %v5094_v40  ;;  %v1127_v60 = vmul.f32 0.7978846, %v1063_v62  ;;  %v899_v47 = vmul.f32 0.044715, %v3977_v46  ;;  %v702_v32 = vpop.f32.mrb[35].mxu1 }
 0x168   : > { %1649 = vmatprep.mubr.bf16.mxu0 %v1492_v7  ;;  %v1251_v42 = vadd.f32 1.0, %v2398_v53  ;;  %v697_v13 = vadd.f32 %v696_v28, %v5096_v18  ;;  %v1131_v58 = vmul.f32 0.7978846, %v1067_v33  ;;  %v5099_v3 = vpack.c.bf16 %v5097_v34, %v5098_v36  ;;  %v5104_v33 = vld [vmem:[#allocation14_spill] sm:$0xff]  ;;  %v5105_v57 = vld [vmem:[#allocation13_spill] sm:$0xff]  ;;  %v5107_v34 = vld [vmem:[#allocation16_spill] sm:$0xff] }
 0x169   : > { %1715 = vmatpush1.bf16.msra.mxu0 %v5095_v25  ;;  %v960_v0 = vmul.f32 %v896_v2, %v3973_v15  ;;  %v4028_v59 = vadd.f32 %v698_v55, %v5100_v4  ;;  %v4031_v17 = vmul.f32 0.5, %v3832_v63  ;;  %2403 = vtanh.f32 %v1127_v60  ;;  %v5101_v63 = vld [vmem:[#allocation12_spill] sm:$0xff] }
 0x16a   : > { %1716 = vmatprep.subr.bf16.mxu0 %v5099_v3  ;;  %v1311_v12 = vmul.f32 %v1247_v21, %v3930_v9  ;;  %v1315_v30 = vmul.f32 %v1251_v42, %v3948_v11  ;;  %v841_v16 = vmul.f32 0.044715, %v697_v13  ;;  %v701_v5 = vadd.f32 %v700_v23, %v5096_v18 }
 0x16b   : > { %v4037_v10 = vmul.f32 %v959_v45, %v3969_v24  ;;  %v900_v31 = vmul.f32 0.044715, %v3982_v48  ;;  %2405 = vtanh.f32 %v1131_v58  ;;  %v4041_v44 = vadd.f32 %v702_v32, %v5100_v4  ;;  %v2400_v9 = vpop.eup %2399  ;;  %v5110_v32 = vld [vmem:[#allocation19_spill] sm:$0xff] }
 0x16c   : > { %v5103_v56 = vpack.c.bf16 %v5101_v63, %v5102_v35  ;;  %v1491_v61 = vpack.c.bf16 %v1315_v30, %v1311_v12  ;;  %v905_v11 = vmul.f32 %v841_v16, %v697_v13  ;;  %v842_v2 = vmul.f32 0.044715, %v4028_v59  ;;  %v706_v3 = vpop.f32.mrb[36].mxu1  ;;  %v5111_v63 = vld [vmem:[#allocation17_spill] sm:$0xff] }
 0x16d   : > { %v845_v62 = vmul.f32 0.044715, %v701_v5  ;;  %v5106_v7 = vpack.c.bf16 %v5104_v33, %v5105_v57  ;;  %v2402_v53 = vpop.eup %2401  ;;  %v963_v45 = vmul.f32 %v899_v47, %v3977_v46  ;;  %v1256_v21 = vadd.f32 1.0, %v2400_v9  ;;  %v5108_v47 = vld [vmem:[#allocation15_spill] sm:$0xff] }
 0x16e   : > { %1717 = vmatpush1.bf16.msra.mxu0 %v5103_v56  ;;  %v846_v41 = vmul.f32 0.044715, %v4041_v44  ;;  %v1072_v40 = vadd.f32 %v3944_v22, %v3869_v8  ;;  %v969_v25 = vmul.f32 %v905_v11, %v697_v13  ;;  %v1260_v28 = vadd.f32 1.0, %v2402_v53  ;;  %v5113_v53 = vld [vmem:[#allocation21_spill] sm:$0xff] }
 0x16f   : > { %1718 = vmatprep.subr.bf16.mxu0 %v5106_v7  ;;  %1650 = vmatmul.mubr.bf16.gmra.mrb[12].mxu0 %v1491_v61  ;;  %v909_v60 = vmul.f32 %v845_v62, %v701_v5  ;;  %v1076_v42 = vadd.f32 %v3960_v51, %v3883_v6  ;;  %v4057_v55 = vmul.f32 %v960_v0, %v3973_v15  ;;  %v4064_v23 = vmul.f32 0.5, %v3869_v8  ;;  %v708_v0 = vpop.f32.mrb[37].mxu1 }
 0x170   : > { %v964_v58 = vmul.f32 %v900_v31, %v3982_v48  ;;  %v5109_v36 = vpack.c.bf16 %v5107_v34, %v5108_v47  ;;  %v1136_v22 = vmul.f32 0.7978846, %v1072_v40  ;;  %v906_v12 = vmul.f32 %v842_v2, %v4028_v59  ;;  %v710_v8 = vpop.f32.mrb[38].mxu1 }
 0x171   : > { %v1320_v30 = vmul.f32 %v1256_v21, %v3992_v39  ;;  %v1324_v51 = vmul.f32 %v1260_v28, %v3995_v20  ;;  %v973_v16 = vmul.f32 %v909_v60, %v701_v5  ;;  %v5112_v31 = vpack.c.bf16 %v5110_v32, %v5111_v63  ;;  %v712_v2 = vpop.f32.mrb[39].mxu1  ;;  %v5114_v21 = vld [vmem:[#allocation20_spill] sm:$0xff]  ;;  %v5119_v32 = vld [vmem:[#allocation26_spill] sm:$0xff]  ;;  %v5120_v63 = vld [vmem:[#allocation25_spill] sm:$0xff] }
 0x172   : > { %1719 = vmatpush1.bf16.msra.mxu0 %v5109_v36  ;;  %v1033_v35 = vadd.f32 %v969_v25, %v697_v13  ;;  %v4073_v56 = vadd.f32 %v706_v3, %v5096_v18  ;;  %v1140_v9 = vmul.f32 0.7978846, %v1076_v42  ;;  %2407 = vtanh.f32 %v1136_v22  ;;  %v5116_v60 = vld [vmem:[#allocation24_spill] sm:$0xff]  ;;  %v5117_v42 = vld [vmem:[#allocation23_spill] sm:$0xff] }
 0x173   : > { %1720 = vmatprep.subr.bf16.mxu0 %v5112_v31  ;;  %v4076_v61 = vmul.f32 %v963_v45, %v3977_v46  ;;  %v1496_v11 = vpack.c.bf16 %v1324_v51, %v1320_v30  ;;  %v910_v39 = vmul.f32 %v846_v41, %v4041_v44  ;;  %v4080_v20 = vadd.f32 %v708_v0, %v5100_v4  ;;  %v2404_v62 = vpop.eup %2403 }
 0x174   : > { %v4083_v33 = vmul.f32 %v964_v58, %v3982_v48  ;;  %v1037_v57 = vadd.f32 %v973_v16, %v701_v5  ;;  %2409 = vtanh.f32 %v1140_v9  ;;  %v4086_v7 = vadd.f32 %v710_v8, %v5096_v18 }
 0x175   : > { %v5115_v45 = vpack.c.bf16 %v5113_v53, %v5114_v21  ;;  %v4091_v40 = vmul.f32 0.5, %v697_v13  ;;  %1659 = vmatprep.mubr.bf16.mxu0 %v1496_v11  ;;  %v4093_v41 = vmul.f32 0.5, %v701_v5  ;;  %v1255_v25 = vadd.f32 1.0, %v2404_v62  ;;  %v2406_v34 = vpop.eup %2405  ;;  %v5123_v62 = vld [vmem:[#allocation27_spill] sm:$0xff] }
 0x176   : > { %v820_v28 = vmul.f32 0.5, %v3883_v6  ;;  %v5118_v58 = vpack.c.bf16 %v5116_v60, %v5117_v42  ;;  %v1097_v47 = vmul.f32 0.7978846, %v1033_v35  ;;  %v4100_v36 = vmul.f32 %v906_v12, %v4028_v59 }
 0x177   : > { %1721 = vmatpush1.bf16.msra.mxu0 %v5115_v45  ;;  %v849_v3 = vmul.f32 0.044715, %v4073_v56  ;;  %v1071_v13 = vadd.f32 %v3940_v50, %v3864_v43  ;;  %v1259_v22 = vadd.f32 1.0, %v2406_v34  ;;  %v4106_v5 = vmul.f32 %v910_v39, %v4041_v44  ;;  %v716_v50 = vpop.f32.mrb[40].mxu1  ;;  %v5122_v39 = vld [vmem:[#allocation28_spill] sm:$0xff] }
 0x178   : > { %1722 = vmatprep.subr.bf16.mxu0 %v5118_v58  ;;  %v850_v6 = vmul.f32 0.044715, %v4080_v20  ;;  %v853_v30 = vmul.f32 0.044715, %v4086_v7  ;;  %v1101_v51 = vmul.f32 0.7978846, %v1037_v57  ;;  %v1075_v12 = vadd.f32 %v3957_v14, %v3872_v19 }
 0x179   : > { %v4111_v16 = vmul.f32 0.5, %v3864_v43  ;;  %v1135_v0 = vmul.f32 0.7978846, %v1071_v13  ;;  %v5121_v31 = vpack.c.bf16 %v5119_v32, %v5120_v63  ;;  %v1319_v35 = vmul.f32 %v1255_v25, %v4012_v1  ;;  %v718_v43 = vpop.f32.mrb[41].mxu1  ;;  %v5126_v13 = vld [vmem:[#allocation29_spill] sm:$0xff] }
 0x17a   : > { %v1323_v9 = vmul.f32 %v1259_v22, %v4031_v17  ;;  %v4121_v8 = vadd.f32 %v712_v2, %v5100_v4  ;;  %v4124_v11 = vadd.f32 %v716_v50, %v5096_v18  ;;  %v5124_v14 = vpack.c.bf16 %v5122_v39, %v5123_v62  ;;  %v720_v1 = vpop.f32.mrb[42].mxu1 }
 0x17b   : > { %1723 = vmatpush1.bf16.msra.mxu0 %v5121_v31  ;;  %v913_v57 = vmul.f32 %v849_v3, %v4073_v56  ;;  %v1139_v53 = vmul.f32 0.7978846, %v1075_v12  ;;  %2411 = vtanh.f32 %v1135_v0  ;;  %v4131_v21 = vadd.f32 %v718_v43, %v5100_v4  ;;  %v722_v25 = vpop.f32.mrb[43].mxu1  ;;  %v5125_v3 = vld [vmem:[#allocation30_spill] sm:$0xff]  ;;  %v5128_v12 = vld [vmem:[#allocation32_spill] sm:$0xff]  ;;  %v5129_v0 = vld [vmem:[#allocation31_spill] sm:$0xff] }
 0x17c   : > { %1724 = vmatprep.subr.bf16.mxu0 %v5124_v14  ;;  %2413 = vtanh.f32 %v1097_v47  ;;  %v1495_v17 = vpack.c.bf16 %v1323_v9, %v1319_v35  ;;  %v914_v2 = vmul.f32 %v850_v6, %v4080_v20  ;;  %v917_v45 = vmul.f32 %v853_v30, %v4086_v7  ;;  %v2408_v60 = vpop.eup %2407  ;;  %v5131_v14 = vld [vmem:[#allocation34_spill] sm:$0xff] }
 0x17d   : > { %2415 = vtanh.f32 %v1139_v53  ;;  %v854_v42 = vmul.f32 0.044715, %v4121_v8  ;;  %v1080_v58 = vadd.f32 %v4006_v52, %v3918_v37  ;;  %v1084_v34 = vadd.f32 %v4015_v54, %v3934_v38 }
 0x17e   : > { %v5127_v22 = vpack.c.bf16 %v5125_v3, %v5126_v13  ;;  %2417 = vtanh.f32 %v1101_v51  ;;  %1660 = vmatmul.mubr.bf16.gmra.mrb[16].mxu0 %v1495_v17  ;;  %v1264_v47 = vadd.f32 1.0, %v2408_v60  ;;  %v4144_v6 = vmul.f32 0.5, %v3872_v19  ;;  %v2410_v52 = vpop.eup %2409  ;;  %v726_v17 = vpop.f32.mrb[44].mxu1  ;;  %v5134_v60 = vld [vmem:[#allocation36_spill] sm:$0xff] }
 0x17f   : > { %v857_v30 = vmul.f32 0.044715, %v4124_v11  ;;  %v5130_v32 = vpack.c.bf16 %v5128_v12, %v5129_v0  ;;  %v4151_v63 = vmul.f32 %v913_v57, %v4073_v56  ;;  %v858_v54 = vmul.f32 0.044715, %v4131_v21  ;;  %v5132_v57 = vld [vmem:[#allocation33_spill] sm:$0xff] }
 0x180   : > { %1725 = vmatpush1.bf16.msra.mxu0 %v5127_v22  ;;  %v1144_v31 = vmul.f32 0.7978846, %v1080_v58  ;;  %v1148_v50 = vmul.f32 0.7978846, %v1084_v34  ;;  %v4155_v51 = vmul.f32 %v914_v2, %v4080_v20  ;;  %v1268_v35 = vadd.f32 1.0, %v2410_v52 }
 0x181   : > { %1726 = vmatprep.subr.bf16.mxu0 %v5130_v32  ;;  %v4158_v19 = vmul.f32 %v917_v45, %v4086_v7  ;;  %v4161_v9 = vmul.f32 0.5, %v3918_v37  ;;  %v1328_v43 = vmul.f32 %v1264_v47, %v4064_v23  ;;  %v918_v39 = vmul.f32 %v854_v42, %v4121_v8  ;;  %v728_v23 = vpop.f32.mrb[45].mxu1  ;;  %v5135_v42 = vld [vmem:[#allocation35_spill] sm:$0xff] }
 0x182   : > { %2419 = vtanh.f32 %v1144_v31  ;;  %v4166_v62 = vadd.f32 %v720_v1, %v5096_v18  ;;  %v5133_v53 = vpack.c.bf16 %v5131_v14, %v5132_v57  ;;  %v1332_v2 = vmul.f32 %v1268_v35, %v820_v28  ;;  %v730_v13 = vpop.f32.mrb[46].mxu1  ;;  %v5138_v31 = vld [vmem:[#allocation37_spill] sm:$0xff]  ;;  %v5140_v57 = vld [vmem:[#allocation40_spill] sm:$0xff] }
 0x183   : > { %2421 = vtanh.f32 %v1148_v50  ;;  %v1079_v45 = vadd.f32 %v3998_v27, %v3913_v26  ;;  %v1083_v37 = vadd.f32 %v4009_v29, %v3924_v49  ;;  %v5136_v58 = vpack.c.bf16 %v5134_v60, %v5135_v42  ;;  %v732_v12 = vpop.f32.mrb[47].mxu1 }
 0x184   : > { %1727 = vmatpush1.bf16.msra.mxu0 %v5133_v53  ;;  %v921_v1 = vmul.f32 %v857_v30, %v4124_v11  ;;  %v922_v34 = vmul.f32 %v858_v54, %v4131_v21  ;;  %v4181_v3 = vadd.f32 %v722_v25, %v5100_v4  ;;  %v4184_v28 = vadd.f32 %v726_v17, %v5096_v18  ;;  %v5137_v54 = vld [vmem:[#allocation38_spill] sm:$0xff] }
 0x185   : > { %1728 = vmatprep.subr.bf16.mxu0 %v5136_v58  ;;  %v1500_v27 = vpack.c.bf16 %v1332_v2, %v1328_v43  ;;  %v1143_v22 = vmul.f32 0.7978846, %v1079_v45  ;;  %v1147_v47 = vmul.f32 0.7978846, %v1083_v37  ;;  %v4187_v29 = vadd.f32 %v728_v23, %v5100_v4  ;;  %v2412_v0 = vpop.eup %2411 }
 0x186   : > { %v828_v32 = vmul.f32 0.5, %v3934_v38  ;;  %v861_v30 = vmul.f32 0.044715, %v4166_v62  ;;  %v4192_v52 = vmul.f32 0.5, %v3913_v26  ;;  %v862_v25 = vmul.f32 0.044715, %v4181_v3  ;;  %v4198_v35 = vpop.eup %2413 }
 0x187   : > { %v5139_v50 = vpack.c.bf16 %v5137_v54, %v5138_v31  ;;  %1669 = vmatprep.mubr.bf16.mxu0 %v1500_v27  ;;  %v1263_v43 = vadd.f32 1.0, %v2412_v0  ;;  %v4201_v14 = vmul.f32 %v918_v39, %v4121_v8  ;;  %2423 = vtanh.f32 %v1143_v22  ;;  %v5141_v26 = vld [vmem:[#allocation39_spill] sm:$0xff]  ;;  %v2416_v17 = vpop.eup %2415  ;;  %v5143_v22 = vld [vmem:[#allocation42_spill] sm:$0xff]  ;;  %v736_v54 = vpop.f32.mrb[48].mxu1 }
 0x188   : > { %v1088_v38 = vadd.f32 %v4057_v55, %v3973_v15  ;;  %v5142_v53 = vpack.c.bf16 %v5140_v57, %v5141_v26  ;;  %v4209_v2 = vmul.f32 %v921_v1, %v4124_v11  ;;  %v4212_v45 = vmul.f32 %v922_v34, %v4131_v21  ;;  %v4215_v39 = vpop.eup %2417 }
 0x189   : > { %1729 = vmatpush1.bf16.msra.mxu0 %v5139_v50  ;;  %2425 = vtanh.f32 %v1147_v47  ;;  %v865_v37 = vmul.f32 0.044715, %v4184_v28  ;;  %v1267_v23 = vadd.f32 1.0, %v2416_v17  ;;  %v866_v60 = vmul.f32 0.044715, %v4187_v29  ;;  %v5144_v47 = vld [vmem:[#allocation41_spill] sm:$0xff] }
 0x18a   : > { %1730 = vmatprep.subr.bf16.mxu0 %v5142_v53  ;;  %v1092_v55 = vadd.f32 %v4083_v33, %v3982_v48  ;;  %v1152_v42 = vmul.f32 0.7978846, %v1088_v38  ;;  %v925_v58 = vmul.f32 %v861_v30, %v4166_v62  ;;  %v827_v1 = vmul.f32 0.5, %v3924_v49  ;;  %v738_v38 = vpop.f32.mrb[49].mxu1 }
 0x18b   : > { %v926_v27 = vmul.f32 %v862_v25, %v4181_v3  ;;  %v4224_v34 = vadd.f32 %v730_v13, %v5096_v18  ;;  %v5145_v0 = vpack.c.bf16 %v5143_v22, %v5144_v47  ;;  %v1327_v31 = vmul.f32 %v1263_v43, %v4111_v16  ;;  %v740_v26 = vpop.f32.mrb[50].mxu1 }
 0x18c   : > { %v1331_v50 = vmul.f32 %v1267_v23, %v4144_v6  ;;  %v1156_v33 = vmul.f32 0.7978846, %v1092_v55  ;;  %2427 = vtanh.f32 %v1152_v42  ;;  %v2420_v30 = vpop.eup %2419  ;;  %v929_v49 = vmul.f32 %v865_v37, %v4184_v28  ;;  %v742_v43 = vpop.f32.mrb[51].mxu1 }
 0x18d   : > { %1731 = vmatpush1.bf16.msra.mxu0 %v5145_v0  ;;  %v869_v25 = vmul.f32 0.044715, %v4224_v34  ;;  %v1087_v13 = vadd.f32 %v4037_v10, %v3969_v24  ;;  %v1091_v57 = vadd.f32 %v4076_v61, %v3977_v46  ;;  %v2422_v53 = vpop.eup %2421  ;;  %v1272_v16 = vadd.f32 1.0, %v2420_v30  ;;  %v746_v30 = vpop.f32.mrb[52].mxu1 }
 0x18e   : > { %v1499_v17 = vpack.c.bf16 %v1331_v50, %v1327_v31  ;;  %v930_v6 = vmul.f32 %v866_v60, %v4187_v29  ;;  %2429 = vtanh.f32 %v1156_v33  ;;  %v1276_v23 = vadd.f32 1.0, %v2422_v53  ;;  %v748_v53 = vpop.f32.mrb[53].mxu1 }
 0x18f   : > { %v832_v55 = vmul.f32 0.5, %v3973_v15  ;;  %v1151_v37 = vmul.f32 0.7978846, %v1087_v13  ;;  %v1155_v42 = vmul.f32 0.7978846, %v1091_v57  ;;  %v4240_v22 = vmul.f32 %v925_v58, %v4166_v62 }
 0x190   : > { %1670 = vmatmul.mubr.bf16.gmra.mrb[20].mxu0 %v1499_v17  ;;  %v4243_v10 = vmul.f32 %v926_v27, %v4181_v3  ;;  %v836_v61 = vmul.f32 0.5, %v3982_v48  ;;  %v4247_v47 = vadd.f32 %v732_v12, %v5100_v4  ;;  %v1336_v60 = vmul.f32 %v1272_v16, %v4161_v9 }
 0x191   : > { %v1340_v0 = vmul.f32 %v1276_v23, %v828_v32  ;;  %v933_v31 = vmul.f32 %v869_v25, %v4224_v34  ;;  %2431 = vtanh.f32 %v1151_v37  ;;  %v2424_v15 = vpop.eup %2423  ;;  %v4252_v50 = vmul.f32 %v929_v49, %v4184_v28 }
 0x192   : > { %v4255_v58 = vmul.f32 %v930_v6, %v4187_v29  ;;  %2433 = vtanh.f32 %v1155_v42  ;;  %v4258_v27 = vadd.f32 %v736_v54, %v5096_v18  ;;  %v1271_v33 = vadd.f32 1.0, %v2424_v15 }
 0x193   : > { %v2426_v48 = vpop.eup %2425  ;;  %v1504_v12 = vpack.c.bf16 %v1340_v0, %v1336_v60  ;;  %v4261_v9 = vadd.f32 %v738_v38, %v5100_v4  ;;  %v1034_v32 = vadd.f32 %v4100_v36, %v4028_v59  ;;  %v831_v49 = vmul.f32 0.5, %v3969_v24  ;;  %v750_v36 = vpop.f32.mrb[54].mxu1 }
 0x194   : > { %v1275_v25 = vadd.f32 1.0, %v2426_v48  ;;  %v835_v13 = vmul.f32 0.5, %v3977_v46  ;;  %v870_v57 = vmul.f32 0.044715, %v4247_v47  ;;  %v4269_v54 = vmul.f32 %v933_v31, %v4224_v34  ;;  %v4279_v42 = vpop.f32.mrb[55].mxu1 }
 0x195   : > { %1679 = vmatprep.mubr.bf16.mxu0 %v1504_v12  ;;  %v1038_v38 = vadd.f32 %v4106_v5, %v4041_v44  ;;  %v1098_v17 = vmul.f32 0.7978846, %v1034_v32  ;;  %v4274_v16 = vadd.f32 %v740_v26, %v5096_v18  ;;  %v1335_v24 = vmul.f32 %v1271_v33, %v4192_v52 }
 0x196   : > { %v2428_v6 = vpop.eup %2427  ;;  %v1339_v23 = vmul.f32 %v1275_v25, %v827_v1  ;;  %v873_v46 = vmul.f32 0.044715, %v4258_v27  ;;  %v1225_v37 = vadd.f32 1.0, %v4198_v35  ;;  %v874_v0 = vmul.f32 0.044715, %v4261_v9 }
 0x197   : > { %v1280_v60 = vadd.f32 1.0, %v2428_v6  ;;  %v1102_v31 = vmul.f32 0.7978846, %v1038_v38  ;;  %2435 = vtanh.f32 %v1098_v17  ;;  %v877_v26 = vmul.f32 0.044715, %v4274_v16  ;;  %v756_v6 = vpop.f32.mrb[56].mxu1 }
 0x198   : > { %v2430_v5 = vpop.eup %2429  ;;  %v1503_v15 = vpack.c.bf16 %v1339_v23, %v1335_v24  ;;  %v1229_v48 = vadd.f32 1.0, %v4215_v39  ;;  %v4285_v52 = vadd.f32 %v742_v43, %v5100_v4  ;;  %v934_v12 = vmul.f32 %v870_v57, %v4247_v47 }
 0x199   : > { %v1284_v1 = vadd.f32 1.0, %v2430_v5  ;;  %v4289_v35 = vmul.f32 0.5, %v4028_v59  ;;  %2437 = vtanh.f32 %v1102_v31  ;;  %v937_v33 = vmul.f32 %v873_v46, %v4258_v27 }
 0x19a   : > { %1680 = vmatmul.mubr.bf16.gmra.mrb[24].mxu0 %v1503_v15  ;;  %v4293_v32 = vmul.f32 %v1225_v37, %v4091_v40  ;;  %v4296_v25 = vmul.f32 %v1229_v48, %v4093_v41  ;;  %v4299_v39 = vadd.f32 %v746_v30, %v5096_v18  ;;  %v1344_v38 = vmul.f32 %v1280_v60, %v832_v55  ;;  %v758_v37 = vpop.f32.mrb[57].mxu1 }
 0x19b   : > { %v2432_v43 = vpop.eup %2431  ;;  %v1348_v17 = vmul.f32 %v1284_v1, %v836_v61  ;;  %v938_v57 = vmul.f32 %v874_v0, %v4261_v9  ;;  %v782_v59 = vmul.f32 0.5, %v4041_v44  ;;  %v941_v46 = vmul.f32 %v877_v26, %v4274_v16  ;;  %v760_v44 = vpop.f32.mrb[58].mxu1 }
 0x19c   : > { %v2434_v24 = vpop.eup %2433  ;;  %v1279_v23 = vadd.f32 1.0, %v2432_v43  ;;  %v1481_v40 = vpack.c.bf16 %v4296_v25, %v4293_v32  ;;  %v878_v41 = vmul.f32 0.044715, %v4285_v52  ;;  %v4308_v55 = vadd.f32 %v748_v53, %v5100_v4  ;;  %v762_v26 = vpop.f32.mrb[59].mxu1 }
 0x19d   : > { %v1508_v30 = vpack.c.bf16 %v1348_v17, %v1344_v38  ;;  %v1283_v31 = vadd.f32 1.0, %v2434_v24  ;;  %v1042_v61 = vadd.f32 %v4155_v51, %v4080_v20  ;;  %v4313_v60 = vmul.f32 %v934_v12, %v4247_v47 }
 0x19e   : > { %v4316_v0 = vmul.f32 %v937_v33, %v4258_v27  ;;  %v881_v5 = vmul.f32 0.044715, %v4299_v39  ;;  %v1046_v15 = vadd.f32 %v4201_v14, %v4121_v8  ;;  %v1343_v48 = vmul.f32 %v1279_v23, %v831_v49 }
 0x19f   : > { %1689 = vmatprep.mubr.bf16.mxu0 %v1508_v30  ;;  %v1347_v53 = vmul.f32 %v1283_v31, %v835_v13  ;;  %v1106_v1 = vmul.f32 0.7978846, %v1042_v61  ;;  %v4322_v43 = vadd.f32 %v750_v36, %v5096_v18  ;;  %v4325_v51 = vmul.f32 %v938_v57, %v4261_v9  ;;  %v766_v61 = vpop.f32.mrb[60].mxu1 }
 0x1a0   : > { %v4328_v12 = vmul.f32 %v941_v46, %v4274_v16  ;;  %v942_v33 = vmul.f32 %v878_v41, %v4285_v52  ;;  %v1110_v38 = vmul.f32 0.7978846, %v1046_v15  ;;  %v882_v14 = vmul.f32 0.044715, %v4308_v55 }
 0x1a1   : > { %v2436_v17 = vpop.eup %2435  ;;  %v1507_v24 = vpack.c.bf16 %v1347_v53, %v1343_v48  ;;  %2439 = vtanh.f32 %v1106_v1  ;;  %v885_v49 = vmul.f32 0.044715, %v4322_v43  ;;  %v1041_v36 = vadd.f32 %v4151_v63, %v4073_v56 }
 0x1a2   : > { %v1226_v13 = vadd.f32 1.0, %v2436_v17  ;;  %2441 = vtanh.f32 %v1110_v38  ;;  %v1045_v57 = vadd.f32 %v4158_v19, %v4086_v7  ;;  %v945_v46 = vmul.f32 %v881_v5, %v4299_v39  ;;  %v768_v19 = vpop.f32.mrb[61].mxu1 }
 0x1a3   : > { %v2438_v23 = vpop.eup %2437  ;;  %1690 = vmatmul.mubr.bf16.gmra.mrb[28].mxu0 %v1507_v24  ;;  %v786_v41 = vmul.f32 0.5, %v4080_v20  ;;  %v4341_v30 = vadd.f32 %v4279_v42, %v5100_v4  ;;  %v4344_v31 = vadd.f32 %v756_v6, %v5096_v18  ;;  %v1105_v48 = vmul.f32 0.7978846, %v1041_v36  ;;  %v770_v24 = vpop.f32.mrb[62].mxu1 }
 0x1a4   : > { %v1230_v15 = vadd.f32 1.0, %v2438_v23  ;;  %v1109_v63 = vmul.f32 0.7978846, %v1045_v57  ;;  %v4347_v53 = vadd.f32 %v758_v37, %v5100_v4  ;;  %v4350_v1 = vmul.f32 %v942_v33, %v4285_v52 }
 0x1a5   : > { %v946_v20 = vmul.f32 %v882_v14, %v4308_v55  ;;  %v790_v5 = vmul.f32 0.5, %v4121_v8  ;;  %v949_v42 = vmul.f32 %v885_v49, %v4322_v43  ;;  %v1290_v6 = vmul.f32 %v1226_v13, %v4289_v35  ;;  %v4362_v14 = vpop.f32.mrb[63].mxu1 }
 0x1a6   : > { %v1294_v38 = vmul.f32 %v1230_v15, %v782_v59  ;;  %2443 = vtanh.f32 %v1105_v48  ;;  %v886_v17 = vmul.f32 0.044715, %v4341_v30  ;;  %v4358_v37 = vmul.f32 %v945_v46, %v4299_v39 }
 0x1a7   : > { %v785_v36 = vmul.f32 0.5, %v4073_v56  ;;  %2445 = vtanh.f32 %v1109_v63  ;;  %v889_v33 = vmul.f32 0.044715, %v4344_v31  ;;  %v890_v49 = vmul.f32 0.044715, %v4347_v53 }
 0x1a8   : > { %v1482_v8 = vpack.c.bf16 %v1294_v38, %v1290_v6  ;;  %v1050_v35 = vadd.f32 %v4212_v45, %v4131_v21  ;;  %v1054_v59 = vadd.f32 %v4243_v10, %v4181_v3  ;;  %v4370_v13 = vmul.f32 %v946_v20, %v4308_v55 }
 0x1a9   : > { %v4373_v57 = vmul.f32 %v949_v42, %v4322_v43  ;;  %v789_v56 = vmul.f32 0.5, %v4086_v7  ;;  %v4377_v23 = vadd.f32 %v760_v44, %v5096_v18  ;;  %v950_v46 = vmul.f32 %v886_v17, %v4341_v30 }
 0x1aa   : > { %1732 = vmatprep.mubr.bf16.mxu0 %v1482_v8  ;;  %v1114_v15 = vmul.f32 0.7978846, %v1050_v35  ;;  %v1118_v48 = vmul.f32 0.7978846, %v1054_v59  ;;  %v1049_v45 = vadd.f32 %v4209_v2, %v4124_v11  ;;  %v953_v63 = vmul.f32 %v889_v33, %v4344_v31 }
 0x1ab   : > { %v2440_v10 = vpop.eup %2439  ;;  %1733 = vmatmul.mubr.bf16.vlgmr.msra.gmra.mrb[0].mxu0 %v1481_v40  ;;  %v1053_v7 = vadd.f32 %v4240_v22, %v4166_v62  ;;  %v4389_v44 = vadd.f32 %v762_v26, %v5100_v4  ;;  %v4392_v20 = vadd.f32 %v766_v61, %v5096_v18  ;;  %v954_v2 = vmul.f32 %v890_v49, %v4347_v53 }
 0x1ac   : > { %v2442_v42 = vpop.eup %2441  ;;  %v1234_v6 = vadd.f32 1.0, %v2440_v10  ;;  %2447 = vtanh.f32 %v1114_v15  ;;  %v1113_v38 = vmul.f32 0.7978846, %v1049_v45  ;;  %v893_v32 = vmul.f32 0.044715, %v4377_v23 }
 0x1ad   : > { %v1238_v17 = vadd.f32 1.0, %v2442_v42  ;;  %2449 = vtanh.f32 %v1118_v48  ;;  %v1117_v25 = vmul.f32 0.7978846, %v1053_v7  ;;  %v794_v40 = vmul.f32 0.5, %v4131_v21 }
 0x1ae   : > { %v798_v22 = vmul.f32 0.5, %v4181_v3  ;;  %2451 = vtanh.f32 %v1113_v38  ;;  %v894_v26 = vmul.f32 0.044715, %v4389_v44  ;;  %v1298_v61 = vmul.f32 %v1234_v6, %v786_v41 }
 0x1af   : > { %v1302_v33 = vmul.f32 %v1238_v17, %v790_v5  ;;  %2453 = vtanh.f32 %v1117_v25  ;;  %v897_v8 = vmul.f32 0.044715, %v4392_v20  ;;  %v4401_v35 = vmul.f32 %v950_v46, %v4341_v30 }
 0x1b0   : > { %v2444_v49 = vpop.eup %2443  ;;  %v4404_v59 = vmul.f32 %v953_v63, %v4344_v31  ;;  %v4407_v15 = vmul.f32 %v954_v2, %v4347_v53  ;;  %v1058_v21 = vadd.f32 %v4255_v58, %v4187_v29  ;;  %v957_v5 = vmul.f32 %v893_v32, %v4377_v23 }
 0x1b1   : > { %v2446_v3 = vpop.eup %2445  ;;  %v1486_v48 = vpack.c.bf16 %v1302_v33, %v1298_v61  ;;  %v1233_v41 = vadd.f32 1.0, %v2444_v49  ;;  %v4413_v45 = vadd.f32 %v768_v19, %v5100_v4  ;;  %v793_v46 = vmul.f32 0.5, %v4124_v11 }
 0x1b2   : > { %v1237_v10 = vadd.f32 1.0, %v2446_v3  ;;  %v1062_v63 = vadd.f32 %v4313_v60, %v4247_v47  ;;  %v1122_v7 = vmul.f32 0.7978846, %v1058_v21  ;;  %v797_v42 = vmul.f32 0.5, %v4166_v62 }
 0x1b3   : > { %1742 = vmatprep.mubr.bf16.mxu0 %v1486_v48  ;;  %v958_v58 = vmul.f32 %v894_v26, %v4389_v44  ;;  %v961_v6 = vmul.f32 %v897_v8, %v4392_v20  ;;  %v4422_v2 = vadd.f32 %v770_v24, %v5096_v18  ;;  %v1297_v38 = vmul.f32 %v1233_v41, %v785_v36 }
 0x1b4   : > { %v1301_v19 = vmul.f32 %v1237_v10, %v789_v56  ;;  %v1126_v17 = vmul.f32 0.7978846, %v1062_v63  ;;  %2455 = vtanh.f32 %v1122_v7  ;;  %v4425_v11 = vmul.f32 %v957_v5, %v4377_v23 }
 0x1b5   : > { %v898_v60 = vmul.f32 0.044715, %v4413_v45  ;;  %v1057_v32 = vadd.f32 %v4252_v50, %v4184_v28  ;;  %v1061_v62 = vadd.f32 %v4269_v54, %v4224_v34  ;;  %v802_v18 = vmul.f32 0.5, %v4187_v29 }
 0x1b6   : > { %v2448_v25 = vpop.eup %2447  ;;  %v1485_v26 = vpack.c.bf16 %v1301_v19, %v1297_v38  ;;  %v806_v24 = vmul.f32 0.5, %v4247_v47  ;;  %2457 = vtanh.f32 %v1126_v17  ;;  %v4435_v61 = vmul.f32 %v958_v58, %v4389_v44 }
 0x1b7   : > { %v2450_v36 = vpop.eup %2449  ;;  %v1242_v56 = vadd.f32 1.0, %v2448_v25  ;;  %v1121_v33 = vmul.f32 0.7978846, %v1057_v32  ;;  %v1125_v8 = vmul.f32 0.7978846, %v1061_v62  ;;  %v4438_v21 = vmul.f32 %v961_v6, %v4392_v20 }
 0x1b8   : > { %v2452_v49 = vpop.eup %2451  ;;  %1743 = vmatmul.mubr.bf16.gmra.mrb[4].mxu0 %v1485_v26  ;;  %v1246_v50 = vadd.f32 1.0, %v2450_v36  ;;  %v901_v54 = vmul.f32 0.044715, %v4422_v2  ;;  %v1066_v29 = vadd.f32 %v4325_v51, %v4261_v9  ;;  %v962_v48 = vmul.f32 %v898_v60, %v4413_v45 }
 0x1b9   : > { %v2454_v47 = vpop.eup %2453  ;;  %v1241_v3 = vadd.f32 1.0, %v2452_v49  ;;  %2459 = vtanh.f32 %v1121_v33  ;;  %v4446_v41 = vadd.f32 %v4362_v14, %v5100_v4  ;;  %v1306_v5 = vmul.f32 %v1242_v56, %v794_v40 }
 0x1ba   : > { %v1310_v10 = vmul.f32 %v1246_v50, %v798_v22  ;;  %v1245_v63 = vadd.f32 1.0, %v2454_v47  ;;  %2461 = vtanh.f32 %v1125_v8  ;;  %v801_v7 = vmul.f32 0.5, %v4184_v28 }
 0x1bb   : > { %v805_v58 = vmul.f32 0.5, %v4224_v34  ;;  %v1070_v51 = vadd.f32 %v4350_v1, %v4285_v52  ;;  %v1130_v6 = vmul.f32 0.7978846, %v1066_v29  ;;  %v1305_v19 = vmul.f32 %v1241_v3, %v793_v46 }
 0x1bc   : > { %v1490_v38 = vpack.c.bf16 %v1310_v10, %v1306_v5  ;;  %v1309_v17 = vmul.f32 %v1245_v63, %v797_v42  ;;  %v965_v60 = vmul.f32 %v901_v54, %v4422_v2  ;;  %v1065_v4 = vadd.f32 %v4316_v0, %v4258_v27 }
 0x1bd   : > { %v1134_v32 = vmul.f32 0.7978846, %v1070_v51  ;;  %2463 = vtanh.f32 %v1130_v6  ;;  %v1069_v14 = vadd.f32 %v4328_v12, %v4274_v16  ;;  %v1026_v40 = vmul.f32 %v962_v48, %v4413_v45 }
 0x1be   : > { %v2456_v28 = vpop.eup %2455  ;;  %1752 = vmatprep.mubr.bf16.mxu0 %v1490_v38  ;;  %v1489_v34 = vpack.c.bf16 %v1309_v17, %v1305_v19  ;;  %v902_v1 = vmul.f32 0.044715, %v4446_v41  ;;  %v1074_v22 = vadd.f32 %v4370_v13, %v4308_v55  ;;  %v1129_v42 = vmul.f32 0.7978846, %v1065_v4 }
 0x1bf   : > { %v1250_v46 = vadd.f32 1.0, %v2456_v28  ;;  %2465 = vtanh.f32 %v1134_v32  ;;  %v1133_v62 = vmul.f32 0.7978846, %v1069_v14  ;;  %v810_v0 = vmul.f32 0.5, %v4261_v9 }
 0x1c0   : > { %v2458_v25 = vpop.eup %2457  ;;  %1753 = vmatmul.mubr.bf16.gmra.mrb[8].mxu0 %v1489_v34  ;;  %v814_v12 = vmul.f32 0.5, %v4285_v52  ;;  %v1078_v26 = vadd.f32 %v4401_v35, %v4341_v30  ;;  %v1138_v36 = vmul.f32 0.7978846, %v1074_v22  ;;  %v1029_v33 = vmul.f32 %v965_v60, %v4422_v2 }
 0x1c1   : > { %v1254_v56 = vadd.f32 1.0, %v2458_v25  ;;  %2467 = vtanh.f32 %v1129_v42  ;;  %v1073_v13 = vadd.f32 %v4358_v37, %v4299_v39  ;;  %v966_v8 = vmul.f32 %v902_v1, %v4446_v41 }
 0x1c2   : > { %2469 = vtanh.f32 %v1133_v62  ;;  %v1142_v49 = vmul.f32 0.7978846, %v1078_v26  ;;  %v1077_v9 = vadd.f32 %v4373_v57, %v4322_v43  ;;  %v1314_v52 = vmul.f32 %v1250_v46, %v802_v18 }
 0x1c3   : > { %v2460_v50 = vpop.eup %2459  ;;  %v1318_v54 = vmul.f32 %v1254_v56, %v806_v24  ;;  %2471 = vtanh.f32 %v1138_v36  ;;  %v1137_v35 = vmul.f32 0.7978846, %v1073_v13  ;;  %v1082_v48 = vadd.f32 %v4407_v15, %v4347_v53 }
 0x1c4   : > { %v2462_v29 = vpop.eup %2461  ;;  %v1249_v47 = vadd.f32 1.0, %v2460_v50  ;;  %2473 = vtanh.f32 %v1142_v49  ;;  %v1141_v3 = vmul.f32 0.7978846, %v1077_v9  ;;  %v1086_v10 = vadd.f32 %v4435_v61, %v4389_v44 }
 0x1c5   : > { %v1494_v37 = vpack.c.bf16 %v1318_v54, %v1314_v52  ;;  %v1253_v5 = vadd.f32 1.0, %v2462_v29  ;;  %2475 = vtanh.f32 %v1137_v35  ;;  %v1030_v57 = vmul.f32 %v966_v8, %v4446_v41 }
 0x1c6   : > { %v809_v18 = vmul.f32 0.5, %v4258_v27  ;;  %2477 = vtanh.f32 %v1141_v3  ;;  %v1146_v24 = vmul.f32 0.7978846, %v1082_v48  ;;  %v1313_v51 = vmul.f32 %v1249_v47, %v801_v7 }
 0x1c7   : > { %v2464_v63 = vpop.eup %2463  ;;  %1762 = vmatprep.mubr.bf16.mxu0 %v1494_v37  ;;  %v1317_v6 = vmul.f32 %v1253_v5, %v805_v58  ;;  %v1150_v38 = vmul.f32 0.7978846, %v1086_v10  ;;  %v1081_v15 = vadd.f32 %v4404_v59, %v4344_v31  ;;  %v813_v17 = vmul.f32 0.5, %v4274_v16 }
 0x1c8   : > { %v1258_v19 = vadd.f32 1.0, %v2464_v63  ;;  %2479 = vtanh.f32 %v1146_v24  ;;  %v1085_v61 = vadd.f32 %v4425_v11, %v4377_v23  ;;  %v818_v27 = vmul.f32 0.5, %v4308_v55 }
 0x1c9   : > { %v2466_v60 = vpop.eup %2465  ;;  %v1493_v32 = vpack.c.bf16 %v1317_v6, %v1313_v51  ;;  %2481 = vtanh.f32 %v1150_v38  ;;  %v1145_v4 = vmul.f32 0.7978846, %v1081_v15  ;;  %v822_v7 = vmul.f32 0.5, %v4341_v30 }
 0x1ca   : > { %v1262_v14 = vadd.f32 1.0, %v2466_v60  ;;  %v1149_v58 = vmul.f32 0.7978846, %v1085_v61  ;;  %v1090_v28 = vadd.f32 %v1026_v40, %v4413_v45  ;;  %v1322_v34 = vmul.f32 %v1258_v19, %v810_v0 }
 0x1cb   : > { %v2468_v59 = vpop.eup %2467  ;;  %1763 = vmatmul.mubr.bf16.gmra.mrb[12].mxu0 %v1493_v32  ;;  %v817_v16 = vmul.f32 0.5, %v4299_v39  ;;  %2483 = vtanh.f32 %v1145_v4  ;;  %v1094_v11 = vadd.f32 %v1030_v57, %v4446_v41  ;;  %v1089_v30 = vadd.f32 %v4438_v21, %v4392_v20 }
 0x1cc   : > { %v2470_v1 = vpop.eup %2469  ;;  %v1326_v22 = vmul.f32 %v1262_v14, %v814_v12  ;;  %v1257_v46 = vadd.f32 1.0, %v2468_v59  ;;  %2485 = vtanh.f32 %v1149_v58  ;;  %v1154_v55 = vmul.f32 0.7978846, %v1090_v28 }
 0x1cd   : > { %v2472_v42 = vpop.eup %2471  ;;  %v1261_v62 = vadd.f32 1.0, %v2470_v1  ;;  %v1158_v25 = vmul.f32 0.7978846, %v1094_v11  ;;  %v1093_v40 = vadd.f32 %v1029_v33, %v4422_v2  ;;  %v1153_v12 = vmul.f32 0.7978846, %v1089_v30 }
 0x1ce   : > { %v2474_v26 = vpop.eup %2473  ;;  %v1498_v0 = vpack.c.bf16 %v1326_v22, %v1322_v34  ;;  %v1321_v36 = vmul.f32 %v1257_v46, %v809_v18  ;;  %v1266_v39 = vadd.f32 1.0, %v2472_v42  ;;  %2487 = vtanh.f32 %v1154_v55  ;;  %v5146_v42 = vld [vmem:[#allocation2_spill] sm:$0xff] }
 0x1cf   : > { %v2476_v56 = vpop.eup %2475  ;;  %v1325_v13 = vmul.f32 %v1261_v62, %v813_v17  ;;  %v1270_v8 = vadd.f32 1.0, %v2474_v26  ;;  %2489 = vtanh.f32 %v1158_v25  ;;  %v821_v50 = vmul.f32 0.5, %v4322_v43 }
 0x1d0   : > { %v2478_v49 = vpop.eup %2477  ;;  %1772 = vmatprep.mubr.bf16.mxu0 %v1498_v0  ;;  %v1330_v9 = vmul.f32 %v1266_v39, %v818_v27  ;;  %v1265_v52 = vadd.f32 1.0, %v2476_v56  ;;  %v1157_v54 = vmul.f32 0.7978846, %v1093_v40  ;;  %2491 = vtanh.f32 %v1153_v12  ;;  %v2527_v56 = vld [vmem:[%s2701_s16] sm:$0xff]  ;;  %v2528_v12 = vld [vmem:[%s2701_s16 + $0x8] sm:$0xff] }
 0x1d1   : > { %v1497_v21 = vpack.c.bf16 %v1325_v13, %v1321_v36  ;;  %v1334_v35 = vmul.f32 %v1270_v8, %v822_v7  ;;  %v1269_v33 = vadd.f32 1.0, %v2478_v49  ;;  %v826_v10 = vmul.f32 0.5, %v4347_v53 }
 0x1d2   : > { %v2480_v29 = vpop.eup %2479  ;;  %2493 = vtanh.f32 %v1157_v54  ;;  %v1329_v48 = vmul.f32 %v1265_v52, %v817_v16  ;;  %v830_v57 = vmul.f32 0.5, %v4389_v44  ;;  %v825_v15 = vmul.f32 0.5, %v4344_v31  ;;  %v2530_v52 = vld [vmem:[%s2701_s16 + $0x18] sm:$0xff] }
 0x1d3   : > { %v2482_v47 = vpop.eup %2481  ;;  %1773 = vmatmul.mubr.bf16.gmra.mrb[16].mxu0 %v1497_v21  ;;  %v1502_v3 = vpack.c.bf16 %v1334_v35, %v1330_v9  ;;  %v1333_v37 = vmul.f32 %v1269_v33, %v821_v50  ;;  %v1274_v5 = vadd.f32 1.0, %v2480_v29  ;;  %v829_v19 = vmul.f32 0.5, %v4377_v23  ;;  %v2529_v9 = vld [vmem:[%s2701_s16 + $0x10] sm:$0xff] }
 0x1d4   : > { %v1278_v18 = vadd.f32 1.0, %v2482_v47  ;;  %v834_v44 = vmul.f32 0.5, %v4413_v45  ;;  %v838_v14 = vmul.f32 0.5, %v4446_v41  ;;  %v833_v16 = vmul.f32 0.5, %v4392_v20  ;;  %v1575_v41 = vld [vmem:[%s4988_s4] sm:$0x3] }
 0x1d5   : > { %v2484_v43 = vpop.eup %2483  ;;  %1782 = vmatprep.mubr.bf16.mxu0 %v1502_v3  ;;  %v1501_v24 = vpack.c.bf16 %v1333_v37, %v1329_v48  ;;  %v1338_v51 = vmul.f32 %v1274_v5, %v826_v10  ;;  %v837_v11 = vmul.f32 0.5, %v4422_v2  ;;  %v4503_v62 = vrot.slane %v1575_v41, %v5146_v42  ;;  %v5147_v20 = vld [vmem:[#allocation3_spill] sm:$0xff]  ;;  %v2531_v10 = vld [vmem:[%s2701_s16 + $0x20] sm:$0xff] }
 0x1d6   : > { %v2486_v63 = vpop.eup %2485  ;;  %v1342_v6 = vmul.f32 %v1278_v18, %v830_v57  ;;  %v1273_v38 = vadd.f32 1.0, %v2484_v43  ;;  %v4506_v2 = vrot.slane %v1575_v41, %v5147_v20  ;;  %v2532_v43 = vld [vmem:[%s2701_s16 + $0x28] sm:$0xff]  ;;  %v2539_v41 = vld [vmem:[%s2701_s16 + $0x60] sm:$0xff] }
 0x1d7   : > { %v1277_v17 = vadd.f32 1.0, %v2486_v63  ;;  %v2533_v63 = vld [vmem:[%s2701_s16 + $0x30] sm:$0xff] }
 0x1d8   : > { %v2488_v61 = vpop.eup %2487  ;;  %v1506_v60 = vpack.c.bf16 %v1342_v6, %v1338_v51  ;;  %v1337_v27 = vmul.f32 %v1273_v38, %v825_v15  ;;  %v2534_v6 = vld [vmem:[%s2701_s16 + $0x38] sm:$0xff] }
 0x1d9   : > { %v2490_v32 = vpop.eup %2489  ;;  %v1341_v53 = vmul.f32 %v1277_v17, %v829_v19  ;;  %v1282_v4 = vadd.f32 1.0, %v2488_v61 }
 0x1da   : > { %v1286_v7 = vadd.f32 1.0, %v2490_v32  ;;  %v2492_v58 = vpop.eup %2491 }
 0x1db   : > { %1783 = vmatmul.mubr.bf16.gmra.mrb[20].mxu0 %v1501_v24  ;;  %v1505_v28 = vpack.c.bf16 %v1341_v53, %v1337_v27  ;;  %v1346_v31 = vmul.f32 %v1282_v4, %v834_v44  ;;  %v1281_v23 = vadd.f32 1.0, %v2492_v58  ;;  %v2535_v53 = vld [vmem:[%s2701_s16 + $0x40] sm:$0xff] }
 0x1dc   : > { %v2494_v59 = vpop.eup %2493  ;;  %1792 = vmatprep.mubr.bf16.mxu0 %v1506_v60  ;;  %v1350_v34 = vmul.f32 %v1286_v7, %v838_v14  ;;  %v2536_v7 = vld [vmem:[%s2701_s16 + $0x48] sm:$0xff] }
 0x1dd   : > { %v1285_v1 = vadd.f32 1.0, %v2494_v59  ;;  %v1345_v46 = vmul.f32 %v1281_v23, %v833_v16  ;;  %v2537_v59 = vld [vmem:[%s2701_s16 + $0x50] sm:$0xff] }
 0x1de   : > { %v1510_v22 = vpack.c.bf16 %v1350_v34, %v1346_v31  ;;  %v2538_v34 = vld [vmem:[%s2701_s16 + $0x58] sm:$0xff] }
 0x1df   : > { %v1349_v45 = vmul.f32 %v1285_v1, %v837_v11 }
 0x1e1   : > { %v1509_v55 = vpack.c.bf16 %v1349_v45, %v1345_v46 }
 0x1e3   : > { %1793 = vmatmul.mubr.bf16.gmra.mrb[24].mxu0 %v1505_v28 }
 0x1e4   : > { %1802 = vmatprep.mubr.bf16.mxu0 %v1510_v22 }
 0x1eb   : > { %1803 = vmatmul.mubr.bf16.gmra.mrb[28].mxu0 %v1509_v55 }
 0x27e   : > { %v1734_v25 = vpop.f32.mrb[0].mxu0 }
 0x27f   : > { %v2295_v30 = vadd.f32 %v1734_v25, %v4503_v62  ;;  %v1736_v40 = vpop.f32.mrb[1].mxu0 }
 0x280   : > { %v2296_v26 = vadd.f32 %v1736_v40, %v4506_v2  ;;  %v1738_v0 = vpop.f32.mrb[2].mxu0 }
 0x281   : > { %v2297_v36 = vadd.f32 %v1738_v0, %v4503_v62  ;;  %v1740_v39 = vpop.f32.mrb[3].mxu0  ;;  %v4512_v13 = vadd.f32 %v2527_v56, %v2295_v30 }
 0x282   : > { %v2298_v8 = vadd.f32 %v1740_v39, %v4506_v2  ;;  %v4516_v49 = vadd.f32 %v2528_v12, %v2296_v26  ;;  %v2540_v26 = vld [vmem:[%s2701_s16 + $0x68] sm:$0xff]  ;;  %v2541_v39 = vld [vmem:[%s2701_s16 + $0x70] sm:$0xff] }
 0x283   : > { %v4519_v50 = vadd.f32 %v2529_v9, %v2297_v36 }
 0x284   : > { %v4522_v54 = vadd.f32 %v2530_v52, %v2298_v8  ;;  %v1847_v21 = vadd.f32 %v4516_v49, %v4512_v13  ;;  %v2542_v8 = vld [vmem:[%s2701_s16 + $0x78] sm:$0xff] }
 0x286   : > { %1848 = vadd.xlane.f32.xlu0 %v1847_v21  ;;  %v1850_v35 = vadd.f32 %v4522_v54, %v4519_v50 }
 0x28a   : > { %1851 = vadd.xlane.f32.xlu0 %v1850_v35 }
 0x28b   : > { %v1744_v33 = vpop.f32.mrb[4].mxu0 }
 0x28c   : > { %v2299_v29 = vadd.f32 %v1744_v33, %v4503_v62  ;;  %v1746_v47 = vpop.f32.mrb[5].mxu0 }
 0x28d   : > { %v2300_v3 = vadd.f32 %v1746_v47, %v4506_v2  ;;  %v1748_v48 = vpop.f32.mrb[6].mxu0 }
 0x28e   : > { %v2301_v37 = vadd.f32 %v1748_v48, %v4503_v62  ;;  %v1750_v5 = vpop.f32.mrb[7].mxu0  ;;  %v4532_v57 = vadd.f32 %v2531_v10, %v2299_v29  ;;  %v2544_v10 = vld [vmem:[%s2701_s16 + $0x88] sm:$0xff] }
 0x28f   : > { %v2302_v18 = vadd.f32 %v1750_v5, %v4506_v2  ;;  %v4536_v24 = vadd.f32 %v2532_v43, %v2300_v3  ;;  %v2543_v3 = vld [vmem:[%s2701_s16 + $0x80] sm:$0xff] }
 0x290   : > { %v4539_v51 = vadd.f32 %v2533_v63, %v2301_v37  ;;  %v2545_v63 = vld [vmem:[%s2701_s16 + $0x90] sm:$0xff] }
 0x291   : > { %v4542_v38 = vadd.f32 %v2534_v6, %v2302_v18  ;;  %v1853_v15 = vadd.f32 %v4536_v24, %v4532_v57 }
 0x293   : > { %v1754_v19 = vpop.f32.mrb[8].mxu0  ;;  %1854 = vadd.xlane.f32.xlu1 %v1853_v15  ;;  %v1856_v27 = vadd.f32 %v4542_v38, %v4539_v51  ;;  %v2546_v15 = vld [vmem:[%s2701_s16 + $0x98] sm:$0xff] }
 0x294   : > { %v2303_v17 = vadd.f32 %v1754_v19, %v4503_v62  ;;  %v1756_v61 = vpop.f32.mrb[9].mxu0 }
 0x295   : > { %v2304_v60 = vadd.f32 %v1756_v61, %v4506_v2  ;;  %v1758_v32 = vpop.f32.mrb[10].mxu0 }
 0x296   : > { %v4551_v4 = vadd.f32 %v2535_v53, %v2303_v17  ;;  %v2305_v44 = vadd.f32 %v1758_v32, %v4503_v62  ;;  %v1760_v14 = vpop.f32.mrb[11].mxu0 }
 0x297   : > { %v4555_v58 = vadd.f32 %v2536_v7, %v2304_v60  ;;  %v2306_v28 = vadd.f32 %v1760_v14, %v4506_v2  ;;  %1857 = vadd.xlane.f32.xlu1 %v1856_v27  ;;  %v2547_v14 = vld [vmem:[%s2701_s16 + $0xa0] sm:$0xff] }
 0x298   : > { %v4559_v31 = vadd.f32 %v2537_v59, %v2305_v44 }
 0x299   : > { %v4562_v23 = vadd.f32 %v2538_v34, %v2306_v28  ;;  %v1859_v16 = vadd.f32 %v4555_v58, %v4551_v4  ;;  %v2548_v34 = vld [vmem:[%s2701_s16 + $0xa8] sm:$0xff] }
 0x29b   : > { %1860 = vadd.xlane.f32.xlu0 %v1859_v16  ;;  %v1862_v11 = vadd.f32 %v4562_v23, %v4559_v31 }
 0x29d   : > { %1863 = vadd.xlane.f32.xlu1 %v1862_v11 }
 0x29e   : > { %v1764_v1 = vpop.f32.mrb[12].mxu0 }
 0x29f   : > { %v2307_v22 = vadd.f32 %v1764_v1, %v4503_v62  ;;  %v1766_v46 = vpop.f32.mrb[13].mxu0  ;;  %v2549_v1 = vld [vmem:[%s2701_s16 + $0xb0] sm:$0xff] }
 0x2a0   : > { %v2308_v45 = vadd.f32 %v1766_v46, %v4506_v2  ;;  %v1768_v55 = vpop.f32.mrb[14].mxu0  ;;  %v2550_v46 = vld [vmem:[%s2701_s16 + $0xb8] sm:$0xff] }
 0x2a1   : > { %v4571_v25 = vadd.f32 %v2539_v41, %v2307_v22  ;;  %v2309_v30 = vadd.f32 %v1768_v55, %v4503_v62  ;;  %v1770_v40 = vpop.f32.mrb[15].mxu0 }
 0x2a2   : > { %v4575_v0 = vadd.f32 %v2540_v26, %v2308_v45  ;;  %v2310_v36 = vadd.f32 %v1770_v40, %v4506_v2 }
 0x2a3   : > { %v4579_v56 = vadd.f32 %v2541_v39, %v2309_v30 }
 0x2a4   : > { %v4582_v12 = vadd.f32 %v2542_v8, %v2310_v36  ;;  %v1865_v9 = vadd.f32 %v4575_v0, %v4571_v25  ;;  %v2551_v8 = vld [vmem:[%s2701_s16 + $0xc0] sm:$0xff] }
 0x2a6   : > { %v1774_v52 = vpop.f32.mrb[16].mxu0  ;;  %1866 = vadd.xlane.f32.xlu0 %v1865_v9  ;;  %v1868_v21 = vadd.f32 %v4582_v12, %v4579_v56 }
 0x2a7   : > { %v2311_v35 = vadd.f32 %v1774_v52, %v4503_v62  ;;  %v1776_v33 = vpop.f32.mrb[17].mxu0 }
 0x2a8   : > { %v2312_v29 = vadd.f32 %v1776_v33, %v4506_v2  ;;  %v1778_v47 = vpop.f32.mrb[18].mxu0  ;;  %1869 = vadd.xlane.f32.xlu1 %v1868_v21 }
 0x2a9   : > { %v4591_v48 = vadd.f32 %v2543_v3, %v2311_v35  ;;  %v2313_v37 = vadd.f32 %v1778_v47, %v4503_v62  ;;  %v1780_v5 = vpop.f32.mrb[19].mxu0  ;;  %v2552_v35 = vld [vmem:[%s2701_s16 + $0xc8] sm:$0xff]  ;;  %v2553_v47 = vld [vmem:[%s2701_s16 + $0xd0] sm:$0xff] }
 0x2aa   : > { %v4595_v18 = vadd.f32 %v2544_v10, %v2312_v29  ;;  %v2314_v43 = vadd.f32 %v1780_v5, %v4506_v2 }
 0x2ab   : > { %v4599_v6 = vadd.f32 %v2545_v63, %v2313_v37  ;;  %v2554_v37 = vld [vmem:[%s2701_s16 + $0xd8] sm:$0xff] }
 0x2ac   : > { %v4602_v19 = vadd.f32 %v2546_v15, %v2314_v43  ;;  %v1871_v17 = vadd.f32 %v4595_v18, %v4591_v48 }
 0x2ae   : > { %v1784_v61 = vpop.f32.mrb[20].mxu0  ;;  %1872 = vadd.xlane.f32.xlu0 %v1871_v17  ;;  %v1874_v60 = vadd.f32 %v4602_v19, %v4599_v6 }
 0x2af   : > { %v2315_v32 = vadd.f32 %v1784_v61, %v4503_v62  ;;  %v1786_v27 = vpop.f32.mrb[21].mxu0 }
 0x2b0   : > { %v2316_v53 = vadd.f32 %v1786_v27, %v4506_v2  ;;  %v1788_v44 = vpop.f32.mrb[22].mxu0  ;;  %1875 = vadd.xlane.f32.xlu1 %v1874_v60 }
 0x2b1   : > { %v4611_v7 = vadd.f32 %v2547_v14, %v2315_v32  ;;  %v2317_v28 = vadd.f32 %v1788_v44, %v4503_v62  ;;  %v1790_v59 = vpop.f32.mrb[23].mxu0  ;;  %v2555_v32 = vld [vmem:[%s2701_s16 + $0xe0] sm:$0xff]  ;;  %v2556_v14 = vld [vmem:[%s2701_s16 + $0xe8] sm:$0xff] }
 0x2b2   : > { %v4615_v16 = vadd.f32 %v2548_v34, %v2316_v53  ;;  %v2318_v11 = vadd.f32 %v1790_v59, %v4506_v2  ;;  %v2557_v34 = vld [vmem:[%s2701_s16 + $0xf0] sm:$0xff] }
 0x2b3   : > { %v4619_v22 = vadd.f32 %v2549_v1, %v2317_v28  ;;  %v2558_v1 = vld [vmem:[%s2701_s16 + $0xf8] sm:$0xff] }
 0x2b4   : > { %v4622_v45 = vadd.f32 %v2550_v46, %v2318_v11  ;;  %v1877_v55 = vadd.f32 %v4615_v16, %v4611_v7 }
 0x2b6   : > { %v1794_v41 = vpop.f32.mrb[24].mxu0  ;;  %1878 = vadd.xlane.f32.xlu0 %v1877_v55  ;;  %v1880_v30 = vadd.f32 %v4622_v45, %v4619_v22 }
 0x2b7   : > { %v2319_v40 = vadd.f32 %v1794_v41, %v4503_v62  ;;  %v1796_v26 = vpop.f32.mrb[25].mxu0 }
 0x2b8   : > { %v2320_v36 = vadd.f32 %v1796_v26, %v4506_v2  ;;  %v1798_v39 = vpop.f32.mrb[26].mxu0  ;;  %1881 = vadd.xlane.f32.xlu1 %v1880_v30 }
 0x2b9   : > { %v4631_v9 = vadd.f32 %v2551_v8, %v2319_v40  ;;  %v2321_v52 = vadd.f32 %v1798_v39, %v4503_v62  ;;  %v1800_v21 = vpop.f32.mrb[27].mxu0 }
 0x2ba   : > { %v4635_v33 = vadd.f32 %v2552_v35, %v2320_v36  ;;  %v2322_v29 = vadd.f32 %v1800_v21, %v4506_v2 }
 0x2bb   : > { %v4639_v3 = vadd.f32 %v2553_v47, %v2321_v52 }
 0x2bc   : > { %v4642_v5 = vadd.f32 %v2554_v37, %v2322_v29  ;;  %v1883_v10 = vadd.f32 %v4635_v33, %v4631_v9 }
 0x2be   : > { %v1804_v43 = vpop.f32.mrb[28].mxu0  ;;  %1884 = vadd.xlane.f32.xlu0 %v1883_v10  ;;  %v1886_v63 = vadd.f32 %v4642_v5, %v4639_v3 }
 0x2bf   : > { %v2323_v15 = vadd.f32 %v1804_v43, %v4503_v62  ;;  %v1806_v17 = vpop.f32.mrb[29].mxu0 }
 0x2c0   : > { %v2324_v61 = vadd.f32 %v1806_v17, %v4506_v2  ;;  %v1808_v60 = vpop.f32.mrb[30].mxu0  ;;  %1887 = vadd.xlane.f32.xlu1 %v1886_v63 }
 0x2c1   : > { %v4651_v27 = vadd.f32 %v2555_v32, %v2323_v15  ;;  %v2325_v53 = vadd.f32 %v1808_v60, %v4503_v62  ;;  %v1810_v44 = vpop.f32.mrb[31].mxu0 }
 0x2c2   : > { %v4655_v28 = vadd.f32 %v2556_v14, %v2324_v61  ;;  %v2326_v59 = vadd.f32 %v1810_v44, %v4506_v2 }
 0x2c3   : > { %v4659_v11 = vadd.f32 %v2557_v34, %v2325_v53 }
 0x2c4   : > { %v4662_v46 = vadd.f32 %v2558_v1, %v2326_v59  ;;  %v1889_v55 = vadd.f32 %v4655_v28, %v4651_v27 }
 0x2c6   : > { %1890 = vadd.xlane.f32.xlu0 %v1889_v55  ;;  %v1892_v41 = vadd.f32 %v4662_v46, %v4659_v11 }
 0x2c8   : > { %1893 = vadd.xlane.f32.xlu1 %v1892_v41 }
 0x313   : > { %v1849_v62 = vpop.xlane.xlu0 %1848 }
 0x314   : > { %v1896_v30 = vmul.f32 0.00390625, %v1849_v62 }
 0x316   : > { %v4669_v40 = vsub.f32 %v4512_v13, %v1896_v30  ;;  %v4672_v2 = vsub.f32 %v4516_v49, %v1896_v30 }
 0x317   : > { %v1852_v26 = vpop.xlane.xlu0 %1851 }
 0x318   : > { %v1897_v36 = vmul.f32 0.00390625, %v1852_v26  ;;  %v1944_v39 = vmul.f32 %v4669_v40, %v4669_v40  ;;  %v1945_v8 = vmul.f32 %v4672_v2, %v4672_v2 }
 0x31a   : > { %v4679_v52 = vsub.f32 %v4519_v50, %v1897_v36  ;;  %v4682_v21 = vsub.f32 %v4522_v54, %v1897_v36  ;;  %v1976_v35 = vadd.f32 %v1945_v8, %v1944_v39 }
 0x31c   : > { %1977 = vadd.xlane.f32.xlu0 %v1976_v35  ;;  %v1946_v13 = vmul.f32 %v4679_v52, %v4679_v52  ;;  %v1947_v49 = vmul.f32 %v4682_v21, %v4682_v21 }
 0x31e   : > { %v1979_v29 = vadd.f32 %v1947_v49, %v1946_v13 }
 0x320   : > { %v1855_v47 = vpop.xlane.xlu1 %1854  ;;  %1980 = vadd.xlane.f32.xlu1 %v1979_v29 }
 0x321   : > { %v1898_v37 = vmul.f32 0.00390625, %v1855_v47 }
 0x323   : > { %v4689_v10 = vsub.f32 %v4532_v57, %v1898_v37  ;;  %v4692_v50 = vsub.f32 %v4536_v24, %v1898_v37 }
 0x324   : > { %v1858_v54 = vpop.xlane.xlu1 %1857 }
 0x325   : > { %v1899_v43 = vmul.f32 0.00390625, %v1858_v54  ;;  %v1948_v63 = vmul.f32 %v4689_v10, %v4689_v10  ;;  %v1949_v15 = vmul.f32 %v4692_v50, %v4692_v50 }
 0x327   : > { %v4699_v17 = vsub.f32 %v4539_v51, %v1899_v43  ;;  %v4702_v61 = vsub.f32 %v4542_v38, %v1899_v43  ;;  %v1982_v60 = vadd.f32 %v1949_v15, %v1948_v63 }
 0x328   : > { %v1861_v57 = vpop.xlane.xlu0 %1860 }
 0x329   : > { %v1900_v32 = vmul.f32 0.00390625, %v1861_v57  ;;  %1983 = vadd.xlane.f32.xlu0 %v1982_v60  ;;  %v1950_v24 = vmul.f32 %v4699_v17, %v4699_v17  ;;  %v1951_v53 = vmul.f32 %v4702_v61, %v4702_v61 }
 0x32a   : > { %v1864_v44 = vpop.xlane.xlu1 %1863 }
 0x32b   : > { %v4709_v14 = vsub.f32 %v4551_v4, %v1900_v32  ;;  %v4712_v51 = vsub.f32 %v4555_v58, %v1900_v32  ;;  %v1901_v59 = vmul.f32 0.00390625, %v1864_v44  ;;  %v1985_v38 = vadd.f32 %v1951_v53, %v1950_v24 }
 0x32d   : > { %v4715_v34 = vsub.f32 %v4559_v31, %v1901_v59  ;;  %v4718_v1 = vsub.f32 %v4562_v23, %v1901_v59  ;;  %1986 = vadd.xlane.f32.xlu1 %v1985_v38  ;;  %v1952_v55 = vmul.f32 %v4709_v14, %v4709_v14  ;;  %v1953_v41 = vmul.f32 %v4712_v51, %v4712_v51 }
 0x32f   : > { %v1988_v4 = vadd.f32 %v1953_v41, %v1952_v55  ;;  %v1954_v58 = vmul.f32 %v4715_v34, %v4715_v34  ;;  %v1955_v62 = vmul.f32 %v4718_v1, %v4718_v1 }
 0x331   : > { %1989 = vadd.xlane.f32.xlu0 %v1988_v4  ;;  %v1991_v31 = vadd.f32 %v1955_v62, %v1954_v58 }
 0x333   : > { %v1867_v30 = vpop.xlane.xlu0 %1866  ;;  %1992 = vadd.xlane.f32.xlu1 %v1991_v31 }
 0x334   : > { %v1902_v23 = vmul.f32 0.00390625, %v1867_v30 }
 0x335   : > { %v1870_v26 = vpop.xlane.xlu1 %1869 }
 0x336   : > { %v4729_v36 = vsub.f32 %v4571_v25, %v1902_v23  ;;  %v4732_v39 = vsub.f32 %v4575_v0, %v1902_v23  ;;  %v1903_v8 = vmul.f32 0.00390625, %v1870_v26 }
 0x338   : > { %v4735_v35 = vsub.f32 %v4579_v56, %v1903_v8  ;;  %v4738_v13 = vsub.f32 %v4582_v12, %v1903_v8  ;;  %v1956_v49 = vmul.f32 %v4729_v36, %v4729_v36  ;;  %v1957_v29 = vmul.f32 %v4732_v39, %v4732_v39 }
 0x33a   : > { %v1994_v47 = vadd.f32 %v1957_v29, %v1956_v49  ;;  %v1958_v25 = vmul.f32 %v4735_v35, %v4735_v35  ;;  %v1959_v0 = vmul.f32 %v4738_v13, %v4738_v13 }
 0x33b   : > { %v1873_v37 = vpop.xlane.xlu0 %1872 }
 0x33c   : > { %v1904_v54 = vmul.f32 0.00390625, %v1873_v37  ;;  %1995 = vadd.xlane.f32.xlu0 %v1994_v47  ;;  %v1997_v56 = vadd.f32 %v1959_v0, %v1958_v25 }
 0x33d   : > { %v1876_v43 = vpop.xlane.xlu1 %1875 }
 0x33e   : > { %v4749_v12 = vsub.f32 %v4591_v48, %v1904_v54  ;;  %v4752_v63 = vsub.f32 %v4595_v18, %v1904_v54  ;;  %v1905_v15 = vmul.f32 0.00390625, %v1876_v43  ;;  %1998 = vadd.xlane.f32.xlu1 %v1997_v56 }
 0x340   : > { %v4755_v60 = vsub.f32 %v4599_v6, %v1905_v15  ;;  %v4758_v57 = vsub.f32 %v4602_v19, %v1905_v15  ;;  %v1960_v32 = vmul.f32 %v4749_v12, %v4749_v12  ;;  %v1961_v24 = vmul.f32 %v4752_v63, %v4752_v63 }
 0x342   : > { %v2000_v53 = vadd.f32 %v1961_v24, %v1960_v32  ;;  %v1962_v48 = vmul.f32 %v4755_v60, %v4755_v60  ;;  %v1963_v18 = vmul.f32 %v4758_v57, %v4758_v57 }
 0x343   : > { %v1879_v44 = vpop.xlane.xlu0 %1878 }
 0x344   : > { %v1906_v59 = vmul.f32 0.00390625, %v1879_v44  ;;  %2001 = vadd.xlane.f32.xlu0 %v2000_v53  ;;  %v2003_v6 = vadd.f32 %v1963_v18, %v1962_v48 }
 0x345   : > { %v1882_v38 = vpop.xlane.xlu1 %1881 }
 0x346   : > { %v4769_v19 = vsub.f32 %v4611_v7, %v1906_v59  ;;  %v4772_v55 = vsub.f32 %v4615_v16, %v1906_v59  ;;  %v1907_v41 = vmul.f32 0.00390625, %v1882_v38  ;;  %2004 = vadd.xlane.f32.xlu1 %v2003_v6 }
 0x348   : > { %v4775_v4 = vsub.f32 %v4619_v22, %v1907_v41  ;;  %v4778_v58 = vsub.f32 %v4622_v45, %v1907_v41  ;;  %v1964_v62 = vmul.f32 %v4769_v19, %v4769_v19  ;;  %v1965_v31 = vmul.f32 %v4772_v55, %v4772_v55 }
 0x34a   : > { %v2006_v30 = vadd.f32 %v1965_v31, %v1964_v62  ;;  %v1966_v7 = vmul.f32 %v4775_v4, %v4775_v4  ;;  %v1967_v16 = vmul.f32 %v4778_v58, %v4778_v58 }
 0x34b   : > { %v1885_v23 = vpop.xlane.xlu0 %1884 }
 0x34c   : > { %v1908_v26 = vmul.f32 0.00390625, %v1885_v23  ;;  %2007 = vadd.xlane.f32.xlu0 %v2006_v30  ;;  %v2009_v22 = vadd.f32 %v1967_v16, %v1966_v7  ;;  %v1845_v30 = vld [vmem:[%s4989_s5] sm:$0x3] }
 0x34d   : > { %v1888_v8 = vpop.xlane.xlu1 %1887  ;;  %v1846_v7 = vld [vmem:[%s4990_s6] sm:$0x3]  ;;  %v4835_v23 = vrot.slane %v1845_v30, %v5146_v42 }
 0x34e   : > { %v4789_v45 = vsub.f32 %v4631_v9, %v1908_v26  ;;  %v4792_v49 = vsub.f32 %v4635_v33, %v1908_v26  ;;  %v1909_v29 = vmul.f32 0.00390625, %v1888_v8  ;;  %2010 = vadd.xlane.f32.xlu1 %v2009_v22  ;;  %v4838_v26 = vrot.slane %v1845_v30, %v5147_v20 }
 0x350   : > { %v4795_v47 = vsub.f32 %v4639_v3, %v1909_v29  ;;  %v4798_v25 = vsub.f32 %v4642_v5, %v1909_v29  ;;  %v1968_v0 = vmul.f32 %v4789_v45, %v4789_v45  ;;  %v1969_v37 = vmul.f32 %v4792_v49, %v4792_v49 }
 0x351   : > { %v4841_v29 = vrot.slane %v1846_v7, %v5146_v42 }
 0x352   : > { %v2012_v54 = vadd.f32 %v1969_v37, %v1968_v0  ;;  %v1970_v9 = vmul.f32 %v4795_v47, %v4795_v47  ;;  %v1971_v33 = vmul.f32 %v4798_v25, %v4798_v25  ;;  %v4844_v0 = vrot.slane %v1846_v7, %v5147_v20 }
 0x353   : > { %v1891_v56 = vpop.xlane.xlu0 %1890 }
 0x354   : > { %v1910_v43 = vmul.f32 0.00390625, %v1891_v56  ;;  %2013 = vadd.xlane.f32.xlu0 %v2012_v54  ;;  %v2015_v3 = vadd.f32 %v1971_v33, %v1970_v9 }
 0x355   : > { %v1894_v15 = vpop.xlane.xlu1 %1893 }
 0x356   : > { %v4809_v5 = vsub.f32 %v4651_v27, %v1910_v43  ;;  %v4812_v32 = vsub.f32 %v4655_v28, %v1910_v43  ;;  %v1911_v24 = vmul.f32 0.00390625, %v1894_v15  ;;  %2016 = vadd.xlane.f32.xlu1 %v2015_v3 }
 0x358   : > { %v4815_v53 = vsub.f32 %v4659_v11, %v1911_v24  ;;  %v4818_v48 = vsub.f32 %v4662_v46, %v1911_v24  ;;  %v1972_v18 = vmul.f32 %v4809_v5, %v4809_v5  ;;  %v1973_v44 = vmul.f32 %v4812_v32, %v4812_v32 }
 0x35a   : > { %v2018_v59 = vadd.f32 %v1973_v44, %v1972_v18  ;;  %v1974_v27 = vmul.f32 %v4815_v53, %v4815_v53  ;;  %v1975_v28 = vmul.f32 %v4818_v48, %v4818_v48 }
 0x35c   : > { %2019 = vadd.xlane.f32.xlu0 %v2018_v59  ;;  %v2021_v6 = vadd.f32 %v1975_v28, %v1974_v27 }
 0x35e   : > { %2022 = vadd.xlane.f32.xlu1 %v2021_v6 }
 0x3a9   : > { %v1978_v11 = vpop.xlane.xlu0 %1977 }
 0x3aa   : > { %v2024_v38 = vmul.f32 0.00390625, %v1978_v11 }
 0x3ac   : > { %v2040_v46 = vadd.f32 1e-12, %v2024_v38 }
 0x3ad   : > { %v1981_v41 = vpop.xlane.xlu1 %1980 }
 0x3ae   : > { %2495 = vrsqrt.f32 %v2040_v46  ;;  %v2025_v62 = vmul.f32 0.00390625, %v1981_v41 }
 0x3b0   : > { %v2041_v31 = vadd.f32 1e-12, %v2025_v62 }
 0x3b2   : > { %2497 = vrsqrt.f32 %v2041_v31 }
 0x3b6   : > { %v1984_v16 = vpop.xlane.xlu0 %1983 }
 0x3b7   : > { %v2026_v22 = vmul.f32 0.00390625, %v1984_v16 }
 0x3b8   : > { %v2496_v8 = vpop.eup %2495 }
 0x3b9   : > { %v2072_v37 = vmul.f32 %v2496_v8, %v4669_v40  ;;  %v2073_v54 = vmul.f32 %v2496_v8, %v4672_v2  ;;  %v2042_v9 = vadd.f32 1e-12, %v2026_v22 }
 0x3ba   : > { %v1987_v33 = vpop.xlane.xlu1 %1986 }
 0x3bb   : > { %v2115_v56 = vmul.f32 %v4835_v23, %v2072_v37  ;;  %v2116_v43 = vmul.f32 %v4838_v26, %v2073_v54  ;;  %2499 = vrsqrt.f32 %v2042_v9  ;;  %v2027_v3 = vmul.f32 0.00390625, %v1987_v33 }
 0x3bc   : > { %v2498_v15 = vpop.eup %2497 }
 0x3bd   : > { %v2158_v42 = vadd.f32 %v4841_v29, %v2115_v56  ;;  %v2159_v20 = vadd.f32 %v4844_v0, %v2116_v43  ;;  %v2074_v40 = vmul.f32 %v2498_v15, %v4679_v52  ;;  %v2075_v2 = vmul.f32 %v2498_v15, %v4682_v21 }
 0x3be   : > { %v2043_v24 = vadd.f32 1e-12, %v2027_v3  ;;  %v1990_v18 = vpop.xlane.xlu0 %1989 }
 0x3bf   : > { %2190 = vst [vmem:[%s4855_s25] sm:$0xff] %v2158_v42  ;;  %2191 = vst [vmem:[%s4855_s25 + $0x8] sm:$0xff] %v2159_v20  ;;  %v2117_v44 = vmul.f32 %v4835_v23, %v2074_v40  ;;  %v2118_v59 = vmul.f32 %v4838_v26, %v2075_v2  ;;  %v2028_v27 = vmul.f32 0.00390625, %v1990_v18 }
 0x3c0   : > { %2501 = vrsqrt.f32 %v2043_v24  ;;  %v1993_v28 = vpop.xlane.xlu1 %1992 }
 0x3c1   : > { %v2160_v6 = vadd.f32 %v4841_v29, %v2117_v44  ;;  %v2161_v11 = vadd.f32 %v4844_v0, %v2118_v59  ;;  %v2044_v38 = vadd.f32 1e-12, %v2028_v27  ;;  %v2029_v52 = vmul.f32 0.00390625, %v1993_v28 }
 0x3c3   : > { %2192 = vst [vmem:[%s4855_s25 + $0x10] sm:$0xff] %v2160_v6  ;;  %2193 = vst [vmem:[%s4855_s25 + $0x18] sm:$0xff] %v2161_v11  ;;  %2503 = vrsqrt.f32 %v2044_v38  ;;  %v2045_v21 = vadd.f32 1e-12, %v2029_v52 }
 0x3c5   : > { %v2500_v46 = vpop.eup %2499  ;;  %2505 = vrsqrt.f32 %v2045_v21 }
 0x3c6   : > { %v2076_v41 = vmul.f32 %v2500_v46, %v4689_v10  ;;  %v2077_v62 = vmul.f32 %v2500_v46, %v4692_v50 }
 0x3c8   : > { %v2119_v31 = vmul.f32 %v4835_v23, %v2076_v41  ;;  %v2120_v30 = vmul.f32 %v4838_v26, %v2077_v62 }
 0x3c9   : > { %v1996_v7 = vpop.xlane.xlu0 %1995 }
 0x3ca   : > { %v2502_v16 = vpop.eup %2501  ;;  %v2162_v22 = vadd.f32 %v4841_v29, %v2119_v31  ;;  %v2163_v8 = vadd.f32 %v4844_v0, %v2120_v30  ;;  %v2030_v37 = vmul.f32 0.00390625, %v1996_v7 }
 0x3cb   : > { %v2078_v54 = vmul.f32 %v2502_v16, %v4699_v17  ;;  %v2079_v9 = vmul.f32 %v2502_v16, %v4702_v61  ;;  %v1999_v33 = vpop.xlane.xlu1 %1998 }
 0x3cc   : > { %2194 = vst [vmem:[%s4855_s25 + $0x20] sm:$0xff] %v2162_v22  ;;  %2195 = vst [vmem:[%s4855_s25 + $0x28] sm:$0xff] %v2163_v8  ;;  %v2046_v10 = vadd.f32 1e-12, %v2030_v37  ;;  %v2031_v50 = vmul.f32 0.00390625, %v1999_v33 }
 0x3cd   : > { %v2504_v56 = vpop.eup %2503  ;;  %v2121_v43 = vmul.f32 %v4835_v23, %v2078_v54  ;;  %v2122_v3 = vmul.f32 %v4838_v26, %v2079_v9 }
 0x3ce   : > { %v2080_v15 = vmul.f32 %v2504_v56, %v4709_v14  ;;  %v2081_v42 = vmul.f32 %v2504_v56, %v4712_v51  ;;  %2507 = vrsqrt.f32 %v2046_v10  ;;  %v2047_v17 = vadd.f32 1e-12, %v2031_v50 }
 0x3cf   : > { %v2506_v20 = vpop.eup %2505  ;;  %v2164_v61 = vadd.f32 %v4841_v29, %v2121_v43  ;;  %v2165_v40 = vadd.f32 %v4844_v0, %v2122_v3 }
 0x3d0   : > { %v2123_v2 = vmul.f32 %v4835_v23, %v2080_v15  ;;  %v2124_v24 = vmul.f32 %v4838_v26, %v2081_v42  ;;  %v2082_v18 = vmul.f32 %v2506_v20, %v4715_v34  ;;  %v2083_v44 = vmul.f32 %v2506_v20, %v4718_v1 }
 0x3d1   : > { %2196 = vst [vmem:[%s4855_s25 + $0x30] sm:$0xff] %v2164_v61  ;;  %2197 = vst [vmem:[%s4855_s25 + $0x38] sm:$0xff] %v2165_v40  ;;  %2509 = vrsqrt.f32 %v2047_v17  ;;  %v2002_v14 = vpop.xlane.xlu0 %2001 }
 0x3d2   : > { %v2166_v51 = vadd.f32 %v4841_v29, %v2123_v2  ;;  %v2167_v59 = vadd.f32 %v4844_v0, %v2124_v24  ;;  %v2125_v27 = vmul.f32 %v4835_v23, %v2082_v18  ;;  %v2126_v28 = vmul.f32 %v4838_v26, %v2083_v44 }
 0x3d3   : > { %v2032_v6 = vmul.f32 0.00390625, %v2002_v14  ;;  %v2005_v11 = vpop.xlane.xlu1 %2004 }
 0x3d4   : > { %2198 = vst [vmem:[%s4855_s25 + $0x40] sm:$0xff] %v2166_v51  ;;  %2199 = vst [vmem:[%s4855_s25 + $0x48] sm:$0xff] %v2167_v59  ;;  %v2168_v34 = vadd.f32 %v4841_v29, %v2125_v27  ;;  %v2169_v1 = vadd.f32 %v4844_v0, %v2126_v28  ;;  %v2033_v38 = vmul.f32 0.00390625, %v2005_v11 }
 0x3d5   : > { %v2048_v52 = vadd.f32 1e-12, %v2032_v6 }
 0x3d6   : > { %2200 = vst [vmem:[%s4855_s25 + $0x50] sm:$0xff] %v2168_v34  ;;  %2201 = vst [vmem:[%s4855_s25 + $0x58] sm:$0xff] %v2169_v1  ;;  %v2049_v21 = vadd.f32 1e-12, %v2033_v38 }
 0x3d7   : > { %2511 = vrsqrt.f32 %v2048_v52 }
 0x3d8   : > { %v2508_v46 = vpop.eup %2507  ;;  %2513 = vrsqrt.f32 %v2049_v21 }
 0x3d9   : > { %v2084_v41 = vmul.f32 %v2508_v46, %v4729_v36  ;;  %v2085_v62 = vmul.f32 %v2508_v46, %v4732_v39  ;;  %v2008_v31 = vpop.xlane.xlu0 %2007 }
 0x3da   : > { %v2034_v30 = vmul.f32 0.00390625, %v2008_v31 }
 0x3db   : > { %v2510_v7 = vpop.eup %2509  ;;  %v2127_v16 = vmul.f32 %v4835_v23, %v2084_v41  ;;  %v2128_v22 = vmul.f32 %v4838_v26, %v2085_v62  ;;  %v2011_v8 = vpop.xlane.xlu1 %2010 }
 0x3dc   : > { %v2086_v37 = vmul.f32 %v2510_v7, %v4735_v35  ;;  %v2087_v54 = vmul.f32 %v2510_v7, %v4738_v13  ;;  %v2050_v9 = vadd.f32 1e-12, %v2034_v30  ;;  %v2035_v33 = vmul.f32 0.00390625, %v2011_v8 }
 0x3dd   : > { %v2170_v36 = vadd.f32 %v4841_v29, %v2127_v16  ;;  %v2171_v39 = vadd.f32 %v4844_v0, %v2128_v22 }
 0x3de   : > { %v2129_v10 = vmul.f32 %v4835_v23, %v2086_v37  ;;  %v2130_v50 = vmul.f32 %v4838_v26, %v2087_v54  ;;  %2515 = vrsqrt.f32 %v2050_v9  ;;  %v2051_v56 = vadd.f32 1e-12, %v2035_v33 }
 0x3df   : > { %2202 = vst [vmem:[%s4855_s25 + $0x60] sm:$0xff] %v2170_v36  ;;  %2203 = vst [vmem:[%s4855_s25 + $0x68] sm:$0xff] %v2171_v39 }
 0x3e0   : > { %v2172_v35 = vadd.f32 %v4841_v29, %v2129_v10  ;;  %v2173_v13 = vadd.f32 %v4844_v0, %v2130_v50  ;;  %2517 = vrsqrt.f32 %v2051_v56 }
 0x3e1   : > { %v2512_v43 = vpop.eup %2511  ;;  %v2014_v3 = vpop.xlane.xlu0 %2013 }
 0x3e2   : > { %v2514_v15 = vpop.eup %2513  ;;  %2204 = vst [vmem:[%s4855_s25 + $0x70] sm:$0xff] %v2172_v35  ;;  %2205 = vst [vmem:[%s4855_s25 + $0x78] sm:$0xff] %v2173_v13  ;;  %v2088_v42 = vmul.f32 %v2512_v43, %v4749_v12  ;;  %v2089_v17 = vmul.f32 %v2512_v43, %v4752_v63  ;;  %v2036_v20 = vmul.f32 0.00390625, %v2014_v3 }
 0x3e3   : > { %v2090_v61 = vmul.f32 %v2514_v15, %v4755_v60  ;;  %v2091_v40 = vmul.f32 %v2514_v15, %v4758_v57  ;;  %v2017_v2 = vpop.xlane.xlu1 %2016 }
 0x3e4   : > { %v2131_v24 = vmul.f32 %v4835_v23, %v2088_v42  ;;  %v2132_v18 = vmul.f32 %v4838_v26, %v2089_v17  ;;  %v2052_v44 = vadd.f32 1e-12, %v2036_v20  ;;  %v2037_v14 = vmul.f32 0.00390625, %v2017_v2 }
 0x3e5   : > { %v2133_v12 = vmul.f32 %v4835_v23, %v2090_v61  ;;  %v2134_v63 = vmul.f32 %v4838_v26, %v2091_v40 }
 0x3e6   : > { %v2174_v51 = vadd.f32 %v4841_v29, %v2131_v24  ;;  %v2175_v60 = vadd.f32 %v4844_v0, %v2132_v18  ;;  %2519 = vrsqrt.f32 %v2052_v44  ;;  %v2053_v57 = vadd.f32 1e-12, %v2037_v14 }
 0x3e7   : > { %v2176_v59 = vadd.f32 %v4841_v29, %v2133_v12  ;;  %v2177_v27 = vadd.f32 %v4844_v0, %v2134_v63 }
 0x3e8   : > { %v2516_v28 = vpop.eup %2515  ;;  %2206 = vst [vmem:[%s4855_s25 + $0x80] sm:$0xff] %v2174_v51  ;;  %2207 = vst [vmem:[%s4855_s25 + $0x88] sm:$0xff] %v2175_v60  ;;  %2521 = vrsqrt.f32 %v2053_v57 }
 0x3e9   : > { %2208 = vst [vmem:[%s4855_s25 + $0x90] sm:$0xff] %v2176_v59  ;;  %2209 = vst [vmem:[%s4855_s25 + $0x98] sm:$0xff] %v2177_v27  ;;  %v2092_v6 = vmul.f32 %v2516_v28, %v4769_v19  ;;  %v2093_v11 = vmul.f32 %v2516_v28, %v4772_v55  ;;  %v2020_v34 = vpop.xlane.xlu0 %2019 }
 0x3ea   : > { %v2518_v1 = vpop.eup %2517  ;;  %v2038_v38 = vmul.f32 0.00390625, %v2020_v34 }
 0x3eb   : > { %v2135_v52 = vmul.f32 %v4835_v23, %v2092_v6  ;;  %v2136_v21 = vmul.f32 %v4838_v26, %v2093_v11  ;;  %v2094_v46 = vmul.f32 %v2518_v1, %v4775_v4  ;;  %v2095_v41 = vmul.f32 %v2518_v1, %v4778_v58  ;;  %v2023_v62 = vpop.xlane.xlu1 %2022 }
 0x3ec   : > { %v2054_v31 = vadd.f32 1e-12, %v2038_v38  ;;  %v2039_v19 = vmul.f32 0.00390625, %v2023_v62 }
 0x3ed   : > { %v2178_v55 = vadd.f32 %v4841_v29, %v2135_v52  ;;  %v2179_v30 = vadd.f32 %v4844_v0, %v2136_v21  ;;  %v2137_v7 = vmul.f32 %v4835_v23, %v2094_v46  ;;  %v2138_v16 = vmul.f32 %v4838_v26, %v2095_v41 }
 0x3ee   : > { %2523 = vrsqrt.f32 %v2054_v31  ;;  %v2055_v22 = vadd.f32 1e-12, %v2039_v19 }
 0x3ef   : > { %2210 = vst [vmem:[%s4855_s25 + $0xa0] sm:$0xff] %v2178_v55  ;;  %2211 = vst [vmem:[%s4855_s25 + $0xa8] sm:$0xff] %v2179_v30  ;;  %v2180_v4 = vadd.f32 %v4841_v29, %v2137_v7  ;;  %v2181_v58 = vadd.f32 %v4844_v0, %v2138_v16 }
 0x3f0   : > { %v2520_v8 = vpop.eup %2519  ;;  %2525 = vrsqrt.f32 %v2055_v22 }
 0x3f1   : > { %2212 = vst [vmem:[%s4855_s25 + $0xb0] sm:$0xff] %v2180_v4  ;;  %2213 = vst [vmem:[%s4855_s25 + $0xb8] sm:$0xff] %v2181_v58  ;;  %v2096_v37 = vmul.f32 %v2520_v8, %v4789_v45  ;;  %v2097_v54 = vmul.f32 %v2520_v8, %v4792_v49 }
 0x3f2   : > { %v2522_v9 = vpop.eup %2521 }
 0x3f3   : > { %v2139_v33 = vmul.f32 %v4835_v23, %v2096_v37  ;;  %v2140_v36 = vmul.f32 %v4838_v26, %v2097_v54  ;;  %v2098_v39 = vmul.f32 %v2522_v9, %v4795_v47  ;;  %v2099_v10 = vmul.f32 %v2522_v9, %v4798_v25 }
 0x3f5   : > { %v2182_v50 = vadd.f32 %v4841_v29, %v2139_v33  ;;  %v2183_v56 = vadd.f32 %v4844_v0, %v2140_v36  ;;  %v2141_v35 = vmul.f32 %v4835_v23, %v2098_v39  ;;  %v2142_v45 = vmul.f32 %v4838_v26, %v2099_v10 }
 0x3f7   : > { %2214 = vst [vmem:[%s4855_s25 + $0xc0] sm:$0xff] %v2182_v50  ;;  %2215 = vst [vmem:[%s4855_s25 + $0xc8] sm:$0xff] %v2183_v56  ;;  %v2184_v49 = vadd.f32 %v4841_v29, %v2141_v35  ;;  %v2185_v13 = vadd.f32 %v4844_v0, %v2142_v45 }
 0x3f8   : > { %v2524_v43 = vpop.eup %2523 }
 0x3f9   : > { %2216 = vst [vmem:[%s4855_s25 + $0xd0] sm:$0xff] %v2184_v49  ;;  %2217 = vst [vmem:[%s4855_s25 + $0xd8] sm:$0xff] %v2185_v13  ;;  %v2100_v47 = vmul.f32 %v2524_v43, %v4809_v5  ;;  %v2101_v25 = vmul.f32 %v2524_v43, %v4812_v32 }
 0x3fa   : > { %v2526_v3 = vpop.eup %2525 }
 0x3fb   : > { %v2143_v15 = vmul.f32 %v4835_v23, %v2100_v47  ;;  %v2144_v42 = vmul.f32 %v4838_v26, %v2101_v25  ;;  %v2102_v17 = vmul.f32 %v2526_v3, %v4815_v53  ;;  %v2103_v20 = vmul.f32 %v2526_v3, %v4818_v48 }
 0x3fd   : > { %v2186_v61 = vadd.f32 %v4841_v29, %v2143_v15  ;;  %v2187_v40 = vadd.f32 %v4844_v0, %v2144_v42  ;;  %v2145_v2 = vmul.f32 %v4835_v23, %v2102_v17  ;;  %v2146_v5 = vmul.f32 %v4838_v26, %v2103_v20 }
 0x3ff   : > { %2218 = vst [vmem:[%s4855_s25 + $0xe0] sm:$0xff] %v2186_v61  ;;  %2219 = vst [vmem:[%s4855_s25 + $0xe8] sm:$0xff] %v2187_v40  ;;  %v2188_v32 = vadd.f32 %v4841_v29, %v2145_v2  ;;  %v2189_v24 = vadd.f32 %v4844_v0, %v2146_v5 }
 0x401   : > { %2220 = vst [vmem:[%s4855_s25 + $0xf0] sm:$0xff] %v2188_v32  ;;  %2221 = vst [vmem:[%s4855_s25 + $0xf8] sm:$0xff] %v2189_v24 }
 0x402 PF: > { %s17_s24 = sadd.s32 1, %s2565_s24  }
 0x403   : > { %p14_p4 = scmp.ge.s32.totalorder %s17_s24, 4  }
 0x405   :  { %16 = sbr.rel (!%p14_p4) target bundleno = 1 (0x1), region = 78 }

</bundles_post_ra>
